<compile_context>
chip_gen: v7x
topology: tpu7x:2x2x1
jax: 0.10.0
libtpu: 0.0.40
codegen_flags: <defaults>
</compile_context>

<pallas_src>
import numpy as np
import jax
import jax.numpy as jnp
from jax.experimental import pallas as pl
from jax.experimental.pallas import tpu as pltpu


# --------------------------------------------------------------------------
# Constants matching the PyTorch module defaults
# --------------------------------------------------------------------------
SAMPLE_RATE = 16000
N_FFT = 1024
WIN_LENGTH = 1024
HOP_LENGTH = 160
F_MIN = 0.0
F_MAX = 8000.0
N_MELS = 80

N_FREQS = N_FFT // 2 + 1          # 513 (onesided)
N_FREQS_PAD = 640                 # 5 * 128 (zero padded)
N_MELS_PAD = 128                  # zero padded
TILE_N_MAX = 256                  # rows (frames) per grid step (MXU height)
N_HOP_PER_FRAME = 7               # ceil(n_fft / hop): hop blocks per frame


def _round_up(x, m):
    return ((x + m - 1) // m) * m


# --------------------------------------------------------------------------
# Deterministic parameter construction (no checkpoint loading)
# --------------------------------------------------------------------------
def _hann_window(n):
    # torch.hann_window(n, periodic=True)
    k = np.arange(n, dtype=np.float64)
    return 0.5 - 0.5 * np.cos(2.0 * np.pi * k / n)


def _hz_to_mel(f):
    return 2595.0 * np.log10(1.0 + f / 700.0)


def _mel_to_hz(m):
    return 700.0 * (10.0 ** (m / 2595.0) - 1.0)


def _mel_filterbank(n_freqs, f_min, f_max, n_mels, sample_rate):
    # torchaudio.functional.melscale_fbanks(norm=None, mel_scale="htk")
    all_freqs = np.linspace(0.0, sample_rate / 2.0, n_freqs)
    m_min = _hz_to_mel(f_min)
    m_max = _hz_to_mel(f_max)
    m_pts = np.linspace(m_min, m_max, n_mels + 2)
    f_pts = _mel_to_hz(m_pts)
    f_diff = f_pts[1:] - f_pts[:-1]                      # (n_mels+1,)
    slopes = f_pts[None, :] - all_freqs[:, None]         # (n_freqs, n_mels+2)
    down = -slopes[:, :-2] / f_diff[:-1]
    up = slopes[:, 2:] / f_diff[1:]
    fb = np.maximum(0.0, np.minimum(down, up))           # (n_freqs, n_mels)
    return fb


def build_weights():
    """Returns (dft_mat, fb_mat) as bfloat16 jnp arrays.

    dft: (N_FFT, 2*N_FREQS_PAD)  -- [cos | sin] fused, hann window and the
         normalized=True factor 1/sqrt(sum(win^2)) folded in, zero padded
         513 -> 640 per half.
    fb:  (N_FREQS_PAD, N_MELS_PAD) zero padded mel filterbank.
    """
    win = _hann_window(WIN_LENGTH)                       # (1024,)
    norm = 1.0 / np.sqrt(np.sum(win ** 2))

    n = np.arange(N_FFT, dtype=np.float64)[:, None]      # (1024, 1)
    k = np.arange(N_FREQS, dtype=np.float64)[None, :]    # (1, 513)
    ang = 2.0 * np.pi * n * k / N_FFT
    dft = np.zeros((N_FFT, 2 * N_FREQS_PAD), dtype=np.float64)
    dft[:, :N_FREQS] = np.cos(ang) * win[:, None] * norm
    dft[:, N_FREQS_PAD:N_FREQS_PAD + N_FREQS] = (
        np.sin(ang) * win[:, None] * norm)               # sign irrelevant (squared)

    fb = np.zeros((N_FREQS_PAD, N_MELS_PAD), dtype=np.float64)
    fb[:N_FREQS, :N_MELS] = _mel_filterbank(
        N_FREQS, F_MIN, F_MAX, N_MELS, SAMPLE_RATE)

    return (jnp.asarray(dft, jnp.bfloat16),
            jnp.asarray(fb, jnp.bfloat16))


# --------------------------------------------------------------------------
# Pallas kernel: fused windowed DFT (1 matmul) -> power -> mel projection
# --------------------------------------------------------------------------
def mel_kernel(frames_ref, dft_ref, fb_ref, out_ref):
    x = frames_ref[...]                                            # (tile, 1024) bf16
    # Single fused [cos|sin] matmul, f32 accumulation on the MXU.
    y = jnp.dot(x, dft_ref[...], preferred_element_type=jnp.float32)  # (tile, 1280)
    re = y[:, :N_FREQS_PAD]                                        # 128-aligned slices
    im = y[:, N_FREQS_PAD:]
    power = re * re + im * im                                      # (tile, 640) f32
    out_ref[...] = jnp.dot(power.astype(jnp.bfloat16), fb_ref[...],
                           preferred_element_type=jnp.float32)     # (tile, 128)


def mel_pallas(frames, dft_m, fb_m, tile_n):
    n_rows = frames.shape[0]
    assert n_rows % tile_n == 0
    grid = (n_rows // tile_n,)
    return pl.pallas_call(
        mel_kernel,
        out_shape=jax.ShapeDtypeStruct((n_rows, N_MELS_PAD), jnp.float32),
        grid_spec=pltpu.PrefetchScalarGridSpec(
            num_scalar_prefetch=0,
            grid=grid,
            in_specs=[
                pl.BlockSpec((tile_n, N_FFT), lambda i: (i, 0)),
                # grid-invariant weights: constant block index -> no re-DMA
                pl.BlockSpec((N_FFT, 2 * N_FREQS_PAD), lambda i: (0, 0)),
                pl.BlockSpec((N_FREQS_PAD, N_MELS_PAD), lambda i: (0, 0)),
            ],
            out_specs=pl.BlockSpec((tile_n, N_MELS_PAD), lambda i: (i, 0)),
        ),
        compiler_params=pltpu.CompilerParams(
            dimension_semantics=("parallel",),
            vmem_limit_bytes=32 * 1024 * 1024,
        ),
    )(frames, dft_m, fb_m)


# --------------------------------------------------------------------------
# Forward pass (glue in plain JAX, hot path in Pallas)
# --------------------------------------------------------------------------
def mel_spectrogram_forward(x, dft_m, fb_m):
    # rearrange 'b ... -> b (...)'
    b = x.shape[0]
    x = x.reshape(b, -1).astype(jnp.float32)
    t = x.shape[1]

    # center=True: reflect pad n_fft//2 on both sides
    pad = N_FFT // 2
    xp = jnp.pad(x, ((0, 0), (pad, pad)), mode="reflect")

    # number of STFT frames = 1 + T // hop; last frame is dropped ([:, :, :-1])
    n_keep = t // HOP_LENGTH
    assert n_keep % 4 == 0, "kept frame count must be divisible by 4 (d=4)"

    # Frame extraction WITHOUT a gather: view the padded audio as hop blocks
    # of 160 samples; frame f = concat of hop blocks f..f+6, truncated to 1024.
    # Each term is a contiguous static slice -> lowers to simple copies.
    # TODO(synk): framing could be moved fully in-kernel via manual DMA of
    # contiguous spans (memory_space=pl.ANY) to avoid materializing the 6.4x
    # frame blow-up in HBM entirely.
    n_hb = n_keep + N_HOP_PER_FRAME - 1                   # <= (t + 960)/160
    xp = xp[:, :n_hb * HOP_LENGTH].astype(jnp.bfloat16)   # bf16 before the blow-up
    hb = xp.reshape(b, n_hb, HOP_LENGTH)
    frames = jnp.concatenate(
        [hb[:, m:m + n_keep, :] for m in range(N_HOP_PER_FRAME)], axis=2)
    frames = frames[:, :, :N_FFT].reshape(b * n_keep, N_FFT)   # (b*n_keep, 1024)

    # Pad rows to a multiple of the tile (zero frames -> zero mel, sliced off).
    n_rows = b * n_keep
    tile_n = min(TILE_N_MAX, _round_up(n_rows, 8))
    n_rows_pad = _round_up(n_rows, tile_n)
    if n_rows_pad != n_rows:
        frames = jnp.pad(frames, ((0, n_rows_pad - n_rows), (0, 0)))

    mel = mel_pallas(frames, dft_m, fb_m, tile_n)          # (n_rows_pad, 128)
    mel = mel[:n_rows, :N_MELS].reshape(b, n_keep, N_MELS)  # (b, n_keep, 80)

    # spec (b, n_mels, n_keep) -> rearrange 'b c (f d) -> b f d c', d=4
    # our `mel` is already (b, time, n_mels) == spec transposed, so:
    return mel.reshape(b, n_keep // 4, 4, N_MELS)


if __name__ == "__main__":
    key = jax.random.PRNGKey(0)
    # batch=2, 1 channel, 28160 samples (~1.76 s @ 16 kHz):
    # 176 kept frames -> 352 rows -> padded to 512 -> grid of 2 tiles of 256.
    x = jax.random.normal(key, (2, 1, 28160), dtype=jnp.float32)

    dft_m, fb_m = build_weights()
    out = mel_spectrogram_forward(x, dft_m, fb_m)
    out = jax.block_until_ready(out)

    n_keep = x.shape[-1] // HOP_LENGTH
    expected_shape = (2, n_keep // 4, 4, N_MELS)   # (2, 44, 4, 80)
    assert out.shape == expected_shape, out.shape
    assert bool(jnp.all(jnp.isfinite(out)))
    print("KERNEL_OK")
</pallas_src>

<mosaic_0001>
module attributes {stable_mosaic.version = 11 : i64} {
  func.func @mel_kernel(%arg0: i32, %arg1: memref<256x1024xbf16, #tpu.memory_space<vmem>>, %arg2: memref<1024x1280xbf16, #tpu.memory_space<vmem>>, %arg3: memref<640x128xbf16, #tpu.memory_space<vmem>>, %arg4: memref<256x128xf32, #tpu.memory_space<vmem>>) attributes {dimension_semantics = [#tpu.dimension_semantics<parallel>], iteration_bounds = array<i64: 2>, scalar_prefetch = 0 : i64, scratch_operands = 0 : i64, tpu.core_type = #tpu.core_type<tc>, window_params = [{transform_indices = @transform_0, window_bounds = array<i64: 256, 1024>}, {pipeline_mode = #tpu.pipeline_mode<synchronous>, transform_indices = @transform_1, window_bounds = array<i64: 1024, 1280>}, {pipeline_mode = #tpu.pipeline_mode<synchronous>, transform_indices = @transform_2, window_bounds = array<i64: 640, 128>}, {transform_indices = @transform_3, window_bounds = array<i64: 256, 128>}]} {
    %c0 = arith.constant 0 : index
    %c0_0 = arith.constant 0 : index
    %0 = vector.load %arg1[%c0, %c0_0] : memref<256x1024xbf16, #tpu.memory_space<vmem>>, vector<256x1024xbf16>
    %c0_1 = arith.constant 0 : index
    %c0_2 = arith.constant 0 : index
    %1 = vector.load %arg2[%c0_1, %c0_2] : memref<1024x1280xbf16, #tpu.memory_space<vmem>>, vector<1024x1280xbf16>
    %cst = arith.constant dense<0.000000e+00> : vector<256x1280xf32>
    %2 = tpu.matmul %0, %1, %cst {dimension_numbers = #tpu.dot_dimension_numbers<[1], [0], [0], [1], [0, 0, 1, 1], [], []>} : vector<256x1024xbf16>, vector<1024x1280xbf16>, vector<256x1280xf32> -> vector<256x1280xf32>
    %3 = vector.extract_strided_slice %2 {offsets = [0, 0], sizes = [256, 640], strides = [1, 1]} : vector<256x1280xf32> to vector<256x640xf32>
    %4 = vector.extract_strided_slice %2 {offsets = [0, 640], sizes = [256, 640], strides = [1, 1]} : vector<256x1280xf32> to vector<256x640xf32>
    %5 = arith.mulf %3, %3 : vector<256x640xf32>
    %6 = arith.mulf %4, %4 : vector<256x640xf32>
    %7 = arith.addf %5, %6 : vector<256x640xf32>
    %8 = arith.truncf %7 : vector<256x640xf32> to vector<256x640xbf16>
    %c0_3 = arith.constant 0 : index
    %c0_4 = arith.constant 0 : index
    %9 = vector.load %arg3[%c0_3, %c0_4] : memref<640x128xbf16, #tpu.memory_space<vmem>>, vector<640x128xbf16>
    %cst_5 = arith.constant dense<0.000000e+00> : vector<256x128xf32>
    %10 = tpu.matmul %8, %9, %cst_5 {dimension_numbers = #tpu.dot_dimension_numbers<[1], [0], [0], [1], [0, 0, 1, 1], [], []>} : vector<256x640xbf16>, vector<640x128xbf16>, vector<256x128xf32> -> vector<256x128xf32>
    %c0_6 = arith.constant 0 : index
    %c0_7 = arith.constant 0 : index
    %11 = vector.load %arg4[%c0_6, %c0_7] : memref<256x128xf32, #tpu.memory_space<vmem>>, vector<256x128xf32>
    tpu.vector_store %arg4[%c0_6, %c0_7], %10 {strides = array<i32>} : memref<256x128xf32, #tpu.memory_space<vmem>>, vector<256x128xf32>,
    return
  }
  func.func @transform_0(%arg0: i32) -> (i32, i32) {
    %c0_i32 = arith.constant 0 : i32
    %c0_i32_0 = arith.constant 0 : i32
    return %arg0, %c0_i32 : i32, i32
  }
  func.func @transform_1(%arg0: i32) -> (i32, i32) {
    %c0_i32 = arith.constant 0 : i32
    %c0_i32_0 = arith.constant 0 : i32
    %c0_i32_1 = arith.constant 0 : i32
    return %c0_i32, %c0_i32_0 : i32, i32
  }
  func.func @transform_2(%arg0: i32) -> (i32, i32) {
    %c0_i32 = arith.constant 0 : i32
    %c0_i32_0 = arith.constant 0 : i32
    %c0_i32_1 = arith.constant 0 : i32
    return %c0_i32, %c0_i32_0 : i32, i32
  }
  func.func @transform_3(%arg0: i32) -> (i32, i32) {
    %c0_i32 = arith.constant 0 : i32
    %c0_i32_0 = arith.constant 0 : i32
    return %arg0, %c0_i32 : i32, i32
  }
}

</mosaic_0001>

<bundles_post_ra>
// kernel: tpu_custom_call.1
= control target key start
LH: loop header
LB: loop body
LE: loop exit
PB: predicated region body
PF: predicated region fallthrough
CT: control target
= control target key end

     0   :  { %8 = vsyncpa [#allocation3], 0  ;;  %s16266_s0 = inlined_call_operand.hbm [shape: bf16[512,1024], index: 0, kind: input, shape index: {}]   ;;  %s16267_s1 = inlined_call_operand.hbm [shape: bf16[1024,1280], index: 1, kind: input, shape index: {}]   ;;  %s16268_s2 = inlined_call_operand.hbm [shape: bf16[640,128], index: 2, kind: input, shape index: {}]   ;;  %s16269_s3 = inlined_call_operand.hbm [shape: f32[512,128], index: 3, kind: output, shape index: {}]  }
   0x1   :  { %10 = vsyncpa [#allocation3 + $0x1], 0 }
   0x2   :  { %11 = vsyncpa [#allocation6], 0 }
   0x3   :  { %12 = vsyncpa [#allocation4], 0 }
   0x4   :  { %14 = vsyncpa [#allocation4 + $0x1], 0  ;;  %s13606_s12 = smov 0   ;;  %s13608_s13 = smov 0  }
   0x5   :  { %s13610_s14 = smov 0   ;;  %s13612_s15 = smov 0  }
   0x6 LB: > { %s13627_s16 = sadd.s32 4294967295, %s13572_s15   ;;  %s10191_s17 = sadd.s32 4294967294, %s13572_s15   ;;  %s13572_s15 = sphi %s13612_s15, %s17310_s15   ;;  %s13568_s14 = sphi %s13610_s14, %s17309_s14   ;;  %s13564_s13 = sphi %s13608_s13, %s17308_s13   ;;  %s13560_s12 = sphi %s13606_s12, %s17307_s12  }
   0x7   : > { %p40_p0 = scmp.ne.s32.totalorder %s13564_s13, %s13560_s12  ;;  %p16270_p1 = scmp.eq.s32.totalorder %s13627_s16, 0 }
   0x8   : > { %p112_p3 = scmp.eq.s32.totalorder %s10191_s17, 1  ;;  %p10192_p5 = scmp.ge.s32.totalorder %s13572_s15, 1 }
   0x9   : > { %p13636_p4 = por %p16270_p1, %p40_p0  ;;  %p119_p7 = scmp.lt.s32.totalorder %s13572_s15, 3 }
   0xa   : > { %p13641_p6 = por %p112_p3, %p40_p0  ;;  %s13574_s21 = smov [#allocation5]  }
   0xb   : > { %s16543_s18 = scalar_select %p13636_p4, 1, 0 }
   0xc   : > { %s16544_s19 = scalar_select %p13641_p6, 1, 0 }
   0xd   : > { %p13646_p8 = pnand %p10192_p5, %p119_p7  ;;  %s131_s22 = sshll.u32 %s13574_s21, 4  ;;  %s13650_s22 = int_to_ptr.vmem [resolvable:$true] %s131_s22 }
   0xe   : > { %s13575_s24 = smov [#allocation7]   ;;  %s13416_s28 = scalar_lea.hbm %s16267_s1, 81920 }
   0xf   : > { %p12321_p9 = pneg %p13646_p8  ;;  %s144_s25 = sshll.u32 %s13575_s24, 4  ;;  %s13661_s25 = int_to_ptr.vmem [resolvable:$true] %s144_s25 }
  0x10   : > { %p13417_p12 = scmp.ne.s32.totalorder %s16267_s1, %s13416_s28  ;;  %p13423_p5 = scmp.lt.u32.totalorder %s13416_s28, %s16267_s1 }
  0x11   : > { %p13657_p11 = pnand %p12321_p9, %p16270_p1 }
  0x13   : > { %p13418_p13 = pneg %p13657_p11 }
  0x15   : > { %p13419_p0 = pnand %p13418_p13, %p13417_p12 }
  0x17   : > { %p13420_p3 = pneg %p13419_p0 }
  0x19   : > { %p13425_p7 = pnand %p13423_p5, %p13420_p3 }
  0x1b   : > { %13428 = shalt.err (!%p13425_p7)
}
  0x1c   : > { %s13429_s6 = scalar_lea.vmem %s13650_s22, 81920  ;;  %p13437_p2 = scmp.lt.s32.totalorder %s13650_s22, %s13650_s22 }
  0x1d   : > { %p13430_p9 = scmp.ne.s32.totalorder %s13650_s22, %s13429_s6  ;;  %p13438_p12 = scmp.lt.s32.totalorder %s13429_s6, %s13429_s6 }
  0x1f   : > { %p13432_p10 = pnand %p13430_p9, %p13418_p13  ;;  %p13439_p0 = por %p13438_p12, %p13437_p2 }
  0x21   : > { %p13433_p1 = pneg %p13432_p10 }
  0x23   : > { %p13440_p6 = pnand %p13439_p0, %p13433_p1 }
  0x25   : > { %13443 = shalt.err (!%p13440_p6)
}
  0x26   : > { %s13576_s7 = smov 640   ;;  %s13577_s8 = smov 40  }
  0x27   : > { %12324 = dma.hbm_to_vmem [thread:$0]  (!%p13657_p11), %s16267_s1, 81920, %s13650_s22, [#allocation6], %s13576_s7, %s13576_s7, %s13577_s8  }
  0x28   : > { %s13444_s21 = scalar_lea.hbm %s16268_s2, 5120 }
  0x29   : > { %p13445_p2 = scmp.ne.s32.totalorder %s16268_s2, %s13444_s21  ;;  %p13451_p10 = scmp.lt.u32.totalorder %s13444_s21, %s16268_s2 }
  0x2b   : > { %p13447_p1 = pnand %p13445_p2, %p13418_p13 }
  0x2d   : > { %p13448_p6 = pneg %p13447_p1 }
  0x2f   : > { %p13453_p3 = pnand %p13451_p10, %p13448_p6 }
  0x31   : > { %13456 = shalt.err (!%p13453_p3)
}
  0x32   : > { %s13457_s22 = scalar_lea.vmem %s13661_s25, 5120  ;;  %p13465_p12 = scmp.lt.s32.totalorder %s13661_s25, %s13661_s25 }
  0x33   : > { %p13458_p5 = scmp.ne.s32.totalorder %s13661_s25, %s13457_s22  ;;  %p13466_p0 = scmp.lt.s32.totalorder %s13457_s22, %s13457_s22 }
  0x35   : > { %p13460_p7 = pnand %p13458_p5, %p13418_p13  ;;  %p13467_p2 = por %p13466_p0, %p13465_p12 }
  0x37   : > { %p13461_p9 = pneg %p13460_p7 }
  0x39   : > { %p13468_p1 = pnand %p13467_p2, %p13461_p9 }
  0x3b   : > { %13471 = shalt.err (!%p13468_p1)
}
  0x3c   : > { %s13578_s29 = smov 64   ;;  %s13579_s30 = smov 4  }
  0x3d   : > { %12327 = dma.hbm_to_vmem [thread:$0]  (!%p13657_p11), %s16268_s2, 5120, %s13661_s25, [#allocation6], %s13578_s29, %s13578_s29, %s13579_s30  }
  0x3e   : > { %s13716_s6 = sadd.s32 1, %s13572_s15   ;;  %s27_s8 = sadd.s32 1, %s13568_s14 }
  0x3f   : > { %s24_s7 = ssub.s32 %s13572_s15, %s13716_s6  ;;  %p34_p6 = scmp.ne.s32.totalorder %s13568_s14, %s13564_s13 }
  0x40   : > { %p25_p13 = scmp.eq.s32.totalorder %s24_s7, 0  ;;  %p35_p10 = scmp.eq.s32.totalorder %s13572_s15, 0 }
  0x41   : > { %p16547_p5 = scmp.eq.s32.totalorder %s13627_s16, 1  ;;  %p12338_p9 = scmp.lt.s32.totalorder %s13572_s15, 2 }
  0x42   : > { %s13725_s9 = scalar_select %p25_p13, %s13568_s14, %s27_s8  }
  0x43   : > { %p36_p3 = por %p35_p10, %p34_p6  ;;  %p13729_p7 = por %p16547_p5, %p34_p6 }
  0x44   : > { %s158_s23 = sand.u32 1, %s13568_s14   ;;  %s11019_s25 = sshll.u32 %s13572_s15, 14 }
  0x45   : > { %s16548_s10 = scalar_select %p13729_p7, 1, 0 }
  0x46   : > { %s10196_s11 = sshll.u32 %s158_s23, 10  ;;  %s13739_s24 = scalar_lea.hbm %s16266_s0, %s11019_s25 }
  0x47   : > { %s162_s26 = scalar_lea.vmem [#allocation2], %s10196_s11  ;;  %p13743_p11 = pnand %p12338_p9, %p36_p3 }
  0x48   : > { %s170_s27 = sshll.u32 %s162_s26, 4  ;;  %s13747_s22 = scalar_lea.sflag [#allocation3], %s158_s23  ;;  %s13741_s27 = int_to_ptr.vmem [resolvable:$true] %s170_s27 }
  0x49   : > { %s13472_s29 = scalar_lea.hbm %s13739_s24, 16384  ;;  %p13474_p0 = pneg %p13743_p11 }
  0x4a   : > { %p13473_p12 = scmp.ne.s32.totalorder %s13739_s24, %s13472_s29  ;;  %s13477_s5 = scalar_lea.hbm %s16266_s0, 32768 }
  0x4b   : > { %p13478_p13 = scmp.lt.u32.totalorder %s13739_s24, %s16266_s0  ;;  %p13479_p6 = scmp.lt.u32.totalorder %s13477_s5, %s13472_s29 }
  0x4c   : > { %p13475_p2 = pnand %p13474_p0, %p13473_p12  ;;  %p13481_p3 = scmp.lt.u32.totalorder %s13472_s29, %s13739_s24 }
  0x4d   : > { %p13480_p10 = por %p13479_p6, %p13478_p13 }
  0x4e   : > { %p13476_p1 = pneg %p13475_p2 }
  0x4f   : > { %p13482_p5 = por %p13481_p3, %p13480_p10 }
  0x51   : > { %p13483_p9 = pnand %p13482_p5, %p13476_p1 }
  0x53   : > { %13486 = shalt.err (!%p13483_p9)
}
  0x54   : > { %s13487_s23 = scalar_lea.vmem %s13741_s27, 16384  ;;  %s13580_s11 = smov [#allocation2]  }
  0x55   : > { %p13488_p12 = scmp.ne.s32.totalorder %s13741_s27, %s13487_s23  ;;  %s13492_s25 = sshll.u32 %s13580_s11, 4  ;;  %s13493_s25 = int_to_ptr.vmem [resolvable:$false] %s13492_s25 }
  0x56   : > { %s13494_s17 = scalar_lea.vmem %s13493_s25, 32768  ;;  %p13495_p4 = scmp.lt.s32.totalorder %s13741_s27, %s13493_s25 }
  0x57   : > { %p13490_p2 = pnand %p13488_p12, %p13474_p0  ;;  %p13496_p13 = scmp.lt.s32.totalorder %s13494_s17, %s13487_s23 }
  0x59   : > { %p13491_p7 = pneg %p13490_p2  ;;  %p13497_p6 = por %p13496_p13, %p13495_p4 }
  0x5b   : > { %p13498_p10 = pnand %p13497_p6, %p13491_p7 }
  0x5d   : > { %13501 = shalt.err (!%p13498_p10)
}
  0x5e   : > { %s13581_s21 = smov 512   ;;  %s13582_s26 = smov 32  }
  0x5f   : > { %12331 = dma.hbm_to_vmem [thread:$0]  (!%p13743_p11), %s13739_s24, 16384, %s13741_s27, %s13747_s22, %s13581_s21, %s13581_s21, %s13582_s26  }
  0x60   : > { %182 = sbr.rel (%p13646_p8) target bundleno = 2220 (0x8ac), region = 32 }
  0x67   : > { %s13778_s29 = sand.u32 1, %s13564_s13   ;;  %p16550_p4 = scmp.ne.s32.totalorder %s16543_s18, 0 }
  0x68   : > { %s10201_s30 = sshll.u32 %s13778_s29, 10  ;;  %s185_s4 = scalar_lea.sflag [#allocation3], %s13778_s29 }
  0x69   : > { %s13782_s5 = scalar_lea.vmem [#allocation2], %s10201_s30 }
  0x6a   : > { %13547 = dma.done.wait (%p16550_p4), %s185_s4, 16384  }
  0x6b   : > { %13549 = vsyncadd (%p16550_p4), %s185_s4, 4294950912  ;;  %p16551_p7 = scmp.eq.s32.totalorder %s13627_s16, 0 }
  0x6d   : > { %13551 = dma.done.wait (%p16551_p7), [#allocation6], 87040   ;;  %p16552_p8 = pmov %p16551_p7 }
  0x6e   : > { %v12384_v0 = vld [vmem:[#allocation5 + $0x4] ss:$40 sps:$4 sm:$0xff]   ;;  %v12388_v2 = vld [vmem:[#allocation5] ss:$40 sps:$4 sm:$0xff]   ;;  %v12390_v4 = vld [vmem:[#allocation5 + $0x54] ss:$40 sps:$4 sm:$0xff]  }
  0x6f   : > { %13553 = vsyncadd (%p16552_p8), [#allocation6], 4294880256  ;;  %v12386_v1 = vld [vmem:[#allocation5 + $0xc] ss:$40 sps:$4 sm:$0xff]   ;;  %4830 = vmatprep.subr.bf16.mxu0 %v12384_v0  ;;  %v12389_v3 = vld [vmem:[#allocation5 + $0x8] ss:$40 sps:$4 sm:$0xff]  }
  0x70   : > { %5602 = vmatprep.subr.bf16.mxu1 %v12386_v1  ;;  %4831 = vmatpush1.bf16.msra.mxu0 %v12388_v2  ;;  %v12392_v5 = vld [vmem:[#allocation5 + $0x5c] ss:$40 sps:$4 sm:$0xff]   ;;  %v12394_v6 = vld [vmem:[#allocation5 + $0x50] ss:$40 sps:$4 sm:$0xff]   ;;  %v12398_v9 = vld [vmem:[#allocation5 + $0xac] ss:$40 sps:$4 sm:$0xff]  }
  0x71   : > { %5603 = vmatpush1.bf16.msra.mxu1 %v12389_v3  ;;  %4832 = vmatprep.subr.bf16.mxu0 %v12390_v4  ;;  %v12395_v7 = vld [vmem:[#allocation5 + $0x58] ss:$40 sps:$4 sm:$0xff]   ;;  %v12396_v8 = vld [vmem:[#allocation5 + $0xa4] ss:$40 sps:$4 sm:$0xff]   ;;  %v12401_v11 = vld [vmem:[#allocation5 + $0xa8] ss:$40 sps:$4 sm:$0xff]  }
  0x72   : > { %5604 = vmatprep.subr.bf16.mxu1 %v12392_v5  ;;  %v12400_v10 = vld [vmem:[#allocation5 + $0xa0] ss:$40 sps:$4 sm:$0xff]   ;;  %v12402_v12 = vld [vmem:[#allocation5 + $0xf4] ss:$40 sps:$4 sm:$0xff]   ;;  %v12406_v14 = vld [vmem:[#allocation5 + $0xf0] ss:$40 sps:$4 sm:$0xff]  }
  0x73   : > { %v12404_v13 = vld [vmem:[#allocation5 + $0xfc] ss:$40 sps:$4 sm:$0xff]   ;;  %v12407_v15 = vld [vmem:[#allocation5 + $0xf8] ss:$40 sps:$4 sm:$0xff]   ;;  %v12410_v17 = vld [vmem:[#allocation5 + $0x14c] ss:$40 sps:$4 sm:$0xff]  }
  0x74   : > { %4833 = vmatpush1.bf16.msra.mxu0 %v12394_v6  ;;  %v12408_v16 = vld [vmem:[#allocation5 + $0x144] ss:$40 sps:$4 sm:$0xff]   ;;  %v12412_v18 = vld [vmem:[#allocation5 + $0x140] ss:$40 sps:$4 sm:$0xff]   ;;  %v12414_v20 = vld [vmem:[#allocation5 + $0x194] ss:$40 sps:$4 sm:$0xff]  }
  0x75   : > { %5605 = vmatpush1.bf16.msra.mxu1 %v12395_v7  ;;  %4834 = vmatprep.subr.bf16.mxu0 %v12396_v8  ;;  %v12413_v19 = vld [vmem:[#allocation5 + $0x148] ss:$40 sps:$4 sm:$0xff]   ;;  %v12416_v21 = vld [vmem:[#allocation5 + $0x19c] ss:$40 sps:$4 sm:$0xff]   ;;  %v12419_v23 = vld [vmem:[#allocation5 + $0x198] ss:$40 sps:$4 sm:$0xff]  }
  0x76   : > { %5606 = vmatprep.subr.bf16.mxu1 %v12398_v9  ;;  %v12418_v22 = vld [vmem:[#allocation5 + $0x190] ss:$40 sps:$4 sm:$0xff]   ;;  %v12420_v24 = vld [vmem:[#allocation5 + $0x1e4] ss:$40 sps:$4 sm:$0xff]   ;;  %v12424_v26 = vld [vmem:[#allocation5 + $0x1e0] ss:$40 sps:$4 sm:$0xff]  }
  0x77   : > { %v12422_v25 = vld [vmem:[#allocation5 + $0x1ec] ss:$40 sps:$4 sm:$0xff]   ;;  %v12425_v27 = vld [vmem:[#allocation5 + $0x1e8] ss:$40 sps:$4 sm:$0xff]   ;;  %v12428_v29 = vld [vmem:[#allocation5 + $0x23c] ss:$40 sps:$4 sm:$0xff]  }
  0x78   : > { %4835 = vmatpush1.bf16.msra.mxu0 %v12400_v10  ;;  %v12426_v28 = vld [vmem:[#allocation5 + $0x234] ss:$40 sps:$4 sm:$0xff]   ;;  %v12430_v30 = vld [vmem:[#allocation5 + $0x230] ss:$40 sps:$4 sm:$0xff]   ;;  %v12432_v32 = vld [vmem:[#allocation5 + $0x284] ss:$40 sps:$4 sm:$0xff]  }
  0x79   : > { %5607 = vmatpush1.bf16.msra.mxu1 %v12401_v11  ;;  %4836 = vmatprep.subr.bf16.mxu0 %v12402_v12  ;;  %v12431_v31 = vld [vmem:[#allocation5 + $0x238] ss:$40 sps:$4 sm:$0xff]   ;;  %v12434_v33 = vld [vmem:[#allocation5 + $0x28c] ss:$40 sps:$4 sm:$0xff]   ;;  %v12437_v35 = vld [vmem:[#allocation5 + $0x288] ss:$40 sps:$4 sm:$0xff]  }
  0x7a   : > { %5608 = vmatprep.subr.bf16.mxu1 %v12404_v13  ;;  %v12436_v34 = vld [vmem:[#allocation5 + $0x280] ss:$40 sps:$4 sm:$0xff]   ;;  %v12438_v36 = vld [vmem:[#allocation5 + $0x2d4] ss:$40 sps:$4 sm:$0xff]   ;;  %v12442_v38 = vld [vmem:[#allocation5 + $0x2d0] ss:$40 sps:$4 sm:$0xff]  }
  0x7b   : > { %v12440_v37 = vld [vmem:[#allocation5 + $0x2dc] ss:$40 sps:$4 sm:$0xff]   ;;  %v12443_v39 = vld [vmem:[#allocation5 + $0x2d8] ss:$40 sps:$4 sm:$0xff]   ;;  %v12446_v41 = vld [vmem:[#allocation5 + $0x32c] ss:$40 sps:$4 sm:$0xff]  }
  0x7c   : > { %4837 = vmatpush1.bf16.msra.mxu0 %v12406_v14  ;;  %v12444_v40 = vld [vmem:[#allocation5 + $0x324] ss:$40 sps:$4 sm:$0xff]   ;;  %v12448_v42 = vld [vmem:[#allocation5 + $0x320] ss:$40 sps:$4 sm:$0xff]   ;;  %v12450_v44 = vld [vmem:[#allocation5 + $0x374] ss:$40 sps:$4 sm:$0xff]  }
  0x7d   : > { %5609 = vmatpush1.bf16.msra.mxu1 %v12407_v15  ;;  %4838 = vmatprep.subr.bf16.mxu0 %v12408_v16  ;;  %v12449_v43 = vld [vmem:[#allocation5 + $0x328] ss:$40 sps:$4 sm:$0xff]   ;;  %v12452_v45 = vld [vmem:[#allocation5 + $0x37c] ss:$40 sps:$4 sm:$0xff]   ;;  %v12455_v49 = vld [vmem:[#allocation5 + $0x378] ss:$40 sps:$4 sm:$0xff]  }
  0x7e   : > { %5610 = vmatprep.subr.bf16.mxu1 %v12410_v17  ;;  %v222_v46 = vld [vmem:[%s13782_s5] sm:$0xff]  ;;  %v12454_v48 = vld [vmem:[#allocation5 + $0x370] ss:$40 sps:$4 sm:$0xff]   ;;  %v12458_v52 = vld [vmem:[#allocation5 + $0x3cc] ss:$40 sps:$4 sm:$0xff]   ;;  %s10204_s18 = sshll.u32 %s13778_s29, 8 }
  0x7f   : > { %v226_v47 = vld [vmem:[%s13782_s5 + $0x20] sm:$0xff]  ;;  %v12461_v54 = vld [vmem:[#allocation5 + $0x3c8] ss:$40 sps:$4 sm:$0xff]   ;;  %v12462_v55 = vld [vmem:[#allocation5 + $0x414] ss:$40 sps:$4 sm:$0xff]   ;;  %s16151_s20 = scalar_lea.vmem [#allocation8], %s10204_s18 }
  0x80   : > { %4839 = vmatpush1.bf16.msra.mxu0 %v12412_v18  ;;  %v12456_v50 = vld [vmem:[#allocation5 + $0x3c4] ss:$40 sps:$4 sm:$0xff]   ;;  %v13794_v51 = vcombine.high %v222_v46, %v226_v47  ;;  %v12460_v53 = vld [vmem:[#allocation5 + $0x3c0] ss:$40 sps:$4 sm:$0xff]   ;;  %v12466_v57 = vld [vmem:[#allocation5 + $0x410] ss:$40 sps:$4 sm:$0xff]   ;;  %v13800_v7 = vcombine.low %v222_v46, %v226_v47 }
  0x81   : > { %5611 = vmatpush1.bf16.msra.mxu1 %v12413_v19  ;;  %4840 = vmatprep.subr.bf16.mxu0 %v12414_v20  ;;  %v12464_v56 = vld [vmem:[#allocation5 + $0x41c] ss:$40 sps:$4 sm:$0xff]   ;;  %v12467_v58 = vld [vmem:[#allocation5 + $0x418] ss:$40 sps:$4 sm:$0xff]   ;;  %v12470_v60 = vld [vmem:[#allocation5 + $0x46c] ss:$40 sps:$4 sm:$0xff]  }
  0x82   : > { %5612 = vmatprep.subr.bf16.mxu1 %v12416_v21  ;;  %16553 = vst [vmem:[#allocation12_spill] sm:$0xff] %v13794_v51  ;;  %4862 = vmatprep.mubr.bf16.mxu0 %v13794_v51  ;;  %v12468_v59 = vld [vmem:[#allocation5 + $0x464] ss:$40 sps:$4 sm:$0xff]   ;;  %v12472_v61 = vld [vmem:[#allocation5 + $0x460] ss:$40 sps:$4 sm:$0xff]   ;;  %s11020_s24 = sshll.u32 %s13627_s16, 12 }
  0x83   : > { %5634 = vmatprep.mubr.bf16.mxu1 %v13794_v51  ;;  %v12473_v62 = vld [vmem:[#allocation5 + $0x468] ss:$40 sps:$4 sm:$0xff]   ;;  %v12474_v63 = vld [vmem:[#allocation5 + $0x4b4] ss:$40 sps:$4 sm:$0xff]   ;;  %v12479_v2 = vld [vmem:[#allocation5 + $0x4b8] ss:$40 sps:$4 sm:$0xff]   ;;  %s16216_s7 = scalar_lea.hbm %s16269_s3, %s11020_s24 }
  0x84   : > { %4841 = vmatpush1.bf16.msra.mxu0 %v12418_v22  ;;  %v12476_v0 = vld [vmem:[#allocation5 + $0x4bc] ss:$40 sps:$4 sm:$0xff]   ;;  %v12478_v1 = vld [vmem:[#allocation5 + $0x4b0] ss:$40 sps:$4 sm:$0xff]   ;;  %v12509_v6 = vld [vmem:[#allocation5 + $0x50c] ss:$40 sps:$4 sm:$0xff]  }
  0x85   : > { %5613 = vmatpush1.bf16.msra.mxu1 %v12419_v23  ;;  %4842 = vmatprep.subr.bf16.mxu0 %v12420_v24  ;;  %v12482_v3 = vld [vmem:[#allocation5 + $0x504] ss:$40 sps:$4 sm:$0xff]   ;;  %v12480_v8 = vld [vmem:[#allocation5 + $0x500] ss:$40 sps:$4 sm:$0xff]   ;;  %v12485_v10 = vld [vmem:[#allocation5 + $0x554] ss:$40 sps:$4 sm:$0xff]  }
  0x86   : > { %5614 = vmatprep.subr.bf16.mxu1 %v12422_v25  ;;  %v230_v4 = vld [vmem:[%s13782_s5 + $0x40] sm:$0xff]  ;;  %v12507_v11 = vld [vmem:[#allocation5 + $0x508] ss:$40 sps:$4 sm:$0xff]   ;;  %v12518_v21 = vld [vmem:[#allocation5 + $0x5ac] ss:$40 sps:$4 sm:$0xff]   ;;  %s10099_s27 = sshll.u32 %s16151_s20, 4  ;;  %s16218_s27 = int_to_ptr.vmem [resolvable:$true] %s10099_s27 }
  0x87   : > { %v234_v5 = vld [vmem:[%s13782_s5 + $0x60] sm:$0xff]  ;;  %v12483_v13 = vld [vmem:[#allocation5 + $0x550] ss:$40 sps:$4 sm:$0xff]   ;;  %v12491_v22 = vld [vmem:[#allocation5 + $0x5f4] ss:$40 sps:$4 sm:$0xff]   ;;  %s10086_s16 = scalar_lea.sflag [#allocation4], %s13778_s29 }
  0x88   : > { %4843 = vmatpush1.bf16.msra.mxu0 %v12424_v26  ;;  %v13802_v9 = vcombine.high %v230_v4, %v234_v5  ;;  %v12512_v12 = vld [vmem:[#allocation5 + $0x55c] ss:$40 sps:$4 sm:$0xff]   ;;  %v12510_v17 = vld [vmem:[#allocation5 + $0x558] ss:$40 sps:$4 sm:$0xff]   ;;  %v13810_v18 = vcombine.low %v230_v4, %v234_v5  ;;  %v12516_v23 = vld [vmem:[#allocation5 + $0x5a8] ss:$40 sps:$4 sm:$0xff]  }
  0x89   : > { %5615 = vmatpush1.bf16.msra.mxu1 %v12425_v27  ;;  %4844 = vmatprep.subr.bf16.mxu0 %v12426_v28  ;;  %v238_v14 = vld [vmem:[%s13782_s5 + $0x80] sm:$0xff]  ;;  %v12489_v27 = vld [vmem:[#allocation5 + $0x5f0] ss:$40 sps:$4 sm:$0xff]   ;;  %v12536_v46 = vld [vmem:[#allocation5 + $0x6ec] ss:$40 sps:$4 sm:$0xff]   ;;  %s13502_s8 = scalar_lea.vmem %s16218_s27, 4096 }
  0x8a   : > { %5616 = vmatprep.subr.bf16.mxu1 %v12428_v29  ;;  %v242_v15 = vld [vmem:[%s13782_s5 + $0xa0] sm:$0xff]  ;;  %16554 = vst [vmem:[#allocation13_spill] sm:$0xff] %v13810_v18  ;;  %v12534_v47 = vld [vmem:[#allocation5 + $0x6e8] ss:$40 sps:$4 sm:$0xff]   ;;  %p13503_p11 = scmp.ne.s32.totalorder %s16218_s27, %s13502_s8  ;;  %p17304_p0 = scmp.ne.s32.totalorder %s16548_s10, 0 }
  0x8b   : > { %v12488_v16 = vld [vmem:[#allocation5 + $0x5a4] ss:$40 sps:$4 sm:$0xff]   ;;  %v13812_v19 = vcombine.high %v238_v14, %v242_v15  ;;  %v12486_v20 = vld [vmem:[#allocation5 + $0x5a0] ss:$40 sps:$4 sm:$0xff]   ;;  %s13583_s23 = smov [#allocation8]  }
  0x8c   : > { %4845 = vmatpush1.bf16.msra.mxu0 %v12430_v30  ;;  %v12521_v24 = vld [vmem:[#allocation5 + $0x5fc] ss:$40 sps:$4 sm:$0xff]   ;;  %v12519_v29 = vld [vmem:[#allocation5 + $0x5f8] ss:$40 sps:$4 sm:$0xff]   ;;  %v13820_v30 = vcombine.low %v238_v14, %v242_v15  ;;  %p13504_p1 = pnand %p13503_p11, %p17304_p0  ;;  %s13506_s11 = sshll.u32 %s13583_s23, 4  ;;  %s13507_s11 = int_to_ptr.vmem [resolvable:$false] %s13506_s11 }
  0x8d   : > { %5617 = vmatpush1.bf16.msra.mxu1 %v12431_v31  ;;  %4846 = vmatprep.subr.bf16.mxu0 %v12432_v32  ;;  %16555 = vst [vmem:[#allocation14_spill] sm:$0xff] %v13812_v19  ;;  %v246_v25 = vld [vmem:[%s13782_s5 + $0xc0] sm:$0xff]  ;;  %s13508_s25 = scalar_lea.vmem %s13507_s11, 8192  ;;  %p13509_p5 = scmp.lt.s32.totalorder %s16218_s27, %s13507_s11 }
  0x8e   : > { %5618 = vmatprep.subr.bf16.mxu1 %v12434_v33  ;;  %v250_v26 = vld [vmem:[%s13782_s5 + $0xe0] sm:$0xff]  ;;  %v12527_v33 = vld [vmem:[#allocation5 + $0x64c] ss:$40 sps:$4 sm:$0xff]   ;;  %p13505_p3 = pneg %p13504_p1  ;;  %p13510_p9 = scmp.lt.s32.totalorder %s13508_s25, %s13502_s8 }
  0x8f   : > { %v12494_v28 = vld [vmem:[#allocation5 + $0x644] ss:$40 sps:$4 sm:$0xff]   ;;  %v13822_v31 = vcombine.high %v246_v25, %v250_v26  ;;  %v12492_v32 = vld [vmem:[#allocation5 + $0x640] ss:$40 sps:$4 sm:$0xff]  }
  0x90   : > { %4847 = vmatpush1.bf16.msra.mxu0 %v12436_v34  ;;  %v12497_v34 = vld [vmem:[#allocation5 + $0x694] ss:$40 sps:$4 sm:$0xff]   ;;  %v12522_v5 = vld [vmem:[#allocation5 + $0x820] ss:$40 sps:$4 sm:$0xff]   ;;  %v12542_v15 = vld [vmem:[#allocation5 + $0x8c4] ss:$40 sps:$4 sm:$0xff]   ;;  %p13511_p12 = por %p13510_p9, %p13509_p5 }
  0x91   : > { %5619 = vmatpush1.bf16.msra.mxu1 %v12437_v35  ;;  %4848 = vmatprep.subr.bf16.mxu0 %v12438_v36  ;;  %v12525_v35 = vld [vmem:[#allocation5 + $0x648] ss:$40 sps:$4 sm:$0xff]   ;;  %v254_v36 = vld [vmem:[%s13782_s5 + $0x100] sm:$0xff] }
  0x92   : > { %5620 = vmatprep.subr.bf16.mxu1 %v12440_v37  ;;  %v12530_v37 = vld [vmem:[#allocation5 + $0x69c] ss:$40 sps:$4 sm:$0xff]   ;;  %p13512_p2 = pnand %p13511_p12, %p13505_p3 }
  0x93   : > { %v12557_v14 = vld [vmem:[#allocation5 + $0x87c] ss:$40 sps:$4 sm:$0xff]  }
  0x94   : > { %4849 = vmatpush1.bf16.msra.mxu0 %v12442_v38  ;;  %v258_v38 = vld [vmem:[%s13782_s5 + $0x120] sm:$0xff] }
  0x95   : > { %5621 = vmatpush1.bf16.msra.mxu1 %v12443_v39  ;;  %4850 = vmatprep.subr.bf16.mxu0 %v12444_v40  ;;  %v12495_v39 = vld [vmem:[#allocation5 + $0x690] ss:$40 sps:$4 sm:$0xff]   ;;  %v12500_v40 = vld [vmem:[#allocation5 + $0x6e4] ss:$40 sps:$4 sm:$0xff]  }
  0x96   : > { %5622 = vmatprep.subr.bf16.mxu1 %v12446_v41  ;;  %v12528_v41 = vld [vmem:[#allocation5 + $0x698] ss:$40 sps:$4 sm:$0xff]  }
  0x98   : > { %4851 = vmatpush1.bf16.msra.mxu0 %v12448_v42  ;;  %v13830_v42 = vcombine.low %v246_v25, %v250_v26  ;;  %v286_v25 = vld [vmem:[%s13782_s5 + $0x200] sm:$0xff] }
  0x99   : > { %5623 = vmatpush1.bf16.msra.mxu1 %v12449_v43  ;;  %4852 = vmatprep.subr.bf16.mxu0 %v12450_v44  ;;  %v13832_v43 = vcombine.high %v254_v36, %v258_v38  ;;  %v12498_v44 = vld [vmem:[#allocation5 + $0x6e0] ss:$40 sps:$4 sm:$0xff]  }
  0x9a   : > { %5624 = vmatprep.subr.bf16.mxu1 %v12452_v45  ;;  %v12503_v45 = vld [vmem:[#allocation5 + $0x734] ss:$40 sps:$4 sm:$0xff]   ;;  %v290_v26 = vld [vmem:[%s13782_s5 + $0x220] sm:$0xff] }
  0x9c   : > { %4853 = vmatpush1.bf16.msra.mxu0 %v12454_v48  ;;  %v262_v48 = vld [vmem:[%s13782_s5 + $0x140] sm:$0xff] }
  0x9d   : > { %5625 = vmatpush1.bf16.msra.mxu1 %v12455_v49  ;;  %4854 = vmatprep.subr.bf16.mxu0 %v12456_v50  ;;  %v12539_v49 = vld [vmem:[#allocation5 + $0x73c] ss:$40 sps:$4 sm:$0xff]  }
  0x9e   : > { %5626 = vmatprep.subr.bf16.mxu1 %v12458_v52  ;;  %v266_v50 = vld [vmem:[%s13782_s5 + $0x160] sm:$0xff]  ;;  %v12501_v52 = vld [vmem:[#allocation5 + $0x730] ss:$40 sps:$4 sm:$0xff]  }
  0xa0   : > { %4855 = vmatpush1.bf16.msra.mxu0 %v12460_v53  ;;  %v12506_v53 = vld [vmem:[#allocation5 + $0x784] ss:$40 sps:$4 sm:$0xff]  }
  0xa1   : > { %5627 = vmatpush1.bf16.msra.mxu1 %v12461_v54  ;;  %4856 = vmatprep.subr.bf16.mxu0 %v12462_v55  ;;  %v12537_v54 = vld [vmem:[#allocation5 + $0x738] ss:$40 sps:$4 sm:$0xff]   ;;  %v13840_v55 = vcombine.low %v254_v36, %v258_v38  ;;  %v13872_v36 = vcombine.high %v286_v25, %v290_v26  ;;  %v12570_v38 = vld [vmem:[#allocation5 + $0x968] ss:$40 sps:$4 sm:$0xff]  }
  0xa2   : > { %5628 = vmatprep.subr.bf16.mxu1 %v12464_v56  ;;  %v13842_v56 = vcombine.high %v262_v48, %v266_v50 }
  0xa4   : > { %4857 = vmatpush1.bf16.msra.mxu0 %v12466_v57  ;;  %v12504_v57 = vld [vmem:[#allocation5 + $0x780] ss:$40 sps:$4 sm:$0xff]  }
  0xa5   : > { %5629 = vmatpush1.bf16.msra.mxu1 %v12467_v58  ;;  %4858 = vmatprep.subr.bf16.mxu0 %v12468_v59  ;;  %v12545_v58 = vld [vmem:[#allocation5 + $0x78c] ss:$40 sps:$4 sm:$0xff]  }
  0xa6   : > { %5630 = vmatprep.subr.bf16.mxu1 %v12470_v60  ;;  %v12515_v59 = vld [vmem:[#allocation5 + $0x7d4] ss:$40 sps:$4 sm:$0xff]   ;;  %v12543_v60 = vld [vmem:[#allocation5 + $0x788] ss:$40 sps:$4 sm:$0xff]  }
  0xa8   : > { %4859 = vmatpush1.bf16.msra.mxu0 %v12472_v61  ;;  %v12548_v61 = vld [vmem:[#allocation5 + $0x7dc] ss:$40 sps:$4 sm:$0xff]  }
  0xa9   : > { %5631 = vmatpush1.bf16.msra.mxu1 %v12473_v62  ;;  %4860 = vmatprep.subr.bf16.mxu0 %v12474_v63  ;;  %v270_v62 = vld [vmem:[%s13782_s5 + $0x180] sm:$0xff] }
  0xaa   : > { %5632 = vmatprep.subr.bf16.mxu1 %v12476_v0  ;;  %v274_v63 = vld [vmem:[%s13782_s5 + $0x1a0] sm:$0xff]  ;;  %v12513_v0 = vld [vmem:[#allocation5 + $0x7d0] ss:$40 sps:$4 sm:$0xff]  }
  0xab   : > { %v13852_v4 = vcombine.high %v270_v62, %v274_v63 }
  0xac   : > { %4861 = vmatpush1.bf16.msra.mxu0 %v12478_v1  ;;  %v12524_v1 = vld [vmem:[#allocation5 + $0x824] ss:$40 sps:$4 sm:$0xff]  }
  0xad   : > { %5633 = vmatpush1.bf16.msra.mxu1 %v12479_v2  ;;  %5023 = vmatprep.subr.bf16.mxu0 %v12482_v3  ;;  %v12546_v2 = vld [vmem:[#allocation5 + $0x7d8] ss:$40 sps:$4 sm:$0xff]   ;;  %v13850_v3 = vcombine.low %v262_v48, %v266_v50 }
  0xae   : > { %5795 = vmatprep.subr.bf16.mxu1 %v12509_v6  ;;  %v12554_v6 = vld [vmem:[#allocation5 + $0x82c] ss:$40 sps:$4 sm:$0xff]   ;;  %v302_v50 = vld [vmem:[%s13782_s5 + $0x280] sm:$0xff] }
  0xaf   : > { %4863 = vmatmul.mubr.bf16.vlgmr.msra.gmra.mrb[0].mxu0 %v13800_v7 }
  0xb0   : > { %5635 = vmatmul.mubr.bf16.vlgmr.msra.gmra.mrb[0].mxu1 %v13800_v7  ;;  %5024 = vmatpush1.bf16.msra.mxu0 %v12480_v8  ;;  %v12533_v8 = vld [vmem:[#allocation5 + $0x874] ss:$40 sps:$4 sm:$0xff]  }
  0xb1   : > { %4872 = vmatprep.mubr.bf16.mxu0 %v13802_v9  ;;  %5644 = vmatprep.mubr.bf16.mxu1 %v13802_v9 }
  0xb2   : > { %5025 = vmatprep.subr.bf16.mxu0 %v12485_v10  ;;  %5796 = vmatpush1.bf16.msra.mxu1 %v12507_v11  ;;  %v12552_v10 = vld [vmem:[#allocation5 + $0x828] ss:$40 sps:$4 sm:$0xff]   ;;  %v278_v11 = vld [vmem:[%s13782_s5 + $0x1c0] sm:$0xff] }
  0xb3   : > { %5797 = vmatprep.subr.bf16.mxu1 %v12512_v12  ;;  %v282_v12 = vld [vmem:[%s13782_s5 + $0x1e0] sm:$0xff] }
  0xb4   : > { %5026 = vmatpush1.bf16.msra.mxu0 %v12483_v13  ;;  %v12531_v13 = vld [vmem:[#allocation5 + $0x870] ss:$40 sps:$4 sm:$0xff]  }
  0xb5   : > { %5027 = vmatprep.subr.bf16.mxu0 %v12488_v16  ;;  %v12555_v16 = vld [vmem:[#allocation5 + $0x878] ss:$40 sps:$4 sm:$0xff]  }
  0xb6   : > { %5798 = vmatpush1.bf16.msra.mxu1 %v12510_v17  ;;  %v13860_v17 = vcombine.low %v270_v62, %v274_v63  ;;  %v322_v62 = vld [vmem:[%s13782_s5 + $0x320] sm:$0xff] }
  0xb7   : > { %4873 = vmatmul.mubr.bf16.gmra.mrb[4].mxu0 %v13810_v18  ;;  %5799 = vmatprep.subr.bf16.mxu1 %v12518_v21  ;;  %v12563_v21 = vld [vmem:[#allocation5 + $0x8cc] ss:$40 sps:$4 sm:$0xff]  }
  0xb8   : > { %5645 = vmatmul.mubr.bf16.gmra.mrb[4].mxu1 %v13810_v18  ;;  %4882 = vmatprep.mubr.bf16.mxu0 %v13812_v19 }
  0xb9   : > { %5654 = vmatprep.mubr.bf16.mxu1 %v13812_v19  ;;  %5028 = vmatpush1.bf16.msra.mxu0 %v12486_v20  ;;  %v12540_v20 = vld [vmem:[#allocation5 + $0x8c0] ss:$40 sps:$4 sm:$0xff]  }
  0xba   : > { %5029 = vmatprep.subr.bf16.mxu0 %v12491_v22  ;;  %5800 = vmatpush1.bf16.msra.mxu1 %v12516_v23  ;;  %v13862_v22 = vcombine.high %v278_v11, %v282_v12  ;;  %v12551_v23 = vld [vmem:[#allocation5 + $0x914] ss:$40 sps:$4 sm:$0xff]  }
  0xbb   : > { %5801 = vmatprep.subr.bf16.mxu1 %v12521_v24  ;;  %v12561_v24 = vld [vmem:[#allocation5 + $0x8c8] ss:$40 sps:$4 sm:$0xff]  }
  0xbd   : > { %5030 = vmatpush1.bf16.msra.mxu0 %v12489_v27  ;;  %v12549_v27 = vld [vmem:[#allocation5 + $0x910] ss:$40 sps:$4 sm:$0xff]  }
  0xbe   : > { %5031 = vmatprep.subr.bf16.mxu0 %v12494_v28  ;;  %5802 = vmatpush1.bf16.msra.mxu1 %v12519_v29  ;;  %v12566_v28 = vld [vmem:[#allocation5 + $0x91c] ss:$40 sps:$4 sm:$0xff]  }
  0xbf   : > { %4883 = vmatmul.mubr.bf16.gmra.mrb[8].mxu0 %v13820_v30  ;;  %5803 = vmatprep.subr.bf16.mxu1 %v12527_v33  ;;  %v12560_v29 = vld [vmem:[#allocation5 + $0x964] ss:$40 sps:$4 sm:$0xff]   ;;  %v13870_v33 = vcombine.low %v278_v11, %v282_v12 }
  0xc0   : > { %5655 = vmatmul.mubr.bf16.gmra.mrb[8].mxu1 %v13820_v30  ;;  %4892 = vmatprep.mubr.bf16.mxu0 %v13822_v31 }
  0xc1   : > { %5664 = vmatprep.mubr.bf16.mxu1 %v13822_v31  ;;  %5032 = vmatpush1.bf16.msra.mxu0 %v12492_v32  ;;  %v12564_v32 = vld [vmem:[#allocation5 + $0x918] ss:$40 sps:$4 sm:$0xff]  }
  0xc2   : > { %5033 = vmatprep.subr.bf16.mxu0 %v12497_v34  ;;  %5804 = vmatpush1.bf16.msra.mxu1 %v12525_v35  ;;  %v12558_v34 = vld [vmem:[#allocation5 + $0x960] ss:$40 sps:$4 sm:$0xff]   ;;  %v12572_v35 = vld [vmem:[#allocation5 + $0x96c] ss:$40 sps:$4 sm:$0xff]  }
  0xc3   : > { %5805 = vmatprep.subr.bf16.mxu1 %v12530_v37  ;;  %v12569_v37 = vld [vmem:[#allocation5 + $0x9b4] ss:$40 sps:$4 sm:$0xff]  }
  0xc5   : > { %5034 = vmatpush1.bf16.msra.mxu0 %v12495_v39  ;;  %v294_v39 = vld [vmem:[%s13782_s5 + $0x240] sm:$0xff] }
  0xc6   : > { %5035 = vmatprep.subr.bf16.mxu0 %v12500_v40  ;;  %5806 = vmatpush1.bf16.msra.mxu1 %v12528_v41  ;;  %v298_v40 = vld [vmem:[%s13782_s5 + $0x260] sm:$0xff]  ;;  %v12567_v41 = vld [vmem:[#allocation5 + $0x9b0] ss:$40 sps:$4 sm:$0xff]  }
  0xc7   : > { %4893 = vmatmul.mubr.bf16.gmra.mrb[12].mxu0 %v13830_v42  ;;  %5807 = vmatprep.subr.bf16.mxu1 %v12536_v46  ;;  %v12578_v46 = vld [vmem:[#allocation5 + $0xa04] ss:$40 sps:$4 sm:$0xff]   ;;  %v13882_v48 = vcombine.high %v294_v39, %v298_v40 }
  0xc8   : > { %5665 = vmatmul.mubr.bf16.gmra.mrb[12].mxu1 %v13830_v42  ;;  %4902 = vmatprep.mubr.bf16.mxu0 %v13832_v43 }
  0xc9   : > { %5674 = vmatprep.mubr.bf16.mxu1 %v13832_v43  ;;  %5036 = vmatpush1.bf16.msra.mxu0 %v12498_v44  ;;  %v12575_v44 = vld [vmem:[#allocation5 + $0x9bc] ss:$40 sps:$4 sm:$0xff]  }
  0xca   : > { %5037 = vmatprep.subr.bf16.mxu0 %v12503_v45  ;;  %5808 = vmatpush1.bf16.msra.mxu1 %v12534_v47  ;;  %v12573_v45 = vld [vmem:[#allocation5 + $0x9b8] ss:$40 sps:$4 sm:$0xff]   ;;  %v13880_v47 = vcombine.low %v286_v25, %v290_v26  ;;  %v231_v25 = vld [vmem:[%s13782_s5 + $0x48] sm:$0xff] }
  0xcb   : > { %5809 = vmatprep.subr.bf16.mxu1 %v12539_v49  ;;  %v12605_v49 = vld [vmem:[#allocation5 + $0xa0c] ss:$40 sps:$4 sm:$0xff]  }
  0xcc   : > { %v235_v26 = vld [vmem:[%s13782_s5 + $0x68] sm:$0xff] }
  0xcd   : > { %5038 = vmatpush1.bf16.msra.mxu0 %v12501_v52  ;;  %v306_v52 = vld [vmem:[%s13782_s5 + $0x2a0] sm:$0xff] }
  0xce   : > { %5039 = vmatprep.subr.bf16.mxu0 %v12506_v53  ;;  %5810 = vmatpush1.bf16.msra.mxu1 %v12537_v54  ;;  %v13890_v53 = vcombine.low %v294_v39, %v298_v40  ;;  %v13892_v54 = vcombine.high %v302_v50, %v306_v52  ;;  %v12608_v39 = vld [vmem:[#allocation5 + $0xa5c] ss:$40 sps:$4 sm:$0xff]  }
  0xcf   : > { %4903 = vmatmul.mubr.bf16.gmra.mrb[16].mxu0 %v13840_v55  ;;  %5811 = vmatprep.subr.bf16.mxu1 %v12545_v58  ;;  %v314_v58 = vld [vmem:[%s13782_s5 + $0x2e0] sm:$0xff] }
  0xd0   : > { %5675 = vmatmul.mubr.bf16.gmra.mrb[16].mxu1 %v13840_v55  ;;  %4912 = vmatprep.mubr.bf16.mxu0 %v13842_v56  ;;  %v12584_v40 = vld [vmem:[#allocation5 + $0xaa4] ss:$40 sps:$4 sm:$0xff]  }
  0xd1   : > { %5684 = vmatprep.mubr.bf16.mxu1 %v13842_v56  ;;  %5040 = vmatpush1.bf16.msra.mxu0 %v12504_v57  ;;  %v310_v57 = vld [vmem:[%s13782_s5 + $0x2c0] sm:$0xff] }
  0xd2   : > { %5041 = vmatprep.subr.bf16.mxu0 %v12515_v59  ;;  %5812 = vmatpush1.bf16.msra.mxu1 %v12543_v60  ;;  %v13900_v59 = vcombine.low %v302_v50, %v306_v52  ;;  %v13902_v60 = vcombine.high %v310_v57, %v314_v58  ;;  %v13910_v63 = vcombine.low %v310_v57, %v314_v58  ;;  %v12587_v50 = vld [vmem:[#allocation5 + $0xaf4] ss:$40 sps:$4 sm:$0xff]   ;;  %v12612_v52 = vld [vmem:[#allocation5 + $0xaa8] ss:$40 sps:$4 sm:$0xff]  }
  0xd3   : > { %5813 = vmatprep.subr.bf16.mxu1 %v12548_v61  ;;  %v318_v61 = vld [vmem:[%s13782_s5 + $0x300] sm:$0xff]  ;;  %v247_v57 = vld [vmem:[%s13782_s5 + $0xc8] sm:$0xff] }
  0xd4   : > { %v251_v58 = vld [vmem:[%s13782_s5 + $0xe8] sm:$0xff] }
  0xd5   : > { %5042 = vmatpush1.bf16.msra.mxu0 %v12513_v0  ;;  %v13912_v0 = vcombine.high %v318_v61, %v322_v62 }
  0xd6   : > { %5043 = vmatprep.subr.bf16.mxu0 %v12524_v1  ;;  %5814 = vmatpush1.bf16.msra.mxu1 %v12546_v2  ;;  %v326_v1 = vld [vmem:[%s13782_s5 + $0x340] sm:$0xff] }
  0xd7   : > { %4913 = vmatmul.mubr.bf16.gmra.mrb[20].mxu0 %v13850_v3  ;;  %5815 = vmatprep.subr.bf16.mxu1 %v12554_v6  ;;  %v330_v2 = vld [vmem:[%s13782_s5 + $0x360] sm:$0xff] }
  0xd8   : > { %5685 = vmatmul.mubr.bf16.gmra.mrb[20].mxu1 %v13850_v3  ;;  %4922 = vmatprep.mubr.bf16.mxu0 %v13852_v4  ;;  %v13922_v6 = vcombine.high %v326_v1, %v330_v2  ;;  %v13930_v11 = vcombine.low %v326_v1, %v330_v2  ;;  %v12590_v1 = vld [vmem:[#allocation5 + $0xb44] ss:$40 sps:$4 sm:$0xff]   ;;  %v12615_v2 = vld [vmem:[#allocation5 + $0xaf8] ss:$40 sps:$4 sm:$0xff]  }
  0xd9   : > { %5694 = vmatprep.mubr.bf16.mxu1 %v13852_v4  ;;  %5044 = vmatpush1.bf16.msra.mxu0 %v12522_v5  ;;  %v13920_v5 = vcombine.low %v318_v61, %v322_v62  ;;  %v12585_v61 = vld [vmem:[#allocation5 + $0xaf0] ss:$40 sps:$4 sm:$0xff]   ;;  %v12617_v62 = vld [vmem:[#allocation5 + $0xafc] ss:$40 sps:$4 sm:$0xff]  }
  0xda   : > { %5045 = vmatprep.subr.bf16.mxu0 %v12533_v8  ;;  %5816 = vmatpush1.bf16.msra.mxu1 %v12552_v10  ;;  %v334_v8 = vld [vmem:[%s13782_s5 + $0x380] sm:$0xff] }
  0xdb   : > { %5817 = vmatprep.subr.bf16.mxu1 %v12557_v14  ;;  %v338_v10 = vld [vmem:[%s13782_s5 + $0x3a0] sm:$0xff] }
  0xdc   : > { %v13932_v12 = vcombine.high %v334_v8, %v338_v10  ;;  %v346_v14 = vld [vmem:[%s13782_s5 + $0x3e0] sm:$0xff] }
  0xdd   : > { %5046 = vmatpush1.bf16.msra.mxu0 %v12531_v13  ;;  %v342_v13 = vld [vmem:[%s13782_s5 + $0x3c0] sm:$0xff] }
  0xde   : > { %5047 = vmatprep.subr.bf16.mxu0 %v12542_v15  ;;  %5818 = vmatpush1.bf16.msra.mxu1 %v12555_v16  ;;  %v13940_v15 = vcombine.low %v334_v8, %v338_v10  ;;  %v13942_v16 = vcombine.high %v342_v13, %v346_v14  ;;  %v12588_v10 = vld [vmem:[#allocation5 + $0xb40] ss:$40 sps:$4 sm:$0xff]  }
  0xdf   : > { %4923 = vmatmul.mubr.bf16.gmra.mrb[24].mxu0 %v13860_v17  ;;  %5819 = vmatprep.subr.bf16.mxu1 %v12563_v21  ;;  %v227_v21 = vld [vmem:[%s13782_s5 + $0x28] sm:$0xff] }
  0xe0   : > { %5695 = vmatmul.mubr.bf16.gmra.mrb[24].mxu1 %v13860_v17  ;;  %4932 = vmatprep.mubr.bf16.mxu0 %v13862_v22  ;;  %16556 = vst [vmem:[#allocation15_spill] sm:$0xff] %v13940_v15  ;;  %16557 = vst [vmem:[#allocation16_spill] sm:$0xff] %v13942_v16 }
  0xe1   : > { %5704 = vmatprep.mubr.bf16.mxu1 %v13862_v22  ;;  %5048 = vmatpush1.bf16.msra.mxu0 %v12540_v20  ;;  %v223_v20 = vld [vmem:[%s13782_s5 + $0x8] sm:$0xff] }
  0xe2   : > { %5049 = vmatprep.subr.bf16.mxu0 %v12551_v23  ;;  %5820 = vmatpush1.bf16.msra.mxu1 %v12561_v24  ;;  %v13950_v23 = vcombine.low %v342_v13, %v346_v14  ;;  %v13952_v24 = vcombine.high %v223_v20, %v227_v21  ;;  %v12623_v13 = vld [vmem:[#allocation5 + $0xb4c] ss:$40 sps:$4 sm:$0xff]   ;;  %v13982_v14 = vcombine.high %v247_v57, %v251_v58 }
  0xe3   : > { %5821 = vmatprep.subr.bf16.mxu1 %v12566_v28  ;;  %v13960_v28 = vcombine.low %v223_v20, %v227_v21  ;;  %v12593_v20 = vld [vmem:[#allocation5 + $0xb94] ss:$40 sps:$4 sm:$0xff]   ;;  %v12621_v21 = vld [vmem:[#allocation5 + $0xb48] ss:$40 sps:$4 sm:$0xff]  }
  0xe4   : > { %16558 = vst [vmem:[#allocation17_spill] sm:$0xff] %v13950_v23  ;;  %16559 = vst [vmem:[#allocation18_spill] sm:$0xff] %v13952_v24 }
  0xe5   : > { %5050 = vmatpush1.bf16.msra.mxu0 %v12549_v27  ;;  %v12576_v27 = vld [vmem:[#allocation5 + $0xa00] ss:$40 sps:$4 sm:$0xff]   ;;  %16560 = vst [vmem:[#allocation19_spill] sm:$0xff] %v13960_v28  ;;  %16565 = vst [vmem:[#allocation24_spill] sm:$0xff] %v13982_v14 }
  0xe6   : > { %5051 = vmatprep.subr.bf16.mxu0 %v12560_v29  ;;  %5822 = vmatpush1.bf16.msra.mxu1 %v12564_v32  ;;  %v12581_v29 = vld [vmem:[#allocation5 + $0xa54] ss:$40 sps:$4 sm:$0xff]   ;;  %v13962_v32 = vcombine.high %v231_v25, %v235_v26 }
  0xe7   : > { %4933 = vmatmul.mubr.bf16.gmra.mrb[28].mxu0 %v13870_v33  ;;  %5823 = vmatprep.subr.bf16.mxu1 %v12572_v35  ;;  %v12579_v35 = vld [vmem:[#allocation5 + $0xa50] ss:$40 sps:$4 sm:$0xff]  }
  0xe8   : > { %5705 = vmatmul.mubr.bf16.gmra.mrb[28].mxu1 %v13870_v33  ;;  %4942 = vmatprep.mubr.bf16.mxu0 %v13872_v36  ;;  %16561 = vst [vmem:[#allocation20_spill] sm:$0xff] %v13962_v32 }
  0xe9   : > { %5714 = vmatprep.mubr.bf16.mxu1 %v13872_v36  ;;  %5052 = vmatpush1.bf16.msra.mxu0 %v12558_v34  ;;  %v12603_v34 = vld [vmem:[#allocation5 + $0xa08] ss:$40 sps:$4 sm:$0xff]  }
  0xea   : > { %5053 = vmatprep.subr.bf16.mxu0 %v12569_v37  ;;  %5824 = vmatpush1.bf16.msra.mxu1 %v12570_v38  ;;  %v239_v37 = vld [vmem:[%s13782_s5 + $0x88] sm:$0xff] }
  0xeb   : > { %5825 = vmatprep.subr.bf16.mxu1 %v12575_v44  ;;  %v243_v38 = vld [vmem:[%s13782_s5 + $0xa8] sm:$0xff]  ;;  %v13970_v44 = vcombine.low %v231_v25, %v235_v26 }
  0xec   : > { %v13980_v8 = vcombine.low %v239_v37, %v243_v38  ;;  %v255_v25 = vld [vmem:[%s13782_s5 + $0x108] sm:$0xff] }
  0xed   : > { %5054 = vmatpush1.bf16.msra.mxu0 %v12567_v41  ;;  %v12606_v41 = vld [vmem:[#allocation5 + $0xa58] ss:$40 sps:$4 sm:$0xff]   ;;  %16562 = vst [vmem:[#allocation21_spill] sm:$0xff] %v13970_v44  ;;  %v259_v26 = vld [vmem:[%s13782_s5 + $0x128] sm:$0xff] }
  0xee   : > { %5826 = vmatpush1.bf16.msra.mxu1 %v12573_v45  ;;  %5216 = vmatprep.subr.bf16.mxu0 %v12578_v46  ;;  %v12582_v45 = vld [vmem:[#allocation5 + $0xaa0] ss:$40 sps:$4 sm:$0xff]   ;;  %v12614_v46 = vld [vmem:[#allocation5 + $0xaac] ss:$40 sps:$4 sm:$0xff]   ;;  %16564 = vst [vmem:[#allocation23_spill] sm:$0xff] %v13980_v8 }
  0xef   : > { %4943 = vmatmul.mubr.bf16.gmra.mrb[32].mxu0 %v13880_v47  ;;  %5988 = vmatprep.subr.bf16.mxu1 %v12605_v49  ;;  %v13972_v49 = vcombine.high %v239_v37, %v243_v38  ;;  %v13990_v37 = vcombine.low %v247_v57, %v251_v58  ;;  %v12594_v38 = vld [vmem:[#allocation5 + $0xbe0] ss:$40 sps:$4 sm:$0xff]   ;;  %v12602_v57 = vld [vmem:[#allocation5 + $0xc84] ss:$40 sps:$4 sm:$0xff]  }
  0xf0   : > { %5715 = vmatmul.mubr.bf16.gmra.mrb[32].mxu1 %v13880_v47  ;;  %4952 = vmatprep.mubr.bf16.mxu0 %v13882_v48  ;;  %v12633_v58 = vld [vmem:[#allocation5 + $0xc38] ss:$40 sps:$4 sm:$0xff]  }
  0xf1   : > { %5724 = vmatprep.mubr.bf16.mxu1 %v13882_v48  ;;  %16563 = vst [vmem:[#allocation22_spill] sm:$0xff] %v13972_v49  ;;  %16566 = vst [vmem:[#allocation25_spill] sm:$0xff] %v13990_v37 }
  0xf7   : > { %4953 = vmatmul.mubr.bf16.gmra.mrb[36].mxu0 %v13890_v53 }
  0xf8   : > { %5725 = vmatmul.mubr.bf16.gmra.mrb[36].mxu1 %v13890_v53  ;;  %4962 = vmatprep.mubr.bf16.mxu0 %v13892_v54 }
  0xf9   : > { %5734 = vmatprep.mubr.bf16.mxu1 %v13892_v54 }
  0xff   : > { %4963 = vmatmul.mubr.bf16.gmra.mrb[40].mxu0 %v13900_v59 }
 0x100   : > { %5735 = vmatmul.mubr.bf16.gmra.mrb[40].mxu1 %v13900_v59  ;;  %4972 = vmatprep.mubr.bf16.mxu0 %v13902_v60 }
 0x101   : > { %5744 = vmatprep.mubr.bf16.mxu1 %v13902_v60 }
 0x107   : > { %4973 = vmatmul.mubr.bf16.gmra.mrb[44].mxu0 %v13910_v63 }
 0x108   : > { %5745 = vmatmul.mubr.bf16.gmra.mrb[44].mxu1 %v13910_v63  ;;  %4982 = vmatprep.mubr.bf16.mxu0 %v13912_v0 }
 0x109   : > { %5754 = vmatprep.mubr.bf16.mxu1 %v13912_v0 }
 0x10f   : > { %4983 = vmatmul.mubr.bf16.gmra.mrb[48].mxu0 %v13920_v5 }
 0x110   : > { %5755 = vmatmul.mubr.bf16.gmra.mrb[48].mxu1 %v13920_v5  ;;  %4992 = vmatprep.mubr.bf16.mxu0 %v13922_v6 }
 0x111   : > { %5764 = vmatprep.mubr.bf16.mxu1 %v13922_v6 }
 0x117   : > { %4993 = vmatmul.mubr.bf16.gmra.mrb[52].mxu0 %v13930_v11 }
 0x118   : > { %5765 = vmatmul.mubr.bf16.gmra.mrb[52].mxu1 %v13930_v11  ;;  %5002 = vmatprep.mubr.bf16.mxu0 %v13932_v12 }
 0x119   : > { %5774 = vmatprep.mubr.bf16.mxu1 %v13932_v12 }
 0x11f   : > { %5003 = vmatmul.mubr.bf16.gmra.mrb[56].mxu0 %v13940_v15 }
 0x120   : > { %5775 = vmatmul.mubr.bf16.gmra.mrb[56].mxu1 %v13940_v15  ;;  %5012 = vmatprep.mubr.bf16.mxu0 %v13942_v16 }
 0x121   : > { %5784 = vmatprep.mubr.bf16.mxu1 %v13942_v16 }
 0x127   : > { %5013 = vmatmul.mubr.bf16.gmra.mrb[60].mxu0 %v13950_v23 }
 0x128   : > { %5785 = vmatmul.mubr.bf16.gmra.mrb[60].mxu1 %v13950_v23  ;;  %5055 = vmatprep.mubr.bf16.mxu0 %v13952_v24 }
 0x129   : > { %5827 = vmatprep.mubr.bf16.mxu1 %v13952_v24 }
 0x12f   : > { %5056 = vmatmul.mubr.bf16.vlgmr.msra.gmra.mrb[0].mxu0 %v13960_v28 }
 0x130   : > { %5828 = vmatmul.mubr.bf16.vlgmr.msra.gmra.mrb[0].mxu1 %v13960_v28  ;;  %5217 = vmatpush1.bf16.msra.mxu0 %v12576_v27  ;;  %v12591_v27 = vld [vmem:[#allocation5 + $0xb90] ss:$40 sps:$4 sm:$0xff]  }
 0x131   : > { %5065 = vmatprep.mubr.bf16.mxu0 %v13962_v32  ;;  %5837 = vmatprep.mubr.bf16.mxu1 %v13962_v32 }
 0x132   : > { %5218 = vmatprep.subr.bf16.mxu0 %v12581_v29  ;;  %5989 = vmatpush1.bf16.msra.mxu1 %v12603_v34  ;;  %v12626_v29 = vld [vmem:[#allocation5 + $0xb9c] ss:$40 sps:$4 sm:$0xff]  }
 0x133   : > { %5990 = vmatprep.subr.bf16.mxu1 %v12608_v39  ;;  %v12596_v34 = vld [vmem:[#allocation5 + $0xbe4] ss:$40 sps:$4 sm:$0xff]  }
 0x134   : > { %5219 = vmatpush1.bf16.msra.mxu0 %v12579_v35  ;;  %v12624_v35 = vld [vmem:[#allocation5 + $0xb98] ss:$40 sps:$4 sm:$0xff]   ;;  %v12632_v39 = vld [vmem:[#allocation5 + $0xbec] ss:$40 sps:$4 sm:$0xff]  }
 0x135   : > { %5220 = vmatprep.subr.bf16.mxu0 %v12584_v40  ;;  %v13992_v40 = vcombine.high %v255_v25, %v259_v26 }
 0x136   : > { %5991 = vmatpush1.bf16.msra.mxu1 %v12606_v41  ;;  %v12599_v41 = vld [vmem:[#allocation5 + $0xc34] ss:$40 sps:$4 sm:$0xff]  }
 0x137   : > { %5066 = vmatmul.mubr.bf16.gmra.mrb[4].mxu0 %v13970_v44  ;;  %5992 = vmatprep.subr.bf16.mxu1 %v12614_v46  ;;  %16567 = vst [vmem:[#allocation26_spill] sm:$0xff] %v13992_v40  ;;  %v263_v46 = vld [vmem:[%s13782_s5 + $0x148] sm:$0xff] }
 0x138   : > { %5838 = vmatmul.mubr.bf16.gmra.mrb[4].mxu1 %v13970_v44  ;;  %5075 = vmatprep.mubr.bf16.mxu0 %v13972_v49 }
 0x139   : > { %5847 = vmatprep.mubr.bf16.mxu1 %v13972_v49  ;;  %5221 = vmatpush1.bf16.msra.mxu0 %v12582_v45  ;;  %v12630_v45 = vld [vmem:[#allocation5 + $0xbe8] ss:$40 sps:$4 sm:$0xff]  }
 0x13a   : > { %5222 = vmatprep.subr.bf16.mxu0 %v12587_v50  ;;  %5993 = vmatpush1.bf16.msra.mxu1 %v12612_v52  ;;  %v267_v50 = vld [vmem:[%s13782_s5 + $0x168] sm:$0xff]  ;;  %v12597_v52 = vld [vmem:[#allocation5 + $0xc30] ss:$40 sps:$4 sm:$0xff]  }
 0x13b   : > { %5994 = vmatprep.subr.bf16.mxu1 %v12617_v62  ;;  %v14000_v62 = vcombine.low %v255_v25, %v259_v26  ;;  %v12620_v25 = vld [vmem:[#allocation5 + $0xd24] ss:$40 sps:$4 sm:$0xff]   ;;  %v12642_v26 = vld [vmem:[#allocation5 + $0xcd8] ss:$40 sps:$4 sm:$0xff]  }
 0x13d   : > { %5223 = vmatpush1.bf16.msra.mxu0 %v12585_v61  ;;  %v12635_v61 = vld [vmem:[#allocation5 + $0xc3c] ss:$40 sps:$4 sm:$0xff]   ;;  %16568 = vst [vmem:[#allocation27_spill] sm:$0xff] %v14000_v62 }
 0x13e   : > { %5224 = vmatprep.subr.bf16.mxu0 %v12590_v1  ;;  %5995 = vmatpush1.bf16.msra.mxu1 %v12615_v2  ;;  %v12600_v1 = vld [vmem:[#allocation5 + $0xc80] ss:$40 sps:$4 sm:$0xff]   ;;  %v12641_v2 = vld [vmem:[#allocation5 + $0xc8c] ss:$40 sps:$4 sm:$0xff]  }
 0x13f   : > { %5076 = vmatmul.mubr.bf16.gmra.mrb[8].mxu0 %v13980_v8  ;;  %5996 = vmatprep.subr.bf16.mxu1 %v12623_v13  ;;  %v12611_v13 = vld [vmem:[#allocation5 + $0xcd4] ss:$40 sps:$4 sm:$0xff]  }
 0x140   : > { %5848 = vmatmul.mubr.bf16.gmra.mrb[8].mxu1 %v13980_v8  ;;  %5085 = vmatprep.mubr.bf16.mxu0 %v13982_v14 }
 0x141   : > { %5857 = vmatprep.mubr.bf16.mxu1 %v13982_v14  ;;  %5225 = vmatpush1.bf16.msra.mxu0 %v12588_v10  ;;  %v14002_v10 = vcombine.high %v263_v46, %v267_v50 }
 0x142   : > { %5226 = vmatprep.subr.bf16.mxu0 %v12593_v20  ;;  %5997 = vmatpush1.bf16.msra.mxu1 %v12621_v21  ;;  %v12639_v20 = vld [vmem:[#allocation5 + $0xc88] ss:$40 sps:$4 sm:$0xff]  }
 0x143   : > { %5998 = vmatprep.subr.bf16.mxu1 %v12626_v29  ;;  %16569 = vst [vmem:[#allocation28_spill] sm:$0xff] %v14002_v10  ;;  %v271_v21 = vld [vmem:[%s13782_s5 + $0x188] sm:$0xff]  ;;  %v12609_v29 = vld [vmem:[#allocation5 + $0xcd0] ss:$40 sps:$4 sm:$0xff]  }
 0x145   : > { %5227 = vmatpush1.bf16.msra.mxu0 %v12591_v27  ;;  %v275_v27 = vld [vmem:[%s13782_s5 + $0x1a8] sm:$0xff] }
 0x146   : > { %5228 = vmatprep.subr.bf16.mxu0 %v12596_v34  ;;  %5999 = vmatpush1.bf16.msra.mxu1 %v12624_v35  ;;  %v12644_v34 = vld [vmem:[#allocation5 + $0xcdc] ss:$40 sps:$4 sm:$0xff]   ;;  %v14010_v35 = vcombine.low %v263_v46, %v267_v50  ;;  %v12651_v50 = vld [vmem:[#allocation5 + $0xd78] ss:$40 sps:$4 sm:$0xff]  }
 0x147   : > { %5086 = vmatmul.mubr.bf16.gmra.mrb[12].mxu0 %v13990_v37  ;;  %6000 = vmatprep.subr.bf16.mxu1 %v12632_v39  ;;  %v12650_v39 = vld [vmem:[#allocation5 + $0xd2c] ss:$40 sps:$4 sm:$0xff]  }
 0x148   : > { %5858 = vmatmul.mubr.bf16.gmra.mrb[12].mxu1 %v13990_v37  ;;  %5095 = vmatprep.mubr.bf16.mxu0 %v13992_v40  ;;  %16570 = vst [vmem:[#allocation29_spill] sm:$0xff] %v14010_v35  ;;  %v12638_v46 = vld [vmem:[#allocation5 + $0xdc4] ss:$40 sps:$4 sm:$0xff]  }
 0x149   : > { %5867 = vmatprep.mubr.bf16.mxu1 %v13992_v40  ;;  %5229 = vmatpush1.bf16.msra.mxu0 %v12594_v38  ;;  %v12618_v38 = vld [vmem:[#allocation5 + $0xd20] ss:$40 sps:$4 sm:$0xff]  }
 0x14a   : > { %5230 = vmatprep.subr.bf16.mxu0 %v12599_v41  ;;  %6001 = vmatpush1.bf16.msra.mxu1 %v12630_v45  ;;  %v14012_v41 = vcombine.high %v271_v21, %v275_v27  ;;  %v12629_v45 = vld [vmem:[#allocation5 + $0xd74] ss:$40 sps:$4 sm:$0xff]  }
 0x14b   : > { %6002 = vmatprep.subr.bf16.mxu1 %v12635_v61  ;;  %v279_v61 = vld [vmem:[%s13782_s5 + $0x1c8] sm:$0xff] }
 0x14c   : > { %16571 = vst [vmem:[#allocation30_spill] sm:$0xff] %v14012_v41 }
 0x14d   : > { %5231 = vmatpush1.bf16.msra.mxu0 %v12597_v52  ;;  %v12648_v52 = vld [vmem:[#allocation5 + $0xd28] ss:$40 sps:$4 sm:$0xff]  }
 0x14e   : > { %5232 = vmatprep.subr.bf16.mxu0 %v12602_v57  ;;  %6003 = vmatpush1.bf16.msra.mxu1 %v12633_v58  ;;  %v283_v57 = vld [vmem:[%s13782_s5 + $0x1e8] sm:$0xff]  ;;  %v12627_v58 = vld [vmem:[#allocation5 + $0xd70] ss:$40 sps:$4 sm:$0xff]  }
 0x14f   : > { %5096 = vmatmul.mubr.bf16.gmra.mrb[16].mxu0 %v14000_v62  ;;  %6004 = vmatprep.subr.bf16.mxu1 %v12641_v2  ;;  %v14020_v2 = vcombine.low %v271_v21, %v275_v27  ;;  %v12656_v21 = vld [vmem:[#allocation5 + $0xe64] ss:$40 sps:$4 sm:$0xff]   ;;  %v12660_v27 = vld [vmem:[#allocation5 + $0xe18] ss:$40 sps:$4 sm:$0xff]  }
 0x150   : > { %5868 = vmatmul.mubr.bf16.gmra.mrb[16].mxu1 %v14000_v62  ;;  %5105 = vmatprep.mubr.bf16.mxu0 %v14002_v10 }
 0x151   : > { %5877 = vmatprep.mubr.bf16.mxu1 %v14002_v10  ;;  %5233 = vmatpush1.bf16.msra.mxu0 %v12600_v1  ;;  %v12653_v1 = vld [vmem:[#allocation5 + $0xd7c] ss:$40 sps:$4 sm:$0xff]   ;;  %16572 = vst [vmem:[#allocation31_spill] sm:$0xff] %v14020_v2 }
 0x152   : > { %5234 = vmatprep.subr.bf16.mxu0 %v12611_v13  ;;  %6005 = vmatpush1.bf16.msra.mxu1 %v12639_v20  ;;  %v12636_v13 = vld [vmem:[#allocation5 + $0xdc0] ss:$40 sps:$4 sm:$0xff]   ;;  %v12659_v20 = vld [vmem:[#allocation5 + $0xdcc] ss:$40 sps:$4 sm:$0xff]  }
 0x153   : > { %6006 = vmatprep.subr.bf16.mxu1 %v12644_v34  ;;  %v12647_v34 = vld [vmem:[#allocation5 + $0xe14] ss:$40 sps:$4 sm:$0xff]  }
 0x155   : > { %5235 = vmatpush1.bf16.msra.mxu0 %v12609_v29  ;;  %v14022_v29 = vcombine.high %v279_v61, %v283_v57 }
 0x156   : > { %5236 = vmatprep.subr.bf16.mxu0 %v12620_v25  ;;  %6007 = vmatpush1.bf16.msra.mxu1 %v12642_v26  ;;  %v12657_v25 = vld [vmem:[#allocation5 + $0xdc8] ss:$40 sps:$4 sm:$0xff]  }
 0x157   : > { %5106 = vmatmul.mubr.bf16.gmra.mrb[20].mxu0 %v14010_v35  ;;  %6008 = vmatprep.subr.bf16.mxu1 %v12650_v39  ;;  %16573 = vst [vmem:[#allocation32_spill] sm:$0xff] %v14022_v29  ;;  %v287_v26 = vld [vmem:[%s13782_s5 + $0x208] sm:$0xff]  ;;  %v12645_v39 = vld [vmem:[#allocation5 + $0xe10] ss:$40 sps:$4 sm:$0xff]  }
 0x158   : > { %5878 = vmatmul.mubr.bf16.gmra.mrb[20].mxu1 %v14010_v35  ;;  %5115 = vmatprep.mubr.bf16.mxu0 %v14012_v41 }
 0x159   : > { %5887 = vmatprep.mubr.bf16.mxu1 %v14012_v41  ;;  %5237 = vmatpush1.bf16.msra.mxu0 %v12618_v38  ;;  %v291_v38 = vld [vmem:[%s13782_s5 + $0x228] sm:$0xff] }
 0x15a   : > { %5238 = vmatprep.subr.bf16.mxu0 %v12629_v45  ;;  %6009 = vmatpush1.bf16.msra.mxu1 %v12648_v52  ;;  %v12662_v45 = vld [vmem:[#allocation5 + $0xe1c] ss:$40 sps:$4 sm:$0xff]   ;;  %v14030_v52 = vcombine.low %v279_v61, %v283_v57  ;;  %v12669_v61 = vld [vmem:[#allocation5 + $0xeb8] ss:$40 sps:$4 sm:$0xff]  }
 0x15b   : > { %6010 = vmatprep.subr.bf16.mxu1 %v12653_v1  ;;  %v12668_v1 = vld [vmem:[#allocation5 + $0xe6c] ss:$40 sps:$4 sm:$0xff]  }
 0x15c   : > { %16574 = vst [vmem:[#allocation33_spill] sm:$0xff] %v14030_v52  ;;  %v12674_v57 = vld [vmem:[#allocation5 + $0xf04] ss:$40 sps:$4 sm:$0xff]  }
 0x15d   : > { %5239 = vmatpush1.bf16.msra.mxu0 %v12627_v58  ;;  %v12654_v58 = vld [vmem:[#allocation5 + $0xe60] ss:$40 sps:$4 sm:$0xff]  }
 0x15e   : > { %5240 = vmatprep.subr.bf16.mxu0 %v12638_v46  ;;  %6011 = vmatpush1.bf16.msra.mxu1 %v12651_v50  ;;  %v14032_v46 = vcombine.high %v287_v26, %v291_v38  ;;  %v12665_v50 = vld [vmem:[#allocation5 + $0xeb4] ss:$40 sps:$4 sm:$0xff]  }
 0x15f   : > { %5116 = vmatmul.mubr.bf16.gmra.mrb[24].mxu0 %v14020_v2  ;;  %6012 = vmatprep.subr.bf16.mxu1 %v12659_v20  ;;  %v299_v20 = vld [vmem:[%s13782_s5 + $0x268] sm:$0xff] }
 0x160   : > { %5888 = vmatmul.mubr.bf16.gmra.mrb[24].mxu1 %v14020_v2  ;;  %5125 = vmatprep.mubr.bf16.mxu0 %v14022_v29  ;;  %16575 = vst [vmem:[#allocation34_spill] sm:$0xff] %v14032_v46  ;;  %v12666_v2 = vld [vmem:[#allocation5 + $0xe68] ss:$40 sps:$4 sm:$0xff]  }
 0x161   : > { %5897 = vmatprep.mubr.bf16.mxu1 %v14022_v29  ;;  %5241 = vmatpush1.bf16.msra.mxu0 %v12636_v13  ;;  %v295_v13 = vld [vmem:[%s13782_s5 + $0x248] sm:$0xff] }
 0x162   : > { %5242 = vmatprep.subr.bf16.mxu0 %v12647_v34  ;;  %6013 = vmatpush1.bf16.msra.mxu1 %v12657_v25  ;;  %v12663_v34 = vld [vmem:[#allocation5 + $0xeb0] ss:$40 sps:$4 sm:$0xff]   ;;  %v12671_v25 = vld [vmem:[#allocation5 + $0xebc] ss:$40 sps:$4 sm:$0xff]  }
 0x163   : > { %6014 = vmatprep.subr.bf16.mxu1 %v12662_v45  ;;  %v14042_v45 = vcombine.high %v295_v13, %v299_v20  ;;  %v12717_v29 = vld [vmem:[#allocation5 + $0x1048] ss:$40 sps:$4 sm:$0xff]  }
 0x165   : > { %5243 = vmatpush1.bf16.msra.mxu0 %v12645_v39  ;;  %v14040_v39 = vcombine.low %v287_v26, %v291_v38  ;;  %16577 = vst [vmem:[#allocation36_spill] sm:$0xff] %v14042_v45  ;;  %v307_v26 = vld [vmem:[%s13782_s5 + $0x2a8] sm:$0xff]  ;;  %v14050_v38 = vcombine.low %v295_v13, %v299_v20 }
 0x166   : > { %5244 = vmatprep.subr.bf16.mxu0 %v12656_v21  ;;  %6015 = vmatpush1.bf16.msra.mxu1 %v12660_v27  ;;  %v12701_v21 = vld [vmem:[#allocation5 + $0xf0c] ss:$40 sps:$4 sm:$0xff]  }
 0x167   : > { %5126 = vmatmul.mubr.bf16.gmra.mrb[28].mxu0 %v14030_v52  ;;  %6016 = vmatprep.subr.bf16.mxu1 %v12668_v1  ;;  %16576 = vst [vmem:[#allocation35_spill] sm:$0xff] %v14040_v39  ;;  %16578 = vst [vmem:[#allocation37_spill] sm:$0xff] %v14050_v38  ;;  %v315_v1 = vld [vmem:[%s13782_s5 + $0x2e8] sm:$0xff] }
 0x168   : > { %5898 = vmatmul.mubr.bf16.gmra.mrb[28].mxu1 %v14030_v52  ;;  %5135 = vmatprep.mubr.bf16.mxu0 %v14032_v46  ;;  %v319_v13 = vld [vmem:[%s13782_s5 + $0x308] sm:$0xff]  ;;  %v252_v52 = vld [vmem:[%s13782_s5 + $0xf0] sm:$0xff] }
 0x169   : > { %5907 = vmatprep.mubr.bf16.mxu1 %v14032_v46  ;;  %5245 = vmatpush1.bf16.msra.mxu0 %v12654_v58  ;;  %v311_v58 = vld [vmem:[%s13782_s5 + $0x2c8] sm:$0xff]  ;;  %v12683_v46 = vld [vmem:[#allocation5 + $0xff4] ss:$40 sps:$4 sm:$0xff]  }
 0x16a   : > { %5246 = vmatprep.subr.bf16.mxu0 %v12665_v50  ;;  %6017 = vmatpush1.bf16.msra.mxu1 %v12666_v2  ;;  %v303_v2 = vld [vmem:[%s13782_s5 + $0x288] sm:$0xff] }
 0x16b   : > { %6018 = vmatprep.subr.bf16.mxu1 %v12671_v25  ;;  %v14052_v27 = vcombine.high %v303_v2, %v307_v26  ;;  %v14060_v50 = vcombine.low %v303_v2, %v307_v26  ;;  %v323_v20 = vld [vmem:[%s13782_s5 + $0x328] sm:$0xff]  ;;  %v14070_v25 = vcombine.low %v311_v58, %v315_v1 }
 0x16c   : > { %v14080_v2 = vcombine.low %v319_v13, %v323_v20 }
 0x16d   : > { %5247 = vmatpush1.bf16.msra.mxu0 %v12663_v34  ;;  %16579 = vst [vmem:[#allocation38_spill] sm:$0xff] %v14052_v27  ;;  %16580 = vst [vmem:[#allocation39_spill] sm:$0xff] %v14060_v50  ;;  %v14062_v34 = vcombine.high %v311_v58, %v315_v1  ;;  %v335_v58 = vld [vmem:[%s13782_s5 + $0x388] sm:$0xff] }
 0x16e   : > { %6019 = vmatpush1.bf16.msra.mxu1 %v12669_v61  ;;  %5409 = vmatprep.subr.bf16.mxu0 %v12674_v57  ;;  %16582 = vst [vmem:[#allocation41_spill] sm:$0xff] %v14070_v25  ;;  %v14072_v61 = vcombine.high %v319_v13, %v323_v20  ;;  %v327_v57 = vld [vmem:[%s13782_s5 + $0x348] sm:$0xff]  ;;  %16584 = vst [vmem:[#allocation43_spill] sm:$0xff] %v14080_v2 }
 0x16f   : > { %5136 = vmatmul.mubr.bf16.gmra.mrb[32].mxu0 %v14040_v39  ;;  %6181 = vmatprep.subr.bf16.mxu1 %v12701_v21  ;;  %16581 = vst [vmem:[#allocation40_spill] sm:$0xff] %v14062_v34  ;;  %v331_v21 = vld [vmem:[%s13782_s5 + $0x368] sm:$0xff] }
 0x170   : > { %5908 = vmatmul.mubr.bf16.gmra.mrb[32].mxu1 %v14040_v39  ;;  %5145 = vmatprep.mubr.bf16.mxu0 %v14042_v45  ;;  %16583 = vst [vmem:[#allocation42_spill] sm:$0xff] %v14072_v61  ;;  %v14082_v26 = vcombine.high %v327_v57, %v331_v21  ;;  %v339_v1 = vld [vmem:[%s13782_s5 + $0x3a8] sm:$0xff] }
 0x171   : > { %5917 = vmatprep.mubr.bf16.mxu1 %v14042_v45  ;;  %v343_v13 = vld [vmem:[%s13782_s5 + $0x3c8] sm:$0xff]  ;;  %v12702_v45 = vld [vmem:[#allocation5 + $0xf58] ss:$40 sps:$4 sm:$0xff]  }
 0x172   : > { %16585 = vst [vmem:[#allocation44_spill] sm:$0xff] %v14082_v26  ;;  %v347_v20 = vld [vmem:[%s13782_s5 + $0x3e8] sm:$0xff] }
 0x173   : > { %v12710_v39 = vld [vmem:[#allocation5 + $0xfac] ss:$40 sps:$4 sm:$0xff]  }
 0x177   : > { %5146 = vmatmul.mubr.bf16.gmra.mrb[36].mxu0 %v14050_v38 }
 0x178   : > { %5918 = vmatmul.mubr.bf16.gmra.mrb[36].mxu1 %v14050_v38  ;;  %5155 = vmatprep.mubr.bf16.mxu0 %v14052_v27  ;;  %v12704_v38 = vld [vmem:[#allocation5 + $0xf5c] ss:$40 sps:$4 sm:$0xff]  }
 0x179   : > { %5927 = vmatprep.mubr.bf16.mxu1 %v14052_v27  ;;  %v240_v27 = vld [vmem:[%s13782_s5 + $0x90] sm:$0xff] }
 0x17f   : > { %5156 = vmatmul.mubr.bf16.gmra.mrb[40].mxu0 %v14060_v50 }
 0x180   : > { %5928 = vmatmul.mubr.bf16.gmra.mrb[40].mxu1 %v14060_v50  ;;  %5165 = vmatprep.mubr.bf16.mxu0 %v14062_v34  ;;  %v12675_v50 = vld [vmem:[#allocation5 + $0xf50] ss:$40 sps:$4 sm:$0xff]  }
 0x181   : > { %5937 = vmatprep.mubr.bf16.mxu1 %v14062_v34  ;;  %v12677_v34 = vld [vmem:[#allocation5 + $0xf54] ss:$40 sps:$4 sm:$0xff]  }
 0x187   : > { %5166 = vmatmul.mubr.bf16.gmra.mrb[44].mxu0 %v14070_v25 }
 0x188   : > { %5938 = vmatmul.mubr.bf16.gmra.mrb[44].mxu1 %v14070_v25  ;;  %5175 = vmatprep.mubr.bf16.mxu0 %v14072_v61  ;;  %v14092_v25 = vcombine.high %v335_v58, %v339_v1 }
 0x189   : > { %5947 = vmatprep.mubr.bf16.mxu1 %v14072_v61  ;;  %v14090_v61 = vcombine.low %v327_v57, %v331_v21  ;;  %v224_v57 = vld [vmem:[%s13782_s5 + $0x10] sm:$0xff] }
 0x18a   : > { %16587 = vst [vmem:[#allocation46_spill] sm:$0xff] %v14092_v25  ;;  %v228_v21 = vld [vmem:[%s13782_s5 + $0x30] sm:$0xff] }
 0x18b   : > { %16586 = vst [vmem:[#allocation45_spill] sm:$0xff] %v14090_v61 }
 0x18f   : > { %5176 = vmatmul.mubr.bf16.gmra.mrb[48].mxu0 %v14080_v2 }
 0x190   : > { %5948 = vmatmul.mubr.bf16.gmra.mrb[48].mxu1 %v14080_v2  ;;  %5185 = vmatprep.mubr.bf16.mxu0 %v14082_v26  ;;  %v14102_v2 = vcombine.high %v343_v13, %v347_v20 }
 0x191   : > { %5957 = vmatprep.mubr.bf16.mxu1 %v14082_v26  ;;  %v14100_v26 = vcombine.low %v335_v58, %v339_v1  ;;  %v232_v58 = vld [vmem:[%s13782_s5 + $0x50] sm:$0xff] }
 0x192   : > { %16589 = vst [vmem:[#allocation48_spill] sm:$0xff] %v14102_v2  ;;  %v236_v1 = vld [vmem:[%s13782_s5 + $0x70] sm:$0xff] }
 0x193   : > { %16588 = vst [vmem:[#allocation47_spill] sm:$0xff] %v14100_v26 }
 0x197   : > { %5186 = vmatmul.mubr.bf16.gmra.mrb[52].mxu0 %v14090_v61 }
 0x198   : > { %5958 = vmatmul.mubr.bf16.gmra.mrb[52].mxu1 %v14090_v61  ;;  %5195 = vmatprep.mubr.bf16.mxu0 %v14092_v25  ;;  %v14110_v61 = vcombine.low %v343_v13, %v347_v20  ;;  %v14122_v13 = vcombine.high %v232_v58, %v236_v1  ;;  %v12699_v20 = vld [vmem:[#allocation5 + $0xf08] ss:$40 sps:$4 sm:$0xff]  }
 0x199   : > { %5967 = vmatprep.mubr.bf16.mxu1 %v14092_v25  ;;  %v14112_v25 = vcombine.high %v224_v57, %v228_v21 }
 0x19a   : > { %16590 = vst [vmem:[#allocation49_spill] sm:$0xff] %v14110_v61  ;;  %16593 = vst [vmem:[#allocation52_spill] sm:$0xff] %v14122_v13 }
 0x19b   : > { %16591 = vst [vmem:[#allocation50_spill] sm:$0xff] %v14112_v25 }
 0x19f   : > { %5196 = vmatmul.mubr.bf16.gmra.mrb[56].mxu0 %v14100_v26 }
 0x1a0   : > { %5968 = vmatmul.mubr.bf16.gmra.mrb[56].mxu1 %v14100_v26  ;;  %5205 = vmatprep.mubr.bf16.mxu0 %v14102_v2  ;;  %v12672_v26 = vld [vmem:[#allocation5 + $0xf00] ss:$40 sps:$4 sm:$0xff]  }
 0x1a1   : > { %5977 = vmatprep.mubr.bf16.mxu1 %v14102_v2  ;;  %v14120_v2 = vcombine.low %v224_v57, %v228_v21  ;;  %v14130_v57 = vcombine.low %v232_v58, %v236_v1  ;;  %v12678_v21 = vld [vmem:[#allocation5 + $0xfa0] ss:$40 sps:$4 sm:$0xff]   ;;  %v12719_v58 = vld [vmem:[#allocation5 + $0x104c] ss:$40 sps:$4 sm:$0xff]  }
 0x1a3   : > { %16592 = vst [vmem:[#allocation51_spill] sm:$0xff] %v14120_v2  ;;  %16594 = vst [vmem:[#allocation53_spill] sm:$0xff] %v14130_v57 }
 0x1a7   : > { %5206 = vmatmul.mubr.bf16.gmra.mrb[60].mxu0 %v14110_v61 }
 0x1a8   : > { %5978 = vmatmul.mubr.bf16.gmra.mrb[60].mxu1 %v14110_v61  ;;  %5248 = vmatprep.mubr.bf16.mxu0 %v14112_v25  ;;  %v244_v61 = vld [vmem:[%s13782_s5 + $0xb0] sm:$0xff] }
 0x1a9   : > { %6020 = vmatprep.mubr.bf16.mxu1 %v14112_v25  ;;  %v12680_v25 = vld [vmem:[#allocation5 + $0xfa4] ss:$40 sps:$4 sm:$0xff]  }
 0x1af   : > { %5249 = vmatmul.mubr.bf16.vlgmr.msra.gmra.mrb[0].mxu0 %v14120_v2 }
 0x1b0   : > { %6021 = vmatmul.mubr.bf16.vlgmr.msra.gmra.mrb[0].mxu1 %v14120_v2  ;;  %5410 = vmatpush1.bf16.msra.mxu0 %v12672_v26  ;;  %v14132_v2 = vcombine.high %v240_v27, %v244_v61  ;;  %v12708_v26 = vld [vmem:[#allocation5 + $0xfa8] ss:$40 sps:$4 sm:$0xff]  }
 0x1b1   : > { %5258 = vmatprep.mubr.bf16.mxu0 %v14122_v13  ;;  %6030 = vmatprep.mubr.bf16.mxu1 %v14122_v13  ;;  %v248_v13 = vld [vmem:[%s13782_s5 + $0xd0] sm:$0xff] }
 0x1b2   : > { %5411 = vmatprep.subr.bf16.mxu0 %v12677_v34  ;;  %6182 = vmatpush1.bf16.msra.mxu1 %v12699_v20  ;;  %16595 = vst [vmem:[#allocation54_spill] sm:$0xff] %v14132_v2  ;;  %v12681_v34 = vld [vmem:[#allocation5 + $0xff0] ss:$40 sps:$4 sm:$0xff]   ;;  %v12713_v20 = vld [vmem:[#allocation5 + $0xffc] ss:$40 sps:$4 sm:$0xff]   ;;  %v14142_v1 = vcombine.high %v248_v13, %v252_v52 }
 0x1b3   : > { %6183 = vmatprep.subr.bf16.mxu1 %v12704_v38  ;;  %v12686_v38 = vld [vmem:[#allocation5 + $0x1044] ss:$40 sps:$4 sm:$0xff]  }
 0x1b4   : > { %5412 = vmatpush1.bf16.msra.mxu0 %v12675_v50  ;;  %v12711_v50 = vld [vmem:[#allocation5 + $0xff8] ss:$40 sps:$4 sm:$0xff]   ;;  %16597 = vst [vmem:[#allocation56_spill] sm:$0xff] %v14142_v1 }
 0x1b5   : > { %5413 = vmatprep.subr.bf16.mxu0 %v12680_v25  ;;  %v12684_v25 = vld [vmem:[#allocation5 + $0x1040] ss:$40 sps:$4 sm:$0xff]  }
 0x1b6   : > { %6184 = vmatpush1.bf16.msra.mxu1 %v12702_v45  ;;  %v14140_v45 = vcombine.low %v240_v27, %v244_v61  ;;  %v12692_v27 = vld [vmem:[#allocation5 + $0x10e4] ss:$40 sps:$4 sm:$0xff]   ;;  %v12720_v61 = vld [vmem:[#allocation5 + $0x1098] ss:$40 sps:$4 sm:$0xff]  }
 0x1b7   : > { %5259 = vmatmul.mubr.bf16.gmra.mrb[4].mxu0 %v14130_v57  ;;  %6185 = vmatprep.subr.bf16.mxu1 %v12710_v39  ;;  %v256_v39 = vld [vmem:[%s13782_s5 + $0x110] sm:$0xff] }
 0x1b8   : > { %6031 = vmatmul.mubr.bf16.gmra.mrb[4].mxu1 %v14130_v57  ;;  %5268 = vmatprep.mubr.bf16.mxu0 %v14132_v2  ;;  %16596 = vst [vmem:[#allocation55_spill] sm:$0xff] %v14140_v45  ;;  %v12689_v57 = vld [vmem:[#allocation5 + $0x1094] ss:$40 sps:$4 sm:$0xff]  }
 0x1b9   : > { %6040 = vmatprep.mubr.bf16.mxu1 %v14132_v2  ;;  %5414 = vmatpush1.bf16.msra.mxu0 %v12678_v21  ;;  %v260_v21 = vld [vmem:[%s13782_s5 + $0x130] sm:$0xff] }
 0x1ba   : > { %5415 = vmatprep.subr.bf16.mxu0 %v12683_v46  ;;  %6186 = vmatpush1.bf16.msra.mxu1 %v12708_v26  ;;  %v12687_v46 = vld [vmem:[#allocation5 + $0x1090] ss:$40 sps:$4 sm:$0xff]   ;;  %v12722_v26 = vld [vmem:[#allocation5 + $0x109c] ss:$40 sps:$4 sm:$0xff]  }
 0x1bb   : > { %6187 = vmatprep.subr.bf16.mxu1 %v12713_v20  ;;  %v12690_v20 = vld [vmem:[#allocation5 + $0x10e0] ss:$40 sps:$4 sm:$0xff]  }
 0x1bc   : > { %v12726_v2 = vld [vmem:[#allocation5 + $0x10e8] ss:$40 sps:$4 sm:$0xff]  }
 0x1bd   : > { %5416 = vmatpush1.bf16.msra.mxu0 %v12681_v34  ;;  %v14150_v34 = vcombine.low %v248_v13, %v252_v52  ;;  %v12698_v52 = vld [vmem:[#allocation5 + $0x1184] ss:$40 sps:$4 sm:$0xff]   ;;  %v12729_v13 = vld [vmem:[#allocation5 + $0x1138] ss:$40 sps:$4 sm:$0xff]  }
 0x1be   : > { %5417 = vmatprep.subr.bf16.mxu0 %v12686_v38  ;;  %6188 = vmatpush1.bf16.msra.mxu1 %v12711_v50  ;;  %v12728_v38 = vld [vmem:[#allocation5 + $0x10ec] ss:$40 sps:$4 sm:$0xff]   ;;  %v14152_v50 = vcombine.high %v256_v39, %v260_v21 }
 0x1bf   : > { %5269 = vmatmul.mubr.bf16.gmra.mrb[8].mxu0 %v14140_v45  ;;  %6189 = vmatprep.subr.bf16.mxu1 %v12719_v58  ;;  %16598 = vst [vmem:[#allocation57_spill] sm:$0xff] %v14150_v34  ;;  %v268_v58 = vld [vmem:[%s13782_s5 + $0x170] sm:$0xff] }
 0x1c0   : > { %6041 = vmatmul.mubr.bf16.gmra.mrb[8].mxu1 %v14140_v45  ;;  %5278 = vmatprep.mubr.bf16.mxu0 %v14142_v1  ;;  %16599 = vst [vmem:[#allocation58_spill] sm:$0xff] %v14152_v50  ;;  %v12695_v45 = vld [vmem:[#allocation5 + $0x1134] ss:$40 sps:$4 sm:$0xff]  }
 0x1c1   : > { %6050 = vmatprep.mubr.bf16.mxu1 %v14142_v1  ;;  %5418 = vmatpush1.bf16.msra.mxu0 %v12684_v25  ;;  %v264_v25 = vld [vmem:[%s13782_s5 + $0x150] sm:$0xff] }
 0x1c2   : > { %5419 = vmatprep.subr.bf16.mxu0 %v12689_v57  ;;  %6190 = vmatpush1.bf16.msra.mxu1 %v12717_v29  ;;  %v12693_v57 = vld [vmem:[#allocation5 + $0x1130] ss:$40 sps:$4 sm:$0xff]   ;;  %v12731_v29 = vld [vmem:[#allocation5 + $0x113c] ss:$40 sps:$4 sm:$0xff]  }
 0x1c3   : > { %6191 = vmatprep.subr.bf16.mxu1 %v12722_v26  ;;  %v12696_v26 = vld [vmem:[#allocation5 + $0x1180] ss:$40 sps:$4 sm:$0xff]  }
 0x1c4   : > { %v12735_v1 = vld [vmem:[#allocation5 + $0x1188] ss:$40 sps:$4 sm:$0xff]  }
 0x1c5   : > { %5420 = vmatpush1.bf16.msra.mxu0 %v12687_v46  ;;  %v14160_v46 = vcombine.low %v256_v39, %v260_v21  ;;  %v12716_v39 = vld [vmem:[#allocation5 + $0x1224] ss:$40 sps:$4 sm:$0xff]   ;;  %v12738_v21 = vld [vmem:[#allocation5 + $0x11d8] ss:$40 sps:$4 sm:$0xff]  }
 0x1c6   : > { %5421 = vmatprep.subr.bf16.mxu0 %v12692_v27  ;;  %6192 = vmatpush1.bf16.msra.mxu1 %v12720_v61  ;;  %v12737_v27 = vld [vmem:[#allocation5 + $0x118c] ss:$40 sps:$4 sm:$0xff]   ;;  %v14162_v61 = vcombine.high %v264_v25, %v268_v58 }
 0x1c7   : > { %5279 = vmatmul.mubr.bf16.gmra.mrb[12].mxu0 %v14150_v34  ;;  %6193 = vmatprep.subr.bf16.mxu1 %v12728_v38  ;;  %16600 = vst [vmem:[#allocation59_spill] sm:$0xff] %v14160_v46  ;;  %v276_v38 = vld [vmem:[%s13782_s5 + $0x1b0] sm:$0xff] }
 0x1c8   : > { %6051 = vmatmul.mubr.bf16.gmra.mrb[12].mxu1 %v14150_v34  ;;  %5288 = vmatprep.mubr.bf16.mxu0 %v14152_v50  ;;  %16601 = vst [vmem:[#allocation60_spill] sm:$0xff] %v14162_v61  ;;  %v12707_v34 = vld [vmem:[#allocation5 + $0x11d4] ss:$40 sps:$4 sm:$0xff]  }
 0x1c9   : > { %6060 = vmatprep.mubr.bf16.mxu1 %v14152_v50  ;;  %5422 = vmatpush1.bf16.msra.mxu0 %v12690_v20  ;;  %v272_v20 = vld [vmem:[%s13782_s5 + $0x190] sm:$0xff] }
 0x1ca   : > { %5423 = vmatprep.subr.bf16.mxu0 %v12695_v45  ;;  %6194 = vmatpush1.bf16.msra.mxu1 %v12726_v2  ;;  %v12705_v45 = vld [vmem:[#allocation5 + $0x11d0] ss:$40 sps:$4 sm:$0xff]   ;;  %v12740_v2 = vld [vmem:[#allocation5 + $0x11dc] ss:$40 sps:$4 sm:$0xff]  }
 0x1cb   : > { %6195 = vmatprep.subr.bf16.mxu1 %v12731_v29  ;;  %v12714_v29 = vld [vmem:[#allocation5 + $0x1220] ss:$40 sps:$4 sm:$0xff]  }
 0x1cc   : > { %v12744_v50 = vld [vmem:[#allocation5 + $0x1228] ss:$40 sps:$4 sm:$0xff]  }
 0x1cd   : > { %5424 = vmatpush1.bf16.msra.mxu0 %v12693_v57  ;;  %v14170_v57 = vcombine.low %v264_v25, %v268_v58  ;;  %v12734_v25 = vld [vmem:[#allocation5 + $0x12c4] ss:$40 sps:$4 sm:$0xff]   ;;  %v12747_v58 = vld [vmem:[#allocation5 + $0x1278] ss:$40 sps:$4 sm:$0xff]  }
 0x1ce   : > { %5425 = vmatprep.subr.bf16.mxu0 %v12698_v52  ;;  %6196 = vmatpush1.bf16.msra.mxu1 %v12729_v13  ;;  %v12746_v52 = vld [vmem:[#allocation5 + $0x122c] ss:$40 sps:$4 sm:$0xff]   ;;  %v14172_v13 = vcombine.high %v272_v20, %v276_v38 }
 0x1cf   : > { %5289 = vmatmul.mubr.bf16.gmra.mrb[16].mxu0 %v14160_v46  ;;  %6197 = vmatprep.subr.bf16.mxu1 %v12737_v27  ;;  %16602 = vst [vmem:[#allocation61_spill] sm:$0xff] %v14170_v57  ;;  %v284_v27 = vld [vmem:[%s13782_s5 + $0x1f0] sm:$0xff] }
 0x1d0   : > { %6061 = vmatmul.mubr.bf16.gmra.mrb[16].mxu1 %v14160_v46  ;;  %5298 = vmatprep.mubr.bf16.mxu0 %v14162_v61  ;;  %16603 = vst [vmem:[#allocation62_spill] sm:$0xff] %v14172_v13  ;;  %v12725_v46 = vld [vmem:[#allocation5 + $0x1274] ss:$40 sps:$4 sm:$0xff]  }
 0x1d1   : > { %6070 = vmatprep.mubr.bf16.mxu1 %v14162_v61  ;;  %5426 = vmatpush1.bf16.msra.mxu0 %v12696_v26  ;;  %v280_v26 = vld [vmem:[%s13782_s5 + $0x1d0] sm:$0xff] }
 0x1d2   : > { %5427 = vmatprep.subr.bf16.mxu0 %v12707_v34  ;;  %6198 = vmatpush1.bf16.msra.mxu1 %v12735_v1  ;;  %v12749_v34 = vld [vmem:[#allocation5 + $0x127c] ss:$40 sps:$4 sm:$0xff]   ;;  %v12723_v1 = vld [vmem:[#allocation5 + $0x1270] ss:$40 sps:$4 sm:$0xff]  }
 0x1d3   : > { %6199 = vmatprep.subr.bf16.mxu1 %v12740_v2  ;;  %v14182_v2 = vcombine.high %v280_v26, %v284_v27 }
 0x1d5   : > { %5428 = vmatpush1.bf16.msra.mxu0 %v12705_v45  ;;  %v14180_v45 = vcombine.low %v272_v20, %v276_v38  ;;  %16605 = vst [vmem:[#allocation64_spill] sm:$0xff] %v14182_v2  ;;  %v292_v20 = vld [vmem:[%s13782_s5 + $0x230] sm:$0xff] }
 0x1d6   : > { %5429 = vmatprep.subr.bf16.mxu0 %v12716_v39  ;;  %6200 = vmatpush1.bf16.msra.mxu1 %v12738_v21  ;;  %v12732_v39 = vld [vmem:[#allocation5 + $0x12c0] ss:$40 sps:$4 sm:$0xff]   ;;  %v12755_v21 = vld [vmem:[#allocation5 + $0x12cc] ss:$40 sps:$4 sm:$0xff]   ;;  %v12741_v38 = vld [vmem:[#allocation5 + $0x1310] ss:$40 sps:$4 sm:$0xff]  }
 0x1d7   : > { %5299 = vmatmul.mubr.bf16.gmra.mrb[20].mxu0 %v14170_v57  ;;  %6201 = vmatprep.subr.bf16.mxu1 %v12746_v52  ;;  %16604 = vst [vmem:[#allocation63_spill] sm:$0xff] %v14180_v45  ;;  %v12756_v52 = vld [vmem:[#allocation5 + $0x1318] ss:$40 sps:$4 sm:$0xff]  }
 0x1d8   : > { %6071 = vmatmul.mubr.bf16.gmra.mrb[20].mxu1 %v14170_v57  ;;  %5308 = vmatprep.mubr.bf16.mxu0 %v14172_v13  ;;  %v12743_v57 = vld [vmem:[#allocation5 + $0x1314] ss:$40 sps:$4 sm:$0xff]  }
 0x1d9   : > { %6080 = vmatprep.mubr.bf16.mxu1 %v14172_v13  ;;  %5430 = vmatpush1.bf16.msra.mxu0 %v12714_v29  ;;  %v12753_v13 = vld [vmem:[#allocation5 + $0x12c8] ss:$40 sps:$4 sm:$0xff]   ;;  %v12752_v29 = vld [vmem:[#allocation5 + $0x1364] ss:$40 sps:$4 sm:$0xff]  }
 0x1da   : > { %5431 = vmatprep.subr.bf16.mxu0 %v12725_v46  ;;  %6202 = vmatpush1.bf16.msra.mxu1 %v12744_v50  ;;  %v12758_v50 = vld [vmem:[#allocation5 + $0x131c] ss:$40 sps:$4 sm:$0xff]   ;;  %v288_v46 = vld [vmem:[%s13782_s5 + $0x210] sm:$0xff] }
 0x1db   : > { %6203 = vmatprep.subr.bf16.mxu1 %v12749_v34  ;;  %v14190_v34 = vcombine.low %v280_v26, %v284_v27  ;;  %v300_v26 = vld [vmem:[%s13782_s5 + $0x270] sm:$0xff] }
 0x1dc   : > { %v12759_v27 = vld [vmem:[#allocation5 + $0x13b0] ss:$40 sps:$4 sm:$0xff]  }
 0x1dd   : > { %5432 = vmatpush1.bf16.msra.mxu0 %v12723_v1  ;;  %16606 = vst [vmem:[#allocation65_spill] sm:$0xff] %v14190_v34  ;;  %v14192_v1 = vcombine.high %v288_v46, %v292_v20 }
 0x1de   : > { %5433 = vmatprep.subr.bf16.mxu0 %v12734_v25  ;;  %6204 = vmatpush1.bf16.msra.mxu1 %v12747_v58  ;;  %v12750_v25 = vld [vmem:[#allocation5 + $0x1360] ss:$40 sps:$4 sm:$0xff]   ;;  %v12764_v58 = vld [vmem:[#allocation5 + $0x136c] ss:$40 sps:$4 sm:$0xff]  }
 0x1df   : > { %5309 = vmatmul.mubr.bf16.gmra.mrb[24].mxu0 %v14180_v45  ;;  %6205 = vmatprep.subr.bf16.mxu1 %v12755_v21  ;;  %16607 = vst [vmem:[#allocation66_spill] sm:$0xff] %v14192_v1  ;;  %v12765_v21 = vld [vmem:[#allocation5 + $0x13b8] ss:$40 sps:$4 sm:$0xff]  }
 0x1e0   : > { %6081 = vmatmul.mubr.bf16.gmra.mrb[24].mxu1 %v14180_v45  ;;  %5318 = vmatprep.mubr.bf16.mxu0 %v14182_v2 }
 0x1e1   : > { %6090 = vmatprep.mubr.bf16.mxu1 %v14182_v2  ;;  %5434 = vmatpush1.bf16.msra.mxu0 %v12732_v39  ;;  %v12761_v2 = vld [vmem:[#allocation5 + $0x13b4] ss:$40 sps:$4 sm:$0xff]   ;;  %v12762_v39 = vld [vmem:[#allocation5 + $0x1368] ss:$40 sps:$4 sm:$0xff]  }
 0x1e2   : > { %5435 = vmatprep.subr.bf16.mxu0 %v12743_v57  ;;  %6206 = vmatpush1.bf16.msra.mxu1 %v12753_v13  ;;  %v12767_v57 = vld [vmem:[#allocation5 + $0x13bc] ss:$40 sps:$4 sm:$0xff]   ;;  %v296_v13 = vld [vmem:[%s13782_s5 + $0x250] sm:$0xff] }
 0x1e3   : > { %6207 = vmatprep.subr.bf16.mxu1 %v12758_v50  ;;  %v12770_v50 = vld [vmem:[#allocation5 + $0x14] ss:$40 sps:$4 sm:$0xff]  }
 0x1e5   : > { %5436 = vmatpush1.bf16.msra.mxu0 %v12741_v38  ;;  %v14200_v38 = vcombine.low %v288_v46, %v292_v20  ;;  %v308_v46 = vld [vmem:[%s13782_s5 + $0x2b0] sm:$0xff]  ;;  %v14210_v20 = vcombine.low %v296_v13, %v300_v26 }
 0x1e6   : > { %5437 = vmatprep.subr.bf16.mxu0 %v12752_v29  ;;  %6208 = vmatpush1.bf16.msra.mxu1 %v12756_v52  ;;  %v14202_v29 = vcombine.high %v296_v13, %v300_v26  ;;  %v12797_v52 = vld [vmem:[#allocation5 + $0x1c] ss:$40 sps:$4 sm:$0xff]   ;;  %v320_v13 = vld [vmem:[%s13782_s5 + $0x310] sm:$0xff] }
 0x1e7   : > { %5319 = vmatmul.mubr.bf16.gmra.mrb[28].mxu0 %v14190_v34  ;;  %6209 = vmatprep.subr.bf16.mxu1 %v12764_v58  ;;  %16608 = vst [vmem:[#allocation67_spill] sm:$0xff] %v14200_v38  ;;  %16610 = vst [vmem:[#allocation69_spill] sm:$0xff] %v14210_v20  ;;  %v312_v58 = vld [vmem:[%s13782_s5 + $0x2d0] sm:$0xff] }
 0x1e8   : > { %6091 = vmatmul.mubr.bf16.gmra.mrb[28].mxu1 %v14190_v34  ;;  %5328 = vmatprep.mubr.bf16.mxu0 %v14192_v1  ;;  %16609 = vst [vmem:[#allocation68_spill] sm:$0xff] %v14202_v29  ;;  %v324_v26 = vld [vmem:[%s13782_s5 + $0x330] sm:$0xff]  ;;  %v12815_v34 = vld [vmem:[#allocation5 + $0x15c] ss:$40 sps:$4 sm:$0xff]  }
 0x1e9   : > { %6100 = vmatprep.mubr.bf16.mxu1 %v14192_v1  ;;  %5438 = vmatpush1.bf16.msra.mxu0 %v12750_v25  ;;  %v12779_v1 = vld [vmem:[#allocation5 + $0x104] ss:$40 sps:$4 sm:$0xff]  }
 0x1ea   : > { %5439 = vmatprep.subr.bf16.mxu0 %v12761_v2  ;;  %6210 = vmatpush1.bf16.msra.mxu1 %v12762_v39  ;;  %v304_v2 = vld [vmem:[%s13782_s5 + $0x290] sm:$0xff] }
 0x1eb   : > { %6211 = vmatprep.subr.bf16.mxu1 %v12767_v57  ;;  %v14212_v25 = vcombine.high %v304_v2, %v308_v46  ;;  %v316_v39 = vld [vmem:[%s13782_s5 + $0x2f0] sm:$0xff]  ;;  %v14220_v57 = vcombine.low %v304_v2, %v308_v46  ;;  %v14240_v46 = vcombine.low %v320_v13, %v324_v26 }
 0x1ec   : > { %v332_v2 = vld [vmem:[%s13782_s5 + $0x370] sm:$0xff] }
 0x1ed   : > { %5440 = vmatpush1.bf16.msra.mxu0 %v12759_v27  ;;  %16611 = vst [vmem:[#allocation70_spill] sm:$0xff] %v14212_v25  ;;  %16612 = vst [vmem:[#allocation71_spill] sm:$0xff] %v14220_v57  ;;  %v14222_v27 = vcombine.high %v312_v58, %v316_v39 }
 0x1ee   : > { %6212 = vmatpush1.bf16.msra.mxu1 %v12765_v21  ;;  %6374 = vmatprep.subr.bf16.mxu0 %v12770_v50  ;;  %v14230_v21 = vcombine.low %v312_v58, %v316_v39  ;;  %v14232_v50 = vcombine.high %v320_v13, %v324_v26  ;;  %16616 = vst [vmem:[#allocation75_spill] sm:$0xff] %v14240_v46  ;;  %v336_v58 = vld [vmem:[%s13782_s5 + $0x390] sm:$0xff] }
 0x1ef   : > { %5329 = vmatmul.mubr.bf16.gmra.mrb[32].mxu0 %v14200_v38  ;;  %7146 = vmatprep.subr.bf16.mxu1 %v12797_v52  ;;  %16613 = vst [vmem:[#allocation72_spill] sm:$0xff] %v14222_v27  ;;  %v328_v52 = vld [vmem:[%s13782_s5 + $0x350] sm:$0xff] }
 0x1f0   : > { %6101 = vmatmul.mubr.bf16.gmra.mrb[32].mxu1 %v14200_v38  ;;  %5338 = vmatprep.mubr.bf16.mxu0 %v14202_v29  ;;  %16614 = vst [vmem:[#allocation73_spill] sm:$0xff] %v14230_v21  ;;  %16615 = vst [vmem:[#allocation74_spill] sm:$0xff] %v14232_v50  ;;  %v340_v39 = vld [vmem:[%s13782_s5 + $0x3b0] sm:$0xff]  ;;  %v12806_v38 = vld [vmem:[#allocation5 + $0xbc] ss:$40 sps:$4 sm:$0xff]  }
 0x1f1   : > { %6110 = vmatprep.mubr.bf16.mxu1 %v14202_v29  ;;  %v344_v13 = vld [vmem:[%s13782_s5 + $0x3d0] sm:$0xff] }
 0x1f2   : > { %v348_v26 = vld [vmem:[%s13782_s5 + $0x3f0] sm:$0xff] }
 0x1f7   : > { %5339 = vmatmul.mubr.bf16.gmra.mrb[36].mxu0 %v14210_v20 }
 0x1f8   : > { %6111 = vmatmul.mubr.bf16.gmra.mrb[36].mxu1 %v14210_v20  ;;  %5348 = vmatprep.mubr.bf16.mxu0 %v14212_v25  ;;  %v12798_v20 = vld [vmem:[#allocation5 + $0x68] ss:$40 sps:$4 sm:$0xff]  }
 0x1f9   : > { %6120 = vmatprep.mubr.bf16.mxu1 %v14212_v25  ;;  %v241_v25 = vld [vmem:[%s13782_s5 + $0x98] sm:$0xff] }
 0x1ff   : > { %5349 = vmatmul.mubr.bf16.gmra.mrb[40].mxu0 %v14220_v57 }
 0x200   : > { %6121 = vmatmul.mubr.bf16.gmra.mrb[40].mxu1 %v14220_v57  ;;  %5358 = vmatprep.mubr.bf16.mxu0 %v14222_v27 }
 0x201   : > { %6130 = vmatprep.mubr.bf16.mxu1 %v14222_v27  ;;  %v14242_v27 = vcombine.high %v328_v52, %v332_v2 }
 0x203   : > { %16617 = vst [vmem:[#allocation76_spill] sm:$0xff] %v14242_v27 }
 0x207   : > { %5359 = vmatmul.mubr.bf16.gmra.mrb[44].mxu0 %v14230_v21 }
 0x208   : > { %6131 = vmatmul.mubr.bf16.gmra.mrb[44].mxu1 %v14230_v21  ;;  %5368 = vmatprep.mubr.bf16.mxu0 %v14232_v50  ;;  %v14252_v21 = vcombine.high %v336_v58, %v340_v39 }
 0x209   : > { %6140 = vmatprep.mubr.bf16.mxu1 %v14232_v50  ;;  %v14250_v50 = vcombine.low %v328_v52, %v332_v2  ;;  %v225_v52 = vld [vmem:[%s13782_s5 + $0x18] sm:$0xff] }
 0x20a   : > { %16619 = vst [vmem:[#allocation78_spill] sm:$0xff] %v14252_v21  ;;  %v229_v2 = vld [vmem:[%s13782_s5 + $0x38] sm:$0xff] }
 0x20b   : > { %16618 = vst [vmem:[#allocation77_spill] sm:$0xff] %v14250_v50 }
 0x20f   : > { %5369 = vmatmul.mubr.bf16.gmra.mrb[48].mxu0 %v14240_v46 }
 0x210   : > { %6141 = vmatmul.mubr.bf16.gmra.mrb[48].mxu1 %v14240_v46  ;;  %5378 = vmatprep.mubr.bf16.mxu0 %v14242_v27  ;;  %v14262_v46 = vcombine.high %v344_v13, %v348_v26 }
 0x211   : > { %6150 = vmatprep.mubr.bf16.mxu1 %v14242_v27  ;;  %v14260_v27 = vcombine.low %v336_v58, %v340_v39  ;;  %v233_v58 = vld [vmem:[%s13782_s5 + $0x58] sm:$0xff] }
 0x212   : > { %16621 = vst [vmem:[#allocation80_spill] sm:$0xff] %v14262_v46  ;;  %v237_v39 = vld [vmem:[%s13782_s5 + $0x78] sm:$0xff] }
 0x213   : > { %16620 = vst [vmem:[#allocation79_spill] sm:$0xff] %v14260_v27  ;;  %v14282_v57 = vcombine.high %v233_v58, %v237_v39  ;;  %v14290_v29 = vcombine.low %v233_v58, %v237_v39  ;;  %v12777_v58 = vld [vmem:[#allocation5 + $0x100] ss:$40 sps:$4 sm:$0xff]   ;;  %v12782_v39 = vld [vmem:[#allocation5 + $0x154] ss:$40 sps:$4 sm:$0xff]  }
 0x215   : > { %16625 = vst [vmem:[#allocation84_spill] sm:$0xff] %v14282_v57  ;;  %16626 = vst [vmem:[#allocation85_spill] sm:$0xff] %v14290_v29 }
 0x217   : > { %5379 = vmatmul.mubr.bf16.gmra.mrb[52].mxu0 %v14250_v50 }
 0x218   : > { %6151 = vmatmul.mubr.bf16.gmra.mrb[52].mxu1 %v14250_v50  ;;  %5388 = vmatprep.mubr.bf16.mxu0 %v14252_v21  ;;  %v14270_v50 = vcombine.low %v344_v13, %v348_v26  ;;  %v12773_v13 = vld [vmem:[#allocation5 + $0x64] ss:$40 sps:$4 sm:$0xff]   ;;  %v12795_v26 = vld [vmem:[#allocation5 + $0x18] ss:$40 sps:$4 sm:$0xff]  }
 0x219   : > { %6160 = vmatprep.mubr.bf16.mxu1 %v14252_v21  ;;  %v14272_v21 = vcombine.high %v225_v52, %v229_v2 }
 0x21a   : > { %16622 = vst [vmem:[#allocation81_spill] sm:$0xff] %v14270_v50 }
 0x21b   : > { %16623 = vst [vmem:[#allocation82_spill] sm:$0xff] %v14272_v21 }
 0x21f   : > { %5389 = vmatmul.mubr.bf16.gmra.mrb[56].mxu0 %v14260_v27 }
 0x220   : > { %6161 = vmatmul.mubr.bf16.gmra.mrb[56].mxu1 %v14260_v27  ;;  %5398 = vmatprep.mubr.bf16.mxu0 %v14262_v46  ;;  %v14280_v27 = vcombine.low %v225_v52, %v229_v2  ;;  %v245_v52 = vld [vmem:[%s13782_s5 + $0xb8] sm:$0xff] }
 0x221   : > { %6170 = vmatprep.mubr.bf16.mxu1 %v14262_v46  ;;  %v12768_v46 = vld [vmem:[#allocation5 + $0x10] ss:$40 sps:$4 sm:$0xff]   ;;  %v12776_v2 = vld [vmem:[#allocation5 + $0xb4] ss:$40 sps:$4 sm:$0xff]  }
 0x222   : > { %16624 = vst [vmem:[#allocation83_spill] sm:$0xff] %v14280_v27 }
 0x227   : > { %5399 = vmatmul.mubr.bf16.gmra.mrb[60].mxu0 %v14270_v50 }
 0x228   : > { %6171 = vmatmul.mubr.bf16.gmra.mrb[60].mxu1 %v14270_v50  ;;  %5441 = vmatprep.mubr.bf16.mxu0 %v14272_v21  ;;  %v12800_v50 = vld [vmem:[#allocation5 + $0x6c] ss:$40 sps:$4 sm:$0xff]  }
 0x229   : > { %6213 = vmatprep.mubr.bf16.mxu1 %v14272_v21  ;;  %v12771_v21 = vld [vmem:[#allocation5 + $0x60] ss:$40 sps:$4 sm:$0xff]  }
 0x22f   : > { %5442 = vmatmul.mubr.bf16.vlgmr.msra.gmra.mrb[0].mxu0 %v14280_v27 }
 0x230   : > { %6214 = vmatmul.mubr.bf16.vlgmr.msra.gmra.mrb[0].mxu1 %v14280_v27  ;;  %6375 = vmatpush1.bf16.msra.mxu0 %v12768_v46  ;;  %v14292_v27 = vcombine.high %v241_v25, %v245_v52  ;;  %v12774_v46 = vld [vmem:[#allocation5 + $0xb0] ss:$40 sps:$4 sm:$0xff]  }
 0x231   : > { %5451 = vmatprep.mubr.bf16.mxu0 %v14282_v57  ;;  %6223 = vmatprep.mubr.bf16.mxu1 %v14282_v57  ;;  %v12804_v57 = vld [vmem:[#allocation5 + $0xb8] ss:$40 sps:$4 sm:$0xff]  }
 0x232   : > { %6376 = vmatprep.subr.bf16.mxu0 %v12773_v13  ;;  %7147 = vmatpush1.bf16.msra.mxu1 %v12795_v26  ;;  %16627 = vst [vmem:[#allocation86_spill] sm:$0xff] %v14292_v27  ;;  %v12809_v13 = vld [vmem:[#allocation5 + $0x10c] ss:$40 sps:$4 sm:$0xff]   ;;  %v12807_v26 = vld [vmem:[#allocation5 + $0x108] ss:$40 sps:$4 sm:$0xff]  }
 0x233   : > { %7148 = vmatprep.subr.bf16.mxu1 %v12800_v50  ;;  %v249_v50 = vld [vmem:[%s13782_s5 + $0xd8] sm:$0xff] }
 0x234   : > { %6377 = vmatpush1.bf16.msra.mxu0 %v12771_v21  ;;  %v253_v21 = vld [vmem:[%s13782_s5 + $0xf8] sm:$0xff] }
 0x235   : > { %6378 = vmatprep.subr.bf16.mxu0 %v12776_v2  ;;  %v14302_v2 = vcombine.high %v249_v50, %v253_v21 }
 0x236   : > { %7149 = vmatpush1.bf16.msra.mxu1 %v12798_v20  ;;  %v14300_v20 = vcombine.low %v241_v25, %v245_v52  ;;  %v261_v25 = vld [vmem:[%s13782_s5 + $0x138] sm:$0xff] }
 0x237   : > { %5452 = vmatmul.mubr.bf16.gmra.mrb[4].mxu0 %v14290_v29  ;;  %7150 = vmatprep.subr.bf16.mxu1 %v12806_v38  ;;  %16629 = vst [vmem:[#allocation88_spill] sm:$0xff] %v14302_v2  ;;  %v257_v38 = vld [vmem:[%s13782_s5 + $0x118] sm:$0xff] }
 0x238   : > { %6224 = vmatmul.mubr.bf16.gmra.mrb[4].mxu1 %v14290_v29  ;;  %5461 = vmatprep.mubr.bf16.mxu0 %v14292_v27  ;;  %16628 = vst [vmem:[#allocation87_spill] sm:$0xff] %v14300_v20  ;;  %v12780_v29 = vld [vmem:[#allocation5 + $0x150] ss:$40 sps:$4 sm:$0xff]   ;;  %v12788_v52 = vld [vmem:[#allocation5 + $0x1f4] ss:$40 sps:$4 sm:$0xff]  }
 0x239   : > { %6233 = vmatprep.mubr.bf16.mxu1 %v14292_v27  ;;  %6379 = vmatpush1.bf16.msra.mxu0 %v12774_v46  ;;  %v12785_v46 = vld [vmem:[#allocation5 + $0x1a4] ss:$40 sps:$4 sm:$0xff]   ;;  %v12813_v27 = vld [vmem:[#allocation5 + $0x158] ss:$40 sps:$4 sm:$0xff]  }
 0x23a   : > { %6380 = vmatprep.subr.bf16.mxu0 %v12779_v1  ;;  %7151 = vmatpush1.bf16.msra.mxu1 %v12804_v57  ;;  %v12818_v1 = vld [vmem:[#allocation5 + $0x1ac] ss:$40 sps:$4 sm:$0xff]   ;;  %v12783_v57 = vld [vmem:[#allocation5 + $0x1a0] ss:$40 sps:$4 sm:$0xff]  }
 0x23b   : > { %7152 = vmatprep.subr.bf16.mxu1 %v12809_v13  ;;  %v12816_v13 = vld [vmem:[#allocation5 + $0x1a8] ss:$40 sps:$4 sm:$0xff]  }
 0x23d   : > { %6381 = vmatpush1.bf16.msra.mxu0 %v12777_v58  ;;  %v14310_v58 = vcombine.low %v249_v50, %v253_v21  ;;  %v269_v50 = vld [vmem:[%s13782_s5 + $0x178] sm:$0xff]  ;;  %v12789_v21 = vld [vmem:[#allocation5 + $0x240] ss:$40 sps:$4 sm:$0xff]  }
 0x23e   : > { %6382 = vmatprep.subr.bf16.mxu0 %v12782_v39  ;;  %7153 = vmatpush1.bf16.msra.mxu1 %v12807_v26  ;;  %v14312_v39 = vcombine.high %v257_v38, %v261_v25  ;;  %v12786_v26 = vld [vmem:[#allocation5 + $0x1f0] ss:$40 sps:$4 sm:$0xff]  }
 0x23f   : > { %5462 = vmatmul.mubr.bf16.gmra.mrb[8].mxu0 %v14300_v20  ;;  %7154 = vmatprep.subr.bf16.mxu1 %v12815_v34  ;;  %16630 = vst [vmem:[#allocation89_spill] sm:$0xff] %v14310_v58  ;;  %v12827_v34 = vld [vmem:[#allocation5 + $0x24c] ss:$40 sps:$4 sm:$0xff]  }
 0x240   : > { %6234 = vmatmul.mubr.bf16.gmra.mrb[8].mxu1 %v14300_v20  ;;  %5471 = vmatprep.mubr.bf16.mxu0 %v14302_v2  ;;  %16631 = vst [vmem:[#allocation90_spill] sm:$0xff] %v14312_v39  ;;  %v12824_v20 = vld [vmem:[#allocation5 + $0x1fc] ss:$40 sps:$4 sm:$0xff]  }
 0x241   : > { %6243 = vmatprep.mubr.bf16.mxu1 %v14302_v2  ;;  %6383 = vmatpush1.bf16.msra.mxu0 %v12780_v29  ;;  %v12791_v2 = vld [vmem:[#allocation5 + $0x244] ss:$40 sps:$4 sm:$0xff]   ;;  %v12822_v29 = vld [vmem:[#allocation5 + $0x1f8] ss:$40 sps:$4 sm:$0xff]  }
 0x242   : > { %6384 = vmatprep.subr.bf16.mxu0 %v12785_v46  ;;  %7155 = vmatpush1.bf16.msra.mxu1 %v12813_v27  ;;  %v265_v27 = vld [vmem:[%s13782_s5 + $0x158] sm:$0xff] }
 0x243   : > { %7156 = vmatprep.subr.bf16.mxu1 %v12818_v1  ;;  %v12794_v46 = vld [vmem:[#allocation5 + $0x294] ss:$40 sps:$4 sm:$0xff]   ;;  %v12825_v1 = vld [vmem:[#allocation5 + $0x248] ss:$40 sps:$4 sm:$0xff]  }
 0x245   : > { %6385 = vmatpush1.bf16.msra.mxu0 %v12783_v57  ;;  %v14320_v57 = vcombine.low %v257_v38, %v261_v25  ;;  %v277_v38 = vld [vmem:[%s13782_s5 + $0x1b8] sm:$0xff]  ;;  %v12801_v25 = vld [vmem:[#allocation5 + $0x2e0] ss:$40 sps:$4 sm:$0xff]  }
 0x246   : > { %6386 = vmatprep.subr.bf16.mxu0 %v12788_v52  ;;  %7157 = vmatpush1.bf16.msra.mxu1 %v12816_v13  ;;  %v14322_v52 = vcombine.high %v265_v27, %v269_v50  ;;  %v12792_v13 = vld [vmem:[#allocation5 + $0x290] ss:$40 sps:$4 sm:$0xff]  }
 0x247   : > { %5472 = vmatmul.mubr.bf16.gmra.mrb[12].mxu0 %v14310_v58  ;;  %7158 = vmatprep.subr.bf16.mxu1 %v12824_v20  ;;  %16632 = vst [vmem:[#allocation91_spill] sm:$0xff] %v14320_v57  ;;  %v12836_v20 = vld [vmem:[#allocation5 + $0x2ec] ss:$40 sps:$4 sm:$0xff]  }
 0x248   : > { %6244 = vmatmul.mubr.bf16.gmra.mrb[12].mxu1 %v14310_v58  ;;  %5481 = vmatprep.mubr.bf16.mxu0 %v14312_v39  ;;  %16633 = vst [vmem:[#allocation92_spill] sm:$0xff] %v14322_v52  ;;  %v12833_v58 = vld [vmem:[#allocation5 + $0x29c] ss:$40 sps:$4 sm:$0xff]  }
 0x249   : > { %6253 = vmatprep.mubr.bf16.mxu1 %v14312_v39  ;;  %6387 = vmatpush1.bf16.msra.mxu0 %v12786_v26  ;;  %v12803_v39 = vld [vmem:[#allocation5 + $0x2e4] ss:$40 sps:$4 sm:$0xff]   ;;  %v12831_v26 = vld [vmem:[#allocation5 + $0x298] ss:$40 sps:$4 sm:$0xff]  }
 0x24a   : > { %6388 = vmatprep.subr.bf16.mxu0 %v12791_v2  ;;  %7159 = vmatpush1.bf16.msra.mxu1 %v12822_v29  ;;  %v273_v2 = vld [vmem:[%s13782_s5 + $0x198] sm:$0xff] }
 0x24b   : > { %7160 = vmatprep.subr.bf16.mxu1 %v12827_v34  ;;  %v12812_v29 = vld [vmem:[#allocation5 + $0x334] ss:$40 sps:$4 sm:$0xff]   ;;  %v12834_v34 = vld [vmem:[#allocation5 + $0x2e8] ss:$40 sps:$4 sm:$0xff]  }
 0x24d   : > { %6389 = vmatpush1.bf16.msra.mxu0 %v12789_v21  ;;  %v14330_v21 = vcombine.low %v265_v27, %v269_v50  ;;  %v285_v27 = vld [vmem:[%s13782_s5 + $0x1f8] sm:$0xff]  ;;  %v12819_v50 = vld [vmem:[#allocation5 + $0x380] ss:$40 sps:$4 sm:$0xff]  }
 0x24e   : > { %6390 = vmatprep.subr.bf16.mxu0 %v12794_v46  ;;  %7161 = vmatpush1.bf16.msra.mxu1 %v12825_v1  ;;  %v14332_v46 = vcombine.high %v273_v2, %v277_v38  ;;  %v12810_v1 = vld [vmem:[#allocation5 + $0x330] ss:$40 sps:$4 sm:$0xff]  }
 0x24f   : > { %5482 = vmatmul.mubr.bf16.gmra.mrb[16].mxu0 %v14320_v57  ;;  %7162 = vmatprep.subr.bf16.mxu1 %v12833_v58  ;;  %16634 = vst [vmem:[#allocation93_spill] sm:$0xff] %v14330_v21  ;;  %v12845_v58 = vld [vmem:[#allocation5 + $0x38c] ss:$40 sps:$4 sm:$0xff]  }
 0x250   : > { %6254 = vmatmul.mubr.bf16.gmra.mrb[16].mxu1 %v14320_v57  ;;  %5491 = vmatprep.mubr.bf16.mxu0 %v14322_v52  ;;  %16635 = vst [vmem:[#allocation94_spill] sm:$0xff] %v14332_v46  ;;  %v12842_v57 = vld [vmem:[#allocation5 + $0x33c] ss:$40 sps:$4 sm:$0xff]  }
 0x251   : > { %6263 = vmatprep.mubr.bf16.mxu1 %v14322_v52  ;;  %6391 = vmatpush1.bf16.msra.mxu0 %v12792_v13  ;;  %v12821_v52 = vld [vmem:[#allocation5 + $0x384] ss:$40 sps:$4 sm:$0xff]   ;;  %v12840_v13 = vld [vmem:[#allocation5 + $0x338] ss:$40 sps:$4 sm:$0xff]  }
 0x252   : > { %6392 = vmatprep.subr.bf16.mxu0 %v12803_v39  ;;  %7163 = vmatpush1.bf16.msra.mxu1 %v12831_v26  ;;  %v281_v39 = vld [vmem:[%s13782_s5 + $0x1d8] sm:$0xff] }
 0x253   : > { %7164 = vmatprep.subr.bf16.mxu1 %v12836_v20  ;;  %v12830_v26 = vld [vmem:[#allocation5 + $0x3d4] ss:$40 sps:$4 sm:$0xff]   ;;  %v12843_v20 = vld [vmem:[#allocation5 + $0x388] ss:$40 sps:$4 sm:$0xff]  }
 0x255   : > { %6393 = vmatpush1.bf16.msra.mxu0 %v12801_v25  ;;  %v14340_v25 = vcombine.low %v273_v2, %v277_v38  ;;  %v293_v2 = vld [vmem:[%s13782_s5 + $0x238] sm:$0xff]  ;;  %v12837_v38 = vld [vmem:[#allocation5 + $0x420] ss:$40 sps:$4 sm:$0xff]  }
 0x256   : > { %6394 = vmatprep.subr.bf16.mxu0 %v12812_v29  ;;  %7165 = vmatpush1.bf16.msra.mxu1 %v12834_v34  ;;  %v14342_v29 = vcombine.high %v281_v39, %v285_v27  ;;  %v12828_v34 = vld [vmem:[#allocation5 + $0x3d0] ss:$40 sps:$4 sm:$0xff]  }
 0x257   : > { %5492 = vmatmul.mubr.bf16.gmra.mrb[20].mxu0 %v14330_v21  ;;  %7166 = vmatprep.subr.bf16.mxu1 %v12842_v57  ;;  %16636 = vst [vmem:[#allocation95_spill] sm:$0xff] %v14340_v25  ;;  %v12854_v57 = vld [vmem:[#allocation5 + $0x42c] ss:$40 sps:$4 sm:$0xff]  }
 0x258   : > { %6264 = vmatmul.mubr.bf16.gmra.mrb[20].mxu1 %v14330_v21  ;;  %5501 = vmatprep.mubr.bf16.mxu0 %v14332_v46  ;;  %16637 = vst [vmem:[#allocation96_spill] sm:$0xff] %v14342_v29  ;;  %v12851_v21 = vld [vmem:[#allocation5 + $0x3dc] ss:$40 sps:$4 sm:$0xff]  }
 0x259   : > { %6273 = vmatprep.mubr.bf16.mxu1 %v14332_v46  ;;  %6395 = vmatpush1.bf16.msra.mxu0 %v12810_v1  ;;  %v12839_v46 = vld [vmem:[#allocation5 + $0x424] ss:$40 sps:$4 sm:$0xff]   ;;  %v12849_v1 = vld [vmem:[#allocation5 + $0x3d8] ss:$40 sps:$4 sm:$0xff]  }
 0x25a   : > { %6396 = vmatprep.subr.bf16.mxu0 %v12821_v52  ;;  %7167 = vmatpush1.bf16.msra.mxu1 %v12840_v13  ;;  %v289_v52 = vld [vmem:[%s13782_s5 + $0x218] sm:$0xff] }
 0x25b   : > { %7168 = vmatprep.subr.bf16.mxu1 %v12845_v58  ;;  %v12848_v13 = vld [vmem:[#allocation5 + $0x474] ss:$40 sps:$4 sm:$0xff]   ;;  %v12852_v58 = vld [vmem:[#allocation5 + $0x428] ss:$40 sps:$4 sm:$0xff]  }
 0x25d   : > { %6397 = vmatpush1.bf16.msra.mxu0 %v12819_v50  ;;  %v14350_v50 = vcombine.low %v281_v39, %v285_v27  ;;  %v301_v39 = vld [vmem:[%s13782_s5 + $0x278] sm:$0xff]  ;;  %v12855_v27 = vld [vmem:[#allocation5 + $0x4c0] ss:$40 sps:$4 sm:$0xff]  }
 0x25e   : > { %6398 = vmatprep.subr.bf16.mxu0 %v12830_v26  ;;  %7169 = vmatpush1.bf16.msra.mxu1 %v12843_v20  ;;  %v14352_v26 = vcombine.high %v289_v52, %v293_v2  ;;  %v12846_v20 = vld [vmem:[#allocation5 + $0x470] ss:$40 sps:$4 sm:$0xff]  }
 0x25f   : > { %5502 = vmatmul.mubr.bf16.gmra.mrb[24].mxu0 %v14340_v25  ;;  %7170 = vmatprep.subr.bf16.mxu1 %v12851_v21  ;;  %v12863_v21 = vld [vmem:[#allocation5 + $0x4cc] ss:$40 sps:$4 sm:$0xff]  }
 0x260   : > { %6274 = vmatmul.mubr.bf16.gmra.mrb[24].mxu1 %v14340_v25  ;;  %5511 = vmatprep.mubr.bf16.mxu0 %v14342_v29  ;;  %v12860_v25 = vld [vmem:[#allocation5 + $0x47c] ss:$40 sps:$4 sm:$0xff]  }
 0x261   : > { %6283 = vmatprep.mubr.bf16.mxu1 %v14342_v29  ;;  %6399 = vmatpush1.bf16.msra.mxu0 %v12828_v34  ;;  %v12857_v29 = vld [vmem:[#allocation5 + $0x4c4] ss:$40 sps:$4 sm:$0xff]   ;;  %v12858_v34 = vld [vmem:[#allocation5 + $0x478] ss:$40 sps:$4 sm:$0xff]  }
 0x262   : > { %6400 = vmatprep.subr.bf16.mxu0 %v12839_v46  ;;  %7171 = vmatpush1.bf16.msra.mxu1 %v12849_v1  ;;  %v297_v46 = vld [vmem:[%s13782_s5 + $0x258] sm:$0xff]  ;;  %v12861_v1 = vld [vmem:[#allocation5 + $0x4c8] ss:$40 sps:$4 sm:$0xff]  }
 0x263   : > { %7172 = vmatprep.subr.bf16.mxu1 %v12854_v57  ;;  %v12866_v57 = vld [vmem:[#allocation5 + $0x514] ss:$40 sps:$4 sm:$0xff]  }
 0x265   : > { %6401 = vmatpush1.bf16.msra.mxu0 %v12837_v38  ;;  %v14360_v38 = vcombine.low %v289_v52, %v293_v2  ;;  %v14370_v52 = vcombine.low %v297_v46, %v301_v39 }
 0x266   : > { %6402 = vmatprep.subr.bf16.mxu0 %v12848_v13  ;;  %7173 = vmatpush1.bf16.msra.mxu1 %v12852_v58  ;;  %v14362_v13 = vcombine.high %v297_v46, %v301_v39  ;;  %v12893_v58 = vld [vmem:[#allocation5 + $0x51c] ss:$40 sps:$4 sm:$0xff]  }
 0x267   : > { %5512 = vmatmul.mubr.bf16.gmra.mrb[28].mxu0 %v14350_v50  ;;  %7174 = vmatprep.subr.bf16.mxu1 %v12860_v25  ;;  %v305_v25 = vld [vmem:[%s13782_s5 + $0x298] sm:$0xff] }
 0x268   : > { %6284 = vmatmul.mubr.bf16.gmra.mrb[28].mxu1 %v14350_v50  ;;  %5521 = vmatprep.mubr.bf16.mxu0 %v14352_v26  ;;  %v321_v46 = vld [vmem:[%s13782_s5 + $0x318] sm:$0xff] }
 0x269   : > { %6293 = vmatprep.mubr.bf16.mxu1 %v14352_v26  ;;  %6403 = vmatpush1.bf16.msra.mxu0 %v12846_v20  ;;  %v313_v20 = vld [vmem:[%s13782_s5 + $0x2d8] sm:$0xff] }
 0x26a   : > { %6404 = vmatprep.subr.bf16.mxu0 %v12857_v29  ;;  %7175 = vmatpush1.bf16.msra.mxu1 %v12858_v34  ;;  %v309_v29 = vld [vmem:[%s13782_s5 + $0x2b8] sm:$0xff] }
 0x26b   : > { %7176 = vmatprep.subr.bf16.mxu1 %v12863_v21  ;;  %v14372_v2 = vcombine.high %v305_v25, %v309_v29  ;;  %v317_v34 = vld [vmem:[%s13782_s5 + $0x2f8] sm:$0xff]  ;;  %v14380_v21 = vcombine.low %v305_v25, %v309_v29 }
 0x26c   : > { %v325_v39 = vld [vmem:[%s13782_s5 + $0x338] sm:$0xff] }
 0x26d   : > { %6405 = vmatpush1.bf16.msra.mxu0 %v12855_v27  ;;  %16638 = vst [vmem:[#allocation97_spill] sm:$0xff] %v14380_v21  ;;  %v14382_v27 = vcombine.high %v313_v20, %v317_v34  ;;  %v333_v25 = vld [vmem:[%s13782_s5 + $0x378] sm:$0xff]  ;;  %v14400_v29 = vcombine.low %v321_v46, %v325_v39 }
 0x26e   : > { %7177 = vmatpush1.bf16.msra.mxu1 %v12861_v1  ;;  %6567 = vmatprep.subr.bf16.mxu0 %v12866_v57  ;;  %v14390_v1 = vcombine.low %v313_v20, %v317_v34  ;;  %v14392_v57 = vcombine.high %v321_v46, %v325_v39  ;;  %v337_v20 = vld [vmem:[%s13782_s5 + $0x398] sm:$0xff] }
 0x26f   : > { %5522 = vmatmul.mubr.bf16.gmra.mrb[32].mxu0 %v14360_v38  ;;  %7339 = vmatprep.subr.bf16.mxu1 %v12893_v58  ;;  %16639 = vst [vmem:[#allocation98_spill] sm:$0xff] %v14382_v27  ;;  %v329_v58 = vld [vmem:[%s13782_s5 + $0x358] sm:$0xff]  ;;  %16642 = vst [vmem:[#allocation101_spill] sm:$0xff] %v14400_v29 }
 0x270   : > { %6294 = vmatmul.mubr.bf16.gmra.mrb[32].mxu1 %v14360_v38  ;;  %5531 = vmatprep.mubr.bf16.mxu0 %v14362_v13  ;;  %16640 = vst [vmem:[#allocation99_spill] sm:$0xff] %v14390_v1  ;;  %16641 = vst [vmem:[#allocation100_spill] sm:$0xff] %v14392_v57  ;;  %v341_v34 = vld [vmem:[%s13782_s5 + $0x3b8] sm:$0xff] }
 0x271   : > { %6303 = vmatprep.mubr.bf16.mxu1 %v14362_v13  ;;  %v345_v46 = vld [vmem:[%s13782_s5 + $0x3d8] sm:$0xff] }
 0x272   : > { %v349_v39 = vld [vmem:[%s13782_s5 + $0x3f8] sm:$0xff] }
 0x277   : > { %5532 = vmatmul.mubr.bf16.gmra.mrb[36].mxu0 %v14370_v52 }
 0x278   : > { %6304 = vmatmul.mubr.bf16.gmra.mrb[36].mxu1 %v14370_v52  ;;  %5541 = vmatprep.mubr.bf16.mxu0 %v14372_v2 }
 0x279   : > { %6313 = vmatprep.mubr.bf16.mxu1 %v14372_v2 }
 0x27f   : > { %5542 = vmatmul.mubr.bf16.gmra.mrb[40].mxu0 %v14380_v21 }
 0x280   : > { %6314 = vmatmul.mubr.bf16.gmra.mrb[40].mxu1 %v14380_v21  ;;  %5551 = vmatprep.mubr.bf16.mxu0 %v14382_v27  ;;  %v14422_v21 = vcombine.high %v345_v46, %v349_v39 }
 0x281   : > { %6323 = vmatprep.mubr.bf16.mxu1 %v14382_v27  ;;  %v14402_v27 = vcombine.high %v329_v58, %v333_v25 }
 0x282   : > { %16646 = vst [vmem:[#allocation105_spill] sm:$0xff] %v14422_v21 }
 0x287   : > { %5552 = vmatmul.mubr.bf16.gmra.mrb[44].mxu0 %v14390_v1 }
 0x288   : > { %6324 = vmatmul.mubr.bf16.gmra.mrb[44].mxu1 %v14390_v1  ;;  %5561 = vmatprep.mubr.bf16.mxu0 %v14392_v57  ;;  %v14410_v1 = vcombine.low %v329_v58, %v333_v25  ;;  %v14428_v58 = vcombine.low %v345_v46, %v349_v39  ;;  %v12864_v25 = vld [vmem:[#allocation5 + $0x510] ss:$40 sps:$4 sm:$0xff]   ;;  %v12867_v46 = vld [vmem:[#allocation5 + $0x560] ss:$40 sps:$4 sm:$0xff]   ;;  %v12872_v39 = vld [vmem:[#allocation5 + $0x5b4] ss:$40 sps:$4 sm:$0xff]  }
 0x289   : > { %6333 = vmatprep.mubr.bf16.mxu1 %v14392_v57  ;;  %v14412_v57 = vcombine.high %v337_v20, %v341_v34 }
 0x28a   : > { %16643 = vst [vmem:[#allocation102_spill] sm:$0xff] %v14410_v1  ;;  %16647 = vst [vmem:[#allocation106_spill] sm:$0xff] %v14428_v58 }
 0x28b   : > { %16644 = vst [vmem:[#allocation103_spill] sm:$0xff] %v14412_v57 }
 0x28f   : > { %5562 = vmatmul.mubr.bf16.gmra.mrb[48].mxu0 %v14400_v29 }
 0x290   : > { %6334 = vmatmul.mubr.bf16.gmra.mrb[48].mxu1 %v14400_v29  ;;  %5571 = vmatprep.mubr.bf16.mxu0 %v14402_v27  ;;  %v14420_v29 = vcombine.low %v337_v20, %v341_v34  ;;  %v12869_v20 = vld [vmem:[#allocation5 + $0x564] ss:$40 sps:$4 sm:$0xff]   ;;  %v12891_v34 = vld [vmem:[#allocation5 + $0x518] ss:$40 sps:$4 sm:$0xff]  }
 0x291   : > { %6343 = vmatprep.mubr.bf16.mxu1 %v14402_v27 }
 0x292   : > { %16645 = vst [vmem:[#allocation104_spill] sm:$0xff] %v14420_v29 }
 0x297   : > { %5572 = vmatmul.mubr.bf16.gmra.mrb[52].mxu0 %v14410_v1 }
 0x298   : > { %6344 = vmatmul.mubr.bf16.gmra.mrb[52].mxu1 %v14410_v1  ;;  %5581 = vmatprep.mubr.bf16.mxu0 %v14412_v57  ;;  %v12900_v1 = vld [vmem:[#allocation5 + $0x5b8] ss:$40 sps:$4 sm:$0xff]  }
 0x299   : > { %6353 = vmatprep.mubr.bf16.mxu1 %v14412_v57  ;;  %v12875_v57 = vld [vmem:[#allocation5 + $0x604] ss:$40 sps:$4 sm:$0xff]  }
 0x29f   : > { %5582 = vmatmul.mubr.bf16.gmra.mrb[56].mxu0 %v14420_v29 }
 0x2a0   : > { %6354 = vmatmul.mubr.bf16.gmra.mrb[56].mxu1 %v14420_v29  ;;  %5591 = vmatprep.mubr.bf16.mxu0 %v14422_v21  ;;  %v12896_v29 = vld [vmem:[#allocation5 + $0x56c] ss:$40 sps:$4 sm:$0xff]  }
 0x2a1   : > { %6363 = vmatprep.mubr.bf16.mxu1 %v14422_v21  ;;  %v12902_v21 = vld [vmem:[#allocation5 + $0x5bc] ss:$40 sps:$4 sm:$0xff]  }
 0x2a7   : > { %5592 = vmatmul.mubr.bf16.gmra.mrb[60].mxu0 %v14428_v58 }
 0x2a8   : > { %6364 = vmatmul.mubr.bf16.gmra.mrb[60].mxu1 %v14428_v58  ;;  %6406 = vmatprep.mubr.bf16.mxu0 %v13794_v51  ;;  %v12894_v58 = vld [vmem:[#allocation5 + $0x568] ss:$40 sps:$4 sm:$0xff]  }
 0x2a9   : > { %7178 = vmatprep.mubr.bf16.mxu1 %v13794_v51  ;;  %v12870_v51 = vld [vmem:[#allocation5 + $0x5b0] ss:$40 sps:$4 sm:$0xff]  }
 0x2af   : > { %6407 = vmatmul.mubr.bf16.vlgmr.msra.gmra.mrb[64].mxu0 %v13800_v7 }
 0x2b0   : > { %7179 = vmatmul.mubr.bf16.vlgmr.msra.gmra.mrb[64].mxu1 %v13800_v7  ;;  %6568 = vmatpush1.bf16.msra.mxu0 %v12864_v25  ;;  %v12905_v25 = vld [vmem:[#allocation5 + $0x60c] ss:$40 sps:$4 sm:$0xff]  }
 0x2b1   : > { %6416 = vmatprep.mubr.bf16.mxu0 %v13802_v9  ;;  %7188 = vmatprep.mubr.bf16.mxu1 %v13802_v9 }
 0x2b2   : > { %6569 = vmatprep.subr.bf16.mxu0 %v12869_v20  ;;  %7340 = vmatpush1.bf16.msra.mxu1 %v12891_v34  ;;  %v12873_v20 = vld [vmem:[#allocation5 + $0x600] ss:$40 sps:$4 sm:$0xff]  }
 0x2b3   : > { %7341 = vmatprep.subr.bf16.mxu1 %v12896_v29  ;;  %v12878_v29 = vld [vmem:[#allocation5 + $0x654] ss:$40 sps:$4 sm:$0xff]   ;;  %v12903_v34 = vld [vmem:[#allocation5 + $0x608] ss:$40 sps:$4 sm:$0xff]  }
 0x2b4   : > { %6570 = vmatpush1.bf16.msra.mxu0 %v12867_v46  ;;  %v12911_v46 = vld [vmem:[#allocation5 + $0x65c] ss:$40 sps:$4 sm:$0xff]  }
 0x2b5   : > { %6571 = vmatprep.subr.bf16.mxu0 %v12872_v39  ;;  %v12881_v39 = vld [vmem:[#allocation5 + $0x6a4] ss:$40 sps:$4 sm:$0xff]  }
 0x2b6   : > { %7342 = vmatpush1.bf16.msra.mxu1 %v12894_v58  ;;  %v12876_v58 = vld [vmem:[#allocation5 + $0x650] ss:$40 sps:$4 sm:$0xff]  }
 0x2b7   : > { %6417 = vmatmul.mubr.bf16.gmra.mrb[68].mxu0 %v13810_v18  ;;  %7343 = vmatprep.subr.bf16.mxu1 %v12902_v21  ;;  %v12884_v21 = vld [vmem:[#allocation5 + $0x6f4] ss:$40 sps:$4 sm:$0xff]  }
 0x2b8   : > { %7189 = vmatmul.mubr.bf16.gmra.mrb[68].mxu1 %v13810_v18  ;;  %6426 = vmatprep.mubr.bf16.mxu0 %v13812_v19  ;;  %v12909_v18 = vld [vmem:[#allocation5 + $0x658] ss:$40 sps:$4 sm:$0xff]  }
 0x2b9   : > { %7198 = vmatprep.mubr.bf16.mxu1 %v13812_v19  ;;  %6572 = vmatpush1.bf16.msra.mxu0 %v12870_v51  ;;  %v12914_v19 = vld [vmem:[#allocation5 + $0x6ac] ss:$40 sps:$4 sm:$0xff]   ;;  %v12879_v51 = vld [vmem:[#allocation5 + $0x6a0] ss:$40 sps:$4 sm:$0xff]  }
 0x2ba   : > { %6573 = vmatprep.subr.bf16.mxu0 %v12875_v57  ;;  %7344 = vmatpush1.bf16.msra.mxu1 %v12900_v1  ;;  %v12912_v1 = vld [vmem:[#allocation5 + $0x6a8] ss:$40 sps:$4 sm:$0xff]  }
 0x2bb   : > { %7345 = vmatprep.subr.bf16.mxu1 %v12905_v25  ;;  %v12882_v57 = vld [vmem:[#allocation5 + $0x6f0] ss:$40 sps:$4 sm:$0xff]   ;;  %v12920_v25 = vld [vmem:[#allocation5 + $0x6fc] ss:$40 sps:$4 sm:$0xff]  }
 0x2bd   : > { %6574 = vmatpush1.bf16.msra.mxu0 %v12873_v20  ;;  %v12887_v20 = vld [vmem:[#allocation5 + $0x744] ss:$40 sps:$4 sm:$0xff]  }
 0x2be   : > { %6575 = vmatprep.subr.bf16.mxu0 %v12878_v29  ;;  %7346 = vmatpush1.bf16.msra.mxu1 %v12903_v34  ;;  %v12918_v29 = vld [vmem:[#allocation5 + $0x6f8] ss:$40 sps:$4 sm:$0xff]   ;;  %v12923_v34 = vld [vmem:[#allocation5 + $0x74c] ss:$40 sps:$4 sm:$0xff]  }
 0x2bf   : > { %6427 = vmatmul.mubr.bf16.gmra.mrb[72].mxu0 %v13820_v30  ;;  %7347 = vmatprep.subr.bf16.mxu1 %v12911_v46  ;;  %v12888_v46 = vld [vmem:[#allocation5 + $0x790] ss:$40 sps:$4 sm:$0xff]  }
 0x2c0   : > { %7199 = vmatmul.mubr.bf16.gmra.mrb[72].mxu1 %v13820_v30  ;;  %6436 = vmatprep.mubr.bf16.mxu0 %v13822_v31 }
 0x2c1   : > { %7208 = vmatprep.mubr.bf16.mxu1 %v13822_v31  ;;  %6576 = vmatpush1.bf16.msra.mxu0 %v12876_v58  ;;  %v12921_v58 = vld [vmem:[#allocation5 + $0x748] ss:$40 sps:$4 sm:$0xff]  }
 0x2c2   : > { %6577 = vmatprep.subr.bf16.mxu0 %v12881_v39  ;;  %7348 = vmatpush1.bf16.msra.mxu1 %v12909_v18  ;;  %v12885_v18 = vld [vmem:[#allocation5 + $0x740] ss:$40 sps:$4 sm:$0xff]   ;;  %v12929_v39 = vld [vmem:[#allocation5 + $0x79c] ss:$40 sps:$4 sm:$0xff]  }
 0x2c3   : > { %7349 = vmatprep.subr.bf16.mxu1 %v12914_v19  ;;  %v12890_v19 = vld [vmem:[#allocation5 + $0x794] ss:$40 sps:$4 sm:$0xff]  }
 0x2c5   : > { %6578 = vmatpush1.bf16.msra.mxu0 %v12879_v51  ;;  %v12899_v51 = vld [vmem:[#allocation5 + $0x7e4] ss:$40 sps:$4 sm:$0xff]  }
 0x2c6   : > { %6579 = vmatprep.subr.bf16.mxu0 %v12884_v21  ;;  %7350 = vmatpush1.bf16.msra.mxu1 %v12912_v1  ;;  %v12927_v21 = vld [vmem:[#allocation5 + $0x798] ss:$40 sps:$4 sm:$0xff]   ;;  %v12932_v1 = vld [vmem:[#allocation5 + $0x7ec] ss:$40 sps:$4 sm:$0xff]  }
 0x2c7   : > { %6437 = vmatmul.mubr.bf16.gmra.mrb[76].mxu0 %v13830_v42  ;;  %7351 = vmatprep.subr.bf16.mxu1 %v12920_v25  ;;  %v12908_v25 = vld [vmem:[#allocation5 + $0x834] ss:$40 sps:$4 sm:$0xff]  }
 0x2c8   : > { %7209 = vmatmul.mubr.bf16.gmra.mrb[76].mxu1 %v13830_v42  ;;  %6446 = vmatprep.mubr.bf16.mxu0 %v13832_v43 }
 0x2c9   : > { %7218 = vmatprep.mubr.bf16.mxu1 %v13832_v43  ;;  %6580 = vmatpush1.bf16.msra.mxu0 %v12882_v57  ;;  %v12897_v57 = vld [vmem:[#allocation5 + $0x7e0] ss:$40 sps:$4 sm:$0xff]  }
 0x2ca   : > { %6581 = vmatprep.subr.bf16.mxu0 %v12887_v20  ;;  %7352 = vmatpush1.bf16.msra.mxu1 %v12918_v29  ;;  %v12930_v20 = vld [vmem:[#allocation5 + $0x7e8] ss:$40 sps:$4 sm:$0xff]  }
 0x2cb   : > { %7353 = vmatprep.subr.bf16.mxu1 %v12923_v34  ;;  %v12906_v29 = vld [vmem:[#allocation5 + $0x830] ss:$40 sps:$4 sm:$0xff]   ;;  %v12938_v34 = vld [vmem:[#allocation5 + $0x83c] ss:$40 sps:$4 sm:$0xff]  }
 0x2cd   : > { %6582 = vmatpush1.bf16.msra.mxu0 %v12885_v18  ;;  %v12917_v18 = vld [vmem:[#allocation5 + $0x884] ss:$40 sps:$4 sm:$0xff]  }
 0x2ce   : > { %6583 = vmatprep.subr.bf16.mxu0 %v12890_v19  ;;  %7354 = vmatpush1.bf16.msra.mxu1 %v12921_v58  ;;  %v12936_v19 = vld [vmem:[#allocation5 + $0x838] ss:$40 sps:$4 sm:$0xff]   ;;  %v12941_v58 = vld [vmem:[#allocation5 + $0x88c] ss:$40 sps:$4 sm:$0xff]  }
 0x2cf   : > { %6447 = vmatmul.mubr.bf16.gmra.mrb[80].mxu0 %v13840_v55  ;;  %7355 = vmatprep.subr.bf16.mxu1 %v12929_v39  ;;  %v12926_v39 = vld [vmem:[#allocation5 + $0x8d4] ss:$40 sps:$4 sm:$0xff]  }
 0x2d0   : > { %7219 = vmatmul.mubr.bf16.gmra.mrb[80].mxu1 %v13840_v55  ;;  %6456 = vmatprep.mubr.bf16.mxu0 %v13842_v56 }
 0x2d1   : > { %7228 = vmatprep.mubr.bf16.mxu1 %v13842_v56  ;;  %6584 = vmatpush1.bf16.msra.mxu0 %v12888_v46  ;;  %v12915_v46 = vld [vmem:[#allocation5 + $0x880] ss:$40 sps:$4 sm:$0xff]  }
 0x2d2   : > { %6585 = vmatprep.subr.bf16.mxu0 %v12899_v51  ;;  %7356 = vmatpush1.bf16.msra.mxu1 %v12927_v21  ;;  %v12939_v51 = vld [vmem:[#allocation5 + $0x888] ss:$40 sps:$4 sm:$0xff]  }
 0x2d3   : > { %7357 = vmatprep.subr.bf16.mxu1 %v12932_v1  ;;  %v12924_v21 = vld [vmem:[#allocation5 + $0x8d0] ss:$40 sps:$4 sm:$0xff]   ;;  %v12947_v1 = vld [vmem:[#allocation5 + $0x8dc] ss:$40 sps:$4 sm:$0xff]  }
 0x2d5   : > { %6586 = vmatpush1.bf16.msra.mxu0 %v12897_v57  ;;  %v12935_v57 = vld [vmem:[#allocation5 + $0x924] ss:$40 sps:$4 sm:$0xff]  }
 0x2d6   : > { %6587 = vmatprep.subr.bf16.mxu0 %v12908_v25  ;;  %7358 = vmatpush1.bf16.msra.mxu1 %v12930_v20  ;;  %v12945_v25 = vld [vmem:[#allocation5 + $0x8d8] ss:$40 sps:$4 sm:$0xff]   ;;  %v12950_v20 = vld [vmem:[#allocation5 + $0x92c] ss:$40 sps:$4 sm:$0xff]  }
 0x2d7   : > { %6457 = vmatmul.mubr.bf16.gmra.mrb[84].mxu0 %v13850_v3  ;;  %7359 = vmatprep.subr.bf16.mxu1 %v12938_v34  ;;  %v12944_v34 = vld [vmem:[#allocation5 + $0x974] ss:$40 sps:$4 sm:$0xff]  }
 0x2d8   : > { %7229 = vmatmul.mubr.bf16.gmra.mrb[84].mxu1 %v13850_v3  ;;  %6466 = vmatprep.mubr.bf16.mxu0 %v13852_v4 }
 0x2d9   : > { %7238 = vmatprep.mubr.bf16.mxu1 %v13852_v4  ;;  %6588 = vmatpush1.bf16.msra.mxu0 %v12906_v29  ;;  %v12933_v29 = vld [vmem:[#allocation5 + $0x920] ss:$40 sps:$4 sm:$0xff]  }
 0x2da   : > { %6589 = vmatprep.subr.bf16.mxu0 %v12917_v18  ;;  %7360 = vmatpush1.bf16.msra.mxu1 %v12936_v19  ;;  %v12948_v18 = vld [vmem:[#allocation5 + $0x928] ss:$40 sps:$4 sm:$0xff]  }
 0x2db   : > { %7361 = vmatprep.subr.bf16.mxu1 %v12941_v58  ;;  %v12942_v19 = vld [vmem:[#allocation5 + $0x970] ss:$40 sps:$4 sm:$0xff]   ;;  %v12956_v58 = vld [vmem:[#allocation5 + $0x97c] ss:$40 sps:$4 sm:$0xff]  }
 0x2dd   : > { %6590 = vmatpush1.bf16.msra.mxu0 %v12915_v46  ;;  %v12953_v46 = vld [vmem:[#allocation5 + $0x9c4] ss:$40 sps:$4 sm:$0xff]  }
 0x2de   : > { %6591 = vmatprep.subr.bf16.mxu0 %v12926_v39  ;;  %7362 = vmatpush1.bf16.msra.mxu1 %v12939_v51  ;;  %v12954_v39 = vld [vmem:[#allocation5 + $0x978] ss:$40 sps:$4 sm:$0xff]   ;;  %v12959_v51 = vld [vmem:[#allocation5 + $0x9cc] ss:$40 sps:$4 sm:$0xff]  }
 0x2df   : > { %6467 = vmatmul.mubr.bf16.gmra.mrb[88].mxu0 %v13860_v17  ;;  %7363 = vmatprep.subr.bf16.mxu1 %v12947_v1  ;;  %v12957_v1 = vld [vmem:[#allocation5 + $0x9c8] ss:$40 sps:$4 sm:$0xff]  }
 0x2e0   : > { %7239 = vmatmul.mubr.bf16.gmra.mrb[88].mxu1 %v13860_v17  ;;  %6476 = vmatprep.mubr.bf16.mxu0 %v13862_v22 }
 0x2e1   : > { %7248 = vmatprep.mubr.bf16.mxu1 %v13862_v22  ;;  %6592 = vmatpush1.bf16.msra.mxu0 %v12924_v21  ;;  %v12951_v21 = vld [vmem:[#allocation5 + $0x9c0] ss:$40 sps:$4 sm:$0xff]  }
 0x2e2   : > { %6593 = vmatprep.subr.bf16.mxu0 %v12935_v57  ;;  %7364 = vmatpush1.bf16.msra.mxu1 %v12945_v25  ;;  %v12962_v57 = vld [vmem:[#allocation5 + $0xa14] ss:$40 sps:$4 sm:$0xff]  }
 0x2e3   : > { %7365 = vmatprep.subr.bf16.mxu1 %v12950_v20  ;;  %v12989_v25 = vld [vmem:[#allocation5 + $0xa1c] ss:$40 sps:$4 sm:$0xff]  }
 0x2e5   : > { %6594 = vmatpush1.bf16.msra.mxu0 %v12933_v29 }
 0x2e6   : > { %6595 = vmatprep.subr.bf16.mxu0 %v12944_v34  ;;  %7366 = vmatpush1.bf16.msra.mxu1 %v12948_v18 }
 0x2e7   : > { %6477 = vmatmul.mubr.bf16.gmra.mrb[92].mxu0 %v13870_v33  ;;  %7367 = vmatprep.subr.bf16.mxu1 %v12956_v58 }
 0x2e8   : > { %7249 = vmatmul.mubr.bf16.gmra.mrb[92].mxu1 %v13870_v33  ;;  %6486 = vmatprep.mubr.bf16.mxu0 %v13872_v36 }
 0x2e9   : > { %7258 = vmatprep.mubr.bf16.mxu1 %v13872_v36  ;;  %6596 = vmatpush1.bf16.msra.mxu0 %v12942_v19 }
 0x2ea   : > { %6597 = vmatprep.subr.bf16.mxu0 %v12953_v46  ;;  %7368 = vmatpush1.bf16.msra.mxu1 %v12954_v39 }
 0x2eb   : > { %7369 = vmatprep.subr.bf16.mxu1 %v12959_v51 }
 0x2ed   : > { %6598 = vmatpush1.bf16.msra.mxu0 %v12951_v21 }
 0x2ee   : > { %7370 = vmatpush1.bf16.msra.mxu1 %v12957_v1  ;;  %6760 = vmatprep.subr.bf16.mxu0 %v12962_v57 }
 0x2ef   : > { %6487 = vmatmul.mubr.bf16.gmra.mrb[96].mxu0 %v13880_v47  ;;  %7532 = vmatprep.subr.bf16.mxu1 %v12989_v25 }
 0x2f0   : > { %7259 = vmatmul.mubr.bf16.gmra.mrb[96].mxu1 %v13880_v47  ;;  %6496 = vmatprep.mubr.bf16.mxu0 %v13882_v48 }
 0x2f1   : > { %7268 = vmatprep.mubr.bf16.mxu1 %v13882_v48 }
 0x2f7   : > { %6497 = vmatmul.mubr.bf16.gmra.mrb[100].mxu0 %v13890_v53 }
 0x2f8   : > { %7269 = vmatmul.mubr.bf16.gmra.mrb[100].mxu1 %v13890_v53  ;;  %6506 = vmatprep.mubr.bf16.mxu0 %v13892_v54 }
 0x2f9   : > { %7278 = vmatprep.mubr.bf16.mxu1 %v13892_v54 }
 0x2ff   : > { %6507 = vmatmul.mubr.bf16.gmra.mrb[104].mxu0 %v13900_v59 }
 0x300   : > { %7279 = vmatmul.mubr.bf16.gmra.mrb[104].mxu1 %v13900_v59  ;;  %6516 = vmatprep.mubr.bf16.mxu0 %v13902_v60 }
 0x301   : > { %7288 = vmatprep.mubr.bf16.mxu1 %v13902_v60 }
 0x302   : > { %v14478_v20 = vpop.f32.mrb[0].mxu0 }
 0x303   : > { %v14480_v29 = vpop.f32.mrb[0].mxu1  ;;  %v14482_v34 = vpop.f32.mrb[1].mxu0 }
 0x304   : > { %v14484_v18 = vpop.f32.mrb[1].mxu1  ;;  %v14486_v19 = vpop.f32.mrb[2].mxu0 }
 0x305   : > { %16648 = vst [vmem:[#allocation107_spill] sm:$0xff] %v14484_v18  ;;  %v14488_v58 = vpop.f32.mrb[2].mxu1  ;;  %v14490_v46 = vpop.f32.mrb[3].mxu0 }
 0x306   : > { %16649 = vst [vmem:[#allocation108_spill] sm:$0xff] %v14490_v46  ;;  %v14492_v39 = vpop.f32.mrb[3].mxu1 }
 0x307   : > { %16650 = vst [vmem:[#allocation109_spill] sm:$0xff] %v14492_v39  ;;  %6517 = vmatmul.mubr.bf16.gmra.mrb[108].mxu0 %v13910_v63 }
 0x308   : > { %7289 = vmatmul.mubr.bf16.gmra.mrb[108].mxu1 %v13910_v63  ;;  %6526 = vmatprep.mubr.bf16.mxu0 %v13912_v0 }
 0x309   : > { %7298 = vmatprep.mubr.bf16.mxu1 %v13912_v0 }
 0x30a   : > { %v14498_v51 = vpop.f32.mrb[4].mxu0 }
 0x30b   : > { %16651 = vst [vmem:[#allocation110_spill] sm:$0xff] %v14498_v51  ;;  %v14500_v21 = vpop.f32.mrb[4].mxu1  ;;  %v14502_v1 = vpop.f32.mrb[5].mxu0 }
 0x30c   : > { %16652 = vst [vmem:[#allocation111_spill] sm:$0xff] %v14500_v21  ;;  %16653 = vst [vmem:[#allocation112_spill] sm:$0xff] %v14502_v1  ;;  %v14504_v57 = vpop.f32.mrb[5].mxu1  ;;  %v14506_v25 = vpop.f32.mrb[6].mxu0 }
 0x30d   : > { %16654 = vst [vmem:[#allocation113_spill] sm:$0xff] %v14504_v57  ;;  %16655 = vst [vmem:[#allocation114_spill] sm:$0xff] %v14506_v25  ;;  %v14508_v18 = vpop.f32.mrb[6].mxu1  ;;  %v14510_v39 = vpop.f32.mrb[7].mxu0 }
 0x30e   : > { %16656 = vst [vmem:[#allocation115_spill] sm:$0xff] %v14508_v18  ;;  %16657 = vst [vmem:[#allocation116_spill] sm:$0xff] %v14510_v39  ;;  %v14512_v46 = vpop.f32.mrb[7].mxu1 }
 0x30f   : > { %16658 = vst [vmem:[#allocation117_spill] sm:$0xff] %v14512_v46  ;;  %6527 = vmatmul.mubr.bf16.gmra.mrb[112].mxu0 %v13920_v5 }
 0x310   : > { %7299 = vmatmul.mubr.bf16.gmra.mrb[112].mxu1 %v13920_v5  ;;  %6536 = vmatprep.mubr.bf16.mxu0 %v13922_v6 }
 0x311   : > { %7308 = vmatprep.mubr.bf16.mxu1 %v13922_v6 }
 0x312   : > { %v14518_v21 = vpop.f32.mrb[8].mxu0 }
 0x313   : > { %16659 = vst [vmem:[#allocation118_spill] sm:$0xff] %v14518_v21  ;;  %v14520_v1 = vpop.f32.mrb[8].mxu1  ;;  %v14522_v57 = vpop.f32.mrb[9].mxu0 }
 0x314   : > { %16660 = vst [vmem:[#allocation119_spill] sm:$0xff] %v14520_v1  ;;  %16661 = vst [vmem:[#allocation120_spill] sm:$0xff] %v14522_v57  ;;  %v14524_v25 = vpop.f32.mrb[9].mxu1  ;;  %v14526_v18 = vpop.f32.mrb[10].mxu0 }
 0x315   : > { %16662 = vst [vmem:[#allocation121_spill] sm:$0xff] %v14524_v25  ;;  %16663 = vst [vmem:[#allocation122_spill] sm:$0xff] %v14526_v18  ;;  %v14528_v39 = vpop.f32.mrb[10].mxu1  ;;  %v14530_v46 = vpop.f32.mrb[11].mxu0 }
 0x316   : > { %16664 = vst [vmem:[#allocation123_spill] sm:$0xff] %v14528_v39  ;;  %16665 = vst [vmem:[#allocation124_spill] sm:$0xff] %v14530_v46  ;;  %v14532_v51 = vpop.f32.mrb[11].mxu1 }
 0x317   : > { %16666 = vst [vmem:[#allocation125_spill] sm:$0xff] %v14532_v51  ;;  %6537 = vmatmul.mubr.bf16.gmra.mrb[116].mxu0 %v13930_v11 }
 0x318   : > { %7309 = vmatmul.mubr.bf16.gmra.mrb[116].mxu1 %v13930_v11  ;;  %6546 = vmatprep.mubr.bf16.mxu0 %v13932_v12 }
 0x319   : > { %7318 = vmatprep.mubr.bf16.mxu1 %v13932_v12 }
 0x31a   : > { %v14538_v1 = vpop.f32.mrb[12].mxu0 }
 0x31b   : > { %16667 = vst [vmem:[#allocation126_spill] sm:$0xff] %v14538_v1  ;;  %v14540_v57 = vpop.f32.mrb[12].mxu1  ;;  %v14542_v25 = vpop.f32.mrb[13].mxu0 }
 0x31c   : > { %16668 = vst [vmem:[#allocation127_spill] sm:$0xff] %v14540_v57  ;;  %16669 = vst [vmem:[#allocation128_spill] sm:$0xff] %v14542_v25  ;;  %v14544_v18 = vpop.f32.mrb[13].mxu1  ;;  %v14546_v39 = vpop.f32.mrb[14].mxu0 }
 0x31d   : > { %16670 = vst [vmem:[#allocation129_spill] sm:$0xff] %v14544_v18  ;;  %16671 = vst [vmem:[#allocation130_spill] sm:$0xff] %v14546_v39  ;;  %v14548_v46 = vpop.f32.mrb[14].mxu1  ;;  %v14550_v51 = vpop.f32.mrb[15].mxu0 }
 0x31e   : > { %16672 = vst [vmem:[#allocation131_spill] sm:$0xff] %v14548_v46  ;;  %16673 = vst [vmem:[#allocation132_spill] sm:$0xff] %v14550_v51  ;;  %v14552_v21 = vpop.f32.mrb[15].mxu1 }
 0x31f   : > { %16674 = vst [vmem:[#allocation133_spill] sm:$0xff] %v14552_v21  ;;  %6547 = vmatmul.mubr.bf16.gmra.mrb[120].mxu0 %v13940_v15 }
 0x320   : > { %7319 = vmatmul.mubr.bf16.gmra.mrb[120].mxu1 %v13940_v15  ;;  %6556 = vmatprep.mubr.bf16.mxu0 %v13942_v16  ;;  %v12987_v15 = vld [vmem:[#allocation5 + $0xa18] ss:$40 sps:$4 sm:$0xff]  }
 0x321   : > { %7328 = vmatprep.mubr.bf16.mxu1 %v13942_v16  ;;  %v12965_v16 = vld [vmem:[#allocation5 + $0xa64] ss:$40 sps:$4 sm:$0xff]  }
 0x322   : > { %v14558_v57 = vpop.f32.mrb[16].mxu0 }
 0x323   : > { %16675 = vst [vmem:[#allocation134_spill] sm:$0xff] %v14558_v57  ;;  %v14560_v25 = vpop.f32.mrb[16].mxu1  ;;  %v14562_v18 = vpop.f32.mrb[17].mxu0 }
 0x324   : > { %16676 = vst [vmem:[#allocation135_spill] sm:$0xff] %v14560_v25  ;;  %16677 = vst [vmem:[#allocation136_spill] sm:$0xff] %v14562_v18  ;;  %v14564_v39 = vpop.f32.mrb[17].mxu1  ;;  %v14566_v46 = vpop.f32.mrb[18].mxu0 }
 0x325   : > { %16678 = vst [vmem:[#allocation137_spill] sm:$0xff] %v14564_v39  ;;  %16679 = vst [vmem:[#allocation138_spill] sm:$0xff] %v14566_v46  ;;  %v14568_v51 = vpop.f32.mrb[18].mxu1  ;;  %v14570_v21 = vpop.f32.mrb[19].mxu0 }
 0x326   : > { %16680 = vst [vmem:[#allocation139_spill] sm:$0xff] %v14568_v51  ;;  %16681 = vst [vmem:[#allocation140_spill] sm:$0xff] %v14570_v21  ;;  %v14572_v1 = vpop.f32.mrb[19].mxu1 }
 0x327   : > { %16682 = vst [vmem:[#allocation141_spill] sm:$0xff] %v14572_v1  ;;  %6557 = vmatmul.mubr.bf16.gmra.mrb[124].mxu0 %v13950_v23  ;;  %v12960_v1 = vld [vmem:[#allocation5 + $0xa10] ss:$40 sps:$4 sm:$0xff]  }
 0x328   : > { %7329 = vmatmul.mubr.bf16.gmra.mrb[124].mxu1 %v13950_v23  ;;  %6599 = vmatprep.mubr.bf16.mxu0 %v13952_v24 }
 0x329   : > { %7371 = vmatprep.mubr.bf16.mxu1 %v13952_v24 }
 0x32a   : > { %v14578_v25 = vpop.f32.mrb[20].mxu0 }
 0x32b   : > { %16683 = vst [vmem:[#allocation142_spill] sm:$0xff] %v14578_v25  ;;  %v14580_v18 = vpop.f32.mrb[20].mxu1  ;;  %v14582_v39 = vpop.f32.mrb[21].mxu0 }
 0x32c   : > { %16684 = vst [vmem:[#allocation143_spill] sm:$0xff] %v14580_v18  ;;  %16685 = vst [vmem:[#allocation144_spill] sm:$0xff] %v14582_v39  ;;  %v14584_v46 = vpop.f32.mrb[21].mxu1  ;;  %v14586_v51 = vpop.f32.mrb[22].mxu0  ;;  %v12992_v18 = vld [vmem:[#allocation5 + $0xa6c] ss:$40 sps:$4 sm:$0xff]  }
 0x32d   : > { %16686 = vst [vmem:[#allocation145_spill] sm:$0xff] %v14584_v46  ;;  %16687 = vst [vmem:[#allocation146_spill] sm:$0xff] %v14586_v51  ;;  %v14588_v21 = vpop.f32.mrb[22].mxu1  ;;  %v14590_v57 = vpop.f32.mrb[23].mxu0  ;;  %v12963_v46 = vld [vmem:[#allocation5 + $0xa60] ss:$40 sps:$4 sm:$0xff]  }
 0x32e   : > { %16688 = vst [vmem:[#allocation147_spill] sm:$0xff] %v14588_v21  ;;  %16689 = vst [vmem:[#allocation148_spill] sm:$0xff] %v14590_v57  ;;  %v14592_v23 = vpop.f32.mrb[23].mxu1  ;;  %v12968_v21 = vld [vmem:[#allocation5 + $0xab4] ss:$40 sps:$4 sm:$0xff]  }
 0x32f   : > { %16690 = vst [vmem:[#allocation149_spill] sm:$0xff] %v14592_v23  ;;  %6600 = vmatmul.mubr.bf16.vlgmr.msra.gmra.mrb[64].mxu0 %v13960_v28  ;;  %v12990_v23 = vld [vmem:[#allocation5 + $0xa68] ss:$40 sps:$4 sm:$0xff]  }
 0x330   : > { %7372 = vmatmul.mubr.bf16.vlgmr.msra.gmra.mrb[64].mxu1 %v13960_v28  ;;  %6761 = vmatpush1.bf16.msra.mxu0 %v12960_v1 }
 0x331   : > { %6609 = vmatprep.mubr.bf16.mxu0 %v13962_v32  ;;  %7381 = vmatprep.mubr.bf16.mxu1 %v13962_v32  ;;  %v12966_v32 = vld [vmem:[#allocation5 + $0xab0] ss:$40 sps:$4 sm:$0xff]  }
 0x332   : > { %6762 = vmatprep.subr.bf16.mxu0 %v12965_v16  ;;  %v14598_v51 = vpop.f32.mrb[24].mxu0  ;;  %7533 = vmatpush1.bf16.msra.mxu1 %v12987_v15  ;;  %v12996_v15 = vld [vmem:[#allocation5 + $0xab8] ss:$40 sps:$4 sm:$0xff]  }
 0x333   : > { %16691 = vst [vmem:[#allocation150_spill] sm:$0xff] %v14598_v51  ;;  %v14600_v57 = vpop.f32.mrb[24].mxu1  ;;  %v14602_v39 = vpop.f32.mrb[25].mxu0  ;;  %7534 = vmatprep.subr.bf16.mxu1 %v12992_v18  ;;  %v12998_v51 = vld [vmem:[#allocation5 + $0xabc] ss:$40 sps:$4 sm:$0xff]  }
 0x334   : > { %16692 = vst [vmem:[#allocation151_spill] sm:$0xff] %v14600_v57  ;;  %16693 = vst [vmem:[#allocation152_spill] sm:$0xff] %v14602_v39  ;;  %v14604_v25 = vpop.f32.mrb[25].mxu1  ;;  %v14606_v28 = vpop.f32.mrb[26].mxu0  ;;  %6763 = vmatpush1.bf16.msra.mxu0 %v12963_v46  ;;  %v12971_v57 = vld [vmem:[#allocation5 + $0xb04] ss:$40 sps:$4 sm:$0xff]  }
 0x335   : > { %16694 = vst [vmem:[#allocation153_spill] sm:$0xff] %v14604_v25  ;;  %16695 = vst [vmem:[#allocation154_spill] sm:$0xff] %v14606_v28  ;;  %v14608_v1 = vpop.f32.mrb[26].mxu1  ;;  %v14610_v24 = vpop.f32.mrb[27].mxu0  ;;  %6764 = vmatprep.subr.bf16.mxu0 %v12968_v21  ;;  %v13001_v18 = vld [vmem:[#allocation5 + $0xb0c] ss:$40 sps:$4 sm:$0xff]  }
 0x336   : > { %16696 = vst [vmem:[#allocation155_spill] sm:$0xff] %v14608_v1  ;;  %16697 = vst [vmem:[#allocation156_spill] sm:$0xff] %v14610_v24  ;;  %v14612_v16 = vpop.f32.mrb[27].mxu1  ;;  %7535 = vmatpush1.bf16.msra.mxu1 %v12990_v23  ;;  %v12969_v46 = vld [vmem:[#allocation5 + $0xb00] ss:$40 sps:$4 sm:$0xff]  }
 0x337   : > { %16698 = vst [vmem:[#allocation157_spill] sm:$0xff] %v14612_v16  ;;  %6610 = vmatmul.mubr.bf16.gmra.mrb[68].mxu0 %v13970_v44  ;;  %7536 = vmatprep.subr.bf16.mxu1 %v12998_v51  ;;  %v12974_v21 = vld [vmem:[#allocation5 + $0xb54] ss:$40 sps:$4 sm:$0xff]   ;;  %v12999_v23 = vld [vmem:[#allocation5 + $0xb08] ss:$40 sps:$4 sm:$0xff]  }
 0x338   : > { %7382 = vmatmul.mubr.bf16.gmra.mrb[68].mxu1 %v13970_v44  ;;  %6619 = vmatprep.mubr.bf16.mxu0 %v13972_v49  ;;  %v13259_v39 = vld [vmem:[#allocation5 + $0x614] ss:$40 sps:$4 sm:$0xff]  }
 0x339   : > { %7391 = vmatprep.mubr.bf16.mxu1 %v13972_v49  ;;  %6765 = vmatpush1.bf16.msra.mxu0 %v12966_v32  ;;  %v13282_v49 = vld [vmem:[#allocation7 + $0x50] sm:$0xff]  }
 0x33a   : > { %v14618_v25 = vpop.f32.mrb[28].mxu0  ;;  %6766 = vmatprep.subr.bf16.mxu0 %v12971_v57  ;;  %7537 = vmatpush1.bf16.msra.mxu1 %v12996_v15  ;;  %v12977_v57 = vld [vmem:[#allocation5 + $0xba4] ss:$40 sps:$4 sm:$0xff]   ;;  %v13005_v15 = vld [vmem:[#allocation5 + $0xb58] ss:$40 sps:$4 sm:$0xff]  }
 0x33b   : > { %16699 = vst [vmem:[#allocation158_spill] sm:$0xff] %v14618_v25  ;;  %v14620_v16 = vpop.f32.mrb[28].mxu1  ;;  %v14622_v24 = vpop.f32.mrb[29].mxu0  ;;  %7538 = vmatprep.subr.bf16.mxu1 %v13001_v18  ;;  %v12972_v25 = vld [vmem:[#allocation5 + $0xb50] ss:$40 sps:$4 sm:$0xff]  }
 0x33c   : > { %16700 = vst [vmem:[#allocation159_spill] sm:$0xff] %v14620_v16  ;;  %16701 = vst [vmem:[#allocation160_spill] sm:$0xff] %v14622_v24  ;;  %v14624_v1 = vpop.f32.mrb[29].mxu1  ;;  %v14626_v44 = vpop.f32.mrb[30].mxu0  ;;  %v13007_v16 = vld [vmem:[#allocation5 + $0xb5c] ss:$40 sps:$4 sm:$0xff]  }
 0x33d   : > { %16702 = vst [vmem:[#allocation161_spill] sm:$0xff] %v14624_v1  ;;  %16703 = vst [vmem:[#allocation162_spill] sm:$0xff] %v14626_v44  ;;  %v14628_v28 = vpop.f32.mrb[30].mxu1  ;;  %v14630_v32 = vpop.f32.mrb[31].mxu0  ;;  %6767 = vmatpush1.bf16.msra.mxu0 %v12969_v46  ;;  %v13010_v18 = vld [vmem:[#allocation5 + $0xbac] ss:$40 sps:$4 sm:$0xff]  }
 0x33e   : > { %16704 = vst [vmem:[#allocation163_spill] sm:$0xff] %v14628_v28  ;;  %16705 = vst [vmem:[#allocation164_spill] sm:$0xff] %v14630_v32  ;;  %v14632_v51 = vpop.f32.mrb[31].mxu1  ;;  %6768 = vmatprep.subr.bf16.mxu0 %v12974_v21  ;;  %7539 = vmatpush1.bf16.msra.mxu1 %v12999_v23  ;;  %v12975_v1 = vld [vmem:[#allocation5 + $0xba0] ss:$40 sps:$4 sm:$0xff]  }
 0x33f   : > { %16706 = vst [vmem:[#allocation165_spill] sm:$0xff] %v14632_v51  ;;  %6620 = vmatmul.mubr.bf16.gmra.mrb[72].mxu0 %v13980_v8  ;;  %7540 = vmatprep.subr.bf16.mxu1 %v13007_v16  ;;  %v12980_v21 = vld [vmem:[#allocation5 + $0xbf4] ss:$40 sps:$4 sm:$0xff]   ;;  %v13008_v23 = vld [vmem:[#allocation5 + $0xba8] ss:$40 sps:$4 sm:$0xff]  }
 0x340   : > { %7392 = vmatmul.mubr.bf16.gmra.mrb[72].mxu1 %v13980_v8  ;;  %6629 = vmatprep.mubr.bf16.mxu0 %v13982_v14  ;;  %v13256_v24 = vld [vmem:[#allocation5 + $0x5c4] ss:$40 sps:$4 sm:$0xff]  }
 0x341   : > { %7401 = vmatprep.mubr.bf16.mxu1 %v13982_v14  ;;  %6769 = vmatpush1.bf16.msra.mxu0 %v12972_v25  ;;  %v13251_v14 = vld [vmem:[#allocation5 + $0x570] ss:$40 sps:$4 sm:$0xff]  }
 0x342   : > { %v14638_v51 = vpop.f32.mrb[32].mxu0  ;;  %6770 = vmatprep.subr.bf16.mxu0 %v12977_v57  ;;  %7541 = vmatpush1.bf16.msra.mxu1 %v13005_v15  ;;  %v12983_v57 = vld [vmem:[#allocation5 + $0xc44] ss:$40 sps:$4 sm:$0xff]   ;;  %v13014_v15 = vld [vmem:[#allocation5 + $0xbf8] ss:$40 sps:$4 sm:$0xff]  }
 0x343   : > { %16707 = vst [vmem:[#allocation166_spill] sm:$0xff] %v14638_v51  ;;  %v14640_v46 = vpop.f32.mrb[32].mxu1  ;;  %v14642_v32 = vpop.f32.mrb[33].mxu0  ;;  %7542 = vmatprep.subr.bf16.mxu1 %v13010_v18  ;;  %v12978_v51 = vld [vmem:[#allocation5 + $0xbf0] ss:$40 sps:$4 sm:$0xff]  }
 0x344   : > { %16708 = vst [vmem:[#allocation167_spill] sm:$0xff] %v14640_v46  ;;  %16709 = vst [vmem:[#allocation168_spill] sm:$0xff] %v14642_v32  ;;  %v14644_v28 = vpop.f32.mrb[33].mxu1  ;;  %v14646_v8 = vpop.f32.mrb[34].mxu0  ;;  %v13016_v46 = vld [vmem:[#allocation5 + $0xbfc] ss:$40 sps:$4 sm:$0xff]  }
 0x345   : > { %16710 = vst [vmem:[#allocation169_spill] sm:$0xff] %v14644_v28  ;;  %16711 = vst [vmem:[#allocation170_spill] sm:$0xff] %v14646_v8  ;;  %v14648_v44 = vpop.f32.mrb[34].mxu1  ;;  %v14650_v25 = vpop.f32.mrb[35].mxu0  ;;  %6771 = vmatpush1.bf16.msra.mxu0 %v12975_v1  ;;  %v13019_v18 = vld [vmem:[#allocation5 + $0xc4c] ss:$40 sps:$4 sm:$0xff]  }
 0x346   : > { %16712 = vst [vmem:[#allocation171_spill] sm:$0xff] %v14648_v44  ;;  %16713 = vst [vmem:[#allocation172_spill] sm:$0xff] %v14650_v25  ;;  %v14652_v16 = vpop.f32.mrb[35].mxu1  ;;  %6772 = vmatprep.subr.bf16.mxu0 %v12980_v21  ;;  %7543 = vmatpush1.bf16.msra.mxu1 %v13008_v23  ;;  %v12981_v28 = vld [vmem:[#allocation5 + $0xc40] ss:$40 sps:$4 sm:$0xff]  }
 0x347   : > { %16714 = vst [vmem:[#allocation173_spill] sm:$0xff] %v14652_v16  ;;  %6630 = vmatmul.mubr.bf16.gmra.mrb[76].mxu0 %v13990_v37  ;;  %7544 = vmatprep.subr.bf16.mxu1 %v13016_v46  ;;  %v12986_v21 = vld [vmem:[#allocation5 + $0xc94] ss:$40 sps:$4 sm:$0xff]   ;;  %v13017_v23 = vld [vmem:[#allocation5 + $0xc48] ss:$40 sps:$4 sm:$0xff]  }
 0x348   : > { %7402 = vmatmul.mubr.bf16.gmra.mrb[76].mxu1 %v13990_v37  ;;  %6639 = vmatprep.mubr.bf16.mxu0 %v13992_v40  ;;  %v13277_v32 = vld [vmem:[#allocation7 + $0x48] sm:$0xff]  }
 0x349   : > { %7411 = vmatprep.mubr.bf16.mxu1 %v13992_v40  ;;  %6773 = vmatpush1.bf16.msra.mxu0 %v12978_v51  ;;  %v13276_v40 = vld [vmem:[#allocation7] sm:$0xff]  }
 0x34a   : > { %v14658_v16 = vpop.f32.mrb[36].mxu0  ;;  %6774 = vmatprep.subr.bf16.mxu0 %v12983_v57  ;;  %7545 = vmatpush1.bf16.msra.mxu1 %v13014_v15  ;;  %v12995_v57 = vld [vmem:[#allocation5 + $0xce4] ss:$40 sps:$4 sm:$0xff]   ;;  %v13023_v15 = vld [vmem:[#allocation5 + $0xc98] ss:$40 sps:$4 sm:$0xff]  }
 0x34b   : > { %16715 = vst [vmem:[#allocation174_spill] sm:$0xff] %v14658_v16  ;;  %v14660_v1 = vpop.f32.mrb[36].mxu1  ;;  %v14662_v25 = vpop.f32.mrb[37].mxu0  ;;  %7546 = vmatprep.subr.bf16.mxu1 %v13019_v18  ;;  %v12984_v16 = vld [vmem:[#allocation5 + $0xc90] ss:$40 sps:$4 sm:$0xff]  }
 0x34c   : > { %16716 = vst [vmem:[#allocation175_spill] sm:$0xff] %v14660_v1  ;;  %16717 = vst [vmem:[#allocation176_spill] sm:$0xff] %v14662_v25  ;;  %v14664_v44 = vpop.f32.mrb[37].mxu1  ;;  %v14666_v37 = vpop.f32.mrb[38].mxu0  ;;  %v13025_v1 = vld [vmem:[#allocation5 + $0xc9c] ss:$40 sps:$4 sm:$0xff]  }
 0x34d   : > { %16718 = vst [vmem:[#allocation177_spill] sm:$0xff] %v14664_v44  ;;  %16719 = vst [vmem:[#allocation178_spill] sm:$0xff] %v14666_v37  ;;  %v14668_v8 = vpop.f32.mrb[38].mxu1  ;;  %v14670_v51 = vpop.f32.mrb[39].mxu0  ;;  %6775 = vmatpush1.bf16.msra.mxu0 %v12981_v28  ;;  %v13028_v18 = vld [vmem:[#allocation5 + $0xcec] ss:$40 sps:$4 sm:$0xff]  }
 0x34e   : > { %16720 = vst [vmem:[#allocation179_spill] sm:$0xff] %v14668_v8  ;;  %16721 = vst [vmem:[#allocation180_spill] sm:$0xff] %v14670_v51  ;;  %v14672_v46 = vpop.f32.mrb[39].mxu1  ;;  %6776 = vmatprep.subr.bf16.mxu0 %v12986_v21  ;;  %7547 = vmatpush1.bf16.msra.mxu1 %v13017_v23  ;;  %v12993_v44 = vld [vmem:[#allocation5 + $0xce0] ss:$40 sps:$4 sm:$0xff]  }
 0x34f   : > { %16722 = vst [vmem:[#allocation181_spill] sm:$0xff] %v14672_v46  ;;  %6640 = vmatmul.mubr.bf16.gmra.mrb[80].mxu0 %v14000_v62  ;;  %7548 = vmatprep.subr.bf16.mxu1 %v13025_v1  ;;  %v13004_v21 = vld [vmem:[#allocation5 + $0xd34] ss:$40 sps:$4 sm:$0xff]   ;;  %v13026_v23 = vld [vmem:[#allocation5 + $0xce8] ss:$40 sps:$4 sm:$0xff]  }
 0x350   : > { %7412 = vmatmul.mubr.bf16.gmra.mrb[80].mxu1 %v14000_v62  ;;  %6649 = vmatprep.mubr.bf16.mxu0 %v14002_v10  ;;  %v13247_v25 = vld [vmem:[#allocation5 + $0x13d4] ss:$40 sps:$4 sm:$0xff]  }
 0x351   : > { %7421 = vmatprep.mubr.bf16.mxu1 %v14002_v10  ;;  %6777 = vmatpush1.bf16.msra.mxu0 %v12984_v16  ;;  %v13238_v10 = vld [vmem:[#allocation5 + $0x1334] ss:$40 sps:$4 sm:$0xff]  }
 0x352   : > { %v14678_v46 = vpop.f32.mrb[40].mxu0  ;;  %6778 = vmatprep.subr.bf16.mxu0 %v12995_v57  ;;  %7549 = vmatpush1.bf16.msra.mxu1 %v13023_v15  ;;  %v13013_v57 = vld [vmem:[#allocation5 + $0xd84] ss:$40 sps:$4 sm:$0xff]   ;;  %v13032_v15 = vld [vmem:[#allocation5 + $0xd38] ss:$40 sps:$4 sm:$0xff]  }
 0x353   : > { %16723 = vst [vmem:[#allocation182_spill] sm:$0xff] %v14678_v46  ;;  %v14680_v28 = vpop.f32.mrb[40].mxu1  ;;  %v14682_v51 = vpop.f32.mrb[41].mxu0  ;;  %7550 = vmatprep.subr.bf16.mxu1 %v13028_v18  ;;  %v13002_v46 = vld [vmem:[#allocation5 + $0xd30] ss:$40 sps:$4 sm:$0xff]  }
 0x354   : > { %16724 = vst [vmem:[#allocation183_spill] sm:$0xff] %v14680_v28  ;;  %16725 = vst [vmem:[#allocation184_spill] sm:$0xff] %v14682_v51  ;;  %v14684_v8 = vpop.f32.mrb[41].mxu1  ;;  %v14686_v62 = vpop.f32.mrb[42].mxu0  ;;  %v13034_v28 = vld [vmem:[#allocation5 + $0xd3c] ss:$40 sps:$4 sm:$0xff]  }
 0x355   : > { %16726 = vst [vmem:[#allocation185_spill] sm:$0xff] %v14684_v8  ;;  %16727 = vst [vmem:[#allocation186_spill] sm:$0xff] %v14686_v62  ;;  %v14688_v37 = vpop.f32.mrb[42].mxu1  ;;  %v14690_v16 = vpop.f32.mrb[43].mxu0  ;;  %6779 = vmatpush1.bf16.msra.mxu0 %v12993_v44  ;;  %v13037_v18 = vld [vmem:[#allocation5 + $0xd8c] ss:$40 sps:$4 sm:$0xff]  }
 0x356   : > { %16728 = vst [vmem:[#allocation187_spill] sm:$0xff] %v14688_v37  ;;  %16729 = vst [vmem:[#allocation188_spill] sm:$0xff] %v14690_v16  ;;  %v14692_v1 = vpop.f32.mrb[43].mxu1  ;;  %6780 = vmatprep.subr.bf16.mxu0 %v13004_v21  ;;  %7551 = vmatpush1.bf16.msra.mxu1 %v13026_v23  ;;  %v13011_v8 = vld [vmem:[#allocation5 + $0xd80] ss:$40 sps:$4 sm:$0xff]   ;;  %v16833_v51 = vld [vmem:[#allocation95_spill] sm:$0xff] }
 0x357   : > { %16730 = vst [vmem:[#allocation189_spill] sm:$0xff] %v14692_v1  ;;  %6650 = vmatmul.mubr.bf16.gmra.mrb[84].mxu0 %v14010_v35  ;;  %7552 = vmatprep.subr.bf16.mxu1 %v13034_v28  ;;  %v13022_v21 = vld [vmem:[#allocation5 + $0xdd4] ss:$40 sps:$4 sm:$0xff]   ;;  %v13035_v23 = vld [vmem:[#allocation5 + $0xd88] ss:$40 sps:$4 sm:$0xff]  }
 0x358   : > { %7422 = vmatmul.mubr.bf16.gmra.mrb[84].mxu1 %v14010_v35  ;;  %6659 = vmatprep.mubr.bf16.mxu0 %v14012_v41 }
 0x359   : > { %7431 = vmatprep.mubr.bf16.mxu1 %v14012_v41  ;;  %6781 = vmatpush1.bf16.msra.mxu0 %v13002_v46  ;;  %v16739_v41 = vld [vmem:[#allocation31_spill] sm:$0xff] }
 0x35a   : > { %v14698_v1 = vpop.f32.mrb[44].mxu0  ;;  %6782 = vmatprep.subr.bf16.mxu0 %v13013_v57  ;;  %7553 = vmatpush1.bf16.msra.mxu1 %v13032_v15  ;;  %v13031_v57 = vld [vmem:[#allocation5 + $0xe24] ss:$40 sps:$4 sm:$0xff]   ;;  %v13041_v15 = vld [vmem:[#allocation5 + $0xdd8] ss:$40 sps:$4 sm:$0xff]  }
 0x35b   : > { %16731 = vst [vmem:[#allocation190_spill] sm:$0xff] %v14698_v1  ;;  %v14700_v44 = vpop.f32.mrb[44].mxu1  ;;  %v14702_v16 = vpop.f32.mrb[45].mxu0  ;;  %7554 = vmatprep.subr.bf16.mxu1 %v13037_v18  ;;  %v13020_v1 = vld [vmem:[#allocation5 + $0xdd0] ss:$40 sps:$4 sm:$0xff]  }
 0x35c   : > { %16732 = vst [vmem:[#allocation191_spill] sm:$0xff] %v14700_v44  ;;  %16733 = vst [vmem:[#allocation192_spill] sm:$0xff] %v14702_v16  ;;  %v14704_v37 = vpop.f32.mrb[45].mxu1  ;;  %v14706_v35 = vpop.f32.mrb[46].mxu0  ;;  %v13043_v44 = vld [vmem:[#allocation5 + $0xddc] ss:$40 sps:$4 sm:$0xff]  }
 0x35d   : > { %16734 = vst [vmem:[#allocation193_spill] sm:$0xff] %v14704_v37  ;;  %16735 = vst [vmem:[#allocation194_spill] sm:$0xff] %v14706_v35  ;;  %v14708_v62 = vpop.f32.mrb[46].mxu1  ;;  %v14710_v46 = vpop.f32.mrb[47].mxu0  ;;  %6783 = vmatpush1.bf16.msra.mxu0 %v13011_v8  ;;  %v13046_v18 = vld [vmem:[#allocation5 + $0xe2c] ss:$40 sps:$4 sm:$0xff]  }
 0x35e   : > { %16736 = vst [vmem:[#allocation195_spill] sm:$0xff] %v14708_v62  ;;  %16737 = vst [vmem:[#allocation196_spill] sm:$0xff] %v14710_v46  ;;  %v14712_v28 = vpop.f32.mrb[47].mxu1  ;;  %6784 = vmatprep.subr.bf16.mxu0 %v13022_v21  ;;  %7555 = vmatpush1.bf16.msra.mxu1 %v13035_v23  ;;  %v16740_v37 = vld [vmem:[#allocation32_spill] sm:$0xff]  ;;  %v13040_v21 = vld [vmem:[#allocation5 + $0xe74] ss:$40 sps:$4 sm:$0xff]  }
 0x35f   : > { %16738 = vst [vmem:[#allocation197_spill] sm:$0xff] %v14712_v28  ;;  %6660 = vmatmul.mubr.bf16.gmra.mrb[88].mxu0 %v16739_v41  ;;  %v13029_v46 = vld [vmem:[#allocation5 + $0xe20] ss:$40 sps:$4 sm:$0xff]   ;;  %7556 = vmatprep.subr.bf16.mxu1 %v13043_v44 }
 0x360   : > { %7432 = vmatmul.mubr.bf16.gmra.mrb[88].mxu1 %v16739_v41  ;;  %6669 = vmatprep.mubr.bf16.mxu0 %v16740_v37  ;;  %v13044_v23 = vld [vmem:[#allocation5 + $0xe28] ss:$40 sps:$4 sm:$0xff]  }
 0x361   : > { %7441 = vmatprep.mubr.bf16.mxu1 %v16740_v37  ;;  %6785 = vmatpush1.bf16.msra.mxu0 %v13020_v1  ;;  %v16749_v37 = vld [vmem:[#allocation33_spill] sm:$0xff] }
 0x362   : > { %v14718_v28 = vpop.f32.mrb[48].mxu0  ;;  %6786 = vmatprep.subr.bf16.mxu0 %v13031_v57  ;;  %7557 = vmatpush1.bf16.msra.mxu1 %v13041_v15  ;;  %v13049_v57 = vld [vmem:[#allocation5 + $0xec4] ss:$40 sps:$4 sm:$0xff]   ;;  %v13050_v15 = vld [vmem:[#allocation5 + $0xe78] ss:$40 sps:$4 sm:$0xff]  }
 0x363   : > { %16741 = vst [vmem:[#allocation198_spill] sm:$0xff] %v14718_v28  ;;  %v14720_v8 = vpop.f32.mrb[48].mxu1  ;;  %v14722_v62 = vpop.f32.mrb[49].mxu0  ;;  %7558 = vmatprep.subr.bf16.mxu1 %v13046_v18  ;;  %v13038_v28 = vld [vmem:[#allocation5 + $0xe70] ss:$40 sps:$4 sm:$0xff]  }
 0x364   : > { %16742 = vst [vmem:[#allocation199_spill] sm:$0xff] %v14720_v8  ;;  %16743 = vst [vmem:[#allocation200_spill] sm:$0xff] %v14722_v62  ;;  %v14724_v35 = vpop.f32.mrb[49].mxu1  ;;  %v14726_v41 = vpop.f32.mrb[50].mxu0  ;;  %v13052_v8 = vld [vmem:[#allocation5 + $0xe7c] ss:$40 sps:$4 sm:$0xff]  }
 0x365   : > { %16744 = vst [vmem:[#allocation201_spill] sm:$0xff] %v14724_v35  ;;  %16745 = vst [vmem:[#allocation202_spill] sm:$0xff] %v14726_v41  ;;  %v14728_v16 = vpop.f32.mrb[50].mxu1  ;;  %v14730_v1 = vpop.f32.mrb[51].mxu0  ;;  %6787 = vmatpush1.bf16.msra.mxu0 %v13029_v46  ;;  %v13055_v18 = vld [vmem:[#allocation5 + $0xecc] ss:$40 sps:$4 sm:$0xff]  }
 0x366   : > { %16746 = vst [vmem:[#allocation203_spill] sm:$0xff] %v14728_v16  ;;  %16747 = vst [vmem:[#allocation204_spill] sm:$0xff] %v14730_v1  ;;  %v14732_v44 = vpop.f32.mrb[51].mxu1  ;;  %6788 = vmatprep.subr.bf16.mxu0 %v13040_v21  ;;  %7559 = vmatpush1.bf16.msra.mxu1 %v13044_v23  ;;  %v16750_v35 = vld [vmem:[#allocation34_spill] sm:$0xff]  ;;  %v13047_v1 = vld [vmem:[#allocation5 + $0xec0] ss:$40 sps:$4 sm:$0xff]  }
 0x367   : > { %16748 = vst [vmem:[#allocation205_spill] sm:$0xff] %v14732_v44  ;;  %6670 = vmatmul.mubr.bf16.gmra.mrb[92].mxu0 %v16749_v37  ;;  %7560 = vmatprep.subr.bf16.mxu1 %v13052_v8  ;;  %v13053_v21 = vld [vmem:[#allocation5 + $0xec8] ss:$40 sps:$4 sm:$0xff]   ;;  %v13058_v23 = vld [vmem:[#allocation5 + $0xf14] ss:$40 sps:$4 sm:$0xff]  }
 0x368   : > { %7442 = vmatmul.mubr.bf16.gmra.mrb[92].mxu1 %v16749_v37  ;;  %6679 = vmatprep.mubr.bf16.mxu0 %v16750_v35 }
 0x369   : > { %7451 = vmatprep.mubr.bf16.mxu1 %v16750_v35  ;;  %6789 = vmatpush1.bf16.msra.mxu0 %v13038_v28  ;;  %v13229_v35 = vld [vmem:[#allocation5 + $0x1294] ss:$40 sps:$4 sm:$0xff]  }
 0x36a   : > { %v14738_v44 = vpop.f32.mrb[52].mxu0  ;;  %6790 = vmatprep.subr.bf16.mxu0 %v13049_v57  ;;  %7561 = vmatpush1.bf16.msra.mxu1 %v13050_v15  ;;  %v16759_v57 = vld [vmem:[#allocation35_spill] sm:$0xff]  ;;  %v16760_v15 = vld [vmem:[#allocation36_spill] sm:$0xff] }
 0x36b   : > { %16751 = vst [vmem:[#allocation206_spill] sm:$0xff] %v14738_v44  ;;  %v14740_v46 = vpop.f32.mrb[52].mxu1  ;;  %v14742_v16 = vpop.f32.mrb[53].mxu0  ;;  %7562 = vmatprep.subr.bf16.mxu1 %v13055_v18  ;;  %v13085_v44 = vld [vmem:[#allocation5 + $0xf1c] ss:$40 sps:$4 sm:$0xff]  }
 0x36c   : > { %16752 = vst [vmem:[#allocation207_spill] sm:$0xff] %v14740_v46  ;;  %16753 = vst [vmem:[#allocation208_spill] sm:$0xff] %v14742_v16  ;;  %v14744_v41 = vpop.f32.mrb[53].mxu1  ;;  %v14746_v37 = vpop.f32.mrb[54].mxu0  ;;  %v13092_v46 = vld [vmem:[#allocation5 + $0xfb8] ss:$40 sps:$4 sm:$0xff]  }
 0x36d   : > { %16754 = vst [vmem:[#allocation209_spill] sm:$0xff] %v14744_v41  ;;  %16755 = vst [vmem:[#allocation210_spill] sm:$0xff] %v14746_v37  ;;  %v14748_v62 = vpop.f32.mrb[54].mxu1  ;;  %v14750_v28 = vpop.f32.mrb[55].mxu0  ;;  %6791 = vmatpush1.bf16.msra.mxu0 %v13047_v1  ;;  %v13067_v37 = vld [vmem:[#allocation5 + $0x1004] ss:$40 sps:$4 sm:$0xff]  }
 0x36e   : > { %16756 = vst [vmem:[#allocation211_spill] sm:$0xff] %v14748_v62  ;;  %16757 = vst [vmem:[#allocation212_spill] sm:$0xff] %v14750_v28  ;;  %v14752_v8 = vpop.f32.mrb[55].mxu1  ;;  %7563 = vmatpush1.bf16.msra.mxu1 %v13053_v21  ;;  %6953 = vmatprep.subr.bf16.mxu0 %v13058_v23  ;;  %v16769_v62 = vld [vmem:[#allocation37_spill] sm:$0xff]  ;;  %v16794_v16 = vld [vmem:[#allocation54_spill] sm:$0xff] }
 0x36f   : > { %16758 = vst [vmem:[#allocation213_spill] sm:$0xff] %v14752_v8  ;;  %6680 = vmatmul.mubr.bf16.gmra.mrb[96].mxu0 %v16759_v57  ;;  %7725 = vmatprep.subr.bf16.mxu1 %v13085_v44  ;;  %v16770_v44 = vld [vmem:[#allocation38_spill] sm:$0xff] }
 0x370   : > { %7452 = vmatmul.mubr.bf16.gmra.mrb[96].mxu1 %v16759_v57  ;;  %6689 = vmatprep.mubr.bf16.mxu0 %v16760_v15 }
 0x371   : > { %7461 = vmatprep.mubr.bf16.mxu1 %v16760_v15  ;;  %v13094_v15 = vld [vmem:[#allocation5 + $0xfbc] ss:$40 sps:$4 sm:$0xff]  }
 0x372   : > { %v14758_v18 = vpop.f32.mrb[56].mxu0 }
 0x373   : > { %16761 = vst [vmem:[#allocation214_spill] sm:$0xff] %v14758_v18  ;;  %v14760_v41 = vpop.f32.mrb[56].mxu1  ;;  %v14762_v28 = vpop.f32.mrb[57].mxu0 }
 0x374   : > { %16762 = vst [vmem:[#allocation215_spill] sm:$0xff] %v14760_v41  ;;  %16763 = vst [vmem:[#allocation216_spill] sm:$0xff] %v14762_v28  ;;  %v14764_v8 = vpop.f32.mrb[57].mxu1  ;;  %v14766_v1 = vpop.f32.mrb[58].mxu0 }
 0x375   : > { %16764 = vst [vmem:[#allocation217_spill] sm:$0xff] %v14764_v8  ;;  %16765 = vst [vmem:[#allocation218_spill] sm:$0xff] %v14766_v1  ;;  %v14768_v21 = vpop.f32.mrb[58].mxu1  ;;  %v14770_v23 = vpop.f32.mrb[59].mxu0 }
 0x376   : > { %16766 = vst [vmem:[#allocation219_spill] sm:$0xff] %v14768_v21  ;;  %16767 = vst [vmem:[#allocation220_spill] sm:$0xff] %v14770_v23  ;;  %v14772_v57 = vpop.f32.mrb[59].mxu1 }
 0x377   : > { %16768 = vst [vmem:[#allocation221_spill] sm:$0xff] %v14772_v57  ;;  %6690 = vmatmul.mubr.bf16.gmra.mrb[100].mxu0 %v16769_v62 }
 0x378   : > { %7462 = vmatmul.mubr.bf16.gmra.mrb[100].mxu1 %v16769_v62  ;;  %6699 = vmatprep.mubr.bf16.mxu0 %v16770_v44  ;;  %v16779_v62 = vld [vmem:[#allocation39_spill] sm:$0xff] }
 0x379   : > { %7471 = vmatprep.mubr.bf16.mxu1 %v16770_v44  ;;  %v16780_v44 = vld [vmem:[#allocation40_spill] sm:$0xff] }
 0x37a   : > { %v14778_v41 = vpop.f32.mrb[60].mxu0 }
 0x37b   : > { %16771 = vst [vmem:[#allocation222_spill] sm:$0xff] %v14778_v41  ;;  %v14780_v28 = vpop.f32.mrb[60].mxu1  ;;  %v14782_v8 = vpop.f32.mrb[61].mxu0  ;;  %v13086_v41 = vld [vmem:[#allocation5 + $0xf68] ss:$40 sps:$4 sm:$0xff]  }
 0x37c   : > { %16772 = vst [vmem:[#allocation223_spill] sm:$0xff] %v14780_v28  ;;  %16773 = vst [vmem:[#allocation224_spill] sm:$0xff] %v14782_v8  ;;  %v14784_v1 = vpop.f32.mrb[61].mxu1  ;;  %v14786_v21 = vpop.f32.mrb[62].mxu0  ;;  %v16781_v28 = vld [vmem:[#allocation41_spill] sm:$0xff]  ;;  %v16792_v8 = vld [vmem:[#allocation52_spill] sm:$0xff] }
 0x37d   : > { %16774 = vst [vmem:[#allocation225_spill] sm:$0xff] %v14784_v1  ;;  %16775 = vst [vmem:[#allocation226_spill] sm:$0xff] %v14786_v21  ;;  %v14788_v23 = vpop.f32.mrb[62].mxu1  ;;  %v14790_v57 = vpop.f32.mrb[63].mxu0  ;;  %v16782_v1 = vld [vmem:[#allocation42_spill] sm:$0xff] }
 0x37e   : > { %16776 = vst [vmem:[#allocation227_spill] sm:$0xff] %v14788_v23  ;;  %16777 = vst [vmem:[#allocation228_spill] sm:$0xff] %v14790_v57  ;;  %v14792_v18 = vpop.f32.mrb[63].mxu1  ;;  %v16783_v23 = vld [vmem:[#allocation43_spill] sm:$0xff]  ;;  %v13061_v57 = vld [vmem:[#allocation5 + $0xf64] ss:$40 sps:$4 sm:$0xff]  }
 0x37f   : > { %16778 = vst [vmem:[#allocation229_spill] sm:$0xff] %v14792_v18  ;;  %6700 = vmatmul.mubr.bf16.gmra.mrb[104].mxu0 %v16779_v62  ;;  %v16784_v18 = vld [vmem:[#allocation44_spill] sm:$0xff] }
 0x380   : > { %7472 = vmatmul.mubr.bf16.gmra.mrb[104].mxu1 %v16779_v62  ;;  %6709 = vmatprep.mubr.bf16.mxu0 %v16780_v44  ;;  %v16785_v62 = vld [vmem:[#allocation45_spill] sm:$0xff]  ;;  %v13083_v21 = vld [vmem:[#allocation5 + $0xf18] ss:$40 sps:$4 sm:$0xff]  }
 0x381   : > { %7481 = vmatprep.mubr.bf16.mxu1 %v16780_v44  ;;  %v16786_v44 = vld [vmem:[#allocation46_spill] sm:$0xff] }
 0x387   : > { %6710 = vmatmul.mubr.bf16.gmra.mrb[108].mxu0 %v16781_v28 }
 0x388   : > { %7482 = vmatmul.mubr.bf16.gmra.mrb[108].mxu1 %v16781_v28  ;;  %6719 = vmatprep.mubr.bf16.mxu0 %v16782_v1  ;;  %v16787_v28 = vld [vmem:[#allocation47_spill] sm:$0xff] }
 0x389   : > { %7491 = vmatprep.mubr.bf16.mxu1 %v16782_v1  ;;  %v16788_v1 = vld [vmem:[#allocation48_spill] sm:$0xff] }
 0x38f   : > { %6720 = vmatmul.mubr.bf16.gmra.mrb[112].mxu0 %v16783_v23 }
 0x390   : > { %7492 = vmatmul.mubr.bf16.gmra.mrb[112].mxu1 %v16783_v23  ;;  %6729 = vmatprep.mubr.bf16.mxu0 %v16784_v18  ;;  %v16789_v23 = vld [vmem:[#allocation49_spill] sm:$0xff] }
 0x391   : > { %7501 = vmatprep.mubr.bf16.mxu1 %v16784_v18  ;;  %v16790_v18 = vld [vmem:[#allocation50_spill] sm:$0xff] }
 0x397   : > { %6730 = vmatmul.mubr.bf16.gmra.mrb[116].mxu0 %v16785_v62 }
 0x398   : > { %7502 = vmatmul.mubr.bf16.gmra.mrb[116].mxu1 %v16785_v62  ;;  %6739 = vmatprep.mubr.bf16.mxu0 %v16786_v44  ;;  %v13056_v62 = vld [vmem:[#allocation5 + $0xf10] ss:$40 sps:$4 sm:$0xff]  }
 0x399   : > { %7511 = vmatprep.mubr.bf16.mxu1 %v16786_v44  ;;  %v16791_v44 = vld [vmem:[#allocation51_spill] sm:$0xff] }
 0x39f   : > { %6740 = vmatmul.mubr.bf16.gmra.mrb[120].mxu0 %v16787_v28 }
 0x3a0   : > { %7512 = vmatmul.mubr.bf16.gmra.mrb[120].mxu1 %v16787_v28  ;;  %6749 = vmatprep.mubr.bf16.mxu0 %v16788_v1  ;;  %v13088_v28 = vld [vmem:[#allocation5 + $0xf6c] ss:$40 sps:$4 sm:$0xff]  }
 0x3a1   : > { %7521 = vmatprep.mubr.bf16.mxu1 %v16788_v1  ;;  %v13059_v1 = vld [vmem:[#allocation5 + $0xf60] ss:$40 sps:$4 sm:$0xff]  }
 0x3a7   : > { %6750 = vmatmul.mubr.bf16.gmra.mrb[124].mxu0 %v16789_v23 }
 0x3a8   : > { %7522 = vmatmul.mubr.bf16.gmra.mrb[124].mxu1 %v16789_v23  ;;  %6792 = vmatprep.mubr.bf16.mxu0 %v16790_v18  ;;  %v13064_v23 = vld [vmem:[#allocation5 + $0xfb4] ss:$40 sps:$4 sm:$0xff]  }
 0x3a9   : > { %7564 = vmatprep.mubr.bf16.mxu1 %v16790_v18  ;;  %v13062_v18 = vld [vmem:[#allocation5 + $0xfb0] ss:$40 sps:$4 sm:$0xff]  }
 0x3af   : > { %6793 = vmatmul.mubr.bf16.vlgmr.msra.gmra.mrb[64].mxu0 %v16791_v44 }
 0x3b0   : > { %7565 = vmatmul.mubr.bf16.vlgmr.msra.gmra.mrb[64].mxu1 %v16791_v44  ;;  %6954 = vmatpush1.bf16.msra.mxu0 %v13056_v62  ;;  %v16793_v44 = vld [vmem:[#allocation53_spill] sm:$0xff] }
 0x3b1   : > { %6802 = vmatprep.mubr.bf16.mxu0 %v16792_v8  ;;  %7574 = vmatprep.mubr.bf16.mxu1 %v16792_v8  ;;  %v13097_v62 = vld [vmem:[#allocation5 + $0x100c] ss:$40 sps:$4 sm:$0xff]   ;;  %v16795_v8 = vld [vmem:[#allocation55_spill] sm:$0xff] }
 0x3b2   : > { %6955 = vmatprep.subr.bf16.mxu0 %v13061_v57  ;;  %7726 = vmatpush1.bf16.msra.mxu1 %v13083_v21  ;;  %v13065_v57 = vld [vmem:[#allocation5 + $0x1000] ss:$40 sps:$4 sm:$0xff]   ;;  %v13103_v21 = vld [vmem:[#allocation5 + $0x105c] ss:$40 sps:$4 sm:$0xff]  }
 0x3b3   : > { %7727 = vmatprep.subr.bf16.mxu1 %v13088_v28  ;;  %v13070_v28 = vld [vmem:[#allocation5 + $0x1054] ss:$40 sps:$4 sm:$0xff]  }
 0x3b4   : > { %6956 = vmatpush1.bf16.msra.mxu0 %v13059_v1  ;;  %v13095_v1 = vld [vmem:[#allocation5 + $0x1008] ss:$40 sps:$4 sm:$0xff]  }
 0x3b5   : > { %6957 = vmatprep.subr.bf16.mxu0 %v13064_v23  ;;  %v13073_v23 = vld [vmem:[#allocation5 + $0x10a4] ss:$40 sps:$4 sm:$0xff]  }
 0x3b6   : > { %7728 = vmatpush1.bf16.msra.mxu1 %v13086_v41  ;;  %v13068_v41 = vld [vmem:[#allocation5 + $0x1050] ss:$40 sps:$4 sm:$0xff]  }
 0x3b7   : > { %6803 = vmatmul.mubr.bf16.gmra.mrb[68].mxu0 %v16793_v44  ;;  %7729 = vmatprep.subr.bf16.mxu1 %v13094_v15  ;;  %v13104_v15 = vld [vmem:[#allocation5 + $0x10a8] ss:$40 sps:$4 sm:$0xff]  }
 0x3b8   : > { %7575 = vmatmul.mubr.bf16.gmra.mrb[68].mxu1 %v16793_v44  ;;  %6812 = vmatprep.mubr.bf16.mxu0 %v16794_v16  ;;  %v13101_v44 = vld [vmem:[#allocation5 + $0x1058] ss:$40 sps:$4 sm:$0xff]  }
 0x3b9   : > { %7584 = vmatprep.mubr.bf16.mxu1 %v16794_v16  ;;  %6958 = vmatpush1.bf16.msra.mxu0 %v13062_v18  ;;  %v13106_v16 = vld [vmem:[#allocation5 + $0x10ac] ss:$40 sps:$4 sm:$0xff]   ;;  %v16796_v18 = vld [vmem:[#allocation56_spill] sm:$0xff] }
 0x3ba   : > { %6959 = vmatprep.subr.bf16.mxu0 %v13067_v37  ;;  %7730 = vmatpush1.bf16.msra.mxu1 %v13092_v46  ;;  %v13071_v37 = vld [vmem:[#allocation5 + $0x10a0] ss:$40 sps:$4 sm:$0xff]   ;;  %v13076_v46 = vld [vmem:[#allocation5 + $0x10f4] ss:$40 sps:$4 sm:$0xff]  }
 0x3bb   : > { %7731 = vmatprep.subr.bf16.mxu1 %v13097_v62  ;;  %v13074_v62 = vld [vmem:[#allocation5 + $0x10f0] ss:$40 sps:$4 sm:$0xff]  }
 0x3bd   : > { %6960 = vmatpush1.bf16.msra.mxu0 %v13065_v57  ;;  %v13112_v57 = vld [vmem:[#allocation5 + $0x10fc] ss:$40 sps:$4 sm:$0xff]  }
 0x3be   : > { %6961 = vmatprep.subr.bf16.mxu0 %v13070_v28  ;;  %7732 = vmatpush1.bf16.msra.mxu1 %v13095_v1  ;;  %v13079_v28 = vld [vmem:[#allocation5 + $0x1144] ss:$40 sps:$4 sm:$0xff]   ;;  %v13110_v1 = vld [vmem:[#allocation5 + $0x10f8] ss:$40 sps:$4 sm:$0xff]  }
 0x3bf   : > { %6813 = vmatmul.mubr.bf16.gmra.mrb[72].mxu0 %v16795_v8  ;;  %7733 = vmatprep.subr.bf16.mxu1 %v13103_v21  ;;  %v13113_v21 = vld [vmem:[#allocation5 + $0x1148] ss:$40 sps:$4 sm:$0xff]  }
 0x3c0   : > { %7585 = vmatmul.mubr.bf16.gmra.mrb[72].mxu1 %v16795_v8  ;;  %6822 = vmatprep.mubr.bf16.mxu0 %v16796_v18  ;;  %v16797_v8 = vld [vmem:[#allocation57_spill] sm:$0xff] }
 0x3c1   : > { %7594 = vmatprep.mubr.bf16.mxu1 %v16796_v18  ;;  %6962 = vmatpush1.bf16.msra.mxu0 %v13068_v41  ;;  %v13115_v18 = vld [vmem:[#allocation5 + $0x114c] ss:$40 sps:$4 sm:$0xff]  }
 0x3c2   : > { %6963 = vmatprep.subr.bf16.mxu0 %v13073_v23  ;;  %7734 = vmatpush1.bf16.msra.mxu1 %v13101_v44  ;;  %v16798_v41 = vld [vmem:[#allocation58_spill] sm:$0xff]  ;;  %v13077_v44 = vld [vmem:[#allocation5 + $0x1140] ss:$40 sps:$4 sm:$0xff]  }
 0x3c3   : > { %7735 = vmatprep.subr.bf16.mxu1 %v13106_v16  ;;  %v13082_v16 = vld [vmem:[#allocation5 + $0x1194] ss:$40 sps:$4 sm:$0xff]   ;;  %v13080_v23 = vld [vmem:[#allocation5 + $0x1190] ss:$40 sps:$4 sm:$0xff]  }
 0x3c5   : > { %6964 = vmatpush1.bf16.msra.mxu0 %v13071_v37  ;;  %v13121_v37 = vld [vmem:[#allocation5 + $0x119c] ss:$40 sps:$4 sm:$0xff]  }
 0x3c6   : > { %6965 = vmatprep.subr.bf16.mxu0 %v13076_v46  ;;  %7736 = vmatpush1.bf16.msra.mxu1 %v13104_v15  ;;  %v13091_v46 = vld [vmem:[#allocation5 + $0x11e4] ss:$40 sps:$4 sm:$0xff]   ;;  %v13119_v15 = vld [vmem:[#allocation5 + $0x1198] ss:$40 sps:$4 sm:$0xff]  }
 0x3c7   : > { %6823 = vmatmul.mubr.bf16.gmra.mrb[76].mxu0 %v16797_v8  ;;  %7737 = vmatprep.subr.bf16.mxu1 %v13112_v57  ;;  %v13122_v57 = vld [vmem:[#allocation5 + $0x11e8] ss:$40 sps:$4 sm:$0xff]  }
 0x3c8   : > { %7595 = vmatmul.mubr.bf16.gmra.mrb[76].mxu1 %v16797_v8  ;;  %6832 = vmatprep.mubr.bf16.mxu0 %v16798_v41  ;;  %v16799_v8 = vld [vmem:[#allocation59_spill] sm:$0xff] }
 0x3c9   : > { %7604 = vmatprep.mubr.bf16.mxu1 %v16798_v41  ;;  %6966 = vmatpush1.bf16.msra.mxu0 %v13074_v62  ;;  %v13124_v41 = vld [vmem:[#allocation5 + $0x11ec] ss:$40 sps:$4 sm:$0xff]   ;;  %v13089_v62 = vld [vmem:[#allocation5 + $0x11e0] ss:$40 sps:$4 sm:$0xff]  }
 0x3ca   : > { %6967 = vmatprep.subr.bf16.mxu0 %v13079_v28  ;;  %7738 = vmatpush1.bf16.msra.mxu1 %v13110_v1  ;;  %v13098_v28 = vld [vmem:[#allocation5 + $0x1230] ss:$40 sps:$4 sm:$0xff]   ;;  %v13130_v1 = vld [vmem:[#allocation5 + $0x123c] ss:$40 sps:$4 sm:$0xff]  }
 0x3cb   : > { %7739 = vmatprep.subr.bf16.mxu1 %v13115_v18  ;;  %v13100_v18 = vld [vmem:[#allocation5 + $0x1234] ss:$40 sps:$4 sm:$0xff]  }
 0x3cd   : > { %6968 = vmatpush1.bf16.msra.mxu0 %v13077_v44  ;;  %v13109_v44 = vld [vmem:[#allocation5 + $0x1284] ss:$40 sps:$4 sm:$0xff]  }
 0x3ce   : > { %6969 = vmatprep.subr.bf16.mxu0 %v13082_v16  ;;  %7740 = vmatpush1.bf16.msra.mxu1 %v13113_v21  ;;  %v13128_v16 = vld [vmem:[#allocation5 + $0x1238] ss:$40 sps:$4 sm:$0xff]   ;;  %v16800_v21 = vld [vmem:[#allocation61_spill] sm:$0xff] }
 0x3cf   : > { %6833 = vmatmul.mubr.bf16.gmra.mrb[80].mxu0 %v16799_v8  ;;  %7741 = vmatprep.subr.bf16.mxu1 %v13121_v37  ;;  %v13107_v37 = vld [vmem:[#allocation5 + $0x1280] ss:$40 sps:$4 sm:$0xff]  }
 0x3d0   : > { %7605 = vmatmul.mubr.bf16.gmra.mrb[80].mxu1 %v16799_v8  ;;  %6842 = vmatprep.mubr.bf16.mxu0 %v14162_v61  ;;  %v16831_v8 = vld [vmem:[#allocation93_spill] sm:$0xff] }
 0x3d1   : > { %7614 = vmatprep.mubr.bf16.mxu1 %v14162_v61  ;;  %6970 = vmatpush1.bf16.msra.mxu0 %v13080_v23  ;;  %v13133_v61 = vld [vmem:[#allocation5 + $0x128c] ss:$40 sps:$4 sm:$0xff]  }
 0x3d2   : > { %6971 = vmatprep.subr.bf16.mxu0 %v13091_v46  ;;  %7742 = vmatpush1.bf16.msra.mxu1 %v13119_v15  ;;  %v16801_v23 = vld [vmem:[#allocation62_spill] sm:$0xff] }
 0x3d3   : > { %7743 = vmatprep.subr.bf16.mxu1 %v13124_v41  ;;  %v13118_v41 = vld [vmem:[#allocation5 + $0x12d4] ss:$40 sps:$4 sm:$0xff]   ;;  %v13131_v46 = vld [vmem:[#allocation5 + $0x1288] ss:$40 sps:$4 sm:$0xff]  }
 0x3d4   : > { %v13116_v15 = vld [vmem:[#allocation5 + $0x12d0] ss:$40 sps:$4 sm:$0xff]  }
 0x3d5   : > { %6972 = vmatpush1.bf16.msra.mxu0 %v13089_v62  ;;  %v13139_v62 = vld [vmem:[#allocation5 + $0x12dc] ss:$40 sps:$4 sm:$0xff]  }
 0x3d6   : > { %6973 = vmatprep.subr.bf16.mxu0 %v13100_v18  ;;  %7744 = vmatpush1.bf16.msra.mxu1 %v13122_v57  ;;  %v13127_v18 = vld [vmem:[#allocation5 + $0x1324] ss:$40 sps:$4 sm:$0xff]   ;;  %v13137_v57 = vld [vmem:[#allocation5 + $0x12d8] ss:$40 sps:$4 sm:$0xff]  }
 0x3d7   : > { %6843 = vmatmul.mubr.bf16.gmra.mrb[84].mxu0 %v16800_v21  ;;  %7745 = vmatprep.subr.bf16.mxu1 %v13130_v1  ;;  %v13125_v1 = vld [vmem:[#allocation5 + $0x1320] ss:$40 sps:$4 sm:$0xff]  }
 0x3d8   : > { %7615 = vmatmul.mubr.bf16.gmra.mrb[84].mxu1 %v16800_v21  ;;  %6852 = vmatprep.mubr.bf16.mxu0 %v16801_v23  ;;  %v13220_v21 = vld [vmem:[#allocation5 + $0x11f4] ss:$40 sps:$4 sm:$0xff]  }
 0x3d9   : > { %7624 = vmatprep.mubr.bf16.mxu1 %v16801_v23  ;;  %6974 = vmatpush1.bf16.msra.mxu0 %v13098_v28  ;;  %v13142_v23 = vld [vmem:[#allocation5 + $0x132c] ss:$40 sps:$4 sm:$0xff]   ;;  %v16802_v28 = vld [vmem:[#allocation64_spill] sm:$0xff] }
 0x3da   : > { %6975 = vmatprep.subr.bf16.mxu0 %v13109_v44  ;;  %7746 = vmatpush1.bf16.msra.mxu1 %v13128_v16  ;;  %v13140_v44 = vld [vmem:[#allocation5 + $0x1328] ss:$40 sps:$4 sm:$0xff]  }
 0x3db   : > { %7747 = vmatprep.subr.bf16.mxu1 %v13133_v61  ;;  %v13136_v61 = vld [vmem:[#allocation5 + $0x1374] ss:$40 sps:$4 sm:$0xff]   ;;  %v13134_v16 = vld [vmem:[#allocation5 + $0x1370] ss:$40 sps:$4 sm:$0xff]  }
 0x3dd   : > { %6976 = vmatpush1.bf16.msra.mxu0 %v13107_v37  ;;  %v13148_v37 = vld [vmem:[#allocation5 + $0x137c] ss:$40 sps:$4 sm:$0xff]  }
 0x3de   : > { %6977 = vmatprep.subr.bf16.mxu0 %v13118_v41  ;;  %7748 = vmatpush1.bf16.msra.mxu1 %v13131_v46  ;;  %v13145_v41 = vld [vmem:[#allocation5 + $0x13c4] ss:$40 sps:$4 sm:$0xff]   ;;  %v13146_v46 = vld [vmem:[#allocation5 + $0x1378] ss:$40 sps:$4 sm:$0xff]  }
 0x3df   : > { %6853 = vmatmul.mubr.bf16.gmra.mrb[88].mxu0 %v14180_v45  ;;  %7749 = vmatprep.subr.bf16.mxu1 %v13139_v62  ;;  %v13143_v62 = vld [vmem:[#allocation5 + $0x13c0] ss:$40 sps:$4 sm:$0xff]  }
 0x3e0   : > { %7625 = vmatmul.mubr.bf16.gmra.mrb[88].mxu1 %v14180_v45  ;;  %6862 = vmatprep.mubr.bf16.mxu0 %v16802_v28  ;;  %v16803_v45 = vld [vmem:[#allocation65_spill] sm:$0xff] }
 0x3e1   : > { %7634 = vmatprep.mubr.bf16.mxu1 %v16802_v28  ;;  %6978 = vmatpush1.bf16.msra.mxu0 %v13116_v15  ;;  %v13151_v28 = vld [vmem:[#allocation5 + $0x13cc] ss:$40 sps:$4 sm:$0xff]  }
 0x3e2   : > { %6979 = vmatprep.subr.bf16.mxu0 %v13127_v18  ;;  %7750 = vmatpush1.bf16.msra.mxu1 %v13137_v57  ;;  %v16804_v15 = vld [vmem:[#allocation66_spill] sm:$0xff]  ;;  %v13154_v18 = vld [vmem:[#allocation5 + $0x24] ss:$40 sps:$4 sm:$0xff]  }
 0x3e3   : > { %7751 = vmatprep.subr.bf16.mxu1 %v13142_v23  ;;  %v13149_v23 = vld [vmem:[#allocation5 + $0x13c8] ss:$40 sps:$4 sm:$0xff]   ;;  %v13181_v57 = vld [vmem:[#allocation5 + $0xf24] ss:$40 sps:$4 sm:$0xff]  }
 0x3e5   : > { %6980 = vmatpush1.bf16.msra.mxu0 %v13125_v1  ;;  %v16805_v1 = vld [vmem:[#allocation67_spill] sm:$0xff] }
 0x3e6   : > { %6981 = vmatprep.subr.bf16.mxu0 %v13136_v61  ;;  %7752 = vmatpush1.bf16.msra.mxu1 %v13140_v44  ;;  %v16806_v61 = vld [vmem:[#allocation68_spill] sm:$0xff]  ;;  %v16807_v44 = vld [vmem:[#allocation69_spill] sm:$0xff] }
 0x3e7   : > { %6863 = vmatmul.mubr.bf16.gmra.mrb[92].mxu0 %v16803_v45  ;;  %7753 = vmatprep.subr.bf16.mxu1 %v13148_v37  ;;  %v16810_v37 = vld [vmem:[#allocation72_spill] sm:$0xff] }
 0x3e8   : > { %7635 = vmatmul.mubr.bf16.gmra.mrb[92].mxu1 %v16803_v45  ;;  %6872 = vmatprep.mubr.bf16.mxu0 %v16804_v15  ;;  %v16824_v45 = vld [vmem:[#allocation86_spill] sm:$0xff] }
 0x3e9   : > { %7644 = vmatprep.mubr.bf16.mxu1 %v16804_v15  ;;  %6982 = vmatpush1.bf16.msra.mxu0 %v13134_v16  ;;  %v16808_v16 = vld [vmem:[#allocation70_spill] sm:$0xff]  ;;  %v13188_v15 = vld [vmem:[#allocation5 + $0xfc0] ss:$40 sps:$4 sm:$0xff]  }
 0x3ea   : > { %6983 = vmatprep.subr.bf16.mxu0 %v13145_v41  ;;  %7754 = vmatpush1.bf16.msra.mxu1 %v13146_v46  ;;  %v16811_v41 = vld [vmem:[#allocation73_spill] sm:$0xff]  ;;  %v16812_v46 = vld [vmem:[#allocation74_spill] sm:$0xff] }
 0x3eb   : > { %7755 = vmatprep.subr.bf16.mxu1 %v13151_v28  ;;  %v16809_v28 = vld [vmem:[#allocation71_spill] sm:$0xff] }
 0x3ed   : > { %6984 = vmatpush1.bf16.msra.mxu0 %v13143_v62  ;;  %v16813_v62 = vld [vmem:[#allocation75_spill] sm:$0xff] }
 0x3ee   : > { %7756 = vmatpush1.bf16.msra.mxu1 %v13149_v23  ;;  %7918 = vmatprep.subr.bf16.mxu0 %v13154_v18  ;;  %v16814_v23 = vld [vmem:[#allocation76_spill] sm:$0xff]  ;;  %v16815_v18 = vld [vmem:[#allocation77_spill] sm:$0xff] }
 0x3ef   : > { %6873 = vmatmul.mubr.bf16.gmra.mrb[96].mxu0 %v16805_v1  ;;  %11317 = vmatprep.subr.bf16.mxu1 %v13181_v57  ;;  %v16816_v57 = vld [vmem:[#allocation78_spill] sm:$0xff] }
 0x3f0   : > { %7645 = vmatmul.mubr.bf16.gmra.mrb[96].mxu1 %v16805_v1  ;;  %6882 = vmatprep.mubr.bf16.mxu0 %v16806_v61  ;;  %v13163_v1 = vld [vmem:[#allocation5 + $0x114] ss:$40 sps:$4 sm:$0xff]  }
 0x3f1   : > { %7654 = vmatprep.mubr.bf16.mxu1 %v16806_v61  ;;  %v13190_v61 = vld [vmem:[#allocation5 + $0xfc4] ss:$40 sps:$4 sm:$0xff]  }
 0x3f7   : > { %6883 = vmatmul.mubr.bf16.gmra.mrb[100].mxu0 %v16807_v44 }
 0x3f8   : > { %7655 = vmatmul.mubr.bf16.gmra.mrb[100].mxu1 %v16807_v44  ;;  %6892 = vmatprep.mubr.bf16.mxu0 %v16808_v16  ;;  %v13182_v44 = vld [vmem:[#allocation5 + $0xf70] ss:$40 sps:$4 sm:$0xff]  }
 0x3f9   : > { %7664 = vmatprep.mubr.bf16.mxu1 %v16808_v16  ;;  %v16822_v16 = vld [vmem:[#allocation84_spill] sm:$0xff] }
 0x3ff   : > { %6893 = vmatmul.mubr.bf16.gmra.mrb[104].mxu0 %v16809_v28 }
 0x400   : > { %7665 = vmatmul.mubr.bf16.gmra.mrb[104].mxu1 %v16809_v28  ;;  %6902 = vmatprep.mubr.bf16.mxu0 %v16810_v37  ;;  %v13179_v28 = vld [vmem:[#allocation5 + $0xf20] ss:$40 sps:$4 sm:$0xff]  }
 0x401   : > { %7674 = vmatprep.mubr.bf16.mxu1 %v16810_v37  ;;  %v13157_v37 = vld [vmem:[#allocation5 + $0x74] ss:$40 sps:$4 sm:$0xff]  }
 0x407   : > { %6903 = vmatmul.mubr.bf16.gmra.mrb[108].mxu0 %v16811_v41 }
 0x408   : > { %7675 = vmatmul.mubr.bf16.gmra.mrb[108].mxu1 %v16811_v41  ;;  %6912 = vmatprep.mubr.bf16.mxu0 %v16812_v46  ;;  %v16817_v41 = vld [vmem:[#allocation79_spill] sm:$0xff] }
 0x409   : > { %7684 = vmatprep.mubr.bf16.mxu1 %v16812_v46  ;;  %v16818_v46 = vld [vmem:[#allocation80_spill] sm:$0xff] }
 0x40f   : > { %6913 = vmatmul.mubr.bf16.gmra.mrb[112].mxu0 %v16813_v62 }
 0x410   : > { %7685 = vmatmul.mubr.bf16.gmra.mrb[112].mxu1 %v16813_v62  ;;  %6922 = vmatprep.mubr.bf16.mxu0 %v16814_v23  ;;  %v16819_v62 = vld [vmem:[#allocation81_spill] sm:$0xff] }
 0x411   : > { %7694 = vmatprep.mubr.bf16.mxu1 %v16814_v23  ;;  %v16820_v23 = vld [vmem:[#allocation82_spill] sm:$0xff] }
 0x417   : > { %6923 = vmatmul.mubr.bf16.gmra.mrb[116].mxu0 %v16815_v18 }
 0x418   : > { %7695 = vmatmul.mubr.bf16.gmra.mrb[116].mxu1 %v16815_v18  ;;  %6932 = vmatprep.mubr.bf16.mxu0 %v16816_v57  ;;  %v13152_v18 = vld [vmem:[#allocation5 + $0x20] ss:$40 sps:$4 sm:$0xff]  }
 0x419   : > { %7704 = vmatprep.mubr.bf16.mxu1 %v16816_v57  ;;  %v16821_v57 = vld [vmem:[#allocation83_spill] sm:$0xff] }
 0x41f   : > { %6933 = vmatmul.mubr.bf16.gmra.mrb[120].mxu0 %v16817_v41 }
 0x420   : > { %7705 = vmatmul.mubr.bf16.gmra.mrb[120].mxu1 %v16817_v41  ;;  %6942 = vmatprep.mubr.bf16.mxu0 %v16818_v46  ;;  %v13184_v41 = vld [vmem:[#allocation5 + $0xf74] ss:$40 sps:$4 sm:$0xff]  }
 0x421   : > { %7714 = vmatprep.mubr.bf16.mxu1 %v16818_v46  ;;  %v13155_v46 = vld [vmem:[#allocation5 + $0x70] ss:$40 sps:$4 sm:$0xff]  }
 0x427   : > { %6943 = vmatmul.mubr.bf16.gmra.mrb[124].mxu0 %v16819_v62 }
 0x428   : > { %7715 = vmatmul.mubr.bf16.gmra.mrb[124].mxu1 %v16819_v62  ;;  %6985 = vmatprep.mubr.bf16.mxu0 %v16820_v23  ;;  %v13160_v62 = vld [vmem:[#allocation5 + $0xc4] ss:$40 sps:$4 sm:$0xff]  }
 0x429   : > { %7757 = vmatprep.mubr.bf16.mxu1 %v16820_v23  ;;  %v13158_v23 = vld [vmem:[#allocation5 + $0xc0] ss:$40 sps:$4 sm:$0xff]  }
 0x42f   : > { %6986 = vmatmul.mubr.bf16.vlgmr.msra.gmra.mrb[64].mxu0 %v16821_v57 }
 0x430   : > { %7758 = vmatmul.mubr.bf16.vlgmr.msra.gmra.mrb[64].mxu1 %v16821_v57  ;;  %7919 = vmatpush1.bf16.msra.mxu0 %v13152_v18  ;;  %v16823_v57 = vld [vmem:[#allocation85_spill] sm:$0xff]  ;;  %v13193_v18 = vld [vmem:[#allocation5 + $0x1014] ss:$40 sps:$4 sm:$0xff]  }
 0x431   : > { %6995 = vmatprep.mubr.bf16.mxu0 %v16822_v16  ;;  %7767 = vmatprep.mubr.bf16.mxu1 %v16822_v16  ;;  %v16825_v16 = vld [vmem:[#allocation87_spill] sm:$0xff] }
 0x432   : > { %7920 = vmatprep.subr.bf16.mxu0 %v13157_v37  ;;  %11333 = vmatpush1.bf16.msra.mxu1 %v13179_v28  ;;  %v13161_v28 = vld [vmem:[#allocation5 + $0x110] ss:$40 sps:$4 sm:$0xff]   ;;  %v13166_v37 = vld [vmem:[#allocation5 + $0x164] ss:$40 sps:$4 sm:$0xff]  }
 0x433   : > { %11318 = vmatprep.subr.bf16.mxu1 %v13184_v41  ;;  %v13191_v41 = vld [vmem:[#allocation5 + $0x1010] ss:$40 sps:$4 sm:$0xff]  }
 0x434   : > { %7921 = vmatpush1.bf16.msra.mxu0 %v13155_v46  ;;  %v13199_v46 = vld [vmem:[#allocation5 + $0x1064] ss:$40 sps:$4 sm:$0xff]  }
 0x435   : > { %7922 = vmatprep.subr.bf16.mxu0 %v13160_v62  ;;  %v13169_v62 = vld [vmem:[#allocation5 + $0x1b4] ss:$40 sps:$4 sm:$0xff]  }
 0x436   : > { %11334 = vmatpush1.bf16.msra.mxu1 %v13182_v44  ;;  %v13164_v44 = vld [vmem:[#allocation5 + $0x160] ss:$40 sps:$4 sm:$0xff]  }
 0x437   : > { %6996 = vmatmul.mubr.bf16.gmra.mrb[68].mxu0 %v16823_v57  ;;  %11319 = vmatprep.subr.bf16.mxu1 %v13190_v61  ;;  %v13200_v61 = vld [vmem:[#allocation5 + $0x10b0] ss:$40 sps:$4 sm:$0xff]  }
 0x438   : > { %7768 = vmatmul.mubr.bf16.gmra.mrb[68].mxu1 %v16823_v57  ;;  %7005 = vmatprep.mubr.bf16.mxu0 %v16824_v45  ;;  %v13197_v57 = vld [vmem:[#allocation5 + $0x1060] ss:$40 sps:$4 sm:$0xff]  }
 0x439   : > { %7777 = vmatprep.mubr.bf16.mxu1 %v16824_v45  ;;  %7923 = vmatpush1.bf16.msra.mxu0 %v13158_v23  ;;  %v13202_v45 = vld [vmem:[#allocation5 + $0x10b4] ss:$40 sps:$4 sm:$0xff]   ;;  %v16826_v23 = vld [vmem:[#allocation88_spill] sm:$0xff] }
 0x43a   : > { %7924 = vmatprep.subr.bf16.mxu0 %v13163_v1  ;;  %11335 = vmatpush1.bf16.msra.mxu1 %v13188_v15  ;;  %v13167_v15 = vld [vmem:[#allocation5 + $0x1b0] ss:$40 sps:$4 sm:$0xff]   ;;  %v13172_v1 = vld [vmem:[#allocation5 + $0x204] ss:$40 sps:$4 sm:$0xff]  }
 0x43b   : > { %11320 = vmatprep.subr.bf16.mxu1 %v13193_v18  ;;  %v13170_v18 = vld [vmem:[#allocation5 + $0x200] ss:$40 sps:$4 sm:$0xff]  }
 0x43d   : > { %7925 = vmatpush1.bf16.msra.mxu0 %v13161_v28  ;;  %v13208_v28 = vld [vmem:[#allocation5 + $0x1104] ss:$40 sps:$4 sm:$0xff]  }
 0x43e   : > { %7926 = vmatprep.subr.bf16.mxu0 %v13166_v37  ;;  %11336 = vmatpush1.bf16.msra.mxu1 %v13191_v41  ;;  %v13175_v37 = vld [vmem:[#allocation5 + $0x254] ss:$40 sps:$4 sm:$0xff]   ;;  %v13206_v41 = vld [vmem:[#allocation5 + $0x1100] ss:$40 sps:$4 sm:$0xff]  }
 0x43f   : > { %7006 = vmatmul.mubr.bf16.gmra.mrb[72].mxu0 %v16825_v16  ;;  %11321 = vmatprep.subr.bf16.mxu1 %v13199_v46  ;;  %v13209_v46 = vld [vmem:[#allocation5 + $0x1150] ss:$40 sps:$4 sm:$0xff]  }
 0x440   : > { %7778 = vmatmul.mubr.bf16.gmra.mrb[72].mxu1 %v16825_v16  ;;  %7015 = vmatprep.mubr.bf16.mxu0 %v16826_v23  ;;  %v16827_v16 = vld [vmem:[#allocation89_spill] sm:$0xff] }
 0x441   : > { %7787 = vmatprep.mubr.bf16.mxu1 %v16826_v23  ;;  %7927 = vmatpush1.bf16.msra.mxu0 %v13164_v44  ;;  %v13211_v23 = vld [vmem:[#allocation5 + $0x1154] ss:$40 sps:$4 sm:$0xff]  }
 0x442   : > { %7928 = vmatprep.subr.bf16.mxu0 %v13169_v62  ;;  %11337 = vmatpush1.bf16.msra.mxu1 %v13197_v57  ;;  %v16828_v44 = vld [vmem:[#allocation90_spill] sm:$0xff]  ;;  %v13176_v62 = vld [vmem:[#allocation5 + $0x2a0] ss:$40 sps:$4 sm:$0xff]  }
 0x443   : > { %11322 = vmatprep.subr.bf16.mxu1 %v13202_v45  ;;  %v13173_v57 = vld [vmem:[#allocation5 + $0x250] ss:$40 sps:$4 sm:$0xff]   ;;  %v13178_v45 = vld [vmem:[#allocation5 + $0x2a4] ss:$40 sps:$4 sm:$0xff]  }
 0x445   : > { %7929 = vmatpush1.bf16.msra.mxu0 %v13167_v15  ;;  %v13217_v15 = vld [vmem:[#allocation5 + $0x11a4] ss:$40 sps:$4 sm:$0xff]  }
 0x446   : > { %7930 = vmatprep.subr.bf16.mxu0 %v13172_v1  ;;  %11338 = vmatpush1.bf16.msra.mxu1 %v13200_v61  ;;  %v13187_v1 = vld [vmem:[#allocation5 + $0x2f4] ss:$40 sps:$4 sm:$0xff]   ;;  %v13215_v61 = vld [vmem:[#allocation5 + $0x11a0] ss:$40 sps:$4 sm:$0xff]  }
 0x447   : > { %7016 = vmatmul.mubr.bf16.gmra.mrb[76].mxu0 %v16827_v16  ;;  %11323 = vmatprep.subr.bf16.mxu1 %v13208_v28  ;;  %v13185_v28 = vld [vmem:[#allocation5 + $0x2f0] ss:$40 sps:$4 sm:$0xff]  }
 0x448   : > { %7788 = vmatmul.mubr.bf16.gmra.mrb[76].mxu1 %v16827_v16  ;;  %7025 = vmatprep.mubr.bf16.mxu0 %v16828_v44  ;;  %v16829_v16 = vld [vmem:[#allocation91_spill] sm:$0xff] }
 0x449   : > { %7797 = vmatprep.mubr.bf16.mxu1 %v16828_v44  ;;  %7931 = vmatpush1.bf16.msra.mxu0 %v13170_v18  ;;  %v16830_v18 = vld [vmem:[#allocation92_spill] sm:$0xff] }
 0x44a   : > { %7932 = vmatprep.subr.bf16.mxu0 %v13175_v37  ;;  %11339 = vmatpush1.bf16.msra.mxu1 %v13206_v41  ;;  %v13218_v37 = vld [vmem:[#allocation5 + $0x11f0] ss:$40 sps:$4 sm:$0xff]   ;;  %v13194_v41 = vld [vmem:[#allocation5 + $0x340] ss:$40 sps:$4 sm:$0xff]  }
 0x44b   : > { %11324 = vmatprep.subr.bf16.mxu1 %v13211_v23  ;;  %v13196_v23 = vld [vmem:[#allocation5 + $0x344] ss:$40 sps:$4 sm:$0xff]  }
 0x44d   : > { %7933 = vmatpush1.bf16.msra.mxu0 %v13173_v57  ;;  %v13226_v57 = vld [vmem:[#allocation5 + $0x1244] ss:$40 sps:$4 sm:$0xff]  }
 0x44e   : > { %7934 = vmatprep.subr.bf16.mxu0 %v13178_v45  ;;  %11340 = vmatpush1.bf16.msra.mxu1 %v13209_v46  ;;  %v13205_v45 = vld [vmem:[#allocation5 + $0x394] ss:$40 sps:$4 sm:$0xff]   ;;  %v13224_v46 = vld [vmem:[#allocation5 + $0x1240] ss:$40 sps:$4 sm:$0xff]  }
 0x44f   : > { %7026 = vmatmul.mubr.bf16.gmra.mrb[80].mxu0 %v16829_v16  ;;  %11325 = vmatprep.subr.bf16.mxu1 %v13217_v15  ;;  %v13203_v15 = vld [vmem:[#allocation5 + $0x390] ss:$40 sps:$4 sm:$0xff]  }
 0x450   : > { %7798 = vmatmul.mubr.bf16.gmra.mrb[80].mxu1 %v16829_v16  ;;  %7035 = vmatprep.mubr.bf16.mxu0 %v16830_v18 }
 0x451   : > { %7807 = vmatprep.mubr.bf16.mxu1 %v16830_v18  ;;  %7935 = vmatpush1.bf16.msra.mxu0 %v13176_v62  ;;  %v16832_v62 = vld [vmem:[#allocation94_spill] sm:$0xff] }
 0x452   : > { %7936 = vmatprep.subr.bf16.mxu0 %v13187_v1  ;;  %11341 = vmatpush1.bf16.msra.mxu1 %v13215_v61  ;;  %v13227_v1 = vld [vmem:[#allocation5 + $0x1290] ss:$40 sps:$4 sm:$0xff]   ;;  %v13212_v61 = vld [vmem:[#allocation5 + $0x3e0] ss:$40 sps:$4 sm:$0xff]  }
 0x453   : > { %11326 = vmatprep.subr.bf16.mxu1 %v13220_v21  ;;  %v13214_v21 = vld [vmem:[#allocation5 + $0x3e4] ss:$40 sps:$4 sm:$0xff]  }
 0x455   : > { %7937 = vmatpush1.bf16.msra.mxu0 %v13185_v28  ;;  %v13235_v28 = vld [vmem:[#allocation5 + $0x12e4] ss:$40 sps:$4 sm:$0xff]  }
 0x456   : > { %7938 = vmatprep.subr.bf16.mxu0 %v13196_v23  ;;  %11342 = vmatpush1.bf16.msra.mxu1 %v13218_v37  ;;  %v13223_v23 = vld [vmem:[#allocation5 + $0x434] ss:$40 sps:$4 sm:$0xff]   ;;  %v13233_v37 = vld [vmem:[#allocation5 + $0x12e0] ss:$40 sps:$4 sm:$0xff]  }
 0x457   : > { %7036 = vmatmul.mubr.bf16.gmra.mrb[84].mxu0 %v16831_v8  ;;  %11327 = vmatprep.subr.bf16.mxu1 %v13226_v57  ;;  %v13221_v57 = vld [vmem:[#allocation5 + $0x430] ss:$40 sps:$4 sm:$0xff]  }
 0x458   : > { %7808 = vmatmul.mubr.bf16.gmra.mrb[84].mxu1 %v16831_v8  ;;  %7045 = vmatprep.mubr.bf16.mxu0 %v16832_v62 }
 0x459   : > { %7817 = vmatprep.mubr.bf16.mxu1 %v16832_v62  ;;  %7939 = vmatpush1.bf16.msra.mxu0 %v13194_v41  ;;  %v16834_v41 = vld [vmem:[#allocation96_spill] sm:$0xff] }
 0x45a   : > { %7940 = vmatprep.subr.bf16.mxu0 %v13205_v45  ;;  %11343 = vmatpush1.bf16.msra.mxu1 %v13224_v46  ;;  %v13236_v45 = vld [vmem:[#allocation5 + $0x1330] ss:$40 sps:$4 sm:$0xff]   ;;  %v13230_v46 = vld [vmem:[#allocation5 + $0x480] ss:$40 sps:$4 sm:$0xff]  }
 0x45b   : > { %11328 = vmatprep.subr.bf16.mxu1 %v13229_v35  ;;  %v13232_v35 = vld [vmem:[#allocation5 + $0x484] ss:$40 sps:$4 sm:$0xff]  }
 0x45d   : > { %7941 = vmatpush1.bf16.msra.mxu0 %v13203_v15  ;;  %v13244_v15 = vld [vmem:[#allocation5 + $0x1384] ss:$40 sps:$4 sm:$0xff]  }
 0x45e   : > { %7942 = vmatprep.subr.bf16.mxu0 %v13214_v21  ;;  %11344 = vmatpush1.bf16.msra.mxu1 %v13227_v1  ;;  %v13241_v21 = vld [vmem:[#allocation5 + $0x4d4] ss:$40 sps:$4 sm:$0xff]   ;;  %v13242_v1 = vld [vmem:[#allocation5 + $0x1380] ss:$40 sps:$4 sm:$0xff]  }
 0x45f   : > { %7046 = vmatmul.mubr.bf16.gmra.mrb[88].mxu0 %v16833_v51  ;;  %11329 = vmatprep.subr.bf16.mxu1 %v13235_v28  ;;  %v13250_v28 = vld [vmem:[#allocation5 + $0x524] ss:$40 sps:$4 sm:$0xff]  }
 0x460   : > { %7818 = vmatmul.mubr.bf16.gmra.mrb[88].mxu1 %v16833_v51  ;;  %7055 = vmatprep.mubr.bf16.mxu0 %v16834_v41 }
 0x461   : > { %7827 = vmatprep.mubr.bf16.mxu1 %v16834_v41  ;;  %7943 = vmatpush1.bf16.msra.mxu0 %v13212_v61  ;;  %v13239_v61 = vld [vmem:[#allocation5 + $0x4d0] ss:$40 sps:$4 sm:$0xff]  }
 0x462   : > { %7944 = vmatprep.subr.bf16.mxu0 %v13223_v23  ;;  %11345 = vmatpush1.bf16.msra.mxu1 %v13233_v37  ;;  %v13275_v23 = vld [vmem:[#allocation7 + $0x40] sm:$0xff]   ;;  %v16836_v37 = vld [vmem:[#allocation98_spill] sm:$0xff] }
 0x463   : > { %11330 = vmatprep.subr.bf16.mxu1 %v13238_v10  ;;  %v13245_v10 = vld [vmem:[#allocation5 + $0x13d0] ss:$40 sps:$4 sm:$0xff]  }
 0x465   : > { %7945 = vmatpush1.bf16.msra.mxu0 %v13221_v57  ;;  %v16837_v57 = vld [vmem:[#allocation99_spill] sm:$0xff] }
 0x466   : > { %7946 = vmatprep.subr.bf16.mxu0 %v13232_v35  ;;  %11346 = vmatpush1.bf16.msra.mxu1 %v13236_v45  ;;  %v16838_v35 = vld [vmem:[#allocation100_spill] sm:$0xff]  ;;  %v16839_v45 = vld [vmem:[#allocation101_spill] sm:$0xff] }
 0x467   : > { %7056 = vmatmul.mubr.bf16.gmra.mrb[92].mxu0 %v14350_v50  ;;  %11331 = vmatprep.subr.bf16.mxu1 %v13244_v15  ;;  %v16841_v15 = vld [vmem:[#allocation103_spill] sm:$0xff] }
 0x468   : > { %7828 = vmatmul.mubr.bf16.gmra.mrb[92].mxu1 %v14350_v50  ;;  %7065 = vmatprep.mubr.bf16.mxu0 %v14352_v26 }
 0x469   : > { %7837 = vmatprep.mubr.bf16.mxu1 %v14352_v26  ;;  %7947 = vmatpush1.bf16.msra.mxu0 %v13230_v46  ;;  %v16840_v46 = vld [vmem:[#allocation102_spill] sm:$0xff] }
 0x46a   : > { %7948 = vmatprep.subr.bf16.mxu0 %v13241_v21  ;;  %11347 = vmatpush1.bf16.msra.mxu1 %v13242_v1  ;;  %v16842_v21 = vld [vmem:[#allocation104_spill] sm:$0xff]  ;;  %v16843_v1 = vld [vmem:[#allocation105_spill] sm:$0xff] }
 0x46b   : > { %11332 = vmatprep.subr.bf16.mxu1 %v13247_v25  ;;  %v16835_v25 = vld [vmem:[#allocation97_spill] sm:$0xff] }
 0x46d   : > { %7949 = vmatpush1.bf16.msra.mxu0 %v13239_v61  ;;  %v16844_v61 = vld [vmem:[#allocation106_spill] sm:$0xff] }
 0x46e   : > { %11348 = vmatpush1.bf16.msra.mxu1 %v13245_v10  ;;  %8111 = vmatprep.subr.bf16.mxu0 %v13250_v28  ;;  %v16845_v10 = vld [vmem:[#allocation12_spill] sm:$0xff] }
 0x46f   : > { %7066 = vmatmul.mubr.bf16.gmra.mrb[96].mxu0 %v14360_v38  ;;  %11021 = vmatprep.subr.bf16.mxu1 %v13275_v23  ;;  %v13248_v28 = vld [vmem:[#allocation5 + $0x520] ss:$40 sps:$4 sm:$0xff]   ;;  %v13253_v23 = vld [vmem:[#allocation5 + $0x574] ss:$40 sps:$4 sm:$0xff]  }
 0x470   : > { %7838 = vmatmul.mubr.bf16.gmra.mrb[96].mxu1 %v14360_v38  ;;  %7075 = vmatprep.mubr.bf16.mxu0 %v14362_v13 }
 0x471   : > { %7847 = vmatprep.mubr.bf16.mxu1 %v14362_v13 }
 0x477   : > { %7076 = vmatmul.mubr.bf16.gmra.mrb[100].mxu0 %v14370_v52 }
 0x478   : > { %7848 = vmatmul.mubr.bf16.gmra.mrb[100].mxu1 %v14370_v52  ;;  %7085 = vmatprep.mubr.bf16.mxu0 %v14372_v2 }
 0x479   : > { %7857 = vmatprep.mubr.bf16.mxu1 %v14372_v2 }
 0x47f   : > { %7086 = vmatmul.mubr.bf16.gmra.mrb[104].mxu0 %v16835_v25 }
 0x480   : > { %7858 = vmatmul.mubr.bf16.gmra.mrb[104].mxu1 %v16835_v25  ;;  %7095 = vmatprep.mubr.bf16.mxu0 %v16836_v37 }
 0x481   : > { %7867 = vmatprep.mubr.bf16.mxu1 %v16836_v37 }
 0x487   : > { %7096 = vmatmul.mubr.bf16.gmra.mrb[108].mxu0 %v16837_v57 }
 0x488   : > { %7868 = vmatmul.mubr.bf16.gmra.mrb[108].mxu1 %v16837_v57  ;;  %7105 = vmatprep.mubr.bf16.mxu0 %v16838_v35 }
 0x489   : > { %7877 = vmatprep.mubr.bf16.mxu1 %v16838_v35 }
 0x48f   : > { %7106 = vmatmul.mubr.bf16.gmra.mrb[112].mxu0 %v16839_v45 }
 0x490   : > { %7878 = vmatmul.mubr.bf16.gmra.mrb[112].mxu1 %v16839_v45  ;;  %7115 = vmatprep.mubr.bf16.mxu0 %v14402_v27 }
 0x491   : > { %7887 = vmatprep.mubr.bf16.mxu1 %v14402_v27 }
 0x497   : > { %7116 = vmatmul.mubr.bf16.gmra.mrb[116].mxu0 %v16840_v46 }
 0x498   : > { %7888 = vmatmul.mubr.bf16.gmra.mrb[116].mxu1 %v16840_v46  ;;  %7125 = vmatprep.mubr.bf16.mxu0 %v16841_v15 }
 0x499   : > { %7897 = vmatprep.mubr.bf16.mxu1 %v16841_v15 }
 0x49f   : > { %7126 = vmatmul.mubr.bf16.gmra.mrb[120].mxu0 %v16842_v21 }
 0x4a0   : > { %7898 = vmatmul.mubr.bf16.gmra.mrb[120].mxu1 %v16842_v21  ;;  %7135 = vmatprep.mubr.bf16.mxu0 %v16843_v1 }
 0x4a1   : > { %7907 = vmatprep.mubr.bf16.mxu1 %v16843_v1 }
 0x4a7   : > { %7136 = vmatmul.mubr.bf16.gmra.mrb[124].mxu0 %v16844_v61 }
 0x4a8   : > { %7908 = vmatmul.mubr.bf16.gmra.mrb[124].mxu1 %v16844_v61  ;;  %7950 = vmatprep.mubr.bf16.mxu0 %v16845_v10  ;;  %v13278_v10 = vld [vmem:[#allocation7 + $0x8] sm:$0xff]  }
 0x4a9   : > { %8569 = vmatprep.mubr.bf16.mxu1 %v16828_v44  ;;  %v13254_v44 = vld [vmem:[#allocation5 + $0x5c0] ss:$40 sps:$4 sm:$0xff]  }
 0x4af   : > { %7951 = vmatmul.mubr.bf16.vlgmr.msra.gmra.mrb[128].mxu0 %v13800_v7  ;;  %v13283_v7 = vld [vmem:[#allocation7 + $0x10] sm:$0xff]  }
 0x4b0   : > { %8570 = vmatmul.mubr.bf16.vlgmr.msra.gmra.mrb[128].mxu1 %v16829_v16  ;;  %8112 = vmatpush1.bf16.msra.mxu0 %v13248_v28  ;;  %v16846_v16 = vld [vmem:[#allocation13_spill] sm:$0xff]  ;;  %v16847_v28 = vld [vmem:[#allocation14_spill] sm:$0xff] }
 0x4b1   : > { %7960 = vmatprep.mubr.bf16.mxu0 %v13802_v9  ;;  %8579 = vmatprep.mubr.bf16.mxu1 %v16830_v18  ;;  %v13284_v9 = vld [vmem:[#allocation7 + $0x58] sm:$0xff]   ;;  %v13289_v18 = vld [vmem:[#allocation7 + $0x60] sm:$0xff]  }
 0x4b2   : > { %8113 = vmatprep.subr.bf16.mxu0 %v13253_v23  ;;  %11022 = vmatpush3.bf16.msra.mxu1 %v13276_v40  ;;  %v13257_v40 = vld [vmem:[#allocation5 + $0x610] ss:$40 sps:$4 sm:$0xff]   ;;  %v13265_v23 = vld [vmem:[#allocation5 + $0x6b4] ss:$40 sps:$4 sm:$0xff]  }
 0x4b3   : > { %11023 = vmatprep.subr.bf16.mxu1 %v13277_v32  ;;  %v13260_v32 = vld [vmem:[#allocation5 + $0x660] ss:$40 sps:$4 sm:$0xff]  }
 0x4b4   : > { %8114 = vmatpush1.bf16.msra.mxu0 %v13251_v14  ;;  %v13262_v14 = vld [vmem:[#allocation5 + $0x664] ss:$40 sps:$4 sm:$0xff]  }
 0x4b5   : > { %8115 = vmatprep.subr.bf16.mxu0 %v13256_v24  ;;  %v13285_v24 = vld [vmem:[#allocation7 + $0x18] sm:$0xff]  }
 0x4b6   : > { %11024 = vmatpush3.bf16.msra.mxu1 %v13278_v10  ;;  %v13292_v10 = vld [vmem:[#allocation7 + $0x28] sm:$0xff]  }
 0x4b7   : > { %7961 = vmatmul.mubr.bf16.gmra.mrb[132].mxu0 %v16846_v16  ;;  %11025 = vmatprep.subr.bf16.mxu1 %v13282_v49  ;;  %v13263_v49 = vld [vmem:[#allocation5 + $0x6b0] ss:$40 sps:$4 sm:$0xff]   ;;  %v13274_v16 = vld [vmem:[#allocation5 + $0x7a4] ss:$40 sps:$4 sm:$0xff]  }
 0x4b8   : > { %8580 = vmatmul.mubr.bf16.gmra.mrb[132].mxu1 %v16831_v8  ;;  %7970 = vmatprep.mubr.bf16.mxu0 %v16847_v28  ;;  %v13290_v8 = vld [vmem:[#allocation7 + $0x20] sm:$0xff]  }
 0x4b9   : > { %8589 = vmatprep.mubr.bf16.mxu1 %v16832_v62  ;;  %8116 = vmatpush1.bf16.msra.mxu0 %v13254_v44  ;;  %v13291_v62 = vld [vmem:[#allocation7 + $0x68] sm:$0xff]  }
 0x4ba   : > { %8117 = vmatprep.subr.bf16.mxu0 %v13259_v39  ;;  %11026 = vmatpush3.bf16.msra.mxu1 %v13283_v7  ;;  %v13268_v39 = vld [vmem:[#allocation5 + $0x704] ss:$40 sps:$4 sm:$0xff]   ;;  %v13266_v44 = vld [vmem:[#allocation5 + $0x700] ss:$40 sps:$4 sm:$0xff]   ;;  %v13296_v7 = vld [vmem:[#allocation7 + $0x70] sm:$0xff]  }
 0x4bb   : > { %11027 = vmatprep.subr.bf16.mxu1 %v13284_v9  ;;  %v13299_v9 = vld [vmem:[#allocation7 + $0x38] sm:$0xff]   ;;  %v13272_v28 = vld [vmem:[#allocation5 + $0x7a0] ss:$40 sps:$4 sm:$0xff]  }
 0x4bd   : > { %8118 = vmatpush1.bf16.msra.mxu0 %v13257_v40  ;;  %v13281_v40 = vld [vmem:[#allocation5 + $0x7f4] ss:$40 sps:$4 sm:$0xff]  }
 0x4be   : > { %8119 = vmatprep.subr.bf16.mxu0 %v13262_v14  ;;  %11028 = vmatpush3.bf16.msra.mxu1 %v13285_v24 }
 0x4bf   : > { %7971 = vmatmul.mubr.bf16.gmra.mrb[136].mxu0 %v13820_v30  ;;  %11029 = vmatprep.subr.bf16.mxu1 %v13289_v18  ;;  %v13271_v30 = vld [vmem:[#allocation5 + $0x754] ss:$40 sps:$4 sm:$0xff]  }
 0x4c0   : > { %8590 = vmatmul.mubr.bf16.gmra.mrb[136].mxu1 %v16833_v51  ;;  %7980 = vmatprep.mubr.bf16.mxu0 %v13822_v31  ;;  %v13297_v51 = vld [vmem:[#allocation7 + $0x30] sm:$0xff]   ;;  %v13298_v31 = vld [vmem:[#allocation7 + $0x78] sm:$0xff]  }
 0x4c1   : > { %8599 = vmatprep.mubr.bf16.mxu1 %v16834_v41  ;;  %8120 = vmatpush1.bf16.msra.mxu0 %v13260_v32  ;;  %v13269_v41 = vld [vmem:[#allocation5 + $0x750] ss:$40 sps:$4 sm:$0xff]  }
 0x4c2   : > { %8121 = vmatprep.subr.bf16.mxu0 %v13265_v23  ;;  %11030 = vmatpush3.bf16.msra.mxu1 %v13290_v8 }
 0x4c3   : > { %11031 = vmatprep.subr.bf16.mxu1 %v13291_v62 }
 0x4c5   : > { %8122 = vmatpush1.bf16.msra.mxu0 %v13263_v49 }
 0x4c6   : > { %8123 = vmatprep.subr.bf16.mxu0 %v13268_v39  ;;  %11032 = vmatpush3.bf16.msra.mxu1 %v13292_v10  ;;  %v16854_v10 = vld [vmem:[#allocation110_spill] sm:$0xff] }
 0x4c7   : > { %7981 = vmatmul.mubr.bf16.gmra.mrb[140].mxu0 %v13830_v42  ;;  %11033 = vmatprep.subr.bf16.mxu1 %v13296_v7  ;;  %v13279_v42 = vld [vmem:[#allocation5 + $0x7f0] ss:$40 sps:$4 sm:$0xff]   ;;  %v16855_v7 = vld [vmem:[#allocation112_spill] sm:$0xff] }
 0x4c8   : > { %8600 = vmatmul.mubr.bf16.gmra.mrb[140].mxu1 %v14350_v50  ;;  %7990 = vmatprep.mubr.bf16.mxu0 %v13832_v43  ;;  %v13288_v43 = vld [vmem:[#allocation5 + $0x844] ss:$40 sps:$4 sm:$0xff]   ;;  %v13286_v50 = vld [vmem:[#allocation5 + $0x840] ss:$40 sps:$4 sm:$0xff]  }
 0x4c9   : > { %8609 = vmatprep.mubr.bf16.mxu1 %v14352_v26  ;;  %8124 = vmatpush1.bf16.msra.mxu0 %v13266_v44  ;;  %v13295_v26 = vld [vmem:[#allocation5 + $0x894] ss:$40 sps:$4 sm:$0xff]   ;;  %v8700_v44 = vmul.f32 %v16854_v10, %v16854_v10 }
 0x4ca   : > { %8125 = vmatprep.subr.bf16.mxu0 %v13271_v30  ;;  %11034 = vmatpush3.bf16.msra.mxu1 %v13297_v51 }
 0x4cb   : > { %11035 = vmatprep.subr.bf16.mxu1 %v13298_v31  ;;  %v16856_v31 = vld [vmem:[#allocation111_spill] sm:$0xff] }
 0x4cd   : > { %8126 = vmatpush1.bf16.msra.mxu0 %v13269_v41  ;;  %v16857_v41 = vld [vmem:[#allocation114_spill] sm:$0xff] }
 0x4ce   : > { %8127 = vmatprep.subr.bf16.mxu0 %v13274_v16  ;;  %11036 = vmatpush3.bf16.msra.mxu1 %v13299_v9  ;;  %v8705_v16 = vmul.f32 %v16857_v41, %v16857_v41 }
 0x4cf   : > { %7991 = vmatmul.mubr.bf16.gmra.mrb[144].mxu0 %v13840_v55  ;;  %v13293_v55 = vld [vmem:[#allocation5 + $0x890] ss:$40 sps:$4 sm:$0xff]  }
 0x4d0   : > { %8610 = vmatmul.mubr.bf16.gmra.mrb[144].mxu1 %v14360_v38  ;;  %8000 = vmatprep.mubr.bf16.mxu0 %v13842_v56  ;;  %v13302_v56 = vld [vmem:[#allocation5 + $0x8e4] ss:$40 sps:$4 sm:$0xff]   ;;  %v13300_v38 = vld [vmem:[#allocation5 + $0x8e0] ss:$40 sps:$4 sm:$0xff]  }
 0x4d1   : > { %8619 = vmatprep.mubr.bf16.mxu1 %v14362_v13  ;;  %8128 = vmatpush1.bf16.msra.mxu0 %v13272_v28  ;;  %v13305_v13 = vld [vmem:[#allocation5 + $0x934] ss:$40 sps:$4 sm:$0xff]  }
 0x4d2   : > { %8129 = vmatprep.subr.bf16.mxu0 %v13281_v40 }
 0x4d5   : > { %8130 = vmatpush1.bf16.msra.mxu0 %v13279_v42 }
 0x4d6   : > { %8131 = vmatprep.subr.bf16.mxu0 %v13288_v43  ;;  %v16859_v43 = vld [vmem:[#allocation115_spill] sm:$0xff] }
 0x4d7   : > { %8001 = vmatmul.mubr.bf16.gmra.mrb[148].mxu0 %v13850_v3  ;;  %v13303_v3 = vld [vmem:[#allocation5 + $0x930] ss:$40 sps:$4 sm:$0xff]  }
 0x4d8   : > { %8620 = vmatmul.mubr.bf16.gmra.mrb[148].mxu1 %v14370_v52  ;;  %8010 = vmatprep.mubr.bf16.mxu0 %v13852_v4  ;;  %v13308_v4 = vld [vmem:[#allocation5 + $0x984] ss:$40 sps:$4 sm:$0xff]   ;;  %v13306_v52 = vld [vmem:[#allocation5 + $0x980] ss:$40 sps:$4 sm:$0xff]  }
 0x4d9   : > { %8629 = vmatprep.mubr.bf16.mxu1 %v14372_v2  ;;  %8132 = vmatpush1.bf16.msra.mxu0 %v13286_v50  ;;  %v13311_v2 = vld [vmem:[#allocation5 + $0x9d4] ss:$40 sps:$4 sm:$0xff]   ;;  %v8707_v50 = vmul.f32 %v16859_v43, %v16859_v43 }
 0x4da   : > { %8133 = vmatprep.subr.bf16.mxu0 %v13295_v26  ;;  %v16860_v26 = vld [vmem:[#allocation116_spill] sm:$0xff]  ;;  %v16874_v43 = vld [vmem:[#allocation126_spill] sm:$0xff] }
 0x4dd   : > { %8134 = vmatpush1.bf16.msra.mxu0 %v13293_v55  ;;  %v8706_v55 = vmul.f32 %v16860_v26, %v16860_v26  ;;  %v16875_v26 = vld [vmem:[#allocation128_spill] sm:$0xff] }
 0x4de   : > { %8135 = vmatprep.subr.bf16.mxu0 %v13302_v56 }
 0x4df   : > { %8011 = vmatmul.mubr.bf16.gmra.mrb[152].mxu0 %v13860_v17  ;;  %v13309_v17 = vld [vmem:[#allocation5 + $0x9d0] ss:$40 sps:$4 sm:$0xff]  }
 0x4e0   : > { %8630 = vmatmul.mubr.bf16.gmra.mrb[152].mxu1 %v16835_v25  ;;  %8020 = vmatprep.mubr.bf16.mxu0 %v13862_v22  ;;  %v13314_v22 = vld [vmem:[#allocation5 + $0xa24] ss:$40 sps:$4 sm:$0xff]  }
 0x4e1   : > { %8639 = vmatprep.mubr.bf16.mxu1 %v16836_v37  ;;  %8136 = vmatpush1.bf16.msra.mxu0 %v13300_v38 }
 0x4e2   : > { %8137 = vmatprep.subr.bf16.mxu0 %v13305_v13 }
 0x4e5   : > { %8138 = vmatpush1.bf16.msra.mxu0 %v13303_v3 }
 0x4e6   : > { %8139 = vmatprep.subr.bf16.mxu0 %v13308_v4 }
 0x4e7   : > { %8021 = vmatmul.mubr.bf16.gmra.mrb[156].mxu0 %v13870_v33 }
 0x4e8   : > { %8640 = vmatmul.mubr.bf16.gmra.mrb[156].mxu1 %v16837_v57  ;;  %8030 = vmatprep.mubr.bf16.mxu0 %v13872_v36 }
 0x4e9   : > { %8649 = vmatprep.mubr.bf16.mxu1 %v16838_v35  ;;  %8140 = vmatpush1.bf16.msra.mxu0 %v13306_v52 }
 0x4ea   : > { %8141 = vmatprep.subr.bf16.mxu0 %v13311_v2 }
 0x4ed   : > { %8142 = vmatpush1.bf16.msra.mxu0 %v13309_v17 }
 0x4ee   : > { %8304 = vmatprep.subr.bf16.mxu0 %v13314_v22 }
 0x4ef   : > { %8031 = vmatmul.mubr.bf16.gmra.mrb[160].mxu0 %v13880_v47  ;;  %v8690_v47 = vmul.f32 %v14478_v20, %v14478_v20  ;;  %v8697_v20 = vmul.f32 %v14488_v58, %v14488_v58 }
 0x4f0   : > { %8650 = vmatmul.mubr.bf16.gmra.mrb[160].mxu1 %v16839_v45  ;;  %8040 = vmatprep.mubr.bf16.mxu0 %v13882_v48  ;;  %v8691_v48 = vmul.f32 %v14482_v34, %v14482_v34  ;;  %v16850_v45 = vld [vmem:[#allocation108_spill] sm:$0xff] }
 0x4f1   : > { %8659 = vmatprep.mubr.bf16.mxu1 %v14402_v27  ;;  %v8696_v34 = vmul.f32 %v16850_v45, %v16850_v45 }
 0x4f7   : > { %8041 = vmatmul.mubr.bf16.gmra.mrb[164].mxu0 %v13890_v53 }
 0x4f8   : > { %8660 = vmatmul.mubr.bf16.gmra.mrb[164].mxu1 %v16840_v46  ;;  %8050 = vmatprep.mubr.bf16.mxu0 %v13892_v54 }
 0x4f9   : > { %8669 = vmatprep.mubr.bf16.mxu1 %v16841_v15 }
 0x4ff   : > { %8051 = vmatmul.mubr.bf16.gmra.mrb[168].mxu0 %v13900_v59  ;;  %v8692_v59 = vmul.f32 %v14480_v29, %v14480_v29 }
 0x500   : > { %8670 = vmatmul.mubr.bf16.gmra.mrb[168].mxu1 %v16842_v21  ;;  %8060 = vmatprep.mubr.bf16.mxu0 %v13902_v60  ;;  %v8695_v60 = vmul.f32 %v14486_v19, %v14486_v19 }
 0x501   : > { %8679 = vmatprep.mubr.bf16.mxu1 %v16843_v1 }
 0x502   : > { %v14990_v33 = vpop.f32.mrb[64].mxu0 }
 0x503   : > { %16848 = vst [vmem:[#allocation90_spill] sm:$0xff] %v14990_v33  ;;  %v7759_v36 = vpop.f32.mrb[64].mxu1  ;;  %v6989_v54 = vpop.f32.mrb[65].mxu0 }
 0x504   : > { %v8851_v53 = vmul.f32 %v7759_v36, %v7759_v36  ;;  %v7761_v27 = vpop.f32.mrb[65].mxu1  ;;  %v8850_v25 = vmul.f32 %v6989_v54, %v6989_v54  ;;  %v15000_v57 = vpop.f32.mrb[66].mxu0 }
 0x505   : > { %v8852_v37 = vmul.f32 %v7761_v27, %v7761_v27  ;;  %16849 = vst [vmem:[#allocation91_spill] sm:$0xff] %v15000_v57  ;;  %v7763_v35 = vpop.f32.mrb[66].mxu1  ;;  %v6993_v21 = vpop.f32.mrb[67].mxu0  ;;  %v17027_v57 = vld [vmem:[#allocation55_spill] sm:$0xff] }
 0x506   : > { %v9011_v46 = vadd.f32 %v8851_v53, %v8691_v48  ;;  %v8856_v15 = vmul.f32 %v7763_v35, %v7763_v35  ;;  %v7765_v1 = vpop.f32.mrb[67].mxu1  ;;  %v9010_v14 = vadd.f32 %v8850_v25, %v8690_v47  ;;  %v8855_v24 = vmul.f32 %v6993_v21, %v6993_v21 }
 0x507   : > { %v15006_v29 = vadd.f32 %v8852_v37, %v8692_v59  ;;  %v8857_v19 = vmul.f32 %v7765_v1, %v7765_v1  ;;  %8061 = vmatmul.mubr.bf16.gmra.mrb[172].mxu0 %v13910_v63  ;;  %v8701_v63 = vmul.f32 %v16855_v7, %v16855_v7  ;;  %v16865_v37 = vld [vmem:[#allocation120_spill] sm:$0xff] }
 0x508   : > { %v9016_v32 = vadd.f32 %v8856_v15, %v8696_v34  ;;  %8680 = vmatmul.mubr.bf16.gmra.mrb[172].mxu1 %v16844_v61  ;;  %v9015_v18 = vadd.f32 %v8855_v24, %v8695_v60  ;;  %8070 = vmatprep.mubr.bf16.mxu0 %v13912_v0  ;;  %v8702_v0 = vmul.f32 %v16856_v31, %v16856_v31  ;;  %v16864_v60 = vld [vmem:[#allocation118_spill] sm:$0xff]  ;;  %v16866_v34 = vld [vmem:[#allocation119_spill] sm:$0xff] }
 0x509   : > { %16851 = vst [vmem:[#allocation92_spill] sm:$0xff] %v15006_v29  ;;  %v15010_v23 = vadd.f32 %v8857_v19, %v8697_v20  ;;  %v8710_v25 = vmul.f32 %v16864_v60, %v16864_v60  ;;  %v16869_v19 = vld [vmem:[#allocation123_spill] sm:$0xff] }
 0x50a   : > { %v9171_v58 = vpack.c.bf16 %v9016_v32, %v9011_v46  ;;  %v9170_v8 = vpack.c.bf16 %v9015_v18, %v9010_v14  ;;  %v15015_v49 = vpop.f32.mrb[68].mxu0  ;;  %v16867_v46 = vld [vmem:[#allocation122_spill] sm:$0xff]  ;;  %v8717_v32 = vmul.f32 %v16869_v19, %v16869_v19  ;;  %v16870_v18 = vld [vmem:[#allocation124_spill] sm:$0xff] }
 0x50b   : > { %16852 = vst [vmem:[#allocation93_spill] sm:$0xff] %v15010_v23  ;;  %16853 = vst [vmem:[#allocation94_spill] sm:$0xff] %v15015_v49  ;;  %v7769_v39 = vpop.f32.mrb[68].mxu1  ;;  %v6999_v30 = vpop.f32.mrb[69].mxu0  ;;  %v8715_v15 = vmul.f32 %v16867_v46, %v16867_v46  ;;  %v13391_v23 = vld [vmem:[#allocation5 + $0x1010] ss:$40 sps:$4 sm:$0xff]  }
 0x50c   : > { %v8861_v61 = vmul.f32 %v7769_v39, %v7769_v39  ;;  %v7771_v51 = vpop.f32.mrb[69].mxu1  ;;  %9602 = vmatprep.mubr.bf16.mxu1 %v9171_v58  ;;  %v8860_v9 = vmul.f32 %v6999_v30, %v6999_v30  ;;  %v15025_v40 = vpop.f32.mrb[70].mxu0  ;;  %v8716_v58 = vmul.f32 %v16870_v18, %v16870_v18  ;;  %v13392_v49 = vld [vmem:[#allocation5 + $0x1064] ss:$40 sps:$4 sm:$0xff]  }
 0x50d   : > { %v8862_v28 = vmul.f32 %v7771_v51, %v7771_v51  ;;  %16858 = vst [vmem:[#allocation95_spill] sm:$0xff] %v15025_v40  ;;  %v7773_v42 = vpop.f32.mrb[70].mxu1  ;;  %v7003_v13 = vpop.f32.mrb[71].mxu0  ;;  %v17025_v40 = vld [vmem:[#allocation53_spill] sm:$0xff] }
 0x50e   : > { %v9021_v56 = vadd.f32 %v8861_v61, %v8701_v63  ;;  %v8866_v38 = vmul.f32 %v7773_v42, %v7773_v42  ;;  %v7775_v3 = vpop.f32.mrb[71].mxu1  ;;  %v9020_v4 = vadd.f32 %v8860_v9, %v8700_v44  ;;  %v8865_v2 = vmul.f32 %v7003_v13, %v7003_v13  ;;  %v16876_v13 = vld [vmem:[#allocation127_spill] sm:$0xff]  ;;  %v16934_v42 = vld [vmem:[#allocation26_spill] sm:$0xff] }
 0x50f   : > { %v15031_v52 = vadd.f32 %v8862_v28, %v8702_v0  ;;  %v8867_v17 = vmul.f32 %v7775_v3, %v7775_v3  ;;  %8071 = vmatmul.mubr.bf16.gmra.mrb[176].mxu0 %v13920_v5  ;;  %v8711_v5 = vmul.f32 %v16865_v37, %v16865_v37  ;;  %v16877_v3 = vld [vmem:[#allocation130_spill] sm:$0xff] }
 0x510   : > { %v9026_v22 = vadd.f32 %v8866_v38, %v8706_v55  ;;  %9603 = vmatmul.mubr.bf16.vlgmr.msra.gmra.mrb[176].mxu1 %v9170_v8  ;;  %v9025_v36 = vadd.f32 %v8865_v2, %v8705_v16  ;;  %8080 = vmatprep.mubr.bf16.mxu0 %v13922_v6  ;;  %v8712_v6 = vmul.f32 %v16866_v34, %v16866_v34 }
 0x511   : > { %16861 = vst [vmem:[#allocation96_spill] sm:$0xff] %v15031_v52  ;;  %v15034_v47 = vadd.f32 %v8867_v17, %v8707_v50  ;;  %v8720_v50 = vmul.f32 %v16874_v43, %v16874_v43 }
 0x512   : > { %v9176_v48 = vpack.c.bf16 %v9026_v22, %v9021_v56  ;;  %v15037_v53 = vpop.f32.mrb[72].mxu0  ;;  %v9175_v27 = vpack.c.bf16 %v9025_v36, %v9020_v4  ;;  %v8725_v4 = vmul.f32 %v16877_v3, %v16877_v3 }
 0x513   : > { %16862 = vst [vmem:[#allocation97_spill] sm:$0xff] %v15034_v47  ;;  %16863 = vst [vmem:[#allocation98_spill] sm:$0xff] %v15037_v53  ;;  %v7779_v54 = vpop.f32.mrb[72].mxu1  ;;  %v7009_v20 = vpop.f32.mrb[73].mxu0  ;;  %v13388_v47 = vld [vmem:[#allocation5 + $0xfc4] ss:$40 sps:$4 sm:$0xff]  }
 0x514   : > { %v8871_v35 = vmul.f32 %v7779_v54, %v7779_v54  ;;  %v7781_v45 = vpop.f32.mrb[73].mxu1  ;;  %9610 = vmatprep.mubr.bf16.mxu1 %v9176_v48  ;;  %v8870_v21 = vmul.f32 %v7009_v20, %v7009_v20  ;;  %v15049_v14 = vpop.f32.mrb[74].mxu0  ;;  %v16879_v48 = vld [vmem:[#allocation131_spill] sm:$0xff] }
 0x515   : > { %v8872_v1 = vmul.f32 %v7781_v45, %v7781_v45  ;;  %16868 = vst [vmem:[#allocation99_spill] sm:$0xff] %v15049_v14  ;;  %v7783_v24 = vpop.f32.mrb[74].mxu1  ;;  %v7013_v10 = vpop.f32.mrb[75].mxu0  ;;  %v8727_v54 = vmul.f32 %v16879_v48, %v16879_v48 }
 0x516   : > { %v9031_v8 = vadd.f32 %v8871_v35, %v8711_v5  ;;  %v8876_v39 = vmul.f32 %v7783_v24, %v7783_v24  ;;  %v7785_v44 = vpop.f32.mrb[75].mxu1  ;;  %v9030_v7 = vadd.f32 %v8870_v21, %v8710_v25  ;;  %v8875_v61 = vmul.f32 %v7013_v10, %v7013_v10  ;;  %v16884_v24 = vld [vmem:[#allocation16_spill] sm:$0xff] }
 0x517   : > { %v15055_v63 = vadd.f32 %v8872_v1, %v8712_v6  ;;  %v8877_v30 = vmul.f32 %v7785_v44, %v7785_v44  ;;  %8081 = vmatmul.mubr.bf16.gmra.mrb[180].mxu0 %v13930_v11  ;;  %v8721_v11 = vmul.f32 %v16875_v26, %v16875_v26  ;;  %v16886_v44 = vld [vmem:[#allocation136_spill] sm:$0xff] }
 0x518   : > { %v9036_v51 = vadd.f32 %v8876_v39, %v8716_v58  ;;  %9611 = vmatmul.mubr.bf16.gmra.mrb[180].mxu1 %v9175_v27  ;;  %v9035_v31 = vadd.f32 %v8875_v61, %v8715_v15  ;;  %8090 = vmatprep.mubr.bf16.mxu0 %v13932_v12  ;;  %v8722_v12 = vmul.f32 %v16876_v13, %v16876_v13  ;;  %v16880_v27 = vld [vmem:[#allocation132_spill] sm:$0xff]  ;;  %v16882_v15 = vld [vmem:[#allocation15_spill] sm:$0xff]  ;;  %v16885_v39 = vld [vmem:[#allocation134_spill] sm:$0xff] }
 0x519   : > { %16871 = vst [vmem:[#allocation100_spill] sm:$0xff] %v15055_v63  ;;  %v15058_v0 = vadd.f32 %v8877_v30, %v8717_v32  ;;  %v8726_v60 = vmul.f32 %v16880_v27, %v16880_v27  ;;  %v8730_v10 = vmul.f32 %v16885_v39, %v16885_v39  ;;  %v13385_v63 = vld [vmem:[#allocation5 + $0xf20] ss:$40 sps:$4 sm:$0xff]  }
 0x51a   : > { %v9181_v41 = vpack.c.bf16 %v9036_v51, %v9031_v8  ;;  %v15061_v16 = vpop.f32.mrb[76].mxu0  ;;  %v9180_v28 = vpack.c.bf16 %v9035_v31, %v9030_v7  ;;  %v8731_v7 = vmul.f32 %v16886_v44, %v16886_v44  ;;  %v16887_v31 = vld [vmem:[#allocation135_spill] sm:$0xff] }
 0x51b   : > { %16872 = vst [vmem:[#allocation101_spill] sm:$0xff] %v15058_v0  ;;  %16873 = vst [vmem:[#allocation102_spill] sm:$0xff] %v15061_v16  ;;  %v7789_v9 = vpop.f32.mrb[76].mxu1  ;;  %v7019_v56 = vpop.f32.mrb[77].mxu0  ;;  %v17024_v0 = vld [vmem:[#allocation52_spill] sm:$0xff] }
 0x51c   : > { %v8881_v55 = vmul.f32 %v7789_v9, %v7789_v9  ;;  %v7791_v38 = vpop.f32.mrb[77].mxu1  ;;  %9618 = vmatprep.mubr.bf16.mxu1 %v9181_v41  ;;  %v8880_v2 = vmul.f32 %v7019_v56, %v7019_v56  ;;  %v15073_v22 = vpop.f32.mrb[78].mxu0  ;;  %v8732_v41 = vmul.f32 %v16887_v31, %v16887_v31  ;;  %v16888_v9 = vld [vmem:[#allocation138_spill] sm:$0xff] }
 0x51d   : > { %v8882_v17 = vmul.f32 %v7791_v38, %v7791_v38  ;;  %16878 = vst [vmem:[#allocation103_spill] sm:$0xff] %v15073_v22  ;;  %v7793_v36 = vpop.f32.mrb[78].mxu1  ;;  %v7023_v5 = vpop.f32.mrb[79].mxu0  ;;  %v16890_v38 = vld [vmem:[#allocation140_spill] sm:$0xff]  ;;  %v13386_v16 = vld [vmem:[#allocation5 + $0xf74] ss:$40 sps:$4 sm:$0xff]  }
 0x51e   : > { %v9041_v25 = vadd.f32 %v8881_v55, %v8721_v11  ;;  %v8886_v37 = vmul.f32 %v7793_v36, %v7793_v36  ;;  %v7795_v35 = vpop.f32.mrb[79].mxu1  ;;  %v9040_v20 = vadd.f32 %v8880_v2, %v8720_v50  ;;  %v8885_v34 = vmul.f32 %v7023_v5, %v7023_v5  ;;  %v16889_v55 = vld [vmem:[#allocation139_spill] sm:$0xff]  ;;  %v16894_v5 = vld [vmem:[#allocation18_spill] sm:$0xff] }
 0x51f   : > { %v15079_v45 = vadd.f32 %v8882_v17, %v8722_v12  ;;  %v8887_v6 = vmul.f32 %v7795_v35, %v7795_v35  ;;  %8091 = vmatmul.mubr.bf16.gmra.mrb[184].mxu0 %v16882_v15  ;;  %v8737_v56 = vmul.f32 %v16889_v55, %v16889_v55  ;;  %v8736_v13 = vmul.f32 %v16890_v38, %v16890_v38  ;;  %v16895_v15 = vld [vmem:[#allocation142_spill] sm:$0xff] }
 0x520   : > { %v9046_v46 = vadd.f32 %v8886_v37, %v8726_v60  ;;  %9619 = vmatmul.mubr.bf16.gmra.mrb[184].mxu1 %v9180_v28  ;;  %v9045_v21 = vadd.f32 %v8885_v34, %v8725_v4  ;;  %8100 = vmatprep.mubr.bf16.mxu0 %v16884_v24  ;;  %v8735_v28 = vmul.f32 %v16888_v9, %v16888_v9  ;;  %v16892_v60 = vld [vmem:[#allocation17_spill] sm:$0xff]  ;;  %v16896_v24 = vld [vmem:[#allocation144_spill] sm:$0xff] }
 0x521   : > { %16881 = vst [vmem:[#allocation104_spill] sm:$0xff] %v15079_v45  ;;  %v15082_v1 = vadd.f32 %v8887_v6, %v8727_v54  ;;  %v13312_v9 = vld [vmem:[#allocation5 + $0xa20] ss:$40 sps:$4 sm:$0xff]  }
 0x522   : > { %v9186_v19 = vpack.c.bf16 %v9046_v46, %v9041_v25  ;;  %v15085_v32 = vpop.f32.mrb[80].mxu0  ;;  %v9185_v58 = vpack.c.bf16 %v9045_v21, %v9040_v20  ;;  %v8740_v21 = vmul.f32 %v16895_v15, %v16895_v15 }
 0x523   : > { %16883 = vst [vmem:[#allocation105_spill] sm:$0xff] %v15082_v1  ;;  %v7799_v18 = vpop.f32.mrb[80].mxu1  ;;  %v7029_v30 = vpop.f32.mrb[81].mxu0 }
 0x524   : > { %v8891_v61 = vmul.f32 %v7799_v18, %v7799_v18  ;;  %v7801_v51 = vpop.f32.mrb[81].mxu1  ;;  %9626 = vmatprep.mubr.bf16.mxu1 %v9186_v19  ;;  %v8890_v43 = vmul.f32 %v7029_v30, %v7029_v30  ;;  %v15097_v26 = vpop.f32.mrb[82].mxu0  ;;  %v8741_v19 = vmul.f32 %v16896_v24, %v16896_v24 }
 0x525   : > { %v8892_v50 = vmul.f32 %v7801_v51, %v7801_v51  ;;  %v7803_v11 = vpop.f32.mrb[82].mxu1  ;;  %v7033_v4 = vpop.f32.mrb[83].mxu0 }
 0x526   : > { %v9051_v12 = vadd.f32 %v8891_v61, %v8731_v7  ;;  %v8896_v3 = vmul.f32 %v7803_v11, %v7803_v11  ;;  %v7805_v2 = vpop.f32.mrb[83].mxu1  ;;  %v9050_v17 = vadd.f32 %v8890_v43, %v8730_v10  ;;  %v8895_v48 = vmul.f32 %v7033_v4, %v7033_v4  ;;  %v16897_v10 = vld [vmem:[#allocation143_spill] sm:$0xff]  ;;  %v16898_v7 = vld [vmem:[#allocation146_spill] sm:$0xff] }
 0x527   : > { %v15103_v36 = vadd.f32 %v8892_v50, %v8732_v41  ;;  %v8897_v54 = vmul.f32 %v7805_v2, %v7805_v2  ;;  %8101 = vmatmul.mubr.bf16.gmra.mrb[188].mxu0 %v16892_v60  ;;  %v8742_v44 = vmul.f32 %v16897_v10, %v16897_v10  ;;  %v8745_v61 = vmul.f32 %v16898_v7, %v16898_v7  ;;  %v16900_v50 = vld [vmem:[#allocation148_spill] sm:$0xff] }
 0x528   : > { %v9056_v27 = vadd.f32 %v8896_v3, %v8736_v13  ;;  %9627 = vmatmul.mubr.bf16.gmra.mrb[188].mxu1 %v9185_v58  ;;  %v9055_v25 = vadd.f32 %v8895_v48, %v8735_v28  ;;  %8143 = vmatprep.mubr.bf16.mxu0 %v16894_v5  ;;  %v16899_v28 = vld [vmem:[#allocation147_spill] sm:$0xff]  ;;  %v8746_v11 = vmul.f32 %v16900_v50, %v16900_v50 }
 0x529   : > { %16891 = vst [vmem:[#allocation106_spill] sm:$0xff] %v15103_v36  ;;  %v15106_v37 = vadd.f32 %v8897_v54, %v8737_v56  ;;  %v8747_v43 = vmul.f32 %v16899_v28, %v16899_v28  ;;  %v16902_v54 = vld [vmem:[#allocation19_spill] sm:$0xff] }
 0x52a   : > { %v9191_v35 = vpack.c.bf16 %v9056_v27, %v9051_v12  ;;  %v15111_v34 = vpop.f32.mrb[84].mxu0  ;;  %v9190_v46 = vpack.c.bf16 %v9055_v25, %v9050_v17  ;;  %v13317_v12 = vld [vmem:[#allocation5 + $0xa74] ss:$40 sps:$4 sm:$0xff]   ;;  %v16904_v25 = vld [vmem:[#allocation20_spill] sm:$0xff]  ;;  %v13315_v5 = vld [vmem:[#allocation5 + $0xa70] ss:$40 sps:$4 sm:$0xff]  }
 0x52b   : > { %16893 = vst [vmem:[#allocation12_spill] sm:$0xff] %v15106_v37  ;;  %v7809_v6 = vpop.f32.mrb[84].mxu1  ;;  %v7039_v58 = vpop.f32.mrb[85].mxu0 }
 0x52c   : > { %v8901_v18 = vmul.f32 %v7809_v6, %v7809_v6  ;;  %v7811_v39 = vpop.f32.mrb[85].mxu1  ;;  %9634 = vmatprep.mubr.bf16.mxu1 %v9191_v35  ;;  %v8900_v30 = vmul.f32 %v7039_v58, %v7039_v58  ;;  %v15121_v31 = vpop.f32.mrb[86].mxu0  ;;  %v13320_v6 = vld [vmem:[#allocation5 + $0xac4] ss:$40 sps:$4 sm:$0xff]  }
 0x52d   : > { %v8902_v51 = vmul.f32 %v7811_v39, %v7811_v39  ;;  %v7813_v41 = vpop.f32.mrb[86].mxu1  ;;  %v7043_v38 = vpop.f32.mrb[87].mxu0  ;;  %v16906_v58 = vld [vmem:[#allocation152_spill] sm:$0xff] }
 0x52e   : > { %v9061_v55 = vadd.f32 %v8901_v18, %v8741_v19  ;;  %v8906_v56 = vmul.f32 %v7813_v41, %v7813_v41  ;;  %v7815_v13 = vpop.f32.mrb[87].mxu1  ;;  %v9060_v3 = vadd.f32 %v8900_v30, %v8740_v21  ;;  %v8905_v2 = vmul.f32 %v7043_v38, %v7043_v38  ;;  %v16905_v18 = vld [vmem:[#allocation150_spill] sm:$0xff]  ;;  %v16910_v38 = vld [vmem:[#allocation156_spill] sm:$0xff] }
 0x52f   : > { %v15127_v4 = vadd.f32 %v8902_v51, %v8742_v44  ;;  %v8907_v17 = vmul.f32 %v7815_v13, %v7815_v13  ;;  %8144 = vmatmul.mubr.bf16.vlgmr.msra.gmra.mrb[128].mxu0 %v16902_v54  ;;  %v8751_v39 = vmul.f32 %v16906_v58, %v16906_v58  ;;  %v16908_v51 = vld [vmem:[#allocation154_spill] sm:$0xff]  ;;  %v8756_v13 = vmul.f32 %v16910_v38, %v16910_v38 }
 0x530   : > { %v9066_v48 = vadd.f32 %v8906_v56, %v8746_v11  ;;  %9635 = vmatmul.mubr.bf16.gmra.mrb[192].mxu1 %v9190_v46  ;;  %v9065_v27 = vadd.f32 %v8905_v2, %v8745_v61  ;;  %8305 = vmatpush1.bf16.msra.mxu0 %v13312_v9  ;;  %v8750_v46 = vmul.f32 %v16905_v18, %v16905_v18  ;;  %v16907_v61 = vld [vmem:[#allocation151_spill] sm:$0xff]  ;;  %v13318_v11 = vld [vmem:[#allocation5 + $0xac0] ss:$40 sps:$4 sm:$0xff]   ;;  %v16918_v38 = vld [vmem:[#allocation162_spill] sm:$0xff] }
 0x531   : > { %16901 = vst [vmem:[#allocation13_spill] sm:$0xff] %v15127_v4  ;;  %v15130_v60 = vadd.f32 %v8907_v17, %v8747_v43  ;;  %8153 = vmatprep.mubr.bf16.mxu0 %v16904_v25  ;;  %8306 = vmatprep.subr.bf16.mxu0 %v13317_v12  ;;  %v8752_v30 = vmul.f32 %v16907_v61, %v16907_v61 }
 0x532   : > { %v9196_v35 = vpack.c.bf16 %v9066_v48, %v9061_v55  ;;  %v15135_v21 = vpop.f32.mrb[88].mxu0  ;;  %v9195_v19 = vpack.c.bf16 %v9065_v27, %v9060_v3  ;;  %v8755_v41 = vmul.f32 %v16908_v51, %v16908_v51  ;;  %v16909_v55 = vld [vmem:[#allocation155_spill] sm:$0xff]  ;;  %v16915_v51 = vld [vmem:[#allocation158_spill] sm:$0xff] }
 0x533   : > { %16903 = vst [vmem:[#allocation14_spill] sm:$0xff] %v15130_v60  ;;  %v7819_v24 = vpop.f32.mrb[88].mxu1  ;;  %v7049_v44 = vpop.f32.mrb[89].mxu0  ;;  %v8757_v56 = vmul.f32 %v16909_v55, %v16909_v55  ;;  %v13323_v48 = vld [vmem:[#allocation5 + $0xb14] ss:$40 sps:$4 sm:$0xff]  }
 0x534   : > { %v8911_v10 = vmul.f32 %v7819_v24, %v7819_v24  ;;  %v7821_v7 = vpop.f32.mrb[89].mxu1  ;;  %9642 = vmatprep.mubr.bf16.mxu1 %v9196_v35  ;;  %v8910_v9 = vmul.f32 %v7049_v44, %v7049_v44  ;;  %v15145_v43 = vpop.f32.mrb[90].mxu0  ;;  %8307 = vmatpush1.bf16.msra.mxu0 %v13315_v5  ;;  %v16912_v5 = vld [vmem:[#allocation21_spill] sm:$0xff]  ;;  %v16914_v44 = vld [vmem:[#allocation22_spill] sm:$0xff]  ;;  %v16917_v55 = vld [vmem:[#allocation159_spill] sm:$0xff] }
 0x535   : > { %v8912_v28 = vmul.f32 %v7821_v7, %v7821_v7  ;;  %v7823_v50 = vpop.f32.mrb[90].mxu1  ;;  %v7053_v2 = vpop.f32.mrb[91].mxu0  ;;  %8308 = vmatprep.subr.bf16.mxu0 %v13320_v6  ;;  %v13326_v6 = vld [vmem:[#allocation5 + $0xb64] ss:$40 sps:$4 sm:$0xff]   ;;  %v16976_v60 = vld [vmem:[#allocation34_spill] sm:$0xff] }
 0x536   : > { %v9071_v12 = vadd.f32 %v8911_v10, %v8751_v39  ;;  %v8916_v3 = vmul.f32 %v7823_v50, %v7823_v50  ;;  %v7825_v17 = vpop.f32.mrb[91].mxu1  ;;  %v9070_v54 = vadd.f32 %v8910_v9, %v8750_v46  ;;  %v8915_v25 = vmul.f32 %v7053_v2, %v7053_v2  ;;  %v13321_v39 = vld [vmem:[#allocation5 + $0xb10] ss:$40 sps:$4 sm:$0xff]   ;;  %v16924_v46 = vld [vmem:[#allocation24_spill] sm:$0xff] }
 0x537   : > { %v15151_v27 = vadd.f32 %v8912_v28, %v8752_v30  ;;  %v8917_v35 = vmul.f32 %v7825_v17, %v7825_v17  ;;  %8154 = vmatmul.mubr.bf16.gmra.mrb[132].mxu0 %v16912_v5 }
 0x538   : > { %v9076_v24 = vadd.f32 %v8916_v3, %v8756_v13  ;;  %9643 = vmatmul.mubr.bf16.gmra.mrb[196].mxu1 %v9195_v19  ;;  %v9075_v18 = vadd.f32 %v8915_v25, %v8755_v41  ;;  %8163 = vmatprep.mubr.bf16.mxu0 %v16914_v44  ;;  %v8760_v19 = vmul.f32 %v16915_v51, %v16915_v51  ;;  %v16916_v41 = vld [vmem:[#allocation160_spill] sm:$0xff] }
 0x539   : > { %16911 = vst [vmem:[#allocation108_spill] sm:$0xff] %v15151_v27  ;;  %v15154_v58 = vadd.f32 %v8917_v35, %v8757_v56  ;;  %8309 = vmatpush1.bf16.msra.mxu0 %v13318_v11  ;;  %v8761_v9 = vmul.f32 %v16916_v41, %v16916_v41  ;;  %v8762_v56 = vmul.f32 %v16917_v55, %v16917_v55  ;;  %v16920_v35 = vld [vmem:[#allocation164_spill] sm:$0xff] }
 0x53a   : > { %v9201_v10 = vpack.c.bf16 %v9076_v24, %v9071_v12  ;;  %8310 = vmatprep.subr.bf16.mxu0 %v13323_v48  ;;  %v15159_v7 = vpop.f32.mrb[92].mxu0  ;;  %v9200_v30 = vpack.c.bf16 %v9075_v18, %v9070_v54  ;;  %v8765_v13 = vmul.f32 %v16918_v38, %v16918_v38  ;;  %v13324_v48 = vld [vmem:[#allocation5 + $0xb60] ss:$40 sps:$4 sm:$0xff]   ;;  %v16919_v54 = vld [vmem:[#allocation163_spill] sm:$0xff]  ;;  %v8766_v24 = vmul.f32 %v16920_v35, %v16920_v35 }
 0x53b   : > { %16913 = vst [vmem:[#allocation110_spill] sm:$0xff] %v15154_v58  ;;  %v7829_v61 = vpop.f32.mrb[92].mxu1  ;;  %v7059_v50 = vpop.f32.mrb[93].mxu0  ;;  %v8767_v25 = vmul.f32 %v16919_v54, %v16919_v54  ;;  %v16964_v58 = vld [vmem:[#allocation32_spill] sm:$0xff] }
 0x53c   : > { %v8921_v28 = vmul.f32 %v7829_v61, %v7829_v61  ;;  %v7831_v11 = vpop.f32.mrb[93].mxu1  ;;  %9650 = vmatprep.mubr.bf16.mxu1 %v9201_v10  ;;  %v8920_v12 = vmul.f32 %v7059_v50, %v7059_v50  ;;  %v15169_v2 = vpop.f32.mrb[94].mxu0  ;;  %v13329_v61 = vld [vmem:[#allocation5 + $0xbb4] ss:$40 sps:$4 sm:$0xff]  }
 0x53d   : > { %v8922_v3 = vmul.f32 %v7831_v11, %v7831_v11  ;;  %v7833_v17 = vpop.f32.mrb[94].mxu1  ;;  %8311 = vmatpush1.bf16.msra.mxu0 %v13321_v39  ;;  %v7063_v44 = vpop.f32.mrb[95].mxu0  ;;  %v16922_v39 = vld [vmem:[#allocation23_spill] sm:$0xff] }
 0x53e   : > { %v9081_v5 = vadd.f32 %v8921_v28, %v8761_v9  ;;  %v8926_v18 = vmul.f32 %v7833_v17, %v7833_v17  ;;  %v7835_v10 = vpop.f32.mrb[95].mxu1  ;;  %8312 = vmatprep.subr.bf16.mxu0 %v13326_v6  ;;  %v9080_v51 = vadd.f32 %v8920_v12, %v8760_v19  ;;  %v8925_v50 = vmul.f32 %v7063_v44, %v7063_v44  ;;  %v13327_v9 = vld [vmem:[#allocation5 + $0xbb0] ss:$40 sps:$4 sm:$0xff]   ;;  %v13332_v6 = vld [vmem:[#allocation5 + $0xc04] ss:$40 sps:$4 sm:$0xff]  }
 0x53f   : > { %v15175_v41 = vadd.f32 %v8922_v3, %v8762_v56  ;;  %v8927_v11 = vmul.f32 %v7835_v10, %v7835_v10  ;;  %8164 = vmatmul.mubr.bf16.gmra.mrb[136].mxu0 %v16922_v39  ;;  %v16925_v17 = vld [vmem:[#allocation166_spill] sm:$0xff] }
 0x540   : > { %v9086_v55 = vadd.f32 %v8926_v18, %v8766_v24  ;;  %9651 = vmatmul.mubr.bf16.gmra.mrb[200].mxu1 %v9200_v30  ;;  %v9085_v38 = vadd.f32 %v8925_v50, %v8765_v13  ;;  %8173 = vmatprep.mubr.bf16.mxu0 %v16924_v46  ;;  %v8770_v30 = vmul.f32 %v16925_v17, %v16925_v17  ;;  %v16926_v13 = vld [vmem:[#allocation168_spill] sm:$0xff]  ;;  %v16927_v24 = vld [vmem:[#allocation167_spill] sm:$0xff]  ;;  %v16928_v18 = vld [vmem:[#allocation170_spill] sm:$0xff] }
 0x541   : > { %16921 = vst [vmem:[#allocation112_spill] sm:$0xff] %v15175_v41  ;;  %v15178_v54 = vadd.f32 %v8927_v11, %v8767_v25  ;;  %8313 = vmatpush1.bf16.msra.mxu0 %v13324_v48  ;;  %v8771_v25 = vmul.f32 %v16926_v13, %v16926_v13  ;;  %v8775_v44 = vmul.f32 %v16928_v18, %v16928_v18  ;;  %v13330_v11 = vld [vmem:[#allocation5 + $0xc00] ss:$40 sps:$4 sm:$0xff]   ;;  %v13335_v19 = vld [vmem:[#allocation5 + $0xc54] ss:$40 sps:$4 sm:$0xff]  }
 0x542   : > { %v9206_v28 = vpack.c.bf16 %v9086_v55, %v9081_v5  ;;  %8314 = vmatprep.subr.bf16.mxu0 %v13329_v61  ;;  %v15183_v56 = vpop.f32.mrb[96].mxu0  ;;  %v9205_v3 = vpack.c.bf16 %v9085_v38, %v9080_v51  ;;  %v8772_v5 = vmul.f32 %v16927_v24, %v16927_v24  ;;  %v16929_v55 = vld [vmem:[#allocation171_spill] sm:$0xff]  ;;  %v16930_v38 = vld [vmem:[#allocation172_spill] sm:$0xff] }
 0x543   : > { %16923 = vst [vmem:[#allocation111_spill] sm:$0xff] %v15178_v54  ;;  %v7839_v12 = vpop.f32.mrb[96].mxu1  ;;  %v7069_v46 = vpop.f32.mrb[97].mxu0  ;;  %v8777_v39 = vmul.f32 %v16929_v55, %v16929_v55  ;;  %v16954_v54 = vld [vmem:[#allocation30_spill] sm:$0xff] }
 0x544   : > { %v8931_v35 = vmul.f32 %v7839_v12, %v7839_v12  ;;  %v7841_v48 = vpop.f32.mrb[97].mxu1  ;;  %9658 = vmatprep.mubr.bf16.mxu1 %v9206_v28  ;;  %v8930_v10 = vmul.f32 %v7069_v46, %v7069_v46  ;;  %v15193_v50 = vpop.f32.mrb[98].mxu0  ;;  %v8776_v12 = vmul.f32 %v16930_v38, %v16930_v38  ;;  %v16938_v38 = vld [vmem:[#allocation178_spill] sm:$0xff] }
 0x545   : > { %v8932_v61 = vmul.f32 %v7841_v48, %v7841_v48  ;;  %v7843_v51 = vpop.f32.mrb[98].mxu1  ;;  %8315 = vmatpush1.bf16.msra.mxu0 %v13327_v9  ;;  %v7073_v13 = vpop.f32.mrb[99].mxu0  ;;  %v16932_v9 = vld [vmem:[#allocation25_spill] sm:$0xff] }
 0x546   : > { %v9091_v28 = vadd.f32 %v8931_v35, %v8771_v25  ;;  %v8936_v17 = vmul.f32 %v7843_v51, %v7843_v51  ;;  %v7845_v24 = vpop.f32.mrb[99].mxu1  ;;  %8316 = vmatprep.subr.bf16.mxu0 %v13332_v6  ;;  %v9090_v18 = vadd.f32 %v8930_v10, %v8770_v30  ;;  %v8935_v48 = vmul.f32 %v7073_v13, %v7073_v13  ;;  %v13333_v25 = vld [vmem:[#allocation5 + $0xc50] ss:$40 sps:$4 sm:$0xff]   ;;  %v13338_v6 = vld [vmem:[#allocation5 + $0xca4] ss:$40 sps:$4 sm:$0xff]  }
 0x547   : > { %v15199_v46 = vadd.f32 %v8932_v61, %v8772_v5  ;;  %v8937_v15 = vmul.f32 %v7845_v24, %v7845_v24  ;;  %8174 = vmatmul.mubr.bf16.gmra.mrb[140].mxu0 %v16932_v9  ;;  %v16935_v51 = vld [vmem:[#allocation174_spill] sm:$0xff]  ;;  %v13336_v24 = vld [vmem:[#allocation5 + $0xca0] ss:$40 sps:$4 sm:$0xff]  }
 0x548   : > { %v9096_v20 = vadd.f32 %v8936_v17, %v8776_v12  ;;  %9659 = vmatmul.mubr.bf16.gmra.mrb[204].mxu1 %v9205_v3  ;;  %v9095_v8 = vadd.f32 %v8935_v48, %v8775_v44  ;;  %8183 = vmatprep.mubr.bf16.mxu0 %v16934_v42  ;;  %v8780_v3 = vmul.f32 %v16935_v51, %v16935_v51  ;;  %v16936_v44 = vld [vmem:[#allocation176_spill] sm:$0xff]  ;;  %v13341_v30 = vld [vmem:[#allocation5 + $0xcf4] ss:$40 sps:$4 sm:$0xff]  }
 0x549   : > { %16931 = vst [vmem:[#allocation114_spill] sm:$0xff] %v15199_v46  ;;  %v15202_v55 = vadd.f32 %v8937_v15, %v8777_v39  ;;  %8317 = vmatpush1.bf16.msra.mxu0 %v13330_v11  ;;  %v8781_v15 = vmul.f32 %v16936_v44, %v16936_v44  ;;  %v8785_v12 = vmul.f32 %v16938_v38, %v16938_v38  ;;  %v16940_v9 = vld [vmem:[#allocation180_spill] sm:$0xff] }
 0x54a   : > { %v9211_v35 = vpack.c.bf16 %v9096_v20, %v9091_v28  ;;  %8318 = vmatprep.subr.bf16.mxu0 %v13335_v19  ;;  %v15207_v5 = vpop.f32.mrb[100].mxu0  ;;  %v9210_v61 = vpack.c.bf16 %v9095_v8, %v9090_v18  ;;  %v16937_v20 = vld [vmem:[#allocation175_spill] sm:$0xff] }
 0x54b   : > { %16933 = vst [vmem:[#allocation115_spill] sm:$0xff] %v15202_v55  ;;  %v7849_v10 = vpop.f32.mrb[100].mxu1  ;;  %v7079_v42 = vpop.f32.mrb[101].mxu0  ;;  %v8782_v19 = vmul.f32 %v16937_v20, %v16937_v20  ;;  %v16939_v18 = vld [vmem:[#allocation179_spill] sm:$0xff]  ;;  %v16944_v55 = vld [vmem:[#allocation28_spill] sm:$0xff] }
 0x54c   : > { %v8941_v39 = vmul.f32 %v7849_v10, %v7849_v10  ;;  %v7851_v11 = vpop.f32.mrb[101].mxu1  ;;  %9666 = vmatprep.mubr.bf16.mxu1 %v9211_v35  ;;  %v8940_v28 = vmul.f32 %v7079_v42, %v7079_v42  ;;  %v15217_v13 = vpop.f32.mrb[102].mxu0  ;;  %v8787_v48 = vmul.f32 %v16939_v18, %v16939_v18  ;;  %v8786_v10 = vmul.f32 %v16940_v9, %v16940_v9  ;;  %v16948_v9 = vld [vmem:[#allocation186_spill] sm:$0xff] }
 0x54d   : > { %v8942_v17 = vmul.f32 %v7851_v11, %v7851_v11  ;;  %v7853_v8 = vpop.f32.mrb[102].mxu1  ;;  %8319 = vmatpush1.bf16.msra.mxu0 %v13333_v25  ;;  %v7083_v44 = vpop.f32.mrb[103].mxu0  ;;  %v16942_v25 = vld [vmem:[#allocation27_spill] sm:$0xff] }
 0x54e   : > { %v9101_v35 = vadd.f32 %v8941_v39, %v8781_v15  ;;  %v8946_v51 = vmul.f32 %v7853_v8, %v7853_v8  ;;  %v7855_v20 = vpop.f32.mrb[103].mxu1  ;;  %8320 = vmatprep.subr.bf16.mxu0 %v13338_v6  ;;  %v9100_v38 = vadd.f32 %v8940_v28, %v8780_v3  ;;  %v8945_v11 = vmul.f32 %v7083_v44, %v7083_v44  ;;  %v13339_v15 = vld [vmem:[#allocation5 + $0xcf0] ss:$40 sps:$4 sm:$0xff]   ;;  %v13344_v6 = vld [vmem:[#allocation5 + $0xd44] ss:$40 sps:$4 sm:$0xff]  }
 0x54f   : > { %v15223_v42 = vadd.f32 %v8942_v17, %v8782_v19  ;;  %v8947_v59 = vmul.f32 %v7855_v20, %v7855_v20  ;;  %8184 = vmatmul.mubr.bf16.gmra.mrb[144].mxu0 %v16942_v25  ;;  %v16945_v8 = vld [vmem:[#allocation182_spill] sm:$0xff]  ;;  %v13342_v20 = vld [vmem:[#allocation5 + $0xd40] ss:$40 sps:$4 sm:$0xff]  }
 0x550   : > { %v9106_v62 = vadd.f32 %v8946_v51, %v8786_v10  ;;  %9667 = vmatmul.mubr.bf16.gmra.mrb[208].mxu1 %v9210_v61  ;;  %v9105_v46 = vadd.f32 %v8945_v11, %v8785_v12  ;;  %8193 = vmatprep.mubr.bf16.mxu0 %v16944_v55  ;;  %v8790_v61 = vmul.f32 %v16945_v8, %v16945_v8  ;;  %v16946_v12 = vld [vmem:[#allocation184_spill] sm:$0xff]  ;;  %v13347_v3 = vld [vmem:[#allocation5 + $0xd94] ss:$40 sps:$4 sm:$0xff]  }
 0x551   : > { %16941 = vst [vmem:[#allocation116_spill] sm:$0xff] %v15223_v42  ;;  %v15226_v18 = vadd.f32 %v8947_v59, %v8787_v48  ;;  %8321 = vmatpush1.bf16.msra.mxu0 %v13336_v24  ;;  %v8791_v59 = vmul.f32 %v16946_v12, %v16946_v12  ;;  %v8795_v10 = vmul.f32 %v16948_v9, %v16948_v9  ;;  %v16950_v25 = vld [vmem:[#allocation188_spill] sm:$0xff] }
 0x552   : > { %v9216_v39 = vpack.c.bf16 %v9106_v62, %v9101_v35  ;;  %8322 = vmatprep.subr.bf16.mxu0 %v13341_v30  ;;  %v15231_v19 = vpop.f32.mrb[104].mxu0  ;;  %v9215_v17 = vpack.c.bf16 %v9105_v46, %v9100_v38  ;;  %v16947_v62 = vld [vmem:[#allocation183_spill] sm:$0xff] }
 0x553   : > { %16943 = vst [vmem:[#allocation118_spill] sm:$0xff] %v15226_v18  ;;  %v7859_v28 = vpop.f32.mrb[104].mxu1  ;;  %v7089_v55 = vpop.f32.mrb[105].mxu0  ;;  %v8792_v30 = vmul.f32 %v16947_v62, %v16947_v62  ;;  %v16949_v38 = vld [vmem:[#allocation187_spill] sm:$0xff] }
 0x554   : > { %v8951_v48 = vmul.f32 %v7859_v28, %v7859_v28  ;;  %v7861_v24 = vpop.f32.mrb[105].mxu1  ;;  %9674 = vmatprep.mubr.bf16.mxu1 %v9216_v39  ;;  %v8950_v35 = vmul.f32 %v7089_v55, %v7089_v55  ;;  %v15241_v44 = vpop.f32.mrb[106].mxu0  ;;  %v8797_v11 = vmul.f32 %v16949_v38, %v16949_v38  ;;  %v8796_v28 = vmul.f32 %v16950_v25, %v16950_v25  ;;  %v16958_v25 = vld [vmem:[#allocation194_spill] sm:$0xff] }
 0x555   : > { %v8952_v51 = vmul.f32 %v7861_v24, %v7861_v24  ;;  %v7863_v46 = vpop.f32.mrb[106].mxu1  ;;  %8323 = vmatpush1.bf16.msra.mxu0 %v13339_v15  ;;  %v7093_v12 = vpop.f32.mrb[107].mxu0  ;;  %v16952_v15 = vld [vmem:[#allocation29_spill] sm:$0xff] }
 0x556   : > { %v9111_v39 = vadd.f32 %v8951_v48, %v8791_v59  ;;  %v8956_v8 = vmul.f32 %v7863_v46, %v7863_v46  ;;  %v7865_v62 = vpop.f32.mrb[107].mxu1  ;;  %8324 = vmatprep.subr.bf16.mxu0 %v13344_v6  ;;  %v9110_v9 = vadd.f32 %v8950_v35, %v8790_v61  ;;  %v8955_v24 = vmul.f32 %v7093_v12, %v7093_v12  ;;  %v13345_v59 = vld [vmem:[#allocation5 + $0xd90] ss:$40 sps:$4 sm:$0xff]   ;;  %v13350_v6 = vld [vmem:[#allocation5 + $0xde4] ss:$40 sps:$4 sm:$0xff]  }
 0x557   : > { %v15247_v55 = vadd.f32 %v8952_v51, %v8792_v30  ;;  %v8957_v42 = vmul.f32 %v7865_v62, %v7865_v62  ;;  %8194 = vmatmul.mubr.bf16.gmra.mrb[148].mxu0 %v16952_v15  ;;  %v16955_v46 = vld [vmem:[#allocation190_spill] sm:$0xff]  ;;  %v13348_v62 = vld [vmem:[#allocation5 + $0xde0] ss:$40 sps:$4 sm:$0xff]  }
 0x558   : > { %v9116_v18 = vadd.f32 %v8956_v8, %v8796_v28  ;;  %9675 = vmatmul.mubr.bf16.gmra.mrb[212].mxu1 %v9215_v17  ;;  %v9115_v41 = vadd.f32 %v8955_v24, %v8795_v10  ;;  %8203 = vmatprep.mubr.bf16.mxu0 %v16954_v54  ;;  %v8800_v17 = vmul.f32 %v16955_v46, %v16955_v46  ;;  %v16956_v10 = vld [vmem:[#allocation192_spill] sm:$0xff]  ;;  %v13353_v61 = vld [vmem:[#allocation5 + $0xe34] ss:$40 sps:$4 sm:$0xff]  }
 0x559   : > { %16951 = vst [vmem:[#allocation120_spill] sm:$0xff] %v15247_v55  ;;  %v15250_v38 = vadd.f32 %v8957_v42, %v8797_v11  ;;  %8325 = vmatpush1.bf16.msra.mxu0 %v13342_v20  ;;  %v8801_v42 = vmul.f32 %v16956_v10, %v16956_v10  ;;  %v8805_v28 = vmul.f32 %v16958_v25, %v16958_v25  ;;  %v16960_v15 = vld [vmem:[#allocation196_spill] sm:$0xff] }
 0x55a   : > { %v9221_v48 = vpack.c.bf16 %v9116_v18, %v9111_v39  ;;  %8326 = vmatprep.subr.bf16.mxu0 %v13347_v3  ;;  %v15255_v30 = vpop.f32.mrb[108].mxu0  ;;  %v9220_v51 = vpack.c.bf16 %v9115_v41, %v9110_v9  ;;  %v16957_v18 = vld [vmem:[#allocation191_spill] sm:$0xff] }
 0x55b   : > { %16953 = vst [vmem:[#allocation119_spill] sm:$0xff] %v15250_v38  ;;  %v7869_v35 = vpop.f32.mrb[108].mxu1  ;;  %v7099_v54 = vpop.f32.mrb[109].mxu0  ;;  %v8802_v3 = vmul.f32 %v16957_v18, %v16957_v18  ;;  %v16959_v9 = vld [vmem:[#allocation195_spill] sm:$0xff] }
 0x55c   : > { %v8961_v11 = vmul.f32 %v7869_v35, %v7869_v35  ;;  %v7871_v20 = vpop.f32.mrb[109].mxu1  ;;  %9682 = vmatprep.mubr.bf16.mxu1 %v9221_v48  ;;  %v8960_v39 = vmul.f32 %v7099_v54, %v7099_v54  ;;  %v15265_v12 = vpop.f32.mrb[110].mxu0  ;;  %v8807_v24 = vmul.f32 %v16959_v9, %v16959_v9  ;;  %v8806_v35 = vmul.f32 %v16960_v15, %v16960_v15  ;;  %v16969_v15 = vld [vmem:[#allocation202_spill] sm:$0xff] }
 0x55d   : > { %v8962_v8 = vmul.f32 %v7871_v20, %v7871_v20  ;;  %v7873_v41 = vpop.f32.mrb[110].mxu1  ;;  %8327 = vmatpush1.bf16.msra.mxu0 %v13345_v59  ;;  %v7103_v10 = vpop.f32.mrb[111].mxu0  ;;  %v16962_v59 = vld [vmem:[#allocation31_spill] sm:$0xff] }
 0x55e   : > { %v9121_v48 = vadd.f32 %v8961_v11, %v8801_v42  ;;  %v8966_v46 = vmul.f32 %v7873_v41, %v7873_v41  ;;  %v7875_v18 = vpop.f32.mrb[111].mxu1  ;;  %8328 = vmatprep.subr.bf16.mxu0 %v13350_v6  ;;  %v9120_v25 = vadd.f32 %v8960_v39, %v8800_v17  ;;  %v8965_v20 = vmul.f32 %v7103_v10, %v7103_v10  ;;  %v13351_v42 = vld [vmem:[#allocation5 + $0xe30] ss:$40 sps:$4 sm:$0xff]   ;;  %v13356_v6 = vld [vmem:[#allocation5 + $0xe84] ss:$40 sps:$4 sm:$0xff]  }
 0x55f   : > { %v15271_v54 = vadd.f32 %v8962_v8, %v8802_v3  ;;  %v8967_v55 = vmul.f32 %v7875_v18, %v7875_v18  ;;  %8204 = vmatmul.mubr.bf16.gmra.mrb[152].mxu0 %v16962_v59  ;;  %v16966_v41 = vld [vmem:[#allocation198_spill] sm:$0xff]  ;;  %v13354_v18 = vld [vmem:[#allocation5 + $0xe80] ss:$40 sps:$4 sm:$0xff]  }
 0x560   : > { %v9126_v38 = vadd.f32 %v8966_v46, %v8806_v35  ;;  %9683 = vmatmul.mubr.bf16.gmra.mrb[216].mxu1 %v9220_v51  ;;  %v9125_v27 = vadd.f32 %v8965_v20, %v8805_v28  ;;  %8213 = vmatprep.mubr.bf16.mxu0 %v16964_v58  ;;  %v8810_v51 = vmul.f32 %v16966_v41, %v16966_v41  ;;  %v16967_v28 = vld [vmem:[#allocation200_spill] sm:$0xff]  ;;  %v13359_v17 = vld [vmem:[#allocation5 + $0xed4] ss:$40 sps:$4 sm:$0xff]  }
 0x561   : > { %16961 = vst [vmem:[#allocation122_spill] sm:$0xff] %v15271_v54  ;;  %v15274_v9 = vadd.f32 %v8967_v55, %v8807_v24  ;;  %8329 = vmatpush1.bf16.msra.mxu0 %v13348_v62  ;;  %v8811_v55 = vmul.f32 %v16967_v28, %v16967_v28  ;;  %v8815_v35 = vmul.f32 %v16969_v15, %v16969_v15  ;;  %v16972_v59 = vld [vmem:[#allocation204_spill] sm:$0xff] }
 0x562   : > { %v9226_v11 = vpack.c.bf16 %v9126_v38, %v9121_v48  ;;  %8330 = vmatprep.subr.bf16.mxu0 %v13353_v61  ;;  %v15279_v3 = vpop.f32.mrb[112].mxu0  ;;  %v9225_v8 = vpack.c.bf16 %v9125_v27, %v9120_v25  ;;  %v16968_v38 = vld [vmem:[#allocation199_spill] sm:$0xff] }
 0x563   : > { %16963 = vst [vmem:[#allocation123_spill] sm:$0xff] %v15274_v9  ;;  %16965 = vst [vmem:[#allocation124_spill] sm:$0xff] %v15279_v3  ;;  %v7879_v39 = vpop.f32.mrb[112].mxu1  ;;  %v7109_v58 = vpop.f32.mrb[113].mxu0  ;;  %v8812_v61 = vmul.f32 %v16968_v38, %v16968_v38  ;;  %v16971_v25 = vld [vmem:[#allocation203_spill] sm:$0xff] }
 0x564   : > { %v8971_v24 = vmul.f32 %v7879_v39, %v7879_v39  ;;  %v7881_v62 = vpop.f32.mrb[113].mxu1  ;;  %9690 = vmatprep.mubr.bf16.mxu1 %v9226_v11  ;;  %v8970_v48 = vmul.f32 %v7109_v58, %v7109_v58  ;;  %v15289_v10 = vpop.f32.mrb[114].mxu0  ;;  %v8817_v20 = vmul.f32 %v16971_v25, %v16971_v25  ;;  %v8816_v39 = vmul.f32 %v16972_v59, %v16972_v59  ;;  %v13411_v3 = vld [vmem:[#allocation5 + $0x1330] ss:$40 sps:$4 sm:$0xff]  }
 0x565   : > { %v8972_v46 = vmul.f32 %v7881_v62, %v7881_v62  ;;  %16970 = vst [vmem:[#allocation126_spill] sm:$0xff] %v15289_v10  ;;  %v7883_v27 = vpop.f32.mrb[114].mxu1  ;;  %8331 = vmatpush1.bf16.msra.mxu0 %v13351_v42  ;;  %v7113_v28 = vpop.f32.mrb[115].mxu0  ;;  %v16974_v42 = vld [vmem:[#allocation33_spill] sm:$0xff] }
 0x566   : > { %v9131_v11 = vadd.f32 %v8971_v24, %v8811_v55  ;;  %v8976_v41 = vmul.f32 %v7883_v27, %v7883_v27  ;;  %v7885_v38 = vpop.f32.mrb[115].mxu1  ;;  %8332 = vmatprep.subr.bf16.mxu0 %v13356_v6  ;;  %v9130_v15 = vadd.f32 %v8970_v48, %v8810_v51  ;;  %v8975_v62 = vmul.f32 %v7113_v28, %v7113_v28  ;;  %v13357_v55 = vld [vmem:[#allocation5 + $0xed0] ss:$40 sps:$4 sm:$0xff]   ;;  %v13400_v10 = vld [vmem:[#allocation5 + $0x11a4] ss:$40 sps:$4 sm:$0xff]  }
 0x567   : > { %v15295_v58 = vadd.f32 %v8972_v46, %v8812_v61  ;;  %v8977_v54 = vmul.f32 %v7885_v38, %v7885_v38  ;;  %8214 = vmatmul.mubr.bf16.gmra.mrb[156].mxu0 %v16974_v42  ;;  %v16978_v46 = vld [vmem:[#allocation206_spill] sm:$0xff]  ;;  %v16983_v28 = vld [vmem:[#allocation211_spill] sm:$0xff] }
 0x568   : > { %v9136_v9 = vadd.f32 %v8976_v41, %v8816_v39  ;;  %9691 = vmatmul.mubr.bf16.gmra.mrb[220].mxu1 %v9225_v8  ;;  %v9135_v4 = vadd.f32 %v8975_v62, %v8815_v35  ;;  %8223 = vmatprep.mubr.bf16.mxu0 %v16976_v60  ;;  %v8820_v27 = vmul.f32 %v16978_v46, %v16978_v46  ;;  %v16979_v8 = vld [vmem:[#allocation208_spill] sm:$0xff] }
 0x569   : > { %16973 = vst [vmem:[#allocation128_spill] sm:$0xff] %v15295_v58  ;;  %v15298_v25 = vadd.f32 %v8977_v54, %v8817_v20  ;;  %8333 = vmatpush1.bf16.msra.mxu0 %v13354_v18  ;;  %v8821_v54 = vmul.f32 %v16979_v8, %v16979_v8  ;;  %v16980_v18 = vld [vmem:[#allocation207_spill] sm:$0xff]  ;;  %v8827_v38 = vmul.f32 %v16983_v28, %v16983_v28  ;;  %v13384_v8 = vld [vmem:[#allocation5 + $0xf24] ss:$40 sps:$4 sm:$0xff]  }
 0x56a   : > { %v9231_v24 = vpack.c.bf16 %v9136_v9, %v9131_v11  ;;  %8334 = vmatprep.subr.bf16.mxu0 %v13359_v17  ;;  %v15303_v51 = vpop.f32.mrb[116].mxu0  ;;  %v9230_v48 = vpack.c.bf16 %v9135_v4, %v9130_v15  ;;  %v8822_v9 = vmul.f32 %v16980_v18, %v16980_v18  ;;  %v16981_v17 = vld [vmem:[#allocation210_spill] sm:$0xff]  ;;  %v16984_v15 = vld [vmem:[#allocation212_spill] sm:$0xff]  ;;  %v16986_v58 = vld [vmem:[#allocation35_spill] sm:$0xff] }
 0x56b   : > { %16975 = vst [vmem:[#allocation127_spill] sm:$0xff] %v15298_v25  ;;  %16977 = vst [vmem:[#allocation130_spill] sm:$0xff] %v15303_v51  ;;  %v7889_v61 = vpop.f32.mrb[116].mxu1  ;;  %v7119_v20 = vpop.f32.mrb[117].mxu0  ;;  %v8825_v59 = vmul.f32 %v16981_v17, %v16981_v17  ;;  %v8826_v62 = vmul.f32 %v16984_v15, %v16984_v15  ;;  %v16988_v25 = vld [vmem:[#allocation36_spill] sm:$0xff] }
 0x56c   : > { %v8981_v35 = vmul.f32 %v7889_v61, %v7889_v61  ;;  %v7891_v60 = vpop.f32.mrb[117].mxu1  ;;  %9698 = vmatprep.mubr.bf16.mxu1 %v9231_v24  ;;  %v8980_v39 = vmul.f32 %v7119_v20, %v7119_v20  ;;  %v15313_v41 = vpop.f32.mrb[118].mxu0  ;;  %v16991_v15 = vld [vmem:[#allocation216_spill] sm:$0xff]  ;;  %v13399_v51 = vld [vmem:[#allocation5 + $0x1150] ss:$40 sps:$4 sm:$0xff]  }
 0x56d   : > { %v8982_v11 = vmul.f32 %v7891_v60, %v7891_v60  ;;  %16982 = vst [vmem:[#allocation131_spill] sm:$0xff] %v15313_v41  ;;  %v7893_v4 = vpop.f32.mrb[118].mxu1  ;;  %8335 = vmatpush1.bf16.msra.mxu0 %v13357_v55  ;;  %v7123_v61 = vpop.f32.mrb[119].mxu0 }
 0x56e   : > { %v9141_v42 = vadd.f32 %v8981_v35, %v8821_v54  ;;  %v8986_v24 = vmul.f32 %v7893_v4, %v7893_v4  ;;  %v7895_v46 = vpop.f32.mrb[119].mxu1  ;;  %8497 = vmatprep.subr.bf16.mxu0 %v13384_v8  ;;  %v9140_v18 = vadd.f32 %v8980_v39, %v8820_v27  ;;  %v8985_v20 = vmul.f32 %v7123_v61, %v7123_v61  ;;  %v16990_v39 = vld [vmem:[#allocation214_spill] sm:$0xff] }
 0x56f   : > { %v15319_v17 = vadd.f32 %v8982_v11, %v8822_v9  ;;  %v8987_v60 = vmul.f32 %v7895_v46, %v7895_v46  ;;  %8224 = vmatmul.mubr.bf16.gmra.mrb[160].mxu0 %v16986_v58  ;;  %v8830_v11 = vmul.f32 %v16990_v39, %v16990_v39  ;;  %v8831_v58 = vmul.f32 %v16991_v15, %v16991_v15 }
 0x570   : > { %v9146_v6 = vadd.f32 %v8986_v24, %v8826_v62  ;;  %9699 = vmatmul.mubr.bf16.gmra.mrb[224].mxu1 %v9230_v48  ;;  %v9145_v55 = vadd.f32 %v8985_v20, %v8825_v59  ;;  %8233 = vmatprep.mubr.bf16.mxu0 %v16988_v25  ;;  %v16992_v62 = vld [vmem:[#allocation215_spill] sm:$0xff] }
 0x571   : > { %16985 = vst [vmem:[#allocation132_spill] sm:$0xff] %v15319_v17  ;;  %v15322_v28 = vadd.f32 %v8987_v60, %v8827_v38  ;;  %v8832_v25 = vmul.f32 %v16992_v62, %v16992_v62  ;;  %v16996_v60 = vld [vmem:[#allocation220_spill] sm:$0xff] }
 0x572   : > { %v9236_v54 = vpack.c.bf16 %v9146_v6, %v9141_v42  ;;  %v15327_v4 = vpop.f32.mrb[120].mxu0  ;;  %v9235_v9 = vpack.c.bf16 %v9145_v55, %v9140_v18  ;;  %v16993_v6 = vld [vmem:[#allocation218_spill] sm:$0xff]  ;;  %v16995_v18 = vld [vmem:[#allocation219_spill] sm:$0xff]  ;;  %v8836_v55 = vmul.f32 %v16996_v60, %v16996_v60 }
 0x573   : > { %16987 = vst [vmem:[#allocation15_spill] sm:$0xff] %v15322_v28  ;;  %16989 = vst [vmem:[#allocation16_spill] sm:$0xff] %v15327_v4  ;;  %v7899_v27 = vpop.f32.mrb[120].mxu1  ;;  %v7129_v59 = vpop.f32.mrb[121].mxu0  ;;  %v8835_v42 = vmul.f32 %v16993_v6, %v16993_v6  ;;  %v8837_v20 = vmul.f32 %v16995_v18, %v16995_v18  ;;  %v17000_v18 = vld [vmem:[#allocation38_spill] sm:$0xff] }
 0x574   : > { %v8991_v48 = vmul.f32 %v7899_v27, %v7899_v27  ;;  %v7901_v38 = vpop.f32.mrb[121].mxu1  ;;  %9706 = vmatprep.mubr.bf16.mxu1 %v9236_v54  ;;  %v8990_v24 = vmul.f32 %v7129_v59, %v7129_v59  ;;  %v15337_v46 = vpop.f32.mrb[122].mxu0 }
 0x575   : > { %v8992_v61 = vmul.f32 %v7901_v38, %v7901_v38  ;;  %16994 = vst [vmem:[#allocation134_spill] sm:$0xff] %v15337_v46  ;;  %v7903_v8 = vpop.f32.mrb[122].mxu1  ;;  %v7133_v54 = vpop.f32.mrb[123].mxu0  ;;  %v16998_v38 = vld [vmem:[#allocation37_spill] sm:$0xff] }
 0x576   : > { %v9151_v27 = vadd.f32 %v8991_v48, %v8831_v58  ;;  %v8996_v39 = vmul.f32 %v7903_v8, %v7903_v8  ;;  %v7905_v15 = vpop.f32.mrb[123].mxu1  ;;  %v9150_v35 = vadd.f32 %v8990_v24, %v8830_v11  ;;  %v8995_v17 = vmul.f32 %v7133_v54, %v7133_v54  ;;  %v17002_v24 = vld [vmem:[#allocation222_spill] sm:$0xff]  ;;  %v17003_v8 = vld [vmem:[#allocation224_spill] sm:$0xff]  ;;  %v17033_v46 = vld [vmem:[#allocation57_spill] sm:$0xff] }
 0x577   : > { %v15343_v62 = vadd.f32 %v8992_v61, %v8832_v25  ;;  %v8997_v6 = vmul.f32 %v7905_v15, %v7905_v15  ;;  %8234 = vmatmul.mubr.bf16.gmra.mrb[164].mxu0 %v16998_v38  ;;  %v8840_v61 = vmul.f32 %v17002_v24, %v17002_v24  ;;  %v8841_v60 = vmul.f32 %v17003_v8, %v17003_v8  ;;  %v17008_v38 = vld [vmem:[#allocation228_spill] sm:$0xff] }
 0x578   : > { %v9156_v59 = vadd.f32 %v8996_v39, %v8836_v55  ;;  %9707 = vmatmul.mubr.bf16.gmra.mrb[228].mxu1 %v9235_v9  ;;  %v9155_v28 = vadd.f32 %v8995_v17, %v8835_v42  ;;  %8243 = vmatprep.mubr.bf16.mxu0 %v17000_v18  ;;  %v8846_v18 = vmul.f32 %v17008_v38, %v17008_v38 }
 0x579   : > { %16997 = vst [vmem:[#allocation136_spill] sm:$0xff] %v15343_v62  ;;  %v15346_v36 = vadd.f32 %v8997_v6, %v8837_v20  ;;  %v17004_v20 = vld [vmem:[#allocation223_spill] sm:$0xff] }
 0x57a   : > { %v9241_v37 = vpack.c.bf16 %v9156_v59, %v9151_v27  ;;  %v15351_v48 = vpop.f32.mrb[124].mxu0  ;;  %v9240_v25 = vpack.c.bf16 %v9155_v28, %v9150_v35  ;;  %v8842_v55 = vmul.f32 %v17004_v20, %v17004_v20  ;;  %v17005_v27 = vld [vmem:[#allocation226_spill] sm:$0xff]  ;;  %v17007_v35 = vld [vmem:[#allocation227_spill] sm:$0xff] }
 0x57b   : > { %16999 = vst [vmem:[#allocation135_spill] sm:$0xff] %v15346_v36  ;;  %17001 = vst [vmem:[#allocation138_spill] sm:$0xff] %v15351_v48  ;;  %v7909_v11 = vpop.f32.mrb[124].mxu1  ;;  %v7139_v17 = vpop.f32.mrb[125].mxu0  ;;  %v8845_v39 = vmul.f32 %v17005_v27, %v17005_v27  ;;  %v8847_v59 = vmul.f32 %v17007_v35, %v17007_v35  ;;  %v17012_v35 = vld [vmem:[#allocation40_spill] sm:$0xff] }
 0x57c   : > { %v9001_v9 = vmul.f32 %v7909_v11, %v7909_v11  ;;  %v7911_v42 = vpop.f32.mrb[125].mxu1  ;;  %9714 = vmatprep.mubr.bf16.mxu1 %v9241_v37  ;;  %v9000_v54 = vmul.f32 %v7139_v17, %v7139_v17  ;;  %v15361_v6 = vpop.f32.mrb[126].mxu0 }
 0x57d   : > { %v9002_v15 = vmul.f32 %v7911_v42, %v7911_v42  ;;  %17006 = vst [vmem:[#allocation139_spill] sm:$0xff] %v15361_v6  ;;  %v7913_v28 = vpop.f32.mrb[126].mxu1  ;;  %v7143_v37 = vpop.f32.mrb[127].mxu0  ;;  %v17010_v42 = vld [vmem:[#allocation39_spill] sm:$0xff] }
 0x57e   : > { %v9161_v11 = vadd.f32 %v9001_v9, %v8841_v60  ;;  %v9006_v24 = vmul.f32 %v7913_v28, %v7913_v28  ;;  %v7915_v8 = vpop.f32.mrb[127].mxu1  ;;  %v9160_v58 = vadd.f32 %v9000_v54, %v8840_v61  ;;  %v9005_v62 = vmul.f32 %v7143_v37, %v7143_v37  ;;  %v17017_v37 = vld [vmem:[#allocation45_spill] sm:$0xff]  ;;  %v17022_v60 = vld [vmem:[#allocation50_spill] sm:$0xff] }
 0x57f   : > { %v15367_v20 = vadd.f32 %v9002_v15, %v8842_v55  ;;  %v9007_v27 = vmul.f32 %v7915_v8, %v7915_v8  ;;  %8244 = vmatmul.mubr.bf16.gmra.mrb[168].mxu0 %v17010_v42  ;;  %v17018_v8 = vld [vmem:[#allocation46_spill] sm:$0xff] }
 0x580   : > { %v9166_v17 = vadd.f32 %v9006_v24, %v8846_v18  ;;  %9715 = vmatmul.mubr.bf16.gmra.mrb[232].mxu1 %v9240_v25  ;;  %v9165_v36 = vadd.f32 %v9005_v62, %v8845_v39  ;;  %8253 = vmatprep.mubr.bf16.mxu0 %v17012_v35  ;;  %v17013_v25 = vld [vmem:[#allocation41_spill] sm:$0xff]  ;;  %v17014_v62 = vld [vmem:[#allocation42_spill] sm:$0xff] }
 0x581   : > { %17009 = vst [vmem:[#allocation140_spill] sm:$0xff] %v15367_v20  ;;  %v15370_v45 = vadd.f32 %v9007_v27, %v8847_v59 }
 0x582   : > { %v9246_v1 = vpack.c.bf16 %v9166_v17, %v9161_v11  ;;  %v9245_v9 = vpack.c.bf16 %v9165_v36, %v9160_v58  ;;  %v17016_v58 = vld [vmem:[#allocation44_spill] sm:$0xff] }
 0x583   : > { %17011 = vst [vmem:[#allocation17_spill] sm:$0xff] %v15370_v45  ;;  %v15375_v28 = vpop.f32.mrb[128].mxu1 }
 0x584   : > { %9722 = vmatprep.mubr.bf16.mxu1 %v9246_v1  ;;  %v15377_v61 = vpop.f32.mrb[129].mxu1  ;;  %v17015_v1 = vld [vmem:[#allocation43_spill] sm:$0xff] }
 0x585   : > { %v15379_v55 = vpop.f32.mrb[130].mxu1 }
 0x586   : > { %v15381_v54 = vpop.f32.mrb[131].mxu1 }
 0x587   : > { %8254 = vmatmul.mubr.bf16.gmra.mrb[172].mxu0 %v17013_v25  ;;  %v17020_v25 = vld [vmem:[#allocation48_spill] sm:$0xff] }
 0x588   : > { %9723 = vmatmul.mubr.bf16.gmra.mrb[236].mxu1 %v9245_v9  ;;  %8263 = vmatprep.mubr.bf16.mxu0 %v17014_v62  ;;  %v17019_v9 = vld [vmem:[#allocation47_spill] sm:$0xff] }
 0x58b   : > { %v15385_v39 = vpop.f32.mrb[132].mxu1 }
 0x58c   : > { %v15387_v15 = vpop.f32.mrb[133].mxu1 }
 0x58d   : > { %v15389_v59 = vpop.f32.mrb[134].mxu1 }
 0x58e   : > { %v15391_v36 = vpop.f32.mrb[135].mxu1 }
 0x58f   : > { %8264 = vmatmul.mubr.bf16.gmra.mrb[176].mxu0 %v17015_v1 }
 0x590   : > { %8273 = vmatprep.mubr.bf16.mxu0 %v17016_v58 }
 0x593   : > { %v15395_v38 = vpop.f32.mrb[136].mxu1 }
 0x594   : > { %v15397_v18 = vpop.f32.mrb[137].mxu1 }
 0x595   : > { %v15399_v11 = vpop.f32.mrb[138].mxu1 }
 0x596   : > { %v15401_v24 = vpop.f32.mrb[139].mxu1 }
 0x597   : > { %8274 = vmatmul.mubr.bf16.gmra.mrb[180].mxu0 %v17017_v37 }
 0x598   : > { %8283 = vmatprep.mubr.bf16.mxu0 %v17018_v8  ;;  %v17021_v8 = vld [vmem:[#allocation49_spill] sm:$0xff] }
 0x59b   : > { %v15405_v27 = vpop.f32.mrb[140].mxu1 }
 0x59c   : > { %v15407_v17 = vpop.f32.mrb[141].mxu1 }
 0x59d   : > { %v15409_v42 = vpop.f32.mrb[142].mxu1 }
 0x59e   : > { %v15411_v35 = vpop.f32.mrb[143].mxu1 }
 0x59f   : > { %8284 = vmatmul.mubr.bf16.gmra.mrb[184].mxu0 %v17019_v9 }
 0x5a0   : > { %8293 = vmatprep.mubr.bf16.mxu0 %v17020_v25  ;;  %v17023_v25 = vld [vmem:[#allocation51_spill] sm:$0xff] }
 0x5a3   : > { %v15415_v62 = vpop.f32.mrb[144].mxu1 }
 0x5a4   : > { %v15417_v1 = vpop.f32.mrb[145].mxu1 }
 0x5a5   : > { %v15419_v58 = vpop.f32.mrb[146].mxu1 }
 0x5a6   : > { %v15421_v37 = vpop.f32.mrb[147].mxu1 }
 0x5a7   : > { %8294 = vmatmul.mubr.bf16.gmra.mrb[188].mxu0 %v17021_v8 }
 0x5a8   : > { %8336 = vmatprep.mubr.bf16.mxu0 %v17022_v60  ;;  %v13387_v60 = vld [vmem:[#allocation5 + $0xf70] ss:$40 sps:$4 sm:$0xff]  }
 0x5ab   : > { %v15425_v20 = vpop.f32.mrb[148].mxu1 }
 0x5ac   : > { %v15427_v45 = vpop.f32.mrb[149].mxu1 }
 0x5ad   : > { %v15429_v22 = vpop.f32.mrb[150].mxu1 }
 0x5ae   : > { %v15431_v9 = vpop.f32.mrb[151].mxu1 }
 0x5af   : > { %8337 = vmatmul.mubr.bf16.vlgmr.msra.gmra.mrb[128].mxu0 %v17023_v25  ;;  %v17026_v25 = vld [vmem:[#allocation54_spill] sm:$0xff] }
 0x5b0   : > { %8498 = vmatpush1.bf16.msra.mxu0 %v13385_v63  ;;  %8346 = vmatprep.mubr.bf16.mxu0 %v17024_v0  ;;  %v13389_v63 = vld [vmem:[#allocation5 + $0xfc0] ss:$40 sps:$4 sm:$0xff]   ;;  %v13390_v0 = vld [vmem:[#allocation5 + $0x1014] ss:$40 sps:$4 sm:$0xff]  }
 0x5b1   : > { %8499 = vmatprep.subr.bf16.mxu0 %v13386_v16 }
 0x5b3   : > { %v15435_v14 = vpop.f32.mrb[152].mxu1 }
 0x5b4   : > { %v15437_v8 = vpop.f32.mrb[153].mxu1  ;;  %8500 = vmatpush1.bf16.msra.mxu0 %v13387_v60 }
 0x5b5   : > { %v15439_v52 = vpop.f32.mrb[154].mxu1  ;;  %8501 = vmatprep.subr.bf16.mxu0 %v13388_v47 }
 0x5b6   : > { %v15441_v53 = vpop.f32.mrb[155].mxu1 }
 0x5b7   : > { %8347 = vmatmul.mubr.bf16.gmra.mrb[132].mxu0 %v17025_v40  ;;  %v17028_v40 = vld [vmem:[#allocation56_spill] sm:$0xff] }
 0x5b8   : > { %8356 = vmatprep.mubr.bf16.mxu0 %v17026_v25  ;;  %8502 = vmatpush1.bf16.msra.mxu0 %v13389_v63  ;;  %v13393_v25 = vld [vmem:[#allocation5 + $0x1060] ss:$40 sps:$4 sm:$0xff]   ;;  %v13394_v63 = vld [vmem:[#allocation5 + $0x10b4] ss:$40 sps:$4 sm:$0xff]  }
 0x5b9   : > { %8503 = vmatprep.subr.bf16.mxu0 %v13390_v0 }
 0x5bb   : > { %v15445_v16 = vpop.f32.mrb[156].mxu1 }
 0x5bc   : > { %v15447_v29 = vpop.f32.mrb[157].mxu1  ;;  %8504 = vmatpush1.bf16.msra.mxu0 %v13391_v23  ;;  %v13395_v23 = vld [vmem:[#allocation5 + $0x10b0] ss:$40 sps:$4 sm:$0xff]  }
 0x5bd   : > { %v15449_v60 = vpop.f32.mrb[158].mxu1  ;;  %8505 = vmatprep.subr.bf16.mxu0 %v13392_v49  ;;  %v13396_v49 = vld [vmem:[#allocation5 + $0x1104] ss:$40 sps:$4 sm:$0xff]  }
 0x5be   : > { %v15451_v47 = vpop.f32.mrb[159].mxu1 }
 0x5bf   : > { %8357 = vmatmul.mubr.bf16.gmra.mrb[136].mxu0 %v17027_v57  ;;  %v17034_v57 = vld [vmem:[#allocation58_spill] sm:$0xff] }
 0x5c0   : > { %8366 = vmatprep.mubr.bf16.mxu0 %v17028_v40  ;;  %8506 = vmatpush1.bf16.msra.mxu0 %v13393_v25  ;;  %v13397_v40 = vld [vmem:[#allocation5 + $0x1100] ss:$40 sps:$4 sm:$0xff]   ;;  %v13398_v25 = vld [vmem:[#allocation5 + $0x1154] ss:$40 sps:$4 sm:$0xff]  }
 0x5c1   : > { %8507 = vmatprep.subr.bf16.mxu0 %v13394_v63 }
 0x5c3   : > { %v15455_v0 = vpop.f32.mrb[160].mxu1 }
 0x5c4   : > { %17029 = vst [vmem:[#allocation18_spill] sm:$0xff] %v15455_v0  ;;  %v15457_v33 = vpop.f32.mrb[161].mxu1  ;;  %8508 = vmatpush1.bf16.msra.mxu0 %v13395_v23 }
 0x5c5   : > { %17030 = vst [vmem:[#allocation142_spill] sm:$0xff] %v15457_v33  ;;  %v15459_v6 = vpop.f32.mrb[162].mxu1  ;;  %8509 = vmatprep.subr.bf16.mxu0 %v13396_v49  ;;  %v17039_v49 = vld [vmem:[#allocation59_spill] sm:$0xff] }
 0x5c6   : > { %17031 = vst [vmem:[#allocation144_spill] sm:$0xff] %v15459_v6  ;;  %v15461_v48 = vpop.f32.mrb[163].mxu1 }
 0x5c7   : > { %17032 = vst [vmem:[#allocation143_spill] sm:$0xff] %v15461_v48  ;;  %8367 = vmatmul.mubr.bf16.gmra.mrb[140].mxu0 %v17033_v46  ;;  %v17040_v46 = vld [vmem:[#allocation60_spill] sm:$0xff]  ;;  %v17051_v48 = vld [vmem:[#allocation63_spill] sm:$0xff] }
 0x5c8   : > { %8376 = vmatprep.mubr.bf16.mxu0 %v17034_v57  ;;  %8510 = vmatpush1.bf16.msra.mxu0 %v13397_v40  ;;  %v13401_v57 = vld [vmem:[#allocation5 + $0x11a0] ss:$40 sps:$4 sm:$0xff]   ;;  %v13402_v40 = vld [vmem:[#allocation5 + $0x11f4] ss:$40 sps:$4 sm:$0xff]  }
 0x5c9   : > { %8511 = vmatprep.subr.bf16.mxu0 %v13398_v25 }
 0x5cb   : > { %v15465_v63 = vpop.f32.mrb[164].mxu1 }
 0x5cc   : > { %17035 = vst [vmem:[#allocation146_spill] sm:$0xff] %v15465_v63  ;;  %v15467_v4 = vpop.f32.mrb[165].mxu1  ;;  %8512 = vmatpush1.bf16.msra.mxu0 %v13399_v51 }
 0x5cd   : > { %17036 = vst [vmem:[#allocation147_spill] sm:$0xff] %v15467_v4  ;;  %v15469_v41 = vpop.f32.mrb[166].mxu1  ;;  %8513 = vmatprep.subr.bf16.mxu0 %v13400_v10  ;;  %v17045_v10 = vld [vmem:[#allocation61_spill] sm:$0xff] }
 0x5ce   : > { %17037 = vst [vmem:[#allocation148_spill] sm:$0xff] %v15469_v41  ;;  %v15471_v23 = vpop.f32.mrb[167].mxu1  ;;  %v13403_v41 = vld [vmem:[#allocation5 + $0x11f0] ss:$40 sps:$4 sm:$0xff]  }
 0x5cf   : > { %17038 = vst [vmem:[#allocation19_spill] sm:$0xff] %v15471_v23  ;;  %8377 = vmatmul.mubr.bf16.gmra.mrb[144].mxu0 %v17039_v49  ;;  %v13404_v23 = vld [vmem:[#allocation5 + $0x1244] ss:$40 sps:$4 sm:$0xff]   ;;  %v17046_v49 = vld [vmem:[#allocation62_spill] sm:$0xff] }
 0x5d0   : > { %8386 = vmatprep.mubr.bf16.mxu0 %v17040_v46  ;;  %8514 = vmatpush1.bf16.msra.mxu0 %v13401_v57  ;;  %v13405_v46 = vld [vmem:[#allocation5 + $0x1240] ss:$40 sps:$4 sm:$0xff]   ;;  %v13406_v57 = vld [vmem:[#allocation5 + $0x1294] ss:$40 sps:$4 sm:$0xff]  }
 0x5d1   : > { %8515 = vmatprep.subr.bf16.mxu0 %v13402_v40 }
 0x5d3   : > { %v15475_v25 = vpop.f32.mrb[168].mxu1 }
 0x5d4   : > { %17041 = vst [vmem:[#allocation20_spill] sm:$0xff] %v15475_v25  ;;  %v15477_v63 = vpop.f32.mrb[169].mxu1  ;;  %8516 = vmatpush1.bf16.msra.mxu0 %v13403_v41 }
 0x5d5   : > { %17042 = vst [vmem:[#allocation150_spill] sm:$0xff] %v15477_v63  ;;  %v15479_v4 = vpop.f32.mrb[170].mxu1  ;;  %8517 = vmatprep.subr.bf16.mxu0 %v13404_v23  ;;  %v13360_v23 = vld [vmem:[#allocation7 + $0xc0] sm:$0xff]  }
 0x5d6   : > { %17043 = vst [vmem:[#allocation152_spill] sm:$0xff] %v15479_v4  ;;  %v15481_v51 = vpop.f32.mrb[171].mxu1  ;;  %v13407_v4 = vld [vmem:[#allocation5 + $0x1290] ss:$40 sps:$4 sm:$0xff]   ;;  %11133 = vmatprep.subr.bf16.mxu1 %v13360_v23  ;;  %v13413_v23 = vld [vmem:[#allocation5 + $0x1380] ss:$40 sps:$4 sm:$0xff]  }
 0x5d7   : > { %17044 = vst [vmem:[#allocation151_spill] sm:$0xff] %v15481_v51  ;;  %8387 = vmatmul.mubr.bf16.gmra.mrb[148].mxu0 %v17045_v10  ;;  %v13408_v51 = vld [vmem:[#allocation5 + $0x12e4] ss:$40 sps:$4 sm:$0xff]  }
 0x5d8   : > { %8396 = vmatprep.mubr.bf16.mxu0 %v17046_v49  ;;  %8518 = vmatpush1.bf16.msra.mxu0 %v13405_v46  ;;  %v13361_v10 = vld [vmem:[#allocation7 + $0x80] sm:$0xff]   ;;  %v13362_v49 = vld [vmem:[#allocation7 + $0xc8] sm:$0xff]  }
 0x5d9   : > { %8519 = vmatprep.subr.bf16.mxu0 %v13406_v57  ;;  %v17052_v46 = vld [vmem:[#allocation64_spill] sm:$0xff]  ;;  %11134 = vmatpush3.bf16.msra.mxu1 %v13361_v10  ;;  %v13414_v10 = vld [vmem:[#allocation5 + $0x13d4] ss:$40 sps:$4 sm:$0xff]  }
 0x5da   : > { %v13409_v57 = vld [vmem:[#allocation5 + $0x12e0] ss:$40 sps:$4 sm:$0xff]   ;;  %11135 = vmatprep.subr.bf16.mxu1 %v13362_v49 }
 0x5db   : > { %v15485_v40 = vpop.f32.mrb[172].mxu1 }
 0x5dc   : > { %17047 = vst [vmem:[#allocation154_spill] sm:$0xff] %v15485_v40  ;;  %v15487_v25 = vpop.f32.mrb[173].mxu1  ;;  %8520 = vmatpush1.bf16.msra.mxu0 %v13407_v4  ;;  %v13410_v40 = vld [vmem:[#allocation5 + $0x1334] ss:$40 sps:$4 sm:$0xff]  }
 0x5dd   : > { %17048 = vst [vmem:[#allocation155_spill] sm:$0xff] %v15487_v25  ;;  %v15489_v63 = vpop.f32.mrb[174].mxu1  ;;  %8521 = vmatprep.subr.bf16.mxu0 %v13408_v51 }
 0x5de   : > { %17049 = vst [vmem:[#allocation156_spill] sm:$0xff] %v15489_v63  ;;  %v15491_v41 = vpop.f32.mrb[175].mxu1  ;;  %v13363_v63 = vld [vmem:[#allocation7 + $0x88] sm:$0xff]  }
 0x5df   : > { %17050 = vst [vmem:[#allocation21_spill] sm:$0xff] %v15491_v41  ;;  %8397 = vmatmul.mubr.bf16.gmra.mrb[152].mxu0 %v17051_v48  ;;  %v13412_v48 = vld [vmem:[#allocation5 + $0x1384] ss:$40 sps:$4 sm:$0xff]   ;;  %11136 = vmatpush3.bf16.msra.mxu1 %v13363_v63 }
 0x5e0   : > { %8406 = vmatprep.mubr.bf16.mxu0 %v17052_v46  ;;  %8522 = vmatpush1.bf16.msra.mxu0 %v13409_v57  ;;  %v17055_v46 = vld [vmem:[#allocation65_spill] sm:$0xff]  ;;  %v17060_v63 = vld [vmem:[#allocation68_spill] sm:$0xff] }
 0x5e1   : > { %8523 = vmatprep.subr.bf16.mxu0 %v13410_v40  ;;  %v17056_v40 = vld [vmem:[#allocation66_spill] sm:$0xff] }
 0x5e3   : > { %v11037_v25 = vpop.f32.mrb[176].mxu1 }
 0x5e4   : > { %v11038_v4 = vpop.f32.mrb[177].mxu1  ;;  %8524 = vmatpush1.bf16.msra.mxu0 %v13411_v3  ;;  %v13415_v3 = vld [vmem:[#allocation5 + $0x13d0] ss:$40 sps:$4 sm:$0xff]  }
 0x5e5   : > { %v15495_v41 = vadd.f32 %v11038_v4, %v11037_v25  ;;  %v11040_v51 = vpop.f32.mrb[178].mxu1  ;;  %8525 = vmatprep.subr.bf16.mxu0 %v13412_v48 }
 0x5e6   : > { %v11041_v6 = vpop.f32.mrb[179].mxu1 }
 0x5e7   : > { %17053 = vst [vmem:[#allocation22_spill] sm:$0xff] %v15495_v41  ;;  %v15497_v33 = vadd.f32 %v11041_v6, %v11040_v51  ;;  %8407 = vmatmul.mubr.bf16.gmra.mrb[156].mxu0 %v17055_v46  ;;  %v17059_v6 = vld [vmem:[#allocation67_spill] sm:$0xff] }
 0x5e8   : > { %8416 = vmatprep.mubr.bf16.mxu0 %v17056_v40  ;;  %8526 = vmatpush1.bf16.msra.mxu0 %v13413_v23 }
 0x5e9   : > { %17054 = vst [vmem:[#allocation158_spill] sm:$0xff] %v15497_v33  ;;  %8527 = vmatprep.subr.bf16.mxu0 %v13414_v10 }
 0x5eb   : > { %v11043_v49 = vpop.f32.mrb[180].mxu1 }
 0x5ec   : > { %v11044_v25 = vpop.f32.mrb[181].mxu1  ;;  %8528 = vmatpush1.bf16.msra.mxu0 %v13415_v3 }
 0x5ed   : > { %v15501_v57 = vadd.f32 %v11044_v25, %v11043_v49  ;;  %v11046_v4 = vpop.f32.mrb[182].mxu1  ;;  %v17063_v49 = vld [vmem:[#allocation69_spill] sm:$0xff]  ;;  %v17064_v25 = vld [vmem:[#allocation70_spill] sm:$0xff] }
 0x5ee   : > { %v11047_v41 = vpop.f32.mrb[183].mxu1 }
 0x5ef   : > { %17057 = vst [vmem:[#allocation160_spill] sm:$0xff] %v15501_v57  ;;  %v15503_v48 = vadd.f32 %v11047_v41, %v11046_v4  ;;  %8417 = vmatmul.mubr.bf16.gmra.mrb[160].mxu0 %v17059_v6 }
 0x5f0   : > { %8426 = vmatprep.mubr.bf16.mxu0 %v17060_v63  ;;  %v17067_v63 = vld [vmem:[#allocation71_spill] sm:$0xff] }
 0x5f1   : > { %17058 = vst [vmem:[#allocation159_spill] sm:$0xff] %v15503_v48 }
 0x5f3   : > { %v11049_v51 = vpop.f32.mrb[184].mxu1 }
 0x5f4   : > { %v11050_v46 = vpop.f32.mrb[185].mxu1 }
 0x5f5   : > { %v15507_v40 = vadd.f32 %v11050_v46, %v11049_v51  ;;  %v11052_v23 = vpop.f32.mrb[186].mxu1  ;;  %v17068_v51 = vld [vmem:[#allocation72_spill] sm:$0xff] }
 0x5f6   : > { %v11053_v10 = vpop.f32.mrb[187].mxu1 }
 0x5f7   : > { %17061 = vst [vmem:[#allocation162_spill] sm:$0xff] %v15507_v40  ;;  %v15509_v33 = vadd.f32 %v11053_v10, %v11052_v23  ;;  %8427 = vmatmul.mubr.bf16.gmra.mrb[164].mxu0 %v17063_v49 }
 0x5f8   : > { %8436 = vmatprep.mubr.bf16.mxu0 %v17064_v25  ;;  %v17071_v25 = vld [vmem:[#allocation73_spill] sm:$0xff] }
 0x5f9   : > { %17062 = vst [vmem:[#allocation163_spill] sm:$0xff] %v15509_v33 }
 0x5fb   : > { %v11055_v3 = vpop.f32.mrb[188].mxu1 }
 0x5fc   : > { %v11056_v57 = vpop.f32.mrb[189].mxu1 }
 0x5fd   : > { %v15513_v41 = vadd.f32 %v11056_v57, %v11055_v3  ;;  %v11058_v4 = vpop.f32.mrb[190].mxu1  ;;  %v17072_v57 = vld [vmem:[#allocation74_spill] sm:$0xff] }
 0x5fe   : > { %v11059_v6 = vpop.f32.mrb[191].mxu1 }
 0x5ff   : > { %17065 = vst [vmem:[#allocation164_spill] sm:$0xff] %v15513_v41  ;;  %v15515_v48 = vadd.f32 %v11059_v6, %v11058_v4  ;;  %8437 = vmatmul.mubr.bf16.gmra.mrb[168].mxu0 %v17067_v63 }
 0x600   : > { %8446 = vmatprep.mubr.bf16.mxu0 %v17068_v51  ;;  %v17075_v51 = vld [vmem:[#allocation75_spill] sm:$0xff] }
 0x601   : > { %17066 = vst [vmem:[#allocation23_spill] sm:$0xff] %v15515_v48 }
 0x603   : > { %v11061_v46 = vpop.f32.mrb[192].mxu1 }
 0x604   : > { %v11062_v40 = vpop.f32.mrb[193].mxu1 }
 0x605   : > { %v15519_v23 = vadd.f32 %v11062_v40, %v11061_v46  ;;  %v11064_v10 = vpop.f32.mrb[194].mxu1  ;;  %v17076_v40 = vld [vmem:[#allocation76_spill] sm:$0xff] }
 0x606   : > { %v11065_v49 = vpop.f32.mrb[195].mxu1 }
 0x607   : > { %17069 = vst [vmem:[#allocation24_spill] sm:$0xff] %v15519_v23  ;;  %v15521_v33 = vadd.f32 %v11065_v49, %v11064_v10  ;;  %8447 = vmatmul.mubr.bf16.gmra.mrb[172].mxu0 %v17071_v25 }
 0x608   : > { %8456 = vmatprep.mubr.bf16.mxu0 %v17072_v57  ;;  %v17079_v57 = vld [vmem:[#allocation77_spill] sm:$0xff] }
 0x609   : > { %17070 = vst [vmem:[#allocation166_spill] sm:$0xff] %v15521_v33 }
 0x60b   : > { %v11067_v3 = vpop.f32.mrb[196].mxu1 }
 0x60c   : > { %v11068_v41 = vpop.f32.mrb[197].mxu1 }
 0x60d   : > { %v15525_v4 = vadd.f32 %v11068_v41, %v11067_v3  ;;  %v11070_v6 = vpop.f32.mrb[198].mxu1  ;;  %v17080_v41 = vld [vmem:[#allocation78_spill] sm:$0xff] }
 0x60e   : > { %v11071_v63 = vpop.f32.mrb[199].mxu1 }
 0x60f   : > { %17073 = vst [vmem:[#allocation168_spill] sm:$0xff] %v15525_v4  ;;  %v15527_v48 = vadd.f32 %v11071_v63, %v11070_v6  ;;  %8457 = vmatmul.mubr.bf16.gmra.mrb[176].mxu0 %v17075_v51 }
 0x610   : > { %8466 = vmatprep.mubr.bf16.mxu0 %v17076_v40  ;;  %v17083_v40 = vld [vmem:[#allocation79_spill] sm:$0xff] }
 0x611   : > { %17074 = vst [vmem:[#allocation167_spill] sm:$0xff] %v15527_v48 }
 0x613   : > { %v11073_v46 = vpop.f32.mrb[200].mxu1 }
 0x614   : > { %v11074_v23 = vpop.f32.mrb[201].mxu1 }
 0x615   : > { %v15531_v10 = vadd.f32 %v11074_v23, %v11073_v46  ;;  %v11076_v49 = vpop.f32.mrb[202].mxu1  ;;  %v17084_v23 = vld [vmem:[#allocation80_spill] sm:$0xff] }
 0x616   : > { %v11077_v25 = vpop.f32.mrb[203].mxu1 }
 0x617   : > { %17077 = vst [vmem:[#allocation170_spill] sm:$0xff] %v15531_v10  ;;  %v15533_v33 = vadd.f32 %v11077_v25, %v11076_v49  ;;  %8467 = vmatmul.mubr.bf16.gmra.mrb[180].mxu0 %v17079_v57 }
 0x618   : > { %8476 = vmatprep.mubr.bf16.mxu0 %v17080_v41  ;;  %v17087_v41 = vld [vmem:[#allocation81_spill] sm:$0xff] }
 0x619   : > { %17078 = vst [vmem:[#allocation171_spill] sm:$0xff] %v15533_v33 }
 0x61b   : > { %v11079_v3 = vpop.f32.mrb[204].mxu1 }
 0x61c   : > { %v11080_v4 = vpop.f32.mrb[205].mxu1 }
 0x61d   : > { %v15537_v6 = vadd.f32 %v11080_v4, %v11079_v3  ;;  %v11082_v63 = vpop.f32.mrb[206].mxu1  ;;  %v17088_v4 = vld [vmem:[#allocation82_spill] sm:$0xff] }
 0x61e   : > { %v11083_v51 = vpop.f32.mrb[207].mxu1 }
 0x61f   : > { %17081 = vst [vmem:[#allocation172_spill] sm:$0xff] %v15537_v6  ;;  %v15539_v48 = vadd.f32 %v11083_v51, %v11082_v63  ;;  %8477 = vmatmul.mubr.bf16.gmra.mrb[184].mxu0 %v17083_v40 }
 0x620   : > { %8486 = vmatprep.mubr.bf16.mxu0 %v17084_v23  ;;  %v17091_v23 = vld [vmem:[#allocation83_spill] sm:$0xff] }
 0x621   : > { %17082 = vst [vmem:[#allocation25_spill] sm:$0xff] %v15539_v48 }
 0x623   : > { %v11085_v46 = vpop.f32.mrb[208].mxu1 }
 0x624   : > { %v11086_v10 = vpop.f32.mrb[209].mxu1 }
 0x625   : > { %v15543_v49 = vadd.f32 %v11086_v10, %v11085_v46  ;;  %v11088_v25 = vpop.f32.mrb[210].mxu1  ;;  %v17092_v10 = vld [vmem:[#allocation84_spill] sm:$0xff]  ;;  %v13364_v46 = vld [vmem:[#allocation7 + $0xd0] sm:$0xff]  }
 0x626   : > { %v11089_v57 = vpop.f32.mrb[211].mxu1  ;;  %11137 = vmatprep.subr.bf16.mxu1 %v13364_v46  ;;  %v17100_v46 = vld [vmem:[#allocation88_spill] sm:$0xff] }
 0x627   : > { %17085 = vst [vmem:[#allocation26_spill] sm:$0xff] %v15543_v49  ;;  %v15545_v33 = vadd.f32 %v11089_v57, %v11088_v25  ;;  %8487 = vmatmul.mubr.bf16.gmra.mrb[188].mxu0 %v17087_v41 }
 0x628   : > { %8529 = vmatprep.mubr.bf16.mxu0 %v17088_v4  ;;  %v13365_v4 = vld [vmem:[#allocation7 + $0x90] sm:$0xff]  }
 0x629   : > { %17086 = vst [vmem:[#allocation174_spill] sm:$0xff] %v15545_v33  ;;  %11138 = vmatpush3.bf16.msra.mxu1 %v13365_v4 }
 0x62b   : > { %v11091_v3 = vpop.f32.mrb[212].mxu1 }
 0x62c   : > { %v11092_v6 = vpop.f32.mrb[213].mxu1 }
 0x62d   : > { %v15549_v63 = vadd.f32 %v11092_v6, %v11091_v3  ;;  %v11094_v51 = vpop.f32.mrb[214].mxu1  ;;  %v17095_v6 = vld [vmem:[#allocation85_spill] sm:$0xff]  ;;  %v17096_v3 = vld [vmem:[#allocation86_spill] sm:$0xff] }
 0x62e   : > { %v11095_v40 = vpop.f32.mrb[215].mxu1 }
 0x62f   : > { %17089 = vst [vmem:[#allocation176_spill] sm:$0xff] %v15549_v63  ;;  %v15551_v48 = vadd.f32 %v11095_v40, %v11094_v51  ;;  %8530 = vmatmul.mubr.bf16.vlgmr.msra.gmra.mrb[128].mxu0 %v17091_v23 }
 0x630   : > { %8539 = vmatprep.mubr.bf16.mxu0 %v17092_v10 }
 0x631   : > { %17090 = vst [vmem:[#allocation175_spill] sm:$0xff] %v15551_v48 }
 0x633   : > { %v11097_v49 = vpop.f32.mrb[216].mxu1 }
 0x634   : > { %v11098_v25 = vpop.f32.mrb[217].mxu1 }
 0x635   : > { %v15555_v57 = vadd.f32 %v11098_v25, %v11097_v49  ;;  %v11100_v41 = vpop.f32.mrb[218].mxu1  ;;  %v17099_v49 = vld [vmem:[#allocation87_spill] sm:$0xff] }
 0x636   : > { %v11101_v33 = vpop.f32.mrb[219].mxu1  ;;  %v13366_v25 = vld [vmem:[#allocation7 + $0xd8] sm:$0xff]  }
 0x637   : > { %17093 = vst [vmem:[#allocation178_spill] sm:$0xff] %v15555_v57  ;;  %v15557_v0 = vadd.f32 %v11101_v33, %v11100_v41  ;;  %8540 = vmatmul.mubr.bf16.gmra.mrb[132].mxu0 %v17095_v6  ;;  %11139 = vmatprep.subr.bf16.mxu1 %v13366_v25 }
 0x638   : > { %8549 = vmatprep.mubr.bf16.mxu0 %v17096_v3  ;;  %v13367_v3 = vld [vmem:[#allocation7 + $0x98] sm:$0xff]  }
 0x639   : > { %17094 = vst [vmem:[#allocation179_spill] sm:$0xff] %v15557_v0  ;;  %11140 = vmatpush3.bf16.msra.mxu1 %v13367_v3 }
 0x63b   : > { %v11103_v51 = vpop.f32.mrb[220].mxu1 }
 0x63c   : > { %v11104_v40 = vpop.f32.mrb[221].mxu1 }
 0x63d   : > { %v15561_v23 = vadd.f32 %v11104_v40, %v11103_v51  ;;  %v11106_v10 = vpop.f32.mrb[222].mxu1  ;;  %v17103_v51 = vld [vmem:[#allocation89_spill] sm:$0xff] }
 0x63e   : > { %v11107_v48 = vpop.f32.mrb[223].mxu1 }
 0x63f   : > { %17097 = vst [vmem:[#allocation180_spill] sm:$0xff] %v15561_v23  ;;  %v15563_v63 = vadd.f32 %v11107_v48, %v11106_v10  ;;  %8550 = vmatmul.mubr.bf16.gmra.mrb[136].mxu0 %v17099_v49  ;;  %v13368_v23 = vld [vmem:[#allocation7 + $0xe0] sm:$0xff]  }
 0x640   : > { %8559 = vmatprep.mubr.bf16.mxu0 %v17100_v46  ;;  %11141 = vmatprep.subr.bf16.mxu1 %v13368_v23  ;;  %v13372_v23 = vld [vmem:[#allocation7 + $0xf0] sm:$0xff]  }
 0x641   : > { %17098 = vst [vmem:[#allocation27_spill] sm:$0xff] %v15563_v63 }
 0x643   : > { %v11109_v33 = vpop.f32.mrb[224].mxu1 }
 0x644   : > { %v11110_v41 = vpop.f32.mrb[225].mxu1 }
 0x645   : > { %v15567_v4 = vadd.f32 %v11110_v41, %v11109_v33  ;;  %v11112_v6 = vpop.f32.mrb[226].mxu1 }
 0x646   : > { %v11113_v0 = vpop.f32.mrb[227].mxu1 }
 0x647   : > { %17101 = vst [vmem:[#allocation28_spill] sm:$0xff] %v15567_v4  ;;  %v15569_v57 = vadd.f32 %v11113_v0, %v11112_v6  ;;  %8560 = vmatmul.mubr.bf16.gmra.mrb[140].mxu0 %v17103_v51  ;;  %v13369_v0 = vld [vmem:[#allocation7 + $0xa0] sm:$0xff]  }
 0x648   : > { %11142 = vmatpush3.bf16.msra.mxu1 %v13369_v0  ;;  %v15584_v0 = vld [vmem:[#allocation7 + $0x100] sm:$0xff]  }
 0x649   : > { %17102 = vst [vmem:[#allocation182_spill] sm:$0xff] %v15569_v57 }
 0x64b   : > { %v11115_v48 = vpop.f32.mrb[228].mxu1 }
 0x64c   : > { %v11116_v40 = vpop.f32.mrb[229].mxu1 }
 0x64d   : > { %v15572_v10 = vadd.f32 %v11116_v40, %v11115_v48  ;;  %v11118_v49 = vpop.f32.mrb[230].mxu1 }
 0x64e   : > { %v11119_v46 = vpop.f32.mrb[231].mxu1 }
 0x64f   : > { %17104 = vst [vmem:[#allocation184_spill] sm:$0xff] %v15572_v10  ;;  %v15574_v63 = vadd.f32 %v11119_v46, %v11118_v49  ;;  %v13370_v46 = vld [vmem:[#allocation7 + $0xe8] sm:$0xff]  }
 0x650   : > { %11143 = vmatprep.subr.bf16.mxu1 %v13370_v46 }
 0x651   : > { %17105 = vst [vmem:[#allocation183_spill] sm:$0xff] %v15574_v63  ;;  %v13371_v63 = vld [vmem:[#allocation7 + $0xa8] sm:$0xff]  }
 0x652   : > { %11144 = vmatpush3.bf16.msra.mxu1 %v13371_v63  ;;  %v17110_v63 = vld [vmem:[#allocation137_spill] sm:$0xff] }
 0x653   : > { %v11121_v25 = vpop.f32.mrb[232].mxu1  ;;  %11145 = vmatprep.subr.bf16.mxu1 %v13372_v23  ;;  %v8733_v46 = vmul.f32 %v17110_v63, %v17110_v63 }
 0x654   : > { %v11122_v33 = vpop.f32.mrb[233].mxu1 }
 0x655   : > { %v15576_v41 = vadd.f32 %v11122_v33, %v11121_v25  ;;  %v11124_v4 = vpop.f32.mrb[234].mxu1  ;;  %v13373_v25 = vld [vmem:[#allocation7 + $0xb0] sm:$0xff]   ;;  %v13374_v33 = vld [vmem:[#allocation7 + $0xf8] sm:$0xff]  }
 0x656   : > { %v11125_v6 = vpop.f32.mrb[235].mxu1  ;;  %11146 = vmatpush3.bf16.msra.mxu1 %v13373_v25 }
 0x657   : > { %17106 = vst [vmem:[#allocation186_spill] sm:$0xff] %v15576_v41  ;;  %v15578_v3 = vadd.f32 %v11125_v6, %v11124_v4  ;;  %11147 = vmatprep.subr.bf16.mxu1 %v13374_v33  ;;  %v13375_v4 = vld [vmem:[#allocation7 + $0xb8] sm:$0xff]  }
 0x659   : > { %17107 = vst [vmem:[#allocation187_spill] sm:$0xff] %v15578_v3  ;;  %v17111_v3 = vld [vmem:[#allocation141_spill] sm:$0xff] }
 0x65a   : > { %11148 = vmatpush3.bf16.msra.mxu1 %v13375_v4  ;;  %v8734_v4 = vmul.f32 %v15085_v32, %v15085_v32 }
 0x65b   : > { %v11127_v51 = vpop.f32.mrb[236].mxu1  ;;  %11269 = vmatprep.subr.bf16.mxu1 %v15584_v0 }
 0x65c   : > { %v11128_v57 = vpop.f32.mrb[237].mxu1 }
 0x65d   : > { %v15580_v48 = vadd.f32 %v11128_v57, %v11127_v51  ;;  %v11130_v40 = vpop.f32.mrb[238].mxu1 }
 0x65e   : > { %v11131_v10 = vpop.f32.mrb[239].mxu1 }
 0x65f   : > { %17108 = vst [vmem:[#allocation188_spill] sm:$0xff] %v15580_v48  ;;  %v15582_v49 = vadd.f32 %v11131_v10, %v11130_v40 }
 0x661   : > { %17109 = vst [vmem:[#allocation29_spill] sm:$0xff] %v15582_v49 }
 0x6a2   : > { %v8378_v57 = vpop.f32.mrb[144].mxu0 }
 0x6a3   : > { %v11349_v10 = vadd.f32 %v15375_v28, %v8378_v57  ;;  %v8380_v6 = vpop.f32.mrb[145].mxu0  ;;  %v8738_v28 = vmul.f32 %v17111_v3, %v17111_v3 }
 0x6a4   : > { %v11350_v51 = vadd.f32 %v15377_v61, %v8380_v6  ;;  %v8382_v40 = vpop.f32.mrb[146].mxu0  ;;  %v8739_v6 = vmul.f32 %v15097_v26, %v15097_v26 }
 0x6a5   : > { %v8893_v23 = vmul.f32 %v11349_v10, %v11349_v10  ;;  %v11351_v25 = vadd.f32 %v15379_v55, %v8382_v40  ;;  %v8384_v33 = vpop.f32.mrb[147].mxu0 }
 0x6a6   : > { %v8894_v49 = vmul.f32 %v11350_v51, %v11350_v51  ;;  %v11352_v48 = vadd.f32 %v15381_v54, %v8384_v33 }
 0x6a7   : > { %v15597_v57 = vadd.f32 %v8893_v23, %v8733_v46  ;;  %v8898_v61 = vmul.f32 %v11351_v25, %v11351_v25 }
 0x6a8   : > { %v15601_v63 = vadd.f32 %v8894_v49, %v8734_v4  ;;  %v8899_v10 = vmul.f32 %v11352_v48, %v11352_v48  ;;  %v17112_v49 = vld [vmem:[#allocation145_spill] sm:$0xff] }
 0x6a9   : > { %v15603_v55 = vadd.f32 %v8898_v61, %v8738_v28  ;;  %v8743_v48 = vmul.f32 %v17112_v49, %v17112_v49 }
 0x6aa   : > { %v15605_v40 = vadd.f32 %v8899_v10, %v8739_v6  ;;  %v8388_v32 = vpop.f32.mrb[148].mxu0  ;;  %v17113_v6 = vld [vmem:[#allocation149_spill] sm:$0xff] }
 0x6ab   : > { %v11353_v51 = vadd.f32 %v15385_v39, %v8388_v32  ;;  %v8390_v54 = vpop.f32.mrb[149].mxu0  ;;  %v8744_v39 = vmul.f32 %v15111_v34, %v15111_v34 }
 0x6ac   : > { %v11354_v46 = vadd.f32 %v15387_v15, %v8390_v54  ;;  %v8392_v23 = vpop.f32.mrb[150].mxu0  ;;  %v8748_v15 = vmul.f32 %v17113_v6, %v17113_v6  ;;  %v8749_v54 = vmul.f32 %v15121_v31, %v15121_v31 }
 0x6ad   : > { %v8903_v25 = vmul.f32 %v11353_v51, %v11353_v51  ;;  %v11355_v33 = vadd.f32 %v15389_v59, %v8392_v23  ;;  %v8394_v4 = vpop.f32.mrb[151].mxu0 }
 0x6ae   : > { %v8904_v28 = vmul.f32 %v11354_v46, %v11354_v46  ;;  %v11356_v61 = vadd.f32 %v15391_v36, %v8394_v4 }
 0x6af   : > { %v15621_v10 = vadd.f32 %v8903_v25, %v8743_v48  ;;  %v8908_v32 = vmul.f32 %v11355_v33, %v11355_v33  ;;  %v17114_v33 = vld [vmem:[#allocation153_spill] sm:$0xff] }
 0x6b0   : > { %v15625_v49 = vadd.f32 %v8904_v28, %v8744_v39  ;;  %v8909_v51 = vmul.f32 %v11356_v61, %v11356_v61  ;;  %v8753_v39 = vmul.f32 %v17114_v33, %v17114_v33 }
 0x6b1   : > { %v15627_v59 = vadd.f32 %v8908_v32, %v8748_v15 }
 0x6b2   : > { %v15629_v23 = vadd.f32 %v8909_v51, %v8749_v54  ;;  %v8398_v34 = vpop.f32.mrb[152].mxu0  ;;  %v17115_v54 = vld [vmem:[#allocation157_spill] sm:$0xff] }
 0x6b3   : > { %v11357_v46 = vadd.f32 %v15395_v38, %v8398_v34  ;;  %v8400_v36 = vpop.f32.mrb[153].mxu0  ;;  %v8754_v38 = vmul.f32 %v15135_v21, %v15135_v21  ;;  %v8758_v51 = vmul.f32 %v17115_v54, %v17115_v54 }
 0x6b4   : > { %v11358_v25 = vadd.f32 %v15397_v18, %v8400_v36  ;;  %v8402_v31 = vpop.f32.mrb[154].mxu0  ;;  %v8759_v36 = vmul.f32 %v15145_v43, %v15145_v43 }
 0x6b5   : > { %v8913_v28 = vmul.f32 %v11357_v46, %v11357_v46  ;;  %v11359_v61 = vadd.f32 %v15399_v11, %v8402_v31  ;;  %v8404_v6 = vpop.f32.mrb[155].mxu0 }
 0x6b6   : > { %v8914_v15 = vmul.f32 %v11358_v25, %v11358_v25  ;;  %v11360_v32 = vadd.f32 %v15401_v24, %v8404_v6 }
 0x6b7   : > { %v15645_v34 = vadd.f32 %v8913_v28, %v8753_v39  ;;  %v8918_v18 = vmul.f32 %v11359_v61, %v11359_v61  ;;  %v17116_v61 = vld [vmem:[#allocation161_spill] sm:$0xff] }
 0x6b8   : > { %v15649_v33 = vadd.f32 %v8914_v15, %v8754_v38  ;;  %v8919_v46 = vmul.f32 %v11360_v32, %v11360_v32  ;;  %v8763_v38 = vmul.f32 %v17116_v61, %v17116_v61 }
 0x6b9   : > { %v15651_v11 = vadd.f32 %v8918_v18, %v8758_v51 }
 0x6ba   : > { %v15653_v31 = vadd.f32 %v8919_v46, %v8759_v36  ;;  %v8408_v21 = vpop.f32.mrb[156].mxu0  ;;  %v17117_v36 = vld [vmem:[#allocation165_spill] sm:$0xff] }
 0x6bb   : > { %v11361_v25 = vadd.f32 %v15405_v27, %v8408_v21  ;;  %v8410_v24 = vpop.f32.mrb[157].mxu0  ;;  %v8764_v27 = vmul.f32 %v15159_v7, %v15159_v7 }
 0x6bc   : > { %v11362_v39 = vadd.f32 %v15407_v17, %v8410_v24  ;;  %v8412_v28 = vpop.f32.mrb[158].mxu0  ;;  %v8768_v17 = vmul.f32 %v17117_v36, %v17117_v36  ;;  %v8769_v24 = vmul.f32 %v15169_v2, %v15169_v2 }
 0x6bd   : > { %v8923_v15 = vmul.f32 %v11361_v25, %v11361_v25  ;;  %v11363_v32 = vadd.f32 %v15409_v42, %v8412_v28  ;;  %v8414_v54 = vpop.f32.mrb[159].mxu0 }
 0x6be   : > { %v8924_v51 = vmul.f32 %v11362_v39, %v11362_v39  ;;  %v11364_v18 = vadd.f32 %v15411_v35, %v8414_v54 }
 0x6bf   : > { %v15669_v46 = vadd.f32 %v8923_v15, %v8763_v38  ;;  %v8928_v21 = vmul.f32 %v11363_v32, %v11363_v32  ;;  %v17118_v32 = vld [vmem:[#allocation169_spill] sm:$0xff] }
 0x6c0   : > { %v15673_v61 = vadd.f32 %v8924_v51, %v8764_v27  ;;  %v8929_v25 = vmul.f32 %v11364_v18, %v11364_v18  ;;  %v8773_v27 = vmul.f32 %v17118_v32, %v17118_v32 }
 0x6c1   : > { %v15675_v42 = vadd.f32 %v8928_v21, %v8768_v17 }
 0x6c2   : > { %v15677_v28 = vadd.f32 %v8929_v25, %v8769_v24  ;;  %v8418_v7 = vpop.f32.mrb[160].mxu0  ;;  %v17119_v24 = vld [vmem:[#allocation173_spill] sm:$0xff] }
 0x6c3   : > { %v11365_v39 = vadd.f32 %v15415_v62, %v8418_v7  ;;  %v8420_v35 = vpop.f32.mrb[161].mxu0  ;;  %v8774_v62 = vmul.f32 %v15183_v56, %v15183_v56  ;;  %v8778_v25 = vmul.f32 %v17119_v24, %v17119_v24 }
 0x6c4   : > { %v11366_v15 = vadd.f32 %v15417_v1, %v8420_v35  ;;  %v8422_v2 = vpop.f32.mrb[162].mxu0  ;;  %v8779_v35 = vmul.f32 %v15193_v50, %v15193_v50  ;;  %v17136_v50 = vld [vmem:[#allocation205_spill] sm:$0xff] }
 0x6c5   : > { %v8933_v51 = vmul.f32 %v11365_v39, %v11365_v39  ;;  %v11367_v18 = vadd.f32 %v15419_v58, %v8422_v2  ;;  %v8424_v36 = vpop.f32.mrb[163].mxu0  ;;  %v8818_v38 = vmul.f32 %v17136_v50, %v17136_v50  ;;  %v17146_v50 = vld [vmem:[#allocation213_spill] sm:$0xff] }
 0x6c6   : > { %v8934_v17 = vmul.f32 %v11366_v15, %v11366_v15  ;;  %v11368_v21 = vadd.f32 %v15421_v37, %v8424_v36 }
 0x6c7   : > { %v15693_v7 = vadd.f32 %v8933_v51, %v8773_v27  ;;  %v8938_v1 = vmul.f32 %v11367_v18, %v11367_v18  ;;  %v17120_v18 = vld [vmem:[#allocation177_spill] sm:$0xff] }
 0x6c8   : > { %v15697_v32 = vadd.f32 %v8934_v17, %v8774_v62  ;;  %v8939_v39 = vmul.f32 %v11368_v21, %v11368_v21  ;;  %v8783_v62 = vmul.f32 %v17120_v18, %v17120_v18 }
 0x6c9   : > { %v15699_v58 = vadd.f32 %v8938_v1, %v8778_v25 }
 0x6ca   : > { %v15701_v2 = vadd.f32 %v8939_v39, %v8779_v35  ;;  %v8428_v56 = vpop.f32.mrb[164].mxu0  ;;  %v17121_v35 = vld [vmem:[#allocation181_spill] sm:$0xff] }
 0x6cb   : > { %v11369_v15 = vadd.f32 %v15425_v20, %v8428_v56  ;;  %v8430_v37 = vpop.f32.mrb[165].mxu0  ;;  %v8784_v20 = vmul.f32 %v15207_v5, %v15207_v5 }
 0x6cc   : > { %v11370_v27 = vadd.f32 %v15427_v45, %v8430_v37  ;;  %v8432_v51 = vpop.f32.mrb[166].mxu0  ;;  %v8788_v45 = vmul.f32 %v17121_v35, %v17121_v35  ;;  %v8789_v37 = vmul.f32 %v15217_v13, %v15217_v13 }
 0x6cd   : > { %v8943_v17 = vmul.f32 %v11369_v15, %v11369_v15  ;;  %v11371_v21 = vadd.f32 %v15429_v22, %v8432_v51  ;;  %v8434_v24 = vpop.f32.mrb[167].mxu0 }
 0x6ce   : > { %v8944_v25 = vmul.f32 %v11370_v27, %v11370_v27  ;;  %v11372_v1 = vadd.f32 %v15431_v9, %v8434_v24 }
 0x6cf   : > { %v15717_v39 = vadd.f32 %v8943_v17, %v8783_v62  ;;  %v8948_v56 = vmul.f32 %v11371_v21, %v11371_v21  ;;  %v17122_v21 = vld [vmem:[#allocation185_spill] sm:$0xff] }
 0x6d0   : > { %v15721_v18 = vadd.f32 %v8944_v25, %v8784_v20  ;;  %v8949_v15 = vmul.f32 %v11372_v1, %v11372_v1  ;;  %v8793_v20 = vmul.f32 %v17122_v21, %v17122_v21 }
 0x6d1   : > { %v15723_v22 = vadd.f32 %v8948_v56, %v8788_v45 }
 0x6d2   : > { %v15725_v51 = vadd.f32 %v8949_v15, %v8789_v37  ;;  %v8438_v5 = vpop.f32.mrb[168].mxu0  ;;  %v17123_v37 = vld [vmem:[#allocation189_spill] sm:$0xff] }
 0x6d3   : > { %v11373_v27 = vadd.f32 %v15435_v14, %v8438_v5  ;;  %v8440_v9 = vpop.f32.mrb[169].mxu0  ;;  %v8794_v14 = vmul.f32 %v15231_v19, %v15231_v19  ;;  %v8798_v15 = vmul.f32 %v17123_v37, %v17123_v37 }
 0x6d4   : > { %v11374_v17 = vadd.f32 %v15437_v8, %v8440_v9  ;;  %v8442_v13 = vpop.f32.mrb[170].mxu0  ;;  %v8799_v9 = vmul.f32 %v15241_v44, %v15241_v44 }
 0x6d5   : > { %v8953_v25 = vmul.f32 %v11373_v27, %v11373_v27  ;;  %v11375_v1 = vadd.f32 %v15439_v52, %v8442_v13  ;;  %v8444_v35 = vpop.f32.mrb[171].mxu0 }
 0x6d6   : > { %v8954_v45 = vmul.f32 %v11374_v17, %v11374_v17  ;;  %v11376_v56 = vadd.f32 %v15441_v53, %v8444_v35 }
 0x6d7   : > { %v15741_v5 = vadd.f32 %v8953_v25, %v8793_v20  ;;  %v8958_v8 = vmul.f32 %v11375_v1, %v11375_v1  ;;  %v17126_v1 = vld [vmem:[#allocation193_spill] sm:$0xff] }
 0x6d8   : > { %v15745_v21 = vadd.f32 %v8954_v45, %v8794_v14  ;;  %v8959_v27 = vmul.f32 %v11376_v56, %v11376_v56  ;;  %v8803_v14 = vmul.f32 %v17126_v1, %v17126_v1 }
 0x6d9   : > { %v15747_v52 = vadd.f32 %v8958_v8, %v8798_v15 }
 0x6da   : > { %17124 = vst [vmem:[#allocation30_spill] sm:$0xff] %v15745_v21  ;;  %v15749_v13 = vadd.f32 %v8959_v27, %v8799_v9  ;;  %v8448_v19 = vpop.f32.mrb[172].mxu0  ;;  %v17127_v9 = vld [vmem:[#allocation197_spill] sm:$0xff] }
 0x6db   : > { %v11377_v17 = vadd.f32 %v15445_v16, %v8448_v19  ;;  %v8450_v53 = vpop.f32.mrb[173].mxu0  ;;  %v8804_v16 = vmul.f32 %v15255_v30, %v15255_v30 }
 0x6dc   : > { %17125 = vst [vmem:[#allocation190_spill] sm:$0xff] %v15749_v13  ;;  %v11378_v20 = vadd.f32 %v15447_v29, %v8450_v53  ;;  %v8452_v25 = vpop.f32.mrb[174].mxu0  ;;  %v8808_v29 = vmul.f32 %v17127_v9, %v17127_v9  ;;  %v8809_v53 = vmul.f32 %v15265_v12, %v15265_v12  ;;  %v17133_v9 = vld [vmem:[#allocation144_spill] sm:$0xff] }
 0x6dd   : > { %v8963_v45 = vmul.f32 %v11377_v17, %v11377_v17  ;;  %v11379_v56 = vadd.f32 %v15449_v60, %v8452_v25  ;;  %v8454_v37 = vpop.f32.mrb[175].mxu0 }
 0x6de   : > { %v8964_v15 = vmul.f32 %v11378_v20, %v11378_v20  ;;  %v11380_v8 = vadd.f32 %v15451_v47, %v8454_v37  ;;  %v17130_v20 = vld [vmem:[#allocation18_spill] sm:$0xff] }
 0x6df   : > { %v15765_v27 = vadd.f32 %v8963_v45, %v8803_v14  ;;  %v8968_v19 = vmul.f32 %v11379_v56, %v11379_v56  ;;  %v17131_v45 = vld [vmem:[#allocation142_spill] sm:$0xff] }
 0x6e0   : > { %v15769_v1 = vadd.f32 %v8964_v15, %v8804_v16  ;;  %v8969_v17 = vmul.f32 %v11380_v8, %v11380_v8  ;;  %v17132_v16 = vld [vmem:[#allocation201_spill] sm:$0xff] }
 0x6e1   : > { %v15771_v60 = vadd.f32 %v8968_v19, %v8808_v29  ;;  %v8813_v15 = vmul.f32 %v17132_v16, %v17132_v16 }
 0x6e2   : > { %17128 = vst [vmem:[#allocation192_spill] sm:$0xff] %v15769_v1  ;;  %v15773_v25 = vadd.f32 %v8969_v17, %v8809_v53  ;;  %v8458_v30 = vpop.f32.mrb[176].mxu0  ;;  %v17134_v53 = vld [vmem:[#allocation124_spill] sm:$0xff] }
 0x6e3   : > { %v11381_v44 = vadd.f32 %v17130_v20, %v8458_v30  ;;  %v8460_v47 = vpop.f32.mrb[177].mxu0  ;;  %v8814_v17 = vmul.f32 %v17134_v53, %v17134_v53  ;;  %v17135_v20 = vld [vmem:[#allocation143_spill] sm:$0xff] }
 0x6e4   : > { %17129 = vst [vmem:[#allocation191_spill] sm:$0xff] %v15773_v25  ;;  %v11382_v56 = vadd.f32 %v17131_v45, %v8460_v47  ;;  %v8462_v12 = vpop.f32.mrb[178].mxu0  ;;  %v17137_v45 = vld [vmem:[#allocation126_spill] sm:$0xff] }
 0x6e5   : > { %v8973_v8 = vmul.f32 %v11381_v44, %v11381_v44  ;;  %v11383_v29 = vadd.f32 %v17133_v9, %v8462_v12  ;;  %v8464_v19 = vpop.f32.mrb[179].mxu0  ;;  %v8819_v43 = vmul.f32 %v17137_v45, %v17137_v45  ;;  %v17144_v45 = vld [vmem:[#allocation130_spill] sm:$0xff] }
 0x6e6   : > { %v8974_v30 = vmul.f32 %v11382_v56, %v11382_v56  ;;  %v11384_v62 = vadd.f32 %v17135_v20, %v8464_v19  ;;  %v17140_v56 = vld [vmem:[#allocation146_spill] sm:$0xff]  ;;  %v17147_v20 = vld [vmem:[#allocation131_spill] sm:$0xff] }
 0x6e7   : > { %v15789_v14 = vadd.f32 %v8973_v8, %v8813_v15  ;;  %v8978_v47 = vmul.f32 %v11383_v29, %v11383_v29  ;;  %v17141_v15 = vld [vmem:[#allocation147_spill] sm:$0xff]  ;;  %v8829_v35 = vmul.f32 %v17147_v20, %v17147_v20 }
 0x6e8   : > { %v15793_v16 = vadd.f32 %v8974_v30, %v8814_v17  ;;  %v8979_v44 = vmul.f32 %v11384_v62, %v11384_v62  ;;  %v17142_v17 = vld [vmem:[#allocation209_spill] sm:$0xff]  ;;  %v17143_v30 = vld [vmem:[#allocation148_spill] sm:$0xff] }
 0x6e9   : > { %v15795_v12 = vadd.f32 %v8978_v47, %v8818_v38  ;;  %v8823_v62 = vmul.f32 %v17142_v17, %v17142_v17 }
 0x6ea   : > { %17138 = vst [vmem:[#allocation194_spill] sm:$0xff] %v15793_v16  ;;  %v15797_v9 = vadd.f32 %v8979_v44, %v8819_v43  ;;  %v8468_v53 = vpop.f32.mrb[180].mxu0  ;;  %v8824_v44 = vmul.f32 %v17144_v45, %v17144_v45 }
 0x6eb   : > { %v11385_v48 = vadd.f32 %v17140_v56, %v8468_v53  ;;  %v8470_v19 = vpop.f32.mrb[181].mxu0  ;;  %v17145_v56 = vld [vmem:[#allocation19_spill] sm:$0xff] }
 0x6ec   : > { %17139 = vst [vmem:[#allocation195_spill] sm:$0xff] %v15797_v9  ;;  %v11386_v8 = vadd.f32 %v17141_v15, %v8470_v19  ;;  %v8472_v29 = vpop.f32.mrb[182].mxu0  ;;  %v8828_v19 = vmul.f32 %v17146_v50, %v17146_v50  ;;  %v17156_v50 = vld [vmem:[#allocation221_spill] sm:$0xff] }
 0x6ed   : > { %v8983_v38 = vmul.f32 %v11385_v48, %v11385_v48  ;;  %v11387_v43 = vadd.f32 %v17143_v30, %v8472_v29  ;;  %v8474_v47 = vpop.f32.mrb[183].mxu0  ;;  %v8838_v54 = vmul.f32 %v17156_v50, %v17156_v50  ;;  %v17166_v50 = vld [vmem:[#allocation229_spill] sm:$0xff] }
 0x6ee   : > { %v8984_v53 = vmul.f32 %v11386_v8, %v11386_v8  ;;  %v11388_v26 = vadd.f32 %v17145_v56, %v8474_v47  ;;  %v17150_v8 = vld [vmem:[#allocation20_spill] sm:$0xff] }
 0x6ef   : > { %v15813_v15 = vadd.f32 %v8983_v38, %v8823_v62  ;;  %v8988_v37 = vmul.f32 %v11387_v43, %v11387_v43  ;;  %v17151_v38 = vld [vmem:[#allocation150_spill] sm:$0xff] }
 0x6f0   : > { %v15817_v17 = vadd.f32 %v8984_v53, %v8824_v44  ;;  %v8989_v48 = vmul.f32 %v11388_v26, %v11388_v26  ;;  %v17152_v44 = vld [vmem:[#allocation217_spill] sm:$0xff]  ;;  %v17153_v53 = vld [vmem:[#allocation152_spill] sm:$0xff] }
 0x6f1   : > { %v15819_v29 = vadd.f32 %v8988_v37, %v8828_v19  ;;  %v8833_v26 = vmul.f32 %v17152_v44, %v17152_v44  ;;  %v17154_v19 = vld [vmem:[#allocation16_spill] sm:$0xff] }
 0x6f2   : > { %17148 = vst [vmem:[#allocation196_spill] sm:$0xff] %v15817_v17  ;;  %v15821_v30 = vadd.f32 %v8989_v48, %v8829_v35  ;;  %v8478_v45 = vpop.f32.mrb[184].mxu0  ;;  %v8834_v48 = vmul.f32 %v17154_v19, %v17154_v19 }
 0x6f3   : > { %v11389_v24 = vadd.f32 %v17150_v8, %v8478_v45  ;;  %v8480_v47 = vpop.f32.mrb[185].mxu0  ;;  %v17155_v8 = vld [vmem:[#allocation151_spill] sm:$0xff] }
 0x6f4   : > { %17149 = vst [vmem:[#allocation31_spill] sm:$0xff] %v15821_v30  ;;  %v11390_v43 = vadd.f32 %v17151_v38, %v8480_v47  ;;  %v8482_v20 = vpop.f32.mrb[186].mxu0  ;;  %v17157_v38 = vld [vmem:[#allocation134_spill] sm:$0xff] }
 0x6f5   : > { %v8993_v37 = vmul.f32 %v11389_v24, %v11389_v24  ;;  %v11391_v35 = vadd.f32 %v17153_v53, %v8482_v20  ;;  %v8484_v56 = vpop.f32.mrb[187].mxu0  ;;  %v8839_v6 = vmul.f32 %v17157_v38, %v17157_v38  ;;  %v17164_v38 = vld [vmem:[#allocation138_spill] sm:$0xff] }
 0x6f6   : > { %v8994_v45 = vmul.f32 %v11390_v43, %v11390_v43  ;;  %v11392_v36 = vadd.f32 %v17155_v8, %v8484_v56  ;;  %v17160_v43 = vld [vmem:[#allocation154_spill] sm:$0xff]  ;;  %v17167_v8 = vld [vmem:[#allocation139_spill] sm:$0xff] }
 0x6f7   : > { %v15837_v62 = vadd.f32 %v8993_v37, %v8833_v26  ;;  %v8998_v47 = vmul.f32 %v11391_v35, %v11391_v35  ;;  %v17161_v26 = vld [vmem:[#allocation155_spill] sm:$0xff] }
 0x6f8   : > { %v15841_v44 = vadd.f32 %v8994_v45, %v8834_v48  ;;  %v8999_v24 = vmul.f32 %v11392_v36, %v11392_v36  ;;  %v17162_v48 = vld [vmem:[#allocation225_spill] sm:$0xff]  ;;  %v17163_v45 = vld [vmem:[#allocation156_spill] sm:$0xff] }
 0x6f9   : > { %v15843_v20 = vadd.f32 %v8998_v47, %v8838_v54  ;;  %v8843_v36 = vmul.f32 %v17162_v48, %v17162_v48 }
 0x6fa   : > { %17158 = vst [vmem:[#allocation32_spill] sm:$0xff] %v15841_v44  ;;  %v15845_v53 = vadd.f32 %v8999_v24, %v8839_v6  ;;  %v8488_v19 = vpop.f32.mrb[188].mxu0  ;;  %v8844_v24 = vmul.f32 %v17164_v38, %v17164_v38  ;;  %v8849_v44 = vmul.f32 %v17167_v8, %v17167_v8  ;;  %v13377_v8 = vld [vmem:[#allocation7 + $0x108] sm:$0xff]  }
 0x6fb   : > { %v11393_v4 = vadd.f32 %v17160_v43, %v8488_v19  ;;  %v8490_v56 = vpop.f32.mrb[189].mxu0  ;;  %v17165_v43 = vld [vmem:[#allocation21_spill] sm:$0xff] }
 0x6fc   : > { %17159 = vst [vmem:[#allocation198_spill] sm:$0xff] %v15845_v53  ;;  %v11394_v37 = vadd.f32 %v17161_v26, %v8490_v56  ;;  %v8492_v35 = vpop.f32.mrb[190].mxu0  ;;  %v8848_v56 = vmul.f32 %v17166_v50, %v17166_v50 }
 0x6fd   : > { %v9003_v54 = vmul.f32 %v11393_v4, %v11393_v4  ;;  %v11395_v6 = vadd.f32 %v17163_v45, %v8492_v35  ;;  %v8494_v47 = vpop.f32.mrb[191].mxu0 }
 0x6fe   : > { %v9004_v19 = vmul.f32 %v11394_v37, %v11394_v37  ;;  %v11396_v3 = vadd.f32 %v17165_v43, %v8494_v47  ;;  %v17170_v37 = vld [vmem:[#allocation107_spill] sm:$0xff] }
 0x6ff   : > { %v15861_v26 = vadd.f32 %v9003_v54, %v8843_v36  ;;  %v9008_v41 = vmul.f32 %v11395_v6, %v11395_v6  ;;  %v8693_v47 = vmul.f32 %v17170_v37, %v17170_v37  ;;  %v17171_v36 = vld [vmem:[#allocation90_spill] sm:$0xff]  ;;  %v17172_v6 = vld [vmem:[#allocation109_spill] sm:$0xff] }
 0x700   : > { %v15865_v48 = vadd.f32 %v9004_v19, %v8844_v24  ;;  %v9009_v4 = vmul.f32 %v11396_v3, %v11396_v3  ;;  %v8694_v54 = vmul.f32 %v17171_v36, %v17171_v36 }
 0x701   : > { %v15867_v35 = vadd.f32 %v9008_v41, %v8848_v56 }
 0x702   : > { %17168 = vst [vmem:[#allocation200_spill] sm:$0xff] %v15865_v48  ;;  %v15869_v45 = vadd.f32 %v9009_v4, %v8849_v44  ;;  %v8531_v38 = vpop.f32.mrb[128].mxu0  ;;  %v8698_v44 = vmul.f32 %v17172_v6, %v17172_v6  ;;  %v17173_v4 = vld [vmem:[#allocation91_spill] sm:$0xff]  ;;  %v17174_v48 = vld [vmem:[#allocation113_spill] sm:$0xff]  ;;  %v17175_v6 = vld [vmem:[#allocation94_spill] sm:$0xff] }
 0x703   : > { %v8853_v43 = vmul.f32 %v8531_v38, %v8531_v38  ;;  %v8533_v53 = vpop.f32.mrb[129].mxu0  ;;  %v8699_v38 = vmul.f32 %v17173_v4, %v17173_v4 }
 0x704   : > { %17169 = vst [vmem:[#allocation199_spill] sm:$0xff] %v15869_v45  ;;  %v8854_v3 = vmul.f32 %v8533_v53, %v8533_v53  ;;  %v8535_v41 = vpop.f32.mrb[130].mxu0 }
 0x705   : > { %v9013_v24 = vadd.f32 %v8853_v43, %v8693_v47  ;;  %v8858_v19 = vmul.f32 %v8535_v41, %v8535_v41  ;;  %v8537_v56 = vpop.f32.mrb[131].mxu0  ;;  %v8703_v47 = vmul.f32 %v17174_v48, %v17174_v48 }
 0x706   : > { %v15883_v37 = vadd.f32 %v8854_v3, %v8694_v54  ;;  %v8859_v50 = vmul.f32 %v8537_v56, %v8537_v56  ;;  %v8704_v54 = vmul.f32 %v17175_v6, %v17175_v6 }
 0x707   : > { %v9018_v17 = vadd.f32 %v8858_v19, %v8698_v44  ;;  %v17176_v44 = vld [vmem:[#allocation93_spill] sm:$0xff] }
 0x708   : > { %v15885_v30 = vadd.f32 %v8859_v50, %v8699_v38  ;;  %v17177_v50 = vld [vmem:[#allocation92_spill] sm:$0xff] }
 0x709   : > { %v9173_v36 = vpack.c.bf16 %v9018_v17, %v9013_v24  ;;  %v17178_v19 = vpack.c.bf16 %v17176_v44, %v17177_v50  ;;  %v17179_v17 = vld [vmem:[#allocation117_spill] sm:$0xff] }
 0x70a   : > { %v8541_v16 = vpop.f32.mrb[132].mxu0  ;;  %v8708_v24 = vmul.f32 %v17179_v17, %v17179_v17 }
 0x70b   : > { %v8863_v43 = vmul.f32 %v8541_v16, %v8541_v16  ;;  %v8543_v41 = vpop.f32.mrb[133].mxu0  ;;  %9763 = vmatprep.mubr.bf16.mxu1 %v9173_v36  ;;  %v17180_v16 = vld [vmem:[#allocation95_spill] sm:$0xff] }
 0x70c   : > { %v8864_v3 = vmul.f32 %v8543_v41, %v8543_v41  ;;  %v8545_v56 = vpop.f32.mrb[134].mxu0  ;;  %9764 = vmatmul.mubr.bf16.vlgmr.msra.gmra.mrb[240].mxu1 %v17178_v19  ;;  %v8709_v48 = vmul.f32 %v17180_v16, %v17180_v16  ;;  %v13378_v41 = vld [vmem:[#allocation7 + $0x110] sm:$0xff]  }
 0x70d   : > { %v9023_v4 = vadd.f32 %v8863_v43, %v8703_v47  ;;  %v8868_v38 = vmul.f32 %v8545_v56, %v8545_v56  ;;  %v8547_v53 = vpop.f32.mrb[135].mxu0  ;;  %11270 = vmatpush3.bf16.msra.mxu1 %v15584_v0  ;;  %v13379_v56 = vld [vmem:[#allocation7 + $0x118] sm:$0xff]   ;;  %v17181_v0 = vld [vmem:[#allocation121_spill] sm:$0xff] }
 0x70e   : > { %v15901_v36 = vadd.f32 %v8864_v3, %v8704_v54  ;;  %v8869_v6 = vmul.f32 %v8547_v53, %v8547_v53  ;;  %11271 = vmatprep.subr.bf16.mxu1 %v13377_v8  ;;  %v8713_v50 = vmul.f32 %v17181_v0, %v17181_v0  ;;  %v17182_v53 = vld [vmem:[#allocation98_spill] sm:$0xff]  ;;  %v17187_v0 = vld [vmem:[#allocation99_spill] sm:$0xff] }
 0x70f   : > { %v9028_v45 = vadd.f32 %v8868_v38, %v8708_v24  ;;  %v8714_v3 = vmul.f32 %v17182_v53, %v17182_v53  ;;  %v17183_v38 = vld [vmem:[#allocation97_spill] sm:$0xff] }
 0x710   : > { %v15903_v9 = vadd.f32 %v8869_v6, %v8709_v48 }
 0x711   : > { %v9178_v44 = vpack.c.bf16 %v9028_v45, %v9023_v4  ;;  %11272 = vmatpush3.bf16.msra.mxu1 %v13377_v8  ;;  %v17184_v45 = vld [vmem:[#allocation96_spill] sm:$0xff]  ;;  %v17186_v4 = vld [vmem:[#allocation125_spill] sm:$0xff] }
 0x712   : > { %v8551_v43 = vpop.f32.mrb[136].mxu0  ;;  %11273 = vmatprep.subr.bf16.mxu1 %v13378_v41  ;;  %v17185_v8 = vpack.c.bf16 %v17183_v38, %v17184_v45  ;;  %v8718_v16 = vmul.f32 %v17186_v4, %v17186_v4 }
 0x713   : > { %v8873_v19 = vmul.f32 %v8551_v43, %v8551_v43  ;;  %v8553_v54 = vpop.f32.mrb[137].mxu0  ;;  %9771 = vmatprep.mubr.bf16.mxu1 %v9178_v44  ;;  %v8719_v43 = vmul.f32 %v17187_v0, %v17187_v0 }
 0x714   : > { %v8874_v17 = vmul.f32 %v8553_v54, %v8553_v54  ;;  %v8555_v24 = vpop.f32.mrb[138].mxu0  ;;  %9772 = vmatmul.mubr.bf16.gmra.mrb[244].mxu1 %v17185_v8  ;;  %v13380_v54 = vld [vmem:[#allocation7 + $0x120] sm:$0xff]   ;;  %v13381_v8 = vld [vmem:[#allocation7 + $0x128] sm:$0xff]  }
 0x715   : > { %v9033_v48 = vadd.f32 %v8873_v19, %v8713_v50  ;;  %v8878_v6 = vmul.f32 %v8555_v24, %v8555_v24  ;;  %v8557_v47 = vpop.f32.mrb[139].mxu0  ;;  %11274 = vmatpush3.bf16.msra.mxu1 %v13378_v41  ;;  %v17188_v41 = vld [vmem:[#allocation129_spill] sm:$0xff] }
 0x716   : > { %v15918_v44 = vadd.f32 %v8874_v17, %v8714_v3  ;;  %v8879_v1 = vmul.f32 %v8557_v47, %v8557_v47  ;;  %11275 = vmatprep.subr.bf16.mxu1 %v13379_v56  ;;  %v8723_v19 = vmul.f32 %v17188_v41, %v17188_v41  ;;  %v17189_v47 = vld [vmem:[#allocation102_spill] sm:$0xff] }
 0x717   : > { %v9038_v53 = vadd.f32 %v8878_v6, %v8718_v16  ;;  %v8724_v17 = vmul.f32 %v17189_v47, %v17189_v47  ;;  %v17190_v16 = vld [vmem:[#allocation101_spill] sm:$0xff]  ;;  %v13382_v47 = vld [vmem:[#allocation7 + $0x130] sm:$0xff]  }
 0x718   : > { %v15920_v25 = vadd.f32 %v8879_v1, %v8719_v43  ;;  %v17193_v6 = vld [vmem:[#allocation133_spill] sm:$0xff] }
 0x719   : > { %v9183_v38 = vpack.c.bf16 %v9038_v53, %v9033_v48  ;;  %11276 = vmatpush3.bf16.msra.mxu1 %v13379_v56  ;;  %v17191_v48 = vld [vmem:[#allocation100_spill] sm:$0xff]  ;;  %v8728_v0 = vmul.f32 %v17193_v6, %v17193_v6  ;;  %v17194_v53 = vld [vmem:[#allocation103_spill] sm:$0xff] }
 0x71a   : > { %v8561_v45 = vpop.f32.mrb[140].mxu0  ;;  %11277 = vmatprep.subr.bf16.mxu1 %v13380_v54  ;;  %v9184_v50 = vpack.c.bf16 %v15920_v25, %v15918_v44  ;;  %v17192_v56 = vpack.c.bf16 %v17190_v16, %v17191_v48  ;;  %v13383_v48 = vld [vmem:[#allocation7 + $0x138] sm:$0xff]  }
 0x71b   : > { %v8883_v24 = vmul.f32 %v8561_v45, %v8561_v45  ;;  %v8563_v3 = vpop.f32.mrb[141].mxu0  ;;  %9779 = vmatprep.mubr.bf16.mxu1 %v9183_v38  ;;  %v8729_v45 = vmul.f32 %v17194_v53, %v17194_v53  ;;  %v17212_v53 = vld [vmem:[#allocation112_spill] sm:$0xff] }
 0x71c   : > { %v8884_v4 = vmul.f32 %v8563_v3, %v8563_v3  ;;  %v8565_v1 = vpop.f32.mrb[142].mxu0  ;;  %9780 = vmatmul.mubr.bf16.gmra.mrb[248].mxu1 %v17192_v56  ;;  %v17195_v56 = vld [vmem:[#allocation105_spill] sm:$0xff] }
 0x71d   : > { %v9043_v43 = vadd.f32 %v8883_v24, %v8723_v19  ;;  %v8888_v25 = vmul.f32 %v8565_v1, %v8565_v1  ;;  %v8567_v44 = vpop.f32.mrb[143].mxu0  ;;  %11278 = vmatpush3.bf16.msra.mxu1 %v13380_v54  ;;  %v17196_v19 = vld [vmem:[#allocation104_spill] sm:$0xff]  ;;  %v17198_v54 = vpack.c.bf16 %v15603_v55, %v15597_v57  ;;  %v17207_v57 = vld [vmem:[#allocation110_spill] sm:$0xff] }
 0x71e   : > { %v9044_v38 = vadd.f32 %v8884_v4, %v8724_v17  ;;  %v8889_v41 = vmul.f32 %v8567_v44, %v8567_v44  ;;  %11279 = vmatprep.subr.bf16.mxu1 %v13381_v8  ;;  %v17197_v24 = vpack.c.bf16 %v17195_v56, %v17196_v19  ;;  %v17199_v17 = vld [vmem:[#allocation12_spill] sm:$0xff]  ;;  %v17200_v4 = vld [vmem:[#allocation106_spill] sm:$0xff]  ;;  %v17211_v44 = vld [vmem:[#allocation111_spill] sm:$0xff] }
 0x71f   : > { %v9048_v3 = vadd.f32 %v8888_v25, %v8728_v0  ;;  %v17201_v1 = vpack.c.bf16 %v17199_v17, %v17200_v4  ;;  %v17206_v0 = vpack.c.bf16 %v15651_v11, %v15645_v34  ;;  %v17208_v55 = vld [vmem:[#allocation108_spill] sm:$0xff]  ;;  %v17210_v25 = vpack.c.bf16 %v15675_v42, %v15669_v46  ;;  %v17227_v56 = vld [vmem:[#allocation123_spill] sm:$0xff]  ;;  %v17228_v19 = vld [vmem:[#allocation122_spill] sm:$0xff] }
 0x720   : > { %v9049_v21 = vadd.f32 %v8889_v41, %v8729_v45  ;;  %v17215_v45 = vld [vmem:[#allocation115_spill] sm:$0xff]  ;;  %v17218_v11 = vpack.c.bf16 %v15723_v22, %v15717_v39  ;;  %v17219_v41 = vld [vmem:[#allocation118_spill] sm:$0xff]  ;;  %v17222_v42 = vpack.c.bf16 %v15747_v52, %v15741_v5  ;;  %v17229_v39 = vpack.c.bf16 %v17227_v56, %v17228_v19  ;;  %v17236_v4 = vld [vmem:[#allocation132_spill] sm:$0xff] }
 0x721   : > { %v9188_v13 = vpack.c.bf16 %v9048_v3, %v9043_v43  ;;  %11280 = vmatpush3.bf16.msra.mxu1 %v13381_v8  ;;  %v17204_v8 = vld [vmem:[#allocation13_spill] sm:$0xff]  ;;  %v17209_v43 = vpack.c.bf16 %v17207_v57, %v17208_v55  ;;  %v17223_v3 = vld [vmem:[#allocation119_spill] sm:$0xff]  ;;  %v17230_v22 = vpack.c.bf16 %v15795_v12, %v15789_v14  ;;  %v17234_v52 = vpack.c.bf16 %v15819_v29, %v15813_v15 }
 0x722   : > { %v9189_v16 = vpack.c.bf16 %v9049_v21, %v9044_v38  ;;  %11281 = vmatprep.subr.bf16.mxu1 %v13382_v47  ;;  %v17202_v21 = vpack.c.bf16 %v15627_v59, %v15621_v10  ;;  %v17213_v10 = vpack.c.bf16 %v17211_v44, %v17212_v53  ;;  %v17214_v59 = vpack.c.bf16 %v15699_v58, %v15693_v7  ;;  %v17216_v38 = vld [vmem:[#allocation114_spill] sm:$0xff]  ;;  %v17235_v17 = vld [vmem:[#allocation15_spill] sm:$0xff] }
 0x723   : > { %9787 = vmatprep.mubr.bf16.mxu1 %v9188_v13  ;;  %v17203_v13 = vld [vmem:[#allocation14_spill] sm:$0xff]  ;;  %v17217_v34 = vpack.c.bf16 %v17215_v45, %v17216_v38  ;;  %v17226_v58 = vpack.c.bf16 %v15771_v60, %v15765_v27  ;;  %v17237_v27 = vpack.c.bf16 %v17235_v17, %v17236_v4  ;;  %v17238_v60 = vpack.c.bf16 %v15843_v20, %v15837_v62  ;;  %v17277_v4 = vld [vmem:[#allocation163_spill] sm:$0xff] }
 0x724   : > { %9788 = vmatmul.mubr.bf16.gmra.mrb[252].mxu1 %v17197_v24  ;;  %v17205_v6 = vpack.c.bf16 %v17203_v13, %v17204_v8  ;;  %v17231_v24 = vld [vmem:[#allocation127_spill] sm:$0xff]  ;;  %v17242_v12 = vpack.c.bf16 %v15867_v35, %v15861_v26  ;;  %v17243_v13 = vld [vmem:[#allocation17_spill] sm:$0xff]  ;;  %v17244_v8 = vld [vmem:[#allocation140_spill] sm:$0xff]  ;;  %v17246_v29 = vpack.c.bf16 %v15885_v30, %v15883_v37  ;;  %v17247_v62 = vpack.c.bf16 %v15903_v9, %v15901_v36 }
 0x725   : > { %9795 = vmatprep.mubr.bf16.mxu1 %v17198_v54  ;;  %11282 = vmatpush3.bf16.msra.mxu1 %v13382_v47  ;;  %v17220_v47 = vld [vmem:[#allocation116_spill] sm:$0xff]  ;;  %v17245_v15 = vpack.c.bf16 %v17243_v13, %v17244_v8  ;;  %v17248_v20 = vpack.c.bf16 %v15605_v40, %v15601_v63  ;;  %v17249_v26 = vpack.c.bf16 %v15629_v23, %v15625_v49  ;;  %v17254_v40 = vld [vmem:[#allocation190_spill] sm:$0xff]  ;;  %v17257_v23 = vld [vmem:[#allocation191_spill] sm:$0xff] }
 0x726   : > { %11283 = vmatprep.subr.bf16.mxu1 %v13383_v48  ;;  %v17221_v46 = vpack.c.bf16 %v17219_v41, %v17220_v47  ;;  %v17232_v54 = vld [vmem:[#allocation128_spill] sm:$0xff]  ;;  %v17250_v35 = vpack.c.bf16 %v15653_v31, %v15649_v33  ;;  %v17251_v30 = vpack.c.bf16 %v15677_v28, %v15673_v61  ;;  %v17252_v9 = vpack.c.bf16 %v15701_v2, %v15697_v32  ;;  %v17255_v37 = vld [vmem:[#allocation30_spill] sm:$0xff]  ;;  %v17260_v31 = vld [vmem:[#allocation195_spill] sm:$0xff] }
 0x727   : > { %v17233_v5 = vpack.c.bf16 %v17231_v24, %v17232_v54  ;;  %v17253_v63 = vpack.c.bf16 %v15725_v51, %v15721_v18  ;;  %v17256_v49 = vpack.c.bf16 %v17254_v40, %v17255_v37  ;;  %v17258_v36 = vld [vmem:[#allocation192_spill] sm:$0xff]  ;;  %v17263_v28 = vld [vmem:[#allocation31_spill] sm:$0xff]  ;;  %v17266_v2 = vld [vmem:[#allocation198_spill] sm:$0xff] }
 0x728   : > { %v17259_v33 = vpack.c.bf16 %v17257_v23, %v17258_v36  ;;  %v17269_v51 = vld [vmem:[#allocation199_spill] sm:$0xff]  ;;  %v17273_v38 = vld [vmem:[#allocation158_spill] sm:$0xff]  ;;  %v17278_v8 = vld [vmem:[#allocation164_spill] sm:$0xff] }
 0x729   : > { %11284 = vmatpush3.bf16.msra.mxu1 %v13383_v48  ;;  %v17224_v48 = vld [vmem:[#allocation120_spill] sm:$0xff] }
 0x72a   : > { %v17225_v7 = vpack.c.bf16 %v17223_v3, %v17224_v48  ;;  %v17274_v48 = vld [vmem:[#allocation160_spill] sm:$0xff] }
 0x72b   : > { %v17280_v40 = vld [vmem:[#allocation24_spill] sm:$0xff] }
 0x72c   : > { %9796 = vmatmul.mubr.bf16.gmra.mrb[0].mxu1 %v17201_v1  ;;  %v17239_v1 = vld [vmem:[#allocation135_spill] sm:$0xff] }
 0x72d   : > { %9803 = vmatprep.mubr.bf16.mxu1 %v17202_v21  ;;  %v17240_v21 = vld [vmem:[#allocation136_spill] sm:$0xff] }
 0x72e   : > { %v17241_v14 = vpack.c.bf16 %v17239_v1, %v17240_v21 }
 0x734   : > { %9804 = vmatmul.mubr.bf16.gmra.mrb[4].mxu1 %v17205_v6  ;;  %v17267_v6 = vld [vmem:[#allocation32_spill] sm:$0xff] }
 0x735   : > { %9811 = vmatprep.mubr.bf16.mxu1 %v17206_v0  ;;  %v17268_v18 = vpack.c.bf16 %v17266_v2, %v17267_v6  ;;  %v17270_v0 = vld [vmem:[#allocation200_spill] sm:$0xff]  ;;  %v17283_v2 = vld [vmem:[#allocation167_spill] sm:$0xff] }
 0x736   : > { %v17271_v57 = vpack.c.bf16 %v17269_v51, %v17270_v0 }
 0x73c   : > { %9812 = vmatmul.mubr.bf16.gmra.mrb[8].mxu1 %v17209_v43 }
 0x73d   : > { %9819 = vmatprep.mubr.bf16.mxu1 %v17210_v25 }
 0x744   : > { %9820 = vmatmul.mubr.bf16.gmra.mrb[12].mxu1 %v17213_v10 }
 0x745   : > { %9827 = vmatprep.mubr.bf16.mxu1 %v17214_v59  ;;  %v17272_v59 = vld [vmem:[#allocation22_spill] sm:$0xff] }
 0x74c   : > { %9828 = vmatmul.mubr.bf16.gmra.mrb[16].mxu1 %v17217_v34 }
 0x74d   : > { %9835 = vmatprep.mubr.bf16.mxu1 %v17218_v11 }
 0x754   : > { %9836 = vmatmul.mubr.bf16.gmra.mrb[20].mxu1 %v17221_v46 }
 0x755   : > { %9843 = vmatprep.mubr.bf16.mxu1 %v17222_v42 }
 0x75c   : > { %9844 = vmatmul.mubr.bf16.gmra.mrb[24].mxu1 %v17225_v7 }
 0x75d   : > { %9851 = vmatprep.mubr.bf16.mxu1 %v17226_v58  ;;  %v17275_v58 = vld [vmem:[#allocation159_spill] sm:$0xff] }
 0x764   : > { %9852 = vmatmul.mubr.bf16.gmra.mrb[28].mxu1 %v17229_v39 }
 0x765   : > { %9859 = vmatprep.mubr.bf16.mxu1 %v17230_v22 }
 0x76c   : > { %9860 = vmatmul.mubr.bf16.gmra.mrb[32].mxu1 %v17233_v5 }
 0x76d   : > { %9867 = vmatprep.mubr.bf16.mxu1 %v17234_v52  ;;  %v17276_v52 = vld [vmem:[#allocation162_spill] sm:$0xff] }
 0x774   : > { %9868 = vmatmul.mubr.bf16.gmra.mrb[36].mxu1 %v17237_v27 }
 0x775   : > { %9875 = vmatprep.mubr.bf16.mxu1 %v17238_v60 }
 0x77c   : > { %9876 = vmatmul.mubr.bf16.gmra.mrb[40].mxu1 %v17241_v14 }
 0x77d   : > { %9883 = vmatprep.mubr.bf16.mxu1 %v17242_v12 }
 0x784   : > { %9884 = vmatmul.mubr.bf16.gmra.mrb[44].mxu1 %v17245_v15 }
 0x785   : > { %11285 = vmatprep.mubr.bf16.mxu1 %v17246_v29  ;;  %v17279_v29 = vld [vmem:[#allocation23_spill] sm:$0xff] }
 0x78c   : > { %11286 = vmatmul.mubr.bf16.vlgmr.msra.gmra.mrb[48].mxu1 %v17247_v62 }
 0x78d   : > { %11289 = vmatprep.mubr.bf16.mxu1 %v9184_v50  ;;  %v17261_v50 = vld [vmem:[#allocation194_spill] sm:$0xff] }
 0x78e   : > { %v17262_v61 = vpack.c.bf16 %v17260_v31, %v17261_v50 }
 0x794   : > { %11290 = vmatmul.mubr.bf16.gmra.mrb[52].mxu1 %v9189_v16  ;;  %v17264_v16 = vld [vmem:[#allocation196_spill] sm:$0xff] }
 0x795   : > { %11293 = vmatprep.mubr.bf16.mxu1 %v17248_v20  ;;  %v17265_v32 = vpack.c.bf16 %v17263_v28, %v17264_v16  ;;  %v17282_v16 = vld [vmem:[#allocation168_spill] sm:$0xff] }
 0x79c   : > { %11294 = vmatmul.mubr.bf16.gmra.mrb[56].mxu1 %v17249_v26 }
 0x79d   : > { %11297 = vmatprep.mubr.bf16.mxu1 %v17250_v35 }
 0x7a4   : > { %11298 = vmatmul.mubr.bf16.gmra.mrb[60].mxu1 %v17251_v30 }
 0x7a5   : > { %11301 = vmatprep.mubr.bf16.mxu1 %v17252_v9 }
 0x7ac   : > { %11302 = vmatmul.mubr.bf16.gmra.mrb[64].mxu1 %v17253_v63 }
 0x7ad   : > { %11305 = vmatprep.mubr.bf16.mxu1 %v17256_v49  ;;  %v17281_v49 = vld [vmem:[#allocation166_spill] sm:$0xff] }
 0x7b4   : > { %11306 = vmatmul.mubr.bf16.gmra.mrb[68].mxu1 %v17259_v33 }
 0x7b5   : > { %11309 = vmatprep.mubr.bf16.mxu1 %v17262_v61 }
 0x7bc   : > { %11310 = vmatmul.mubr.bf16.gmra.mrb[72].mxu1 %v17265_v32 }
 0x7bd   : > { %11313 = vmatprep.mubr.bf16.mxu1 %v17268_v18 }
 0x7c4   : > { %11314 = vmatmul.mubr.bf16.gmra.mrb[76].mxu1 %v17271_v57 }
 0x7df   : > { %v11149_v55 = vpop.f32.mrb[240].mxu1 }
 0x7e0   : > { %v11150_v43 = vpop.f32.mrb[241].mxu1 }
 0x7e1   : > { %v11151_v25 = vadd.f32 %v11150_v43, %v11149_v55  ;;  %v11152_v44 = vpop.f32.mrb[242].mxu1 }
 0x7e2   : > { %v11153_v53 = vpop.f32.mrb[243].mxu1 }
 0x7e3   : > { %v11154_v10 = vadd.f32 %v11153_v53, %v11152_v44  ;;  %v16053_v45 = vadd.f32 %v11151_v25, %v17272_v59  ;;  %v17284_v25 = vld [vmem:[#allocation170_spill] sm:$0xff]  ;;  %v17285_v53 = vld [vmem:[#allocation171_spill] sm:$0xff] }
 0x7e5   : > { %v16056_v34 = vadd.f32 %v11154_v10, %v17273_v38 }
 0x7e7   : > { %v11155_v11 = vpop.f32.mrb[244].mxu1 }
 0x7e8   : > { %v11156_v41 = vpop.f32.mrb[245].mxu1 }
 0x7e9   : > { %v11157_v47 = vadd.f32 %v11156_v41, %v11155_v11  ;;  %v11158_v46 = vpop.f32.mrb[246].mxu1 }
 0x7ea   : > { %v11159_v42 = vpop.f32.mrb[247].mxu1 }
 0x7eb   : > { %v11160_v3 = vadd.f32 %v11159_v42, %v11158_v46  ;;  %v16059_v7 = vadd.f32 %v11157_v47, %v17274_v48  ;;  %v17286_v42 = vld [vmem:[#allocation172_spill] sm:$0xff]  ;;  %v17287_v48 = vld [vmem:[#allocation25_spill] sm:$0xff] }
 0x7ed   : > { %v16062_v56 = vadd.f32 %v11160_v3, %v17275_v58 }
 0x7ef   : > { %v11161_v19 = vpop.f32.mrb[248].mxu1 }
 0x7f0   : > { %v11162_v39 = vpop.f32.mrb[249].mxu1 }
 0x7f1   : > { %v11163_v22 = vadd.f32 %v11162_v39, %v11161_v19  ;;  %v11164_v24 = vpop.f32.mrb[250].mxu1 }
 0x7f2   : > { %v11165_v54 = vpop.f32.mrb[251].mxu1 }
 0x7f3   : > { %v11166_v5 = vadd.f32 %v11165_v54, %v11164_v24  ;;  %v16065_v17 = vadd.f32 %v11163_v22, %v17276_v52  ;;  %v17288_v52 = vld [vmem:[#allocation26_spill] sm:$0xff] }
 0x7f5   : > { %v16068_v27 = vadd.f32 %v11166_v5, %v17277_v4 }
 0x7f7   : > { %v11167_v60 = vpop.f32.mrb[252].mxu1 }
 0x7f8   : > { %v11168_v1 = vpop.f32.mrb[253].mxu1 }
 0x7f9   : > { %v11169_v21 = vadd.f32 %v11168_v1, %v11167_v60  ;;  %v11170_v14 = vpop.f32.mrb[254].mxu1  ;;  %v17289_v60 = vld [vmem:[#allocation174_spill] sm:$0xff] }
 0x7fa   : > { %v11171_v12 = vpop.f32.mrb[255].mxu1 }
 0x7fb   : > { %v11172_v13 = vadd.f32 %v11171_v12, %v11170_v14  ;;  %v16071_v15 = vadd.f32 %v11169_v21, %v17278_v8 }
 0x7fd   : > { %v16074_v62 = vadd.f32 %v11172_v13, %v17279_v29 }
 0x7ff   : > { %v11173_v20 = vpop.f32.mrb[0].mxu1 }
 0x800   : > { %v11174_v26 = vpop.f32.mrb[1].mxu1 }
 0x801   : > { %v11175_v35 = vadd.f32 %v11174_v26, %v11173_v20  ;;  %v11176_v30 = vpop.f32.mrb[2].mxu1  ;;  %v17290_v20 = vld [vmem:[#allocation176_spill] sm:$0xff] }
 0x802   : > { %v11177_v9 = vpop.f32.mrb[3].mxu1 }
 0x803   : > { %v11178_v63 = vadd.f32 %v11177_v9, %v11176_v30  ;;  %v16077_v37 = vadd.f32 %v11175_v35, %v17280_v40  ;;  %v17291_v35 = vld [vmem:[#allocation175_spill] sm:$0xff] }
 0x805   : > { %v16080_v23 = vadd.f32 %v11178_v63, %v17281_v49 }
 0x807   : > { %v11179_v36 = vpop.f32.mrb[4].mxu1 }
 0x808   : > { %v11180_v33 = vpop.f32.mrb[5].mxu1 }
 0x809   : > { %v11181_v31 = vadd.f32 %v11180_v33, %v11179_v36  ;;  %v11182_v50 = vpop.f32.mrb[6].mxu1 }
 0x80a   : > { %v11183_v61 = vpop.f32.mrb[7].mxu1 }
 0x80b   : > { %v11184_v28 = vadd.f32 %v11183_v61, %v11182_v50  ;;  %v16083_v32 = vadd.f32 %v11181_v31, %v17282_v16  ;;  %v17292_v31 = vld [vmem:[#allocation178_spill] sm:$0xff]  ;;  %v17293_v61 = vld [vmem:[#allocation179_spill] sm:$0xff] }
 0x80d   : > { %v16086_v6 = vadd.f32 %v11184_v28, %v17283_v2 }
 0x80f   : > { %v11185_v18 = vpop.f32.mrb[8].mxu1 }
 0x810   : > { %v11186_v51 = vpop.f32.mrb[9].mxu1 }
 0x811   : > { %v11187_v0 = vadd.f32 %v11186_v51, %v11185_v18  ;;  %v11188_v57 = vpop.f32.mrb[10].mxu1 }
 0x812   : > { %v11189_v55 = vpop.f32.mrb[11].mxu1 }
 0x813   : > { %v11190_v43 = vadd.f32 %v11189_v55, %v11188_v57  ;;  %v16089_v44 = vadd.f32 %v11187_v0, %v17284_v25  ;;  %v17294_v55 = vld [vmem:[#allocation180_spill] sm:$0xff]  ;;  %v17295_v25 = vld [vmem:[#allocation27_spill] sm:$0xff] }
 0x815   : > { %v16092_v10 = vadd.f32 %v11190_v43, %v17285_v53 }
 0x817   : > { %v11191_v59 = vpop.f32.mrb[12].mxu1 }
 0x818   : > { %v11192_v38 = vpop.f32.mrb[13].mxu1 }
 0x819   : > { %v11193_v11 = vadd.f32 %v11192_v38, %v11191_v59  ;;  %v11194_v41 = vpop.f32.mrb[14].mxu1 }
 0x81a   : > { %v11195_v47 = vpop.f32.mrb[15].mxu1 }
 0x81b   : > { %v11196_v46 = vadd.f32 %v11195_v47, %v11194_v41  ;;  %v16095_v3 = vadd.f32 %v11193_v11, %v17286_v42  ;;  %v17296_v42 = vld [vmem:[#allocation28_spill] sm:$0xff] }
 0x81d   : > { %v16098_v58 = vadd.f32 %v11196_v46, %v17287_v48 }
 0x81f   : > { %v11197_v19 = vpop.f32.mrb[16].mxu1 }
 0x820   : > { %v11198_v39 = vpop.f32.mrb[17].mxu1 }
 0x821   : > { %v11199_v22 = vadd.f32 %v11198_v39, %v11197_v19  ;;  %v11200_v24 = vpop.f32.mrb[18].mxu1  ;;  %v17297_v19 = vld [vmem:[#allocation182_spill] sm:$0xff] }
 0x822   : > { %v11201_v54 = vpop.f32.mrb[19].mxu1 }
 0x823   : > { %v11202_v5 = vadd.f32 %v11201_v54, %v11200_v24  ;;  %v16101_v4 = vadd.f32 %v11199_v22, %v17288_v52 }
 0x825   : > { %v16104_v1 = vadd.f32 %v11202_v5, %v17289_v60 }
 0x827   : > { %v11203_v21 = vpop.f32.mrb[20].mxu1 }
 0x828   : > { %v11204_v14 = vpop.f32.mrb[21].mxu1 }
 0x829   : > { %v11205_v12 = vadd.f32 %v11204_v14, %v11203_v21  ;;  %v11206_v13 = vpop.f32.mrb[22].mxu1  ;;  %v17298_v21 = vld [vmem:[#allocation184_spill] sm:$0xff] }
 0x82a   : > { %v11207_v8 = vpop.f32.mrb[23].mxu1 }
 0x82b   : > { %v11208_v29 = vadd.f32 %v11207_v8, %v11206_v13  ;;  %v16107_v26 = vadd.f32 %v11205_v12, %v17290_v20  ;;  %v17299_v12 = vld [vmem:[#allocation183_spill] sm:$0xff] }
 0x82d   : > { %v16110_v30 = vadd.f32 %v11208_v29, %v17291_v35 }
 0x82f   : > { %v11209_v9 = vpop.f32.mrb[24].mxu1 }
 0x830   : > { %v11210_v63 = vpop.f32.mrb[25].mxu1 }
 0x831   : > { %v11211_v40 = vadd.f32 %v11210_v63, %v11209_v9  ;;  %v11212_v49 = vpop.f32.mrb[26].mxu1 }
 0x832   : > { %v11213_v36 = vpop.f32.mrb[27].mxu1 }
 0x833   : > { %v11214_v33 = vadd.f32 %v11213_v36, %v11212_v49  ;;  %v16113_v50 = vadd.f32 %v11211_v40, %v17292_v31  ;;  %v17300_v40 = vld [vmem:[#allocation186_spill] sm:$0xff]  ;;  %v17301_v36 = vld [vmem:[#allocation187_spill] sm:$0xff] }
 0x835   : > { %v16116_v28 = vadd.f32 %v11214_v33, %v17293_v61 }
 0x837   : > { %v11215_v16 = vpop.f32.mrb[28].mxu1 }
 0x838   : > { %v11216_v2 = vpop.f32.mrb[29].mxu1 }
 0x839   : > { %v11217_v18 = vadd.f32 %v11216_v2, %v11215_v16  ;;  %v11218_v51 = vpop.f32.mrb[30].mxu1 }
 0x83a   : > { %v11219_v0 = vpop.f32.mrb[31].mxu1 }
 0x83b   : > { %v11220_v57 = vadd.f32 %v11219_v0, %v11218_v51  ;;  %v16119_v43 = vadd.f32 %v11217_v18, %v17294_v55  ;;  %v17302_v0 = vld [vmem:[#allocation188_spill] sm:$0xff]  ;;  %v17303_v55 = vld [vmem:[#allocation29_spill] sm:$0xff] }
 0x83d   : > { %v16122_v53 = vadd.f32 %v11220_v57, %v17295_v25 }
 0x83f   : > { %v11221_v59 = vpop.f32.mrb[32].mxu1 }
 0x840   : > { %v11222_v38 = vpop.f32.mrb[33].mxu1 }
 0x841   : > { %v11223_v11 = vadd.f32 %v11222_v38, %v11221_v59  ;;  %v11224_v41 = vpop.f32.mrb[34].mxu1 }
 0x842   : > { %v11225_v47 = vpop.f32.mrb[35].mxu1 }
 0x843   : > { %v11226_v46 = vadd.f32 %v11225_v47, %v11224_v41  ;;  %v16125_v48 = vadd.f32 %v11223_v11, %v17296_v42 }
 0x845   : > { %v16128_v39 = vadd.f32 %v11226_v46, %v17297_v19 }
 0x847   : > { %v11227_v22 = vpop.f32.mrb[36].mxu1 }
 0x848   : > { %v11228_v24 = vpop.f32.mrb[37].mxu1 }
 0x849   : > { %v11229_v54 = vadd.f32 %v11228_v24, %v11227_v22  ;;  %v11230_v5 = vpop.f32.mrb[38].mxu1 }
 0x84a   : > { %v11231_v52 = vpop.f32.mrb[39].mxu1 }
 0x84b   : > { %v11232_v60 = vadd.f32 %v11231_v52, %v11230_v5  ;;  %v16131_v14 = vadd.f32 %v11229_v54, %v17298_v21 }
 0x84d   : > { %v16134_v13 = vadd.f32 %v11232_v60, %v17299_v12 }
 0x84f   : > { %v11233_v8 = vpop.f32.mrb[40].mxu1 }
 0x850   : > { %v11234_v29 = vpop.f32.mrb[41].mxu1 }
 0x851   : > { %v11235_v20 = vadd.f32 %v11234_v29, %v11233_v8  ;;  %v11236_v35 = vpop.f32.mrb[42].mxu1 }
 0x852   : > { %v11237_v9 = vpop.f32.mrb[43].mxu1 }
 0x853   : > { %v11238_v63 = vadd.f32 %v11237_v9, %v11236_v35  ;;  %v16137_v49 = vadd.f32 %v11235_v20, %v17300_v40 }
 0x855   : > { %v16140_v33 = vadd.f32 %v11238_v63, %v17301_v36 }
 0x857   : > { %v11239_v31 = vpop.f32.mrb[44].mxu1 }
 0x858   : > { %v11240_v61 = vpop.f32.mrb[45].mxu1 }
 0x859   : > { %v11241_v16 = vadd.f32 %v11240_v61, %v11239_v31  ;;  %v11242_v2 = vpop.f32.mrb[46].mxu1 }
 0x85a   : > { %v11243_v18 = vpop.f32.mrb[47].mxu1 }
 0x85b   : > { %v11244_v51 = vadd.f32 %v11243_v18, %v11242_v2  ;;  %v16143_v57 = vadd.f32 %v11241_v16, %v17302_v0 }
 0x85d   : > { %v16147_v25 = vadd.f32 %v11244_v51, %v17303_v55 }
 0x85f   : > { %v11287_v59 = vpop.f32.mrb[48].mxu1 }
 0x860   : > { %v9935_v38 = vadd.f32 %v11287_v59, %v16059_v7  ;;  %v9926_v11 = vpop.f32.mrb[49].mxu1 }
 0x861   : > { %v9927_v41 = vadd.f32 %v9926_v11, %v16053_v45  ;;  %v11288_v47 = vpop.f32.mrb[50].mxu1 }
 0x862   : > { %10055 = vst [vmem:[%s16151_s20 + $0x10] sm:$0xff] %v9935_v38  ;;  %v9938_v46 = vadd.f32 %v11288_v47, %v16062_v56  ;;  %v9929_v42 = vpop.f32.mrb[51].mxu1 }
 0x863   : > { %10053 = vst [vmem:[%s16151_s20] sm:$0xff] %v9927_v41  ;;  %v9930_v7 = vadd.f32 %v9929_v42, %v16056_v34 }
 0x864   : > { %10056 = vst [vmem:[%s16151_s20 + $0x18] sm:$0xff] %v9938_v46 }
 0x865   : > { %10054 = vst [vmem:[%s16151_s20 + $0x8] sm:$0xff] %v9930_v7 }
 0x867   : > { %v11291_v45 = vpop.f32.mrb[52].mxu1 }
 0x868   : > { %v9951_v19 = vadd.f32 %v11291_v45, %v16071_v15  ;;  %v9942_v22 = vpop.f32.mrb[53].mxu1 }
 0x869   : > { %v9943_v24 = vadd.f32 %v9942_v22, %v16065_v17  ;;  %v11292_v54 = vpop.f32.mrb[54].mxu1 }
 0x86a   : > { %10059 = vst [vmem:[%s16151_s20 + $0x30] sm:$0xff] %v9951_v19  ;;  %v9954_v56 = vadd.f32 %v11292_v54, %v16074_v62  ;;  %v9945_v5 = vpop.f32.mrb[55].mxu1 }
 0x86b   : > { %10057 = vst [vmem:[%s16151_s20 + $0x20] sm:$0xff] %v9943_v24  ;;  %v9946_v34 = vadd.f32 %v9945_v5, %v16068_v27 }
 0x86c   : > { %10060 = vst [vmem:[%s16151_s20 + $0x38] sm:$0xff] %v9954_v56 }
 0x86d   : > { %10058 = vst [vmem:[%s16151_s20 + $0x28] sm:$0xff] %v9946_v34 }
 0x86f   : > { %v11295_v52 = vpop.f32.mrb[56].mxu1 }
 0x870   : > { %v9967_v15 = vadd.f32 %v11295_v52, %v16083_v32  ;;  %v9958_v60 = vpop.f32.mrb[57].mxu1 }
 0x871   : > { %v9959_v17 = vadd.f32 %v9958_v60, %v16077_v37  ;;  %v11296_v21 = vpop.f32.mrb[58].mxu1 }
 0x872   : > { %10063 = vst [vmem:[%s16151_s20 + $0x50] sm:$0xff] %v9967_v15  ;;  %v9970_v62 = vadd.f32 %v11296_v21, %v16086_v6  ;;  %v9961_v12 = vpop.f32.mrb[59].mxu1 }
 0x873   : > { %10061 = vst [vmem:[%s16151_s20 + $0x40] sm:$0xff] %v9959_v17  ;;  %v9962_v27 = vadd.f32 %v9961_v12, %v16080_v23 }
 0x874   : > { %10064 = vst [vmem:[%s16151_s20 + $0x58] sm:$0xff] %v9970_v62 }
 0x875   : > { %10062 = vst [vmem:[%s16151_s20 + $0x48] sm:$0xff] %v9962_v27 }
 0x877   : > { %v11299_v8 = vpop.f32.mrb[60].mxu1 }
 0x878   : > { %v9983_v32 = vadd.f32 %v11299_v8, %v16095_v3  ;;  %v9974_v29 = vpop.f32.mrb[61].mxu1 }
 0x879   : > { %v9975_v37 = vadd.f32 %v9974_v29, %v16089_v44  ;;  %v11300_v20 = vpop.f32.mrb[62].mxu1 }
 0x87a   : > { %10067 = vst [vmem:[%s16151_s20 + $0x70] sm:$0xff] %v9983_v32  ;;  %v9986_v6 = vadd.f32 %v11300_v20, %v16098_v58  ;;  %v9977_v35 = vpop.f32.mrb[63].mxu1 }
 0x87b   : > { %10065 = vst [vmem:[%s16151_s20 + $0x60] sm:$0xff] %v9975_v37  ;;  %v9978_v23 = vadd.f32 %v9977_v35, %v16092_v10 }
 0x87c   : > { %10068 = vst [vmem:[%s16151_s20 + $0x78] sm:$0xff] %v9986_v6 }
 0x87d   : > { %10066 = vst [vmem:[%s16151_s20 + $0x68] sm:$0xff] %v9978_v23 }
 0x87f   : > { %v11303_v9 = vpop.f32.mrb[64].mxu1 }
 0x880   : > { %v9999_v3 = vadd.f32 %v11303_v9, %v16107_v26  ;;  %v9990_v63 = vpop.f32.mrb[65].mxu1 }
 0x881   : > { %v9991_v44 = vadd.f32 %v9990_v63, %v16101_v4  ;;  %v11304_v40 = vpop.f32.mrb[66].mxu1 }
 0x882   : > { %10071 = vst [vmem:[%s16151_s20 + $0x90] sm:$0xff] %v9999_v3  ;;  %v10002_v58 = vadd.f32 %v11304_v40, %v16110_v30  ;;  %v9993_v36 = vpop.f32.mrb[67].mxu1 }
 0x883   : > { %10069 = vst [vmem:[%s16151_s20 + $0x80] sm:$0xff] %v9991_v44  ;;  %v9994_v10 = vadd.f32 %v9993_v36, %v16104_v1 }
 0x884   : > { %10072 = vst [vmem:[%s16151_s20 + $0x98] sm:$0xff] %v10002_v58 }
 0x885   : > { %10070 = vst [vmem:[%s16151_s20 + $0x88] sm:$0xff] %v9994_v10 }
 0x887   : > { %v11307_v31 = vpop.f32.mrb[68].mxu1 }
 0x888   : > { %v10015_v26 = vadd.f32 %v11307_v31, %v16119_v43  ;;  %v10006_v61 = vpop.f32.mrb[69].mxu1 }
 0x889   : > { %v10007_v4 = vadd.f32 %v10006_v61, %v16113_v50  ;;  %v11308_v16 = vpop.f32.mrb[70].mxu1 }
 0x88a   : > { %10075 = vst [vmem:[%s16151_s20 + $0xb0] sm:$0xff] %v10015_v26  ;;  %v10018_v30 = vadd.f32 %v11308_v16, %v16122_v53  ;;  %v10009_v2 = vpop.f32.mrb[71].mxu1 }
 0x88b   : > { %10073 = vst [vmem:[%s16151_s20 + $0xa0] sm:$0xff] %v10007_v4  ;;  %v10010_v1 = vadd.f32 %v10009_v2, %v16116_v28 }
 0x88c   : > { %10076 = vst [vmem:[%s16151_s20 + $0xb8] sm:$0xff] %v10018_v30 }
 0x88d   : > { %10074 = vst [vmem:[%s16151_s20 + $0xa8] sm:$0xff] %v10010_v1 }
 0x88f   : > { %v11311_v43 = vpop.f32.mrb[72].mxu1 }
 0x890   : > { %v10031_v18 = vadd.f32 %v11311_v43, %v16131_v14  ;;  %v10022_v51 = vpop.f32.mrb[73].mxu1 }
 0x891   : > { %v10023_v50 = vadd.f32 %v10022_v51, %v16125_v48  ;;  %v11312_v0 = vpop.f32.mrb[74].mxu1 }
 0x892   : > { %10079 = vst [vmem:[%s16151_s20 + $0xd0] sm:$0xff] %v10031_v18  ;;  %v10034_v53 = vadd.f32 %v11312_v0, %v16134_v13  ;;  %v10025_v55 = vpop.f32.mrb[75].mxu1 }
 0x893   : > { %10077 = vst [vmem:[%s16151_s20 + $0xc0] sm:$0xff] %v10023_v50  ;;  %v10026_v28 = vadd.f32 %v10025_v55, %v16128_v39 }
 0x894   : > { %10080 = vst [vmem:[%s16151_s20 + $0xd8] sm:$0xff] %v10034_v53 }
 0x895   : > { %10078 = vst [vmem:[%s16151_s20 + $0xc8] sm:$0xff] %v10026_v28 }
 0x897   : > { %v11315_v59 = vpop.f32.mrb[76].mxu1 }
 0x898   : > { %v10047_v48 = vadd.f32 %v11315_v59, %v16143_v57  ;;  %v10038_v14 = vpop.f32.mrb[77].mxu1 }
 0x899   : > { %v10039_v38 = vadd.f32 %v10038_v14, %v16137_v49  ;;  %v11316_v13 = vpop.f32.mrb[78].mxu1 }
 0x89a   : > { %10083 = vst [vmem:[%s16151_s20 + $0xf0] sm:$0xff] %v10047_v48  ;;  %v10050_v11 = vadd.f32 %v11316_v13, %v16147_v25  ;;  %v10041_v41 = vpop.f32.mrb[79].mxu1 }
 0x89b   : > { %10081 = vst [vmem:[%s16151_s20 + $0xe0] sm:$0xff] %v10039_v38  ;;  %v10042_v39 = vadd.f32 %v10041_v41, %v16140_v33 }
 0x89c   : > { %10084 = vst [vmem:[%s16151_s20 + $0xf8] sm:$0xff] %v10050_v11 }
 0x89d   : > { %10082 = vst [vmem:[%s16151_s20 + $0xe8] sm:$0xff] %v10042_v39 }
 0x89e   : > { %13515 = shalt.err (!%p13512_p2)
}
 0x89f   : > { %s13516_s17 = scalar_lea.hbm %s16216_s7, 4096  ;;  %s13520_s30 = scalar_lea.hbm %s16269_s3, 8192 }
 0x8a0   : > { %p13517_p13 = scmp.ne.s32.totalorder %s16216_s7, %s13516_s17  ;;  %p13521_p4 = scmp.lt.u32.totalorder %s16216_s7, %s16269_s3 }
 0x8a1   : > { %p13522_p7 = scmp.lt.u32.totalorder %s13520_s30, %s13516_s17  ;;  %p13524_p11 = scmp.lt.u32.totalorder %s13516_s17, %s16216_s7 }
 0x8a2   : > { %p13518_p6 = pnand %p13517_p13, %p17304_p0 }
 0x8a3   : > { %p13523_p8 = por %p13522_p7, %p13521_p4 }
 0x8a4   : > { %p13519_p10 = pneg %p13518_p6 }
 0x8a5   : > { %p13525_p1 = por %p13524_p11, %p13523_p8 }
 0x8a7   : > { %p13526_p3 = pnand %p13525_p1, %p13519_p10 }
 0x8a9   : > { %13529 = shalt.err (!%p13526_p3)
}
 0x8aa   : > { %s13584_s18 = smov 128   ;;  %s13585_s20 = smov 8  }
 0x8ab   : > { %12319 = dma.vmem_to_hbm [thread:$0]  (%p17304_p0), %s16218_s27, 4096, %s16216_s7, %s10086_s16, %s13584_s18, %s13584_s18, %s13585_s20  }
 0x8ac PF: > { %s10114_s24 = sand.u32 1, %s13560_s12   ;;  %p17305_p5 = scmp.ne.s32.totalorder %s16544_s19, 0 }
 0x8ad   : > { %p17306_p9 = scmp.ge.s32.totalorder %s13572_s15, 2  ;;  %s10115_s28 = scalar_lea.sflag [#allocation4], %s10114_s24 }
 0x8af   : > { %p12333_p12 = pnand %p17306_p9, %p17305_p5 }
 0x8b1   : > { %13555 = dma.done.wait (!%p12333_p12), %s10115_s28, 4096  }
 0x8b2   : > { %13557 = vsyncadd (!%p12333_p12), %s10115_s28, 4294963200  ;;  %p17_p2 = scmp.ge.s32.totalorder %s13716_s6, 4   ;;  %s17307_s12 = smov %s13564_s13 }
 0x8b3   : > { %s17308_s13 = smov %s13568_s14  ;;  %s17309_s14 = smov %s13725_s9 }
 0x8b4   : > { %s17310_s15 = smov %s13716_s6  ;;  %19 = sbr.rel (!%p17_p2) target bundleno = 6 (0x6), region = 85 }
 0x8bb   :  { %10120 = vsyncpa [#allocation3], 1 }
 0x8bc   :  { %10122 = vsyncpa [#allocation3 + $0x1], 1 }
 0x8bd   :  { %10123 = vsyncpa [#allocation6], 1 }
 0x8be   :  { %10124 = vsyncpa [#allocation4], 1 }
 0x8bf   :  { %10126 = vsyncpa [#allocation4 + $0x1], 1 }

</bundles_post_ra>
